<compile_context>
chip_gen: v5e
topology: v5e:2x2
jax: 0.10.0
libtpu: 0.0.40
codegen_flags: <defaults>
</compile_context>

<pallas_src>
import jax
import jax.numpy as jnp
from jax.experimental import pallas as pl
from jax.experimental.pallas import tpu as pltpu

LANE = 128
SUBLANE = 8


# ---------------------------------------------------------------------------
# Pallas kernel: fused 3-layer MLP for one batch tile.
#   s_ref:(tb,S) bf16   w*:(in,out) bf16   b*:(1,out) f32   o_ref:(tb,Zp) f32
#   h_ref: (tb,H) bf16 VMEM scratch, reused for both hidden activations.
# ---------------------------------------------------------------------------
def _lsd_mlp_kernel(s_ref, w1_ref, b1_ref, w2_ref, b2_ref, w3_ref, b3_ref,
                    o_ref, h_ref):
    # layer 1: (tb, S) @ (S, H) + (1, H), relu  -> bf16 hidden
    x = jnp.dot(s_ref[...], w1_ref[...], preferred_element_type=jnp.float32)
    h_ref[...] = jnp.maximum(x + b1_ref[...], 0.0).astype(jnp.bfloat16)
    # layer 2: (tb, H) @ (H, H) + (1, H), relu  -> bf16 hidden (same buffer)
    x = jnp.dot(h_ref[...], w2_ref[...], preferred_element_type=jnp.float32)
    h_ref[...] = jnp.maximum(x + b2_ref[...], 0.0).astype(jnp.bfloat16)
    # layer 3: (tb, H) @ (H, Zp) + (1, Zp)   (Zp = z_dim padded to 128 lanes)
    y = jnp.dot(h_ref[...], w3_ref[...], preferred_element_type=jnp.float32)
    o_ref[...] = (y + b3_ref[...]).astype(o_ref.dtype)


# ---------------------------------------------------------------------------
# Wrapper.
# ---------------------------------------------------------------------------
def _round_up(x, m):
    return (x + m - 1) // m * m


def _vmem_limit():
    """vmem_limit_bytes tuned by physical VMEM size."""
    vmem_phys = 64 << 20  # conservative default (v7x-class)
    try:
        vmem_phys = int(pltpu.get_tpu_info().vmem_capacity_bytes)
    except Exception:
        pass
    if vmem_phys <= (64 << 20):      # v7x: 64 MiB / TC -> leave headroom
        return 48 << 20
    return 100 << 20                 # v5e / v6e: 128 MiB physical


def _build_specs(S, H, Zp, tb, single_buffer_weights):
    if single_buffer_weights:
        # Constant index_map -> a second pipeline buffer is dead weight.
        def wspec(shape):
            return pl.BlockSpec(shape, lambda i: (0, 0),
                                pipeline_mode=pl.Buffered(1))
    else:
        def wspec(shape):
            return pl.BlockSpec(shape, lambda i: (0, 0))

    in_specs = [
        pl.BlockSpec((tb, S), lambda i: (i, 0)),   # s tile (pipelined over batch)
        wspec((S, H)),                             # W1
        wspec((1, H)),                             # b1
        wspec((H, H)),                             # W2
        wspec((1, H)),                             # b2
        wspec((H, Zp)),                            # W3 (lane-padded)
        wspec((1, Zp)),                            # b3 (lane-padded)
    ]
    out_spec = pl.BlockSpec((tb, Zp), lambda i: (i, 0))
    return in_specs, out_spec


def discriminator_lsd_forward(s, params, *, tb=None):
    """s: [B, state_dim] float32.  params: dict of spectrally-normalized weights."""
    w1 = params["w1"].astype(jnp.bfloat16)
    w2 = params["w2"].astype(jnp.bfloat16)
    w3 = params["w3"].astype(jnp.bfloat16)
    b1 = params["b1"].astype(jnp.float32)
    b2 = params["b2"].astype(jnp.float32)
    b3 = params["b3"].astype(jnp.float32)

    B, S = s.shape
    H = w1.shape[1]
    Z = w3.shape[1]

    # Adaptive batch tile: no wasted MXU rows for small batches, full 256-row
    # tiles (pipelined) for large ones.
    if tb is None:
        tb = min(256, _round_up(max(B, 1), SUBLANE))

    # Lane-pad the z_dim output to a full 128-lane tile (unmasked stores);
    # extra columns are zero and sliced off below.
    Zp = max(LANE, _round_up(Z, LANE))
    w3p = jnp.zeros((H, Zp), jnp.bfloat16).at[:, :Z].set(w3)
    b3p = jnp.zeros((1, Zp), jnp.float32).at[:, :Z].set(b3)

    # Pad batch to a multiple of the batch tile; padded rows are sliced off below.
    Bp = _round_up(max(B, tb), tb)
    s_pad = jnp.zeros((Bp, S), jnp.bfloat16).at[:B, :].set(s.astype(jnp.bfloat16))

    grid = (Bp // tb,)
    out_shape = jax.ShapeDtypeStruct((Bp, Zp), jnp.float32)
    scratch = [pltpu.VMEM((tb, H), jnp.bfloat16)]

    last_err = None
    for single_buffer_weights in (True, False):
        in_specs, out_spec = _build_specs(S, H, Zp, tb, single_buffer_weights)
        try:
            out = pl.pallas_call(
                _lsd_mlp_kernel,
                out_shape=out_shape,
                grid_spec=pltpu.PrefetchScalarGridSpec(
                    num_scalar_prefetch=0,
                    grid=grid,
                    in_specs=in_specs,
                    out_specs=out_spec,
                    scratch_shapes=scratch,
                ),
                compiler_params=pltpu.CompilerParams(
                    dimension_semantics=("parallel",),
                    vmem_limit_bytes=_vmem_limit(),
                ),
            )(s_pad, w1, b1, w2, b2, w3p, b3p)
            return out[:B, :Z]
        except Exception as e:  # pl.Buffered(1) unsupported on this build -> retry
            last_err = e
    raise last_err


# ---------------------------------------------------------------------------
# Parameter setup (plain JAX glue): deterministic init + spectral normalization.
# ---------------------------------------------------------------------------
def _spectral_normalize(w, n_iters=20):
    """Divide w (in, out) by its largest singular value (power iteration)."""
    u = jnp.ones((w.shape[1],), jnp.float32) / jnp.sqrt(w.shape[1])
    v = w @ u
    for _ in range(n_iters):
        v = w @ u
        v = v / (jnp.linalg.norm(v) + 1e-12)
        u = w.T @ v
        u = u / (jnp.linalg.norm(u) + 1e-12)
    sigma = v @ (w @ u)
    return w / sigma


def make_params(key, state_dim, z_dim, hidden=1024):
    ks = jax.random.split(key, 6)

    def linear(kw, kb, fan_in, fan_out):
        # PyTorch Linear default init: U(-1/sqrt(fan_in), 1/sqrt(fan_in)); weight
        # stored pre-transposed as (fan_in, fan_out), spectrally normalized in f32,
        # then cast to bf16 (native MXU input dtype).
        bound = 1.0 / jnp.sqrt(fan_in)
        w = jax.random.uniform(kw, (fan_in, fan_out), jnp.float32, -bound, bound)
        b = jax.random.uniform(kb, (1, fan_out), jnp.float32, -bound, bound)
        return _spectral_normalize(w).astype(jnp.bfloat16), b

    w1, b1 = linear(ks[0], ks[1], state_dim, hidden)
    w2, b2 = linear(ks[2], ks[3], hidden, hidden)
    w3, b3 = linear(ks[4], ks[5], hidden, z_dim)
    return {"w1": w1, "b1": b1, "w2": w2, "b2": b2, "w3": w3, "b3": b3}


def reference_forward(s, p):
    """Plain-JAX reference with the same bf16-operand / f32-accumulate math."""
    bf = jnp.bfloat16
    x = jnp.dot(s.astype(bf), p["w1"].astype(bf),
                preferred_element_type=jnp.float32) + p["b1"]
    x = jnp.maximum(x, 0.0)
    x = jnp.dot(x.astype(bf), p["w2"].astype(bf),
                preferred_element_type=jnp.float32) + p["b2"]
    x = jnp.maximum(x, 0.0)
    return jnp.dot(x.astype(bf), p["w3"].astype(bf),
                   preferred_element_type=jnp.float32) + p["b3"]


# TODO(synk): lipshitz_loss (training-time loss over two forward passes) is plain JAX
# composition of this forward; it has no dedicated kernel here.

if __name__ == "__main__":
    key = jax.random.PRNGKey(0)
    k_param, k_s = jax.random.split(key)

    batch, state_dim, z_dim = 8, 32, 8
    params = make_params(k_param, state_dim, z_dim, hidden=1024)
    s = jax.random.normal(k_s, (batch, state_dim), jnp.float32)

    out = jax.block_until_ready(discriminator_lsd_forward(s, params))
    ref = reference_forward(s, params)

    assert out.shape == (batch, z_dim)
    assert jnp.allclose(out, ref, atol=1e-2, rtol=1e-2), "mismatch vs reference"

    print("KERNEL_OK")
</pallas_src>

<mosaic_0001>
module attributes {stable_mosaic.version = 11 : i64} {
  func.func @_lsd_mlp_kernel(%arg0: i32, %arg1: memref<8x32xbf16, #tpu.memory_space<vmem>>, %arg2: memref<32x1024xbf16, #tpu.memory_space<vmem>>, %arg3: memref<1x1024xf32, #tpu.memory_space<vmem>>, %arg4: memref<1024x1024xbf16, #tpu.memory_space<vmem>>, %arg5: memref<1x1024xf32, #tpu.memory_space<vmem>>, %arg6: memref<1024x128xbf16, #tpu.memory_space<vmem>>, %arg7: memref<1x128xf32, #tpu.memory_space<vmem>>, %arg8: memref<8x128xf32, #tpu.memory_space<vmem>>, %arg9: memref<8x1024xbf16, #tpu.memory_space<vmem>>) attributes {dimension_semantics = [#tpu.dimension_semantics<parallel>], iteration_bounds = array<i64: 1>, scalar_prefetch = 0 : i64, scratch_operands = 1 : i64, tpu.core_type = #tpu.core_type<tc>, window_params = [{transform_indices = @transform_0, window_bounds = array<i64: 8, 32>}, {pipeline_mode = #tpu.pipeline_mode<synchronous>, transform_indices = @transform_1, window_bounds = array<i64: 32, 1024>}, {pipeline_mode = #tpu.pipeline_mode<synchronous>, transform_indices = @transform_2, window_bounds = array<i64: 1, 1024>}, {pipeline_mode = #tpu.pipeline_mode<synchronous>, transform_indices = @transform_3, window_bounds = array<i64: 1024, 1024>}, {pipeline_mode = #tpu.pipeline_mode<synchronous>, transform_indices = @transform_4, window_bounds = array<i64: 1, 1024>}, {pipeline_mode = #tpu.pipeline_mode<synchronous>, transform_indices = @transform_5, window_bounds = array<i64: 1024, 128>}, {pipeline_mode = #tpu.pipeline_mode<synchronous>, transform_indices = @transform_6, window_bounds = array<i64: 1, 128>}, {transform_indices = @transform_7, window_bounds = array<i64: 8, 128>}]} {
    %c0 = arith.constant 0 : index
    %c0_0 = arith.constant 0 : index
    %0 = vector.load %arg1[%c0, %c0_0] : memref<8x32xbf16, #tpu.memory_space<vmem>>, vector<8x32xbf16>
    %c0_1 = arith.constant 0 : index
    %c0_2 = arith.constant 0 : index
    %1 = vector.load %arg2[%c0_1, %c0_2] : memref<32x1024xbf16, #tpu.memory_space<vmem>>, vector<32x1024xbf16>
    %cst = arith.constant dense<0.000000e+00> : vector<8x1024xf32>
    %2 = tpu.matmul %0, %1, %cst {dimension_numbers = #tpu.dot_dimension_numbers<[1], [0], [0], [1], [0, 0, 1, 1], [], []>} : vector<8x32xbf16>, vector<32x1024xbf16>, vector<8x1024xf32> -> vector<8x1024xf32>
    %c0_3 = arith.constant 0 : index
    %c0_4 = arith.constant 0 : index
    %3 = vector.load %arg3[%c0_3, %c0_4] : memref<1x1024xf32, #tpu.memory_space<vmem>>, vector<1x1024xf32>
    %4 = vector.broadcast %3 : vector<1x1024xf32> to vector<8x1024xf32>
    %5 = arith.addf %2, %4 : vector<8x1024xf32>
    %cst_5 = arith.constant 0.000000e+00 : f32
    %6 = vector.broadcast %cst_5 : f32 to vector<8x1024xf32>
    %7 = arith.maximumf %5, %6 : vector<8x1024xf32>
    %8 = arith.truncf %7 : vector<8x1024xf32> to vector<8x1024xbf16>
    %c0_6 = arith.constant 0 : index
    %c0_7 = arith.constant 0 : index
    %9 = vector.load %arg9[%c0_6, %c0_7] : memref<8x1024xbf16, #tpu.memory_space<vmem>>, vector<8x1024xbf16>
    tpu.vector_store %arg9[%c0_6, %c0_7], %8 {strides = array<i32>} : memref<8x1024xbf16, #tpu.memory_space<vmem>>, vector<8x1024xbf16>,
    %c0_8 = arith.constant 0 : index
    %c0_9 = arith.constant 0 : index
    %10 = vector.load %arg9[%c0_8, %c0_9] : memref<8x1024xbf16, #tpu.memory_space<vmem>>, vector<8x1024xbf16>
    %c0_10 = arith.constant 0 : index
    %c0_11 = arith.constant 0 : index
    %11 = vector.load %arg4[%c0_10, %c0_11] : memref<1024x1024xbf16, #tpu.memory_space<vmem>>, vector<1024x1024xbf16>
    %cst_12 = arith.constant dense<0.000000e+00> : vector<8x1024xf32>
    %12 = tpu.matmul %10, %11, %cst_12 {dimension_numbers = #tpu.dot_dimension_numbers<[1], [0], [0], [1], [0, 0, 1, 1], [], []>} : vector<8x1024xbf16>, vector<1024x1024xbf16>, vector<8x1024xf32> -> vector<8x1024xf32>
    %c0_13 = arith.constant 0 : index
    %c0_14 = arith.constant 0 : index
    %13 = vector.load %arg5[%c0_13, %c0_14] : memref<1x1024xf32, #tpu.memory_space<vmem>>, vector<1x1024xf32>
    %14 = vector.broadcast %13 : vector<1x1024xf32> to vector<8x1024xf32>
    %15 = arith.addf %12, %14 : vector<8x1024xf32>
    %cst_15 = arith.constant 0.000000e+00 : f32
    %16 = vector.broadcast %cst_15 : f32 to vector<8x1024xf32>
    %17 = arith.maximumf %15, %16 : vector<8x1024xf32>
    %18 = arith.truncf %17 : vector<8x1024xf32> to vector<8x1024xbf16>
    %c0_16 = arith.constant 0 : index
    %c0_17 = arith.constant 0 : index
    %19 = vector.load %arg9[%c0_16, %c0_17] : memref<8x1024xbf16, #tpu.memory_space<vmem>>, vector<8x1024xbf16>
    tpu.vector_store %arg9[%c0_16, %c0_17], %18 {strides = array<i32>} : memref<8x1024xbf16, #tpu.memory_space<vmem>>, vector<8x1024xbf16>,
    %c0_18 = arith.constant 0 : index
    %c0_19 = arith.constant 0 : index
    %20 = vector.load %arg9[%c0_18, %c0_19] : memref<8x1024xbf16, #tpu.memory_space<vmem>>, vector<8x1024xbf16>
    %c0_20 = arith.constant 0 : index
    %c0_21 = arith.constant 0 : index
    %21 = vector.load %arg6[%c0_20, %c0_21] : memref<1024x128xbf16, #tpu.memory_space<vmem>>, vector<1024x128xbf16>
    %cst_22 = arith.constant dense<0.000000e+00> : vector<8x128xf32>
    %22 = tpu.matmul %20, %21, %cst_22 {dimension_numbers = #tpu.dot_dimension_numbers<[1], [0], [0], [1], [0, 0, 1, 1], [], []>} : vector<8x1024xbf16>, vector<1024x128xbf16>, vector<8x128xf32> -> vector<8x128xf32>
    %c0_23 = arith.constant 0 : index
    %c0_24 = arith.constant 0 : index
    %23 = vector.load %arg7[%c0_23, %c0_24] : memref<1x128xf32, #tpu.memory_space<vmem>>, vector<1x128xf32>
    %24 = vector.broadcast %23 : vector<1x128xf32> to vector<8x128xf32>
    %25 = arith.addf %22, %24 : vector<8x128xf32>
    %c0_25 = arith.constant 0 : index
    %c0_26 = arith.constant 0 : index
    %26 = vector.load %arg8[%c0_25, %c0_26] : memref<8x128xf32, #tpu.memory_space<vmem>>, vector<8x128xf32>
    tpu.vector_store %arg8[%c0_25, %c0_26], %25 {strides = array<i32>} : memref<8x128xf32, #tpu.memory_space<vmem>>, vector<8x128xf32>,
    return
  }
  func.func @transform_0(%arg0: i32) -> (i32, i32) {
    %c0_i32 = arith.constant 0 : i32
    %c0_i32_0 = arith.constant 0 : i32
    return %arg0, %c0_i32 : i32, i32
  }
  func.func @transform_1(%arg0: i32) -> (i32, i32) {
    %c0_i32 = arith.constant 0 : i32
    %c0_i32_0 = arith.constant 0 : i32
    %c0_i32_1 = arith.constant 0 : i32
    return %c0_i32, %c0_i32_0 : i32, i32
  }
  func.func @transform_2(%arg0: i32) -> (i32, i32) {
    %c0_i32 = arith.constant 0 : i32
    %c0_i32_0 = arith.constant 0 : i32
    %c0_i32_1 = arith.constant 0 : i32
    return %c0_i32, %c0_i32_0 : i32, i32
  }
  func.func @transform_3(%arg0: i32) -> (i32, i32) {
    %c0_i32 = arith.constant 0 : i32
    %c0_i32_0 = arith.constant 0 : i32
    %c0_i32_1 = arith.constant 0 : i32
    return %c0_i32, %c0_i32_0 : i32, i32
  }
  func.func @transform_4(%arg0: i32) -> (i32, i32) {
    %c0_i32 = arith.constant 0 : i32
    %c0_i32_0 = arith.constant 0 : i32
    %c0_i32_1 = arith.constant 0 : i32
    return %c0_i32, %c0_i32_0 : i32, i32
  }
  func.func @transform_5(%arg0: i32) -> (i32, i32) {
    %c0_i32 = arith.constant 0 : i32
    %c0_i32_0 = arith.constant 0 : i32
    %c0_i32_1 = arith.constant 0 : i32
    return %c0_i32, %c0_i32_0 : i32, i32
  }
  func.func @transform_6(%arg0: i32) -> (i32, i32) {
    %c0_i32 = arith.constant 0 : i32
    %c0_i32_0 = arith.constant 0 : i32
    %c0_i32_1 = arith.constant 0 : i32
    return %c0_i32, %c0_i32_0 : i32, i32
  }
  func.func @transform_7(%arg0: i32) -> (i32, i32) {
    %c0_i32 = arith.constant 0 : i32
    %c0_i32_0 = arith.constant 0 : i32
    return %arg0, %c0_i32 : i32, i32
  }
}

module attributes {stable_mosaic.version = 11 : i64} {
  func.func @_lsd_mlp_kernel(%arg0: i32, %arg1: memref<8x32xbf16, #tpu.memory_space<vmem>>, %arg2: memref<32x1024xbf16, #tpu.memory_space<vmem>>, %arg3: memref<1x1024xf32, #tpu.memory_space<vmem>>, %arg4: memref<1024x1024xbf16, #tpu.memory_space<vmem>>, %arg5: memref<1x1024xf32, #tpu.memory_space<vmem>>, %arg6: memref<1024x128xbf16, #tpu.memory_space<vmem>>, %arg7: memref<1x128xf32, #tpu.memory_space<vmem>>, %arg8: memref<8x128xf32, #tpu.memory_space<vmem>>, %arg9: memref<8x1024xbf16, #tpu.memory_space<vmem>>) attributes {dimension_semantics = [#tpu.dimension_semantics<parallel>], iteration_bounds = array<i64: 1>, scalar_prefetch = 0 : i64, scratch_operands = 1 : i64, tpu.core_type = #tpu.core_type<tc>, window_params = [{transform_indices = @transform_0, window_bounds = array<i64: 8, 32>}, {pipeline_mode = #tpu.pipeline_mode<synchronous>, transform_indices = @transform_1, window_bounds = array<i64: 32, 1024>}, {pipeline_mode = #tpu.pipeline_mode<synchronous>, transform_indices = @transform_2, window_bounds = array<i64: 1, 1024>}, {pipeline_mode = #tpu.pipeline_mode<synchronous>, transform_indices = @transform_3, window_bounds = array<i64: 1024, 1024>}, {pipeline_mode = #tpu.pipeline_mode<synchronous>, transform_indices = @transform_4, window_bounds = array<i64: 1, 1024>}, {pipeline_mode = #tpu.pipeline_mode<synchronous>, transform_indices = @transform_5, window_bounds = array<i64: 1024, 128>}, {pipeline_mode = #tpu.pipeline_mode<synchronous>, transform_indices = @transform_6, window_bounds = array<i64: 1, 128>}, {transform_indices = @transform_7, window_bounds = array<i64: 8, 128>}]} {
    %c0 = arith.constant 0 : index
    %c0_0 = arith.constant 0 : index
    %0 = vector.load %arg1[%c0, %c0_0] : memref<8x32xbf16, #tpu.memory_space<vmem>>, vector<8x32xbf16>
    %c0_1 = arith.constant 0 : index
    %c0_2 = arith.constant 0 : index
    %1 = vector.load %arg2[%c0_1, %c0_2] : memref<32x1024xbf16, #tpu.memory_space<vmem>>, vector<32x1024xbf16>
    %cst = arith.constant dense<0.000000e+00> : vector<8x1024xf32>
    %2 = tpu.matmul %0, %1, %cst {dimension_numbers = #tpu.dot_dimension_numbers<[1], [0], [0], [1], [0, 0, 1, 1], [], []>} : vector<8x32xbf16>, vector<32x1024xbf16>, vector<8x1024xf32> -> vector<8x1024xf32>
    %c0_3 = arith.constant 0 : index
    %c0_4 = arith.constant 0 : index
    %3 = vector.load %arg3[%c0_3, %c0_4] : memref<1x1024xf32, #tpu.memory_space<vmem>>, vector<1x1024xf32>
    %4 = vector.broadcast %3 : vector<1x1024xf32> to vector<8x1024xf32>
    %5 = arith.addf %2, %4 : vector<8x1024xf32>
    %cst_5 = arith.constant 0.000000e+00 : f32
    %6 = vector.broadcast %cst_5 : f32 to vector<8x1024xf32>
    %7 = arith.maximumf %5, %6 : vector<8x1024xf32>
    %8 = arith.truncf %7 : vector<8x1024xf32> to vector<8x1024xbf16>
    %c0_6 = arith.constant 0 : index
    %c0_7 = arith.constant 0 : index
    %9 = vector.load %arg9[%c0_6, %c0_7] : memref<8x1024xbf16, #tpu.memory_space<vmem>>, vector<8x1024xbf16>
    tpu.vector_store %arg9[%c0_6, %c0_7], %8 {strides = array<i32>} : memref<8x1024xbf16, #tpu.memory_space<vmem>>, vector<8x1024xbf16>,
    %c0_8 = arith.constant 0 : index
    %c0_9 = arith.constant 0 : index
    %10 = vector.load %arg9[%c0_8, %c0_9] : memref<8x1024xbf16, #tpu.memory_space<vmem>>, vector<8x1024xbf16>
    %c0_10 = arith.constant 0 : index
    %c0_11 = arith.constant 0 : index
    %11 = vector.load %arg4[%c0_10, %c0_11] : memref<1024x1024xbf16, #tpu.memory_space<vmem>>, vector<1024x1024xbf16>
    %cst_12 = arith.constant dense<0.000000e+00> : vector<8x1024xf32>
    %12 = tpu.matmul %10, %11, %cst_12 {dimension_numbers = #tpu.dot_dimension_numbers<[1], [0], [0], [1], [0, 0, 1, 1], [], []>} : vector<8x1024xbf16>, vector<1024x1024xbf16>, vector<8x1024xf32> -> vector<8x1024xf32>
    %c0_13 = arith.constant 0 : index
    %c0_14 = arith.constant 0 : index
    %13 = vector.load %arg5[%c0_13, %c0_14] : memref<1x1024xf32, #tpu.memory_space<vmem>>, vector<1x1024xf32>
    %14 = vector.broadcast %13 : vector<1x1024xf32> to vector<8x1024xf32>
    %15 = arith.addf %12, %14 : vector<8x1024xf32>
    %cst_15 = arith.constant 0.000000e+00 : f32
    %16 = vector.broadcast %cst_15 : f32 to vector<8x1024xf32>
    %17 = arith.maximumf %15, %16 : vector<8x1024xf32>
    %18 = arith.truncf %17 : vector<8x1024xf32> to vector<8x1024xbf16>
    %c0_16 = arith.constant 0 : index
    %c0_17 = arith.constant 0 : index
    %19 = vector.load %arg9[%c0_16, %c0_17] : memref<8x1024xbf16, #tpu.memory_space<vmem>>, vector<8x1024xbf16>
    tpu.vector_store %arg9[%c0_16, %c0_17], %18 {strides = array<i32>} : memref<8x1024xbf16, #tpu.memory_space<vmem>>, vector<8x1024xbf16>,
    %c0_18 = arith.constant 0 : index
    %c0_19 = arith.constant 0 : index
    %20 = vector.load %arg9[%c0_18, %c0_19] : memref<8x1024xbf16, #tpu.memory_space<vmem>>, vector<8x1024xbf16>
    %c0_20 = arith.constant 0 : index
    %c0_21 = arith.constant 0 : index
    %21 = vector.load %arg6[%c0_20, %c0_21] : memref<1024x128xbf16, #tpu.memory_space<vmem>>, vector<1024x128xbf16>
    %cst_22 = arith.constant dense<0.000000e+00> : vector<8x128xf32>
    %22 = tpu.matmul %20, %21, %cst_22 {dimension_numbers = #tpu.dot_dimension_numbers<[1], [0], [0], [1], [0, 0, 1, 1], [], []>} : vector<8x1024xbf16>, vector<1024x128xbf16>, vector<8x128xf32> -> vector<8x128xf32>
    %c0_23 = arith.constant 0 : index
    %c0_24 = arith.constant 0 : index
    %23 = vector.load %arg7[%c0_23, %c0_24] : memref<1x128xf32, #tpu.memory_space<vmem>>, vector<1x128xf32>
    %24 = vector.broadcast %23 : vector<1x128xf32> to vector<8x128xf32>
    %25 = arith.addf %22, %24 : vector<8x128xf32>
    %c0_25 = arith.constant 0 : index
    %c0_26 = arith.constant 0 : index
    %26 = vector.load %arg8[%c0_25, %c0_26] : memref<8x128xf32, #tpu.memory_space<vmem>>, vector<8x128xf32>
    tpu.vector_store %arg8[%c0_25, %c0_26], %25 {strides = array<i32>} : memref<8x128xf32, #tpu.memory_space<vmem>>, vector<8x128xf32>,
    return
  }
  func.func @transform_0(%arg0: i32) -> (i32, i32) {
    %c0_i32 = arith.constant 0 : i32
    %c0_i32_0 = arith.constant 0 : i32
    return %arg0, %c0_i32 : i32, i32
  }
  func.func @transform_1(%arg0: i32) -> (i32, i32) {
    %c0_i32 = arith.constant 0 : i32
    %c0_i32_0 = arith.constant 0 : i32
    %c0_i32_1 = arith.constant 0 : i32
    return %c0_i32, %c0_i32_0 : i32, i32
  }
  func.func @transform_2(%arg0: i32) -> (i32, i32) {
    %c0_i32 = arith.constant 0 : i32
    %c0_i32_0 = arith.constant 0 : i32
    %c0_i32_1 = arith.constant 0 : i32
    return %c0_i32, %c0_i32_0 : i32, i32
  }
  func.func @transform_3(%arg0: i32) -> (i32, i32) {
    %c0_i32 = arith.constant 0 : i32
    %c0_i32_0 = arith.constant 0 : i32
    %c0_i32_1 = arith.constant 0 : i32
    return %c0_i32, %c0_i32_0 : i32, i32
  }
  func.func @transform_4(%arg0: i32) -> (i32, i32) {
    %c0_i32 = arith.constant 0 : i32
    %c0_i32_0 = arith.constant 0 : i32
    %c0_i32_1 = arith.constant 0 : i32
    return %c0_i32, %c0_i32_0 : i32, i32
  }
  func.func @transform_5(%arg0: i32) -> (i32, i32) {
    %c0_i32 = arith.constant 0 : i32
    %c0_i32_0 = arith.constant 0 : i32
    %c0_i32_1 = arith.constant 0 : i32
    return %c0_i32, %c0_i32_0 : i32, i32
  }
  func.func @transform_6(%arg0: i32) -> (i32, i32) {
    %c0_i32 = arith.constant 0 : i32
    %c0_i32_0 = arith.constant 0 : i32
    %c0_i32_1 = arith.constant 0 : i32
    return %c0_i32, %c0_i32_0 : i32, i32
  }
  func.func @transform_7(%arg0: i32) -> (i32, i32) {
    %c0_i32 = arith.constant 0 : i32
    %c0_i32_0 = arith.constant 0 : i32
    return %arg0, %c0_i32 : i32, i32
  }
}

</mosaic_0001>

<bundles_post_ra>
// kernel: tpu_custom_call.1
= control target key start
LH: loop header
LB: loop body
LE: loop exit
PB: predicated region body
PF: predicated region fallthrough
CT: control target
= control target key end

     0   :  { %12 = vsyncpa [#allocation4], 0  ;;  %s8447_s0 = inlined_call_operand.hbm [shape: bf16[8,32], index: 0, kind: input, shape index: {}]   ;;  %s8448_s1 = inlined_call_operand.hbm [shape: bf16[32,1024], index: 1, kind: input, shape index: {}]   ;;  %s8449_s2 = inlined_call_operand.hbm [shape: f32[1,1024], index: 2, kind: input, shape index: {}]   ;;  %s8450_s3 = inlined_call_operand.hbm [shape: bf16[1024,1024], index: 3, kind: input, shape index: {}]   ;;  %s8451_s4 = inlined_call_operand.hbm [shape: f32[1,1024], index: 4, kind: input, shape index: {}]   ;;  %s8452_s5 = inlined_call_operand.hbm [shape: bf16[1024,128], index: 5, kind: input, shape index: {}]   ;;  %s8453_s6 = inlined_call_operand.hbm [shape: f32[1,128], index: 6, kind: input, shape index: {}]   ;;  %s8454_s7 = inlined_call_operand.hbm [shape: f32[8,128], index: 7, kind: output, shape index: {}]  }
   0x1   :  { %13 = vsyncpa [#allocation7], 0 }
   0x2   :  { %14 = vsyncpa [#allocation10], 0 }
   0x3   :  { %15 = vsyncpa [#allocation13], 0  ;;  %s32_s26 = sshll.u32 %s8448_s1, 4  ;;  %s33_s26 = int_to_ptr.hbm [resolvable:$true] %s32_s26 }
   0x4   :  { %16 = vsyncpa [#allocation5], 0  ;;  %s8196_s27 = smov [#allocation6]   ;;  %s56_s8 = sshll.u32 %s8450_s3, 4  ;;  %s57_s8 = int_to_ptr.hbm [resolvable:$true] %s56_s8 }
   0x5   :  { %s34_s28 = sshll.u32 %s8196_s27, 4  ;;  %s8197_s9 = smov 512   ;;  %s35_s28 = int_to_ptr.vmem [resolvable:$true] %s34_s28 }
   0x6   :  { %s8198_s10 = smov 32   ;;  %s8199_s11 = smov [#allocation9]  }
   0x7   :  { %40 = dma.hbm_to_vmem [thread:$0]  %s33_s26, 2048, %s35_s28, [#allocation7], %s8197_s9, %s8197_s9, %s8198_s10  }
   0x8   :  { %s58_s12 = sshll.u32 %s8199_s11, 4  ;;  %s80_s15 = sshll.u32 %s8452_s5, 4  ;;  %s59_s12 = int_to_ptr.vmem [resolvable:$true] %s58_s12  ;;  %s81_s15 = int_to_ptr.hbm [resolvable:$true] %s80_s15 }
   0x9   :  { %64 = dma.hbm_to_vmem [thread:$0]  %s57_s8, 65536, %s59_s12, [#allocation10], %s8197_s9, %s8197_s9, %s8198_s10  }
   0xa   :  { %s8200_s1 = smov [#allocation12]   ;;  %s22_s3 = sshll.u32 %s8447_s0, 4  ;;  %s23_s3 = int_to_ptr.hbm [resolvable:$true] %s22_s3 }
   0xb   :  { %s82_s16 = sshll.u32 %s8200_s1, 4  ;;  %s8201_s19 = smov 64   ;;  %s83_s16 = int_to_ptr.vmem [resolvable:$true] %s82_s16 }
   0xc   :  { %s8202_s20 = smov 4   ;;  %s8203_s21 = smov [#allocation3]  }
   0xd   :  { %88 = dma.hbm_to_vmem [thread:$0]  %s81_s15, 8192, %s83_s16, [#allocation13], %s8201_s19, %s8201_s19, %s8202_s20  }
   0xe   :  { %s24_s22 = sshll.u32 %s8203_s21, 4  ;;  %s46_s5 = sshll.u32 %s8449_s2, 4  ;;  %s25_s22 = int_to_ptr.vmem [resolvable:$true] %s24_s22  ;;  %s47_s5 = int_to_ptr.hbm [resolvable:$true] %s46_s5 }
   0xf   :  { %27 = dma.hbm_to_vmem [thread:$0]  %s23_s3, 64, %s25_s22, [#allocation4]  }
  0x10   :  { %s70_s27 = sshll.u32 %s8451_s4, 4  ;;  %s8204_s28 = smov [#allocation8]   ;;  %s71_s27 = int_to_ptr.hbm [resolvable:$true] %s70_s27 }
  0x11   :  { %s48_s29 = sshll.u32 %s8204_s28, 4  ;;  %s8205_s0 = smov [#allocation11]   ;;  %s49_s29 = int_to_ptr.vmem [resolvable:$true] %s48_s29 }
  0x12   :  { %51 = dma.hbm_to_vmem [thread:$0]  %s47_s5, 128, %s49_s29, [#allocation7]  }
  0x13   :  { %s72_s30 = sshll.u32 %s8205_s0, 4  ;;  %s94_s10 = sshll.u32 %s8453_s6, 4  ;;  %s73_s30 = int_to_ptr.vmem [resolvable:$true] %s72_s30  ;;  %s95_s10 = int_to_ptr.hbm [resolvable:$true] %s94_s10 }
  0x14   :  { %75 = dma.hbm_to_vmem [thread:$0]  %s71_s27, 128, %s73_s30, [#allocation10]  }
  0x15   :  { %s8206_s2 = smov [#allocation14]  }
  0x16   :  { %s96_s11 = sshll.u32 %s8206_s2, 4  ;;  %s97_s11 = int_to_ptr.vmem [resolvable:$true] %s96_s11 }
  0x17   :  { %99 = dma.hbm_to_vmem [thread:$0]  %s95_s10, 16, %s97_s11, [#allocation13]  }
  0x18   :  { %8186 = dma.done.wait [#allocation4], 64  }
  0x19   :  { %8187 = vsyncadd [#allocation4], 4294967232 }
  0x1a   :  { %8188 = dma.done.wait [#allocation7], 2176  }
  0x1b   :  { %8189 = vsyncadd [#allocation7], 4294965120 }
  0x1c   :  { %8190 = dma.done.wait [#allocation10], 65664  }
  0x1d   :  { %8191 = vsyncadd [#allocation10], 4294901632 }
  0x1e   :  { %8192 = dma.done.wait [#allocation13], 8208  }
  0x1f   :  { %8193 = vsyncadd [#allocation13], 4294959088  ;;  %vm244_vm0 = vcmask 261120   ;;  %v5045_v0 = vld [vmem:[#allocation6 + $0x40] sm:$0xf]  ;;  %s8207_s4 = smov [#allocation15]  }
  0x20   :  { %v7399_v1 = vld [vmem:[#allocation6 + $0x5c] sm:$0xf0]  ;;  %v7395_v2 = vld [vmem:[#allocation6 + $0x44] sm:$0xf]  ;;  %v5053_v5 = vld [vmem:[#allocation6 + $0x48] sm:$0xf] }
  0x21   :  { %v5046_v3 = vor.u32 %v7399_v1, %v5045_v0  ;;  %v5047_v4 = vld [vmem:[#allocation6 + $0x60] sm:$0xf0]  ;;  %v7400_v6 = vld [vmem:[#allocation6 + $0x64] sm:$0xf0]  ;;  %v7396_v9 = vld [vmem:[#allocation6 + $0x4c] sm:$0xf] }
  0x22   :  { %v5050_v7 = vor.u32 %v7395_v2, %v5047_v4  ;;  %v5054_v8 = vor.u32 %v7400_v6, %v5053_v5  ;;  %v5055_v10 = vld [vmem:[#allocation6 + $0x68] sm:$0xf0]  ;;  %v5013_v11 = vld [vmem:[#allocation6] sm:$0xf]  ;;  %v7387_v14 = vld [vmem:[#allocation6 + $0x4] sm:$0xf] }
  0x23   :  { %254 = vmatpush.bf16.msra.mxu0 %v5046_v3  ;;  %v5058_v12 = vor.u32 %v7396_v9, %v5055_v10  ;;  %v7391_v13 = vld [vmem:[#allocation6 + $0x1c] sm:$0xf0]  ;;  %v5015_v15 = vld [vmem:[#allocation6 + $0x20] sm:$0xf0]  ;;  %v5021_v18 = vld [vmem:[#allocation6 + $0x8] sm:$0xf] }
  0x24   :  { %267 = vmatpush.bf16.msra.mxu1 %v5050_v7  ;;  %280 = vmatpush.bf16.msra.mxu2 %v5054_v8  ;;  %v5014_v16 = vor.u32 %v7391_v13, %v5013_v11  ;;  %v5018_v17 = vor.u32 %v7387_v14, %v5015_v15  ;;  %v7392_v19 = vld [vmem:[#allocation6 + $0x24] sm:$0xf0]  ;;  %v7388_v20 = vld [vmem:[#allocation6 + $0xc] sm:$0xf]  ;;  %v8269_v23 = vld [vmem:[#allocation3] sm:$0xf] }
  0x25   :  { %293 = vmatpush.bf16.msra.mxu3 %v5058_v12  ;;  %v5022_v21 = vor.u32 %v7392_v19, %v5021_v18  ;;  %v5023_v22 = vld [vmem:[#allocation6 + $0x28] sm:$0xf0]  ;;  %v5061_v24 = vld [vmem:[#allocation6 + $0x50] sm:$0xf]  ;;  %v7397_v27 = vld [vmem:[#allocation6 + $0x54] sm:$0xf] }
  0x26   :  { %v5026_v25 = vor.u32 %v7388_v20, %v5023_v22  ;;  %v7401_v26 = vld [vmem:[#allocation6 + $0x6c] sm:$0xf0]  ;;  %v5063_v28 = vld [vmem:[#allocation6 + $0x70] sm:$0xf0]  ;;  %v5069_v31 = vld [vmem:[#allocation6 + $0x58] sm:$0xf] }
  0x27   :  { %255 = vmatpush.bf16.msra.mxu0 %v5014_v16  ;;  %v5062_v29 = vor.u32 %v7401_v26, %v5061_v24  ;;  %v5066_v30 = vor.u32 %v7397_v27, %v5063_v28  ;;  %v7402_v32 = vld [vmem:[#allocation6 + $0x74] sm:$0xf0]  ;;  %v7398_v33 = vld [vmem:[#allocation6 + $0x5c] sm:$0xf]  ;;  %v5029_v36 = vld [vmem:[#allocation6 + $0x10] sm:$0xf] }
  0x28   :  { %268 = vmatpush.bf16.msra.mxu1 %v5018_v17  ;;  %281 = vmatpush.bf16.msra.mxu2 %v5022_v21  ;;  %v5070_v34 = vor.u32 %v7402_v32, %v5069_v31  ;;  %v5071_v35 = vld [vmem:[#allocation6 + $0x78] sm:$0xf0]  ;;  %v7393_v37 = vld [vmem:[#allocation6 + $0x2c] sm:$0xf0]  ;;  %v7389_v40 = vld [vmem:[#allocation6 + $0x14] sm:$0xf] }
  0x29   :  { %294 = vmatpush.bf16.msra.mxu3 %v5026_v25  ;;  %v5074_v38 = vor.u32 %v7398_v33, %v5071_v35  ;;  %v5030_v39 = vor.u32 %v7393_v37, %v5029_v36  ;;  %v5031_v41 = vld [vmem:[#allocation6 + $0x30] sm:$0xf0]  ;;  %v5037_v42 = vld [vmem:[#allocation6 + $0x18] sm:$0xf]  ;;  %v7390_v45 = vld [vmem:[#allocation6 + $0x1c] sm:$0xf] }
  0x2a   :  { %5075 = vmatmul.msk.bf16.vlgmr.msra.gmra.mxu0 %vm244_vm0, %v8269_v23  ;;  %v5034_v43 = vor.u32 %v7389_v40, %v5031_v41  ;;  %v7394_v44 = vld [vmem:[#allocation6 + $0x34] sm:$0xf0]  ;;  %v5039_v46 = vld [vmem:[#allocation6 + $0x38] sm:$0xf0]  ;;  %v5309_v47 = vld [vmem:[#allocation9 + $0x1c0] sm:$0xf] }
  0x2b   :  { %306 = vmatpush.bf16.msrb.mxu0 %v5062_v29  ;;  %5076 = vmatmul.msk.bf16.vlgmr.msra.gmra.mxu1 %vm244_vm0, %v8269_v23  ;;  %v7463_v48 = vld [vmem:[#allocation9 + $0x1dc] sm:$0xf0]  ;;  %v5038_v50 = vor.u32 %v7394_v44, %v5037_v42  ;;  %v5042_v55 = vor.u32 %v7390_v45, %v5039_v46  ;;  %s4996_s6 = sshll.u32 %s8207_s4, 4  ;;  %s4998_s14 = sshll.u32 %s8454_s7, 4  ;;  %s4997_s6 = int_to_ptr.vmem [resolvable:$true] %s4996_s6  ;;  %s4999_s14 = int_to_ptr.hbm [resolvable:$true] %s4998_s14 }
  0x2c   :  { %319 = vmatpush.bf16.msrb.mxu1 %v5066_v30  ;;  %5077 = vmatmul.msk.bf16.vlgmr.msra.gmra.mxu2 %vm244_vm0, %v8269_v23  ;;  %v5565_v49 = vld [vmem:[#allocation9 + $0x3c0] sm:$0xf]  ;;  %v5310_v51 = vor.u32 %v7463_v48, %v5309_v47 }
  0x2d   :  { %5078 = vmatmul.msk.bf16.vlgmr.msra.gmra.mxu3 %vm244_vm0, %v8269_v23  ;;  %332 = vmatpush.bf16.msrb.mxu2 %v5070_v34  ;;  %v7527_v52 = vld [vmem:[#allocation9 + $0x3dc] sm:$0xf0] }
  0x2e   :  { %v5277_v53 = vld [vmem:[#allocation9 + $0x180] sm:$0xf]  ;;  %345 = vmatpush.bf16.msrb.mxu3 %v5074_v38  ;;  %v5566_v56 = vor.u32 %v7527_v52, %v5565_v49 }
  0x2f   :  { %v7455_v54 = vld [vmem:[#allocation9 + $0x19c] sm:$0xf0]  ;;  %307 = vmatpush.bf16.msrb.mxu0 %v5030_v39 }
  0x30   :  { %v5533_v57 = vld [vmem:[#allocation9 + $0x380] sm:$0xf]  ;;  %320 = vmatpush.bf16.msrb.mxu1 %v5034_v43  ;;  %v5278_v60 = vor.u32 %v7455_v54, %v5277_v53 }
  0x31   :  { %v7519_v58 = vld [vmem:[#allocation9 + $0x39c] sm:$0xf0]  ;;  %333 = vmatpush.bf16.msrb.mxu2 %v5038_v50 }
  0x32   :  { %v5821_v59 = vld [vmem:[#allocation9 + $0x5c0] sm:$0xf]  ;;  %v5534_v0 = vor.u32 %v7519_v58, %v5533_v57  ;;  %346 = vmatpush.bf16.msrb.mxu3 %v5042_v55 }
  0x33   :  { %3490 = vmatpush.bf16.msra.mxu0 %v5310_v51  ;;  %v7591_v61 = vld [vmem:[#allocation9 + $0x5dc] sm:$0xf0] }
  0x34   :  { %v6077_v62 = vld [vmem:[#allocation9 + $0x7c0] sm:$0xf]  ;;  %3503 = vmatpush.bf16.msra.mxu1 %v5566_v56  ;;  %v5822_v1 = vor.u32 %v7591_v61, %v5821_v59 }
  0x35   :  { %v7655_v63 = vld [vmem:[#allocation9 + $0x7dc] sm:$0xf0] }
  0x36   :  { %v6078_v2 = vor.u32 %v7655_v63, %v6077_v62  ;;  %v5245_v3 = vld [vmem:[#allocation9 + $0x140] sm:$0xf]  ;;  %3516 = vmatpush.bf16.msra.mxu2 %v5822_v1 }
  0x37   :  { %v7447_v4 = vld [vmem:[#allocation9 + $0x15c] sm:$0xf0]  ;;  %3491 = vmatpush.bf16.msra.mxu0 %v5278_v60 }
  0x38   :  { %v5501_v5 = vld [vmem:[#allocation9 + $0x340] sm:$0xf]  ;;  %3529 = vmatpush.bf16.msra.mxu3 %v6078_v2  ;;  %v5246_v12 = vor.u32 %v7447_v4, %v5245_v3  ;;  %3504 = vmatpush.bf16.msra.mxu1 %v5534_v0 }
  0x39   :  { %v7511_v6 = vld [vmem:[#allocation9 + $0x35c] sm:$0xf0] }
  0x3a   :  { %v5789_v7 = vld [vmem:[#allocation9 + $0x580] sm:$0xf]  ;;  %v5502_v14 = vor.u32 %v7511_v6, %v5501_v5  ;;  %5079 = vmatmul.msk.bf16.vlgmr.msrb.gmra.mxu0 %vm244_vm0, %v8269_v23 }
  0x3b   :  { %v7583_v8 = vld [vmem:[#allocation9 + $0x59c] sm:$0xf0]  ;;  %3492 = vmatpush.bf16.msra.mxu0 %v5246_v12  ;;  %5080 = vmatmul.msk.bf16.vlgmr.msrb.gmra.mxu1 %vm244_vm0, %v8269_v23 }
  0x3c   :  { %v5790_v9 = vor.u32 %v7583_v8, %v5789_v7  ;;  %v6045_v10 = vld [vmem:[#allocation9 + $0x780] sm:$0xf]  ;;  %3505 = vmatpush.bf16.msra.mxu1 %v5502_v14  ;;  %5081 = vmatmul.msk.bf16.vlgmr.msrb.gmra.mxu2 %vm244_vm0, %v8269_v23 }
  0x3d   :  { %v7647_v11 = vld [vmem:[#allocation9 + $0x79c] sm:$0xf0]  ;;  %5082 = vmatmul.msk.bf16.vlgmr.msrb.gmra.mxu3 %vm244_vm0, %v8269_v23 }
  0x3e   :  { %v6046_v13 = vor.u32 %v7647_v11, %v6045_v10  ;;  %v5757_v15 = vld [vmem:[#allocation9 + $0x540] sm:$0xf]  ;;  %3517 = vmatpush.bf16.msra.mxu2 %v5790_v9 }
  0x3f   :  { %v7575_v16 = vld [vmem:[#allocation9 + $0x55c] sm:$0xf0] }
  0x40   :  { %v6013_v17 = vld [vmem:[#allocation9 + $0x740] sm:$0xf]  ;;  %v5758_v22 = vor.u32 %v7575_v16, %v5757_v15  ;;  %3530 = vmatpush.bf16.msra.mxu3 %v6046_v13 }
  0x41   :  { %v7639_v18 = vld [vmem:[#allocation9 + $0x75c] sm:$0xf0] }
  0x42   :  { %v5213_v19 = vld [vmem:[#allocation9 + $0x100] sm:$0xf]  ;;  %v6014_v25 = vor.u32 %v7639_v18, %v6013_v17  ;;  %3518 = vmatpush.bf16.msra.mxu2 %v5758_v22 }
  0x43   :  { %v7439_v20 = vld [vmem:[#allocation9 + $0x11c] sm:$0xf0] }
  0x44   :  { %v5469_v21 = vld [vmem:[#allocation9 + $0x300] sm:$0xf]  ;;  %v5214_v30 = vor.u32 %v7439_v20, %v5213_v19  ;;  %3531 = vmatpush.bf16.msra.mxu3 %v6014_v25 }
  0x45   :  { %v7503_v24 = vld [vmem:[#allocation9 + $0x31c] sm:$0xf0] }
  0x46   :  { %v5725_v26 = vld [vmem:[#allocation9 + $0x500] sm:$0xf]  ;;  %v5470_v31 = vor.u32 %v7503_v24, %v5469_v21  ;;  %3493 = vmatpush.bf16.msra.mxu0 %v5214_v30 }
  0x47   :  { %v7567_v27 = vld [vmem:[#allocation9 + $0x51c] sm:$0xf0] }
  0x48   :  { %v5981_v28 = vld [vmem:[#allocation9 + $0x700] sm:$0xf]  ;;  %v5726_v35 = vor.u32 %v7567_v27, %v5725_v26  ;;  %3506 = vmatpush.bf16.msra.mxu1 %v5470_v31 }
  0x49   :  { %v7631_v29 = vld [vmem:[#allocation9 + $0x71c] sm:$0xf0] }
  0x4a   :  { %v5181_v32 = vld [vmem:[#allocation9 + $0xc0] sm:$0xf]  ;;  %v5982_v37 = vor.u32 %v7631_v29, %v5981_v28  ;;  %3519 = vmatpush.bf16.msra.mxu2 %v5726_v35 }
  0x4b   :  { %v7431_v33 = vld [vmem:[#allocation9 + $0xdc] sm:$0xf0] }
  0x4c   :  { %v5437_v34 = vld [vmem:[#allocation9 + $0x2c0] sm:$0xf]  ;;  %v5182_v42 = vor.u32 %v7431_v33, %v5181_v32  ;;  %3532 = vmatpush.bf16.msra.mxu3 %v5982_v37 }
  0x4d   :  { %v7495_v36 = vld [vmem:[#allocation9 + $0x2dc] sm:$0xf0] }
  0x4e   :  { %v5693_v38 = vld [vmem:[#allocation9 + $0x4c0] sm:$0xf]  ;;  %v5438_v43 = vor.u32 %v7495_v36, %v5437_v34  ;;  %3494 = vmatpush.bf16.msra.mxu0 %v5182_v42 }
  0x4f   :  { %v7559_v39 = vld [vmem:[#allocation9 + $0x4dc] sm:$0xf0] }
  0x50   :  { %v5949_v40 = vld [vmem:[#allocation9 + $0x6c0] sm:$0xf]  ;;  %v5694_v47 = vor.u32 %v7559_v39, %v5693_v38  ;;  %3507 = vmatpush.bf16.msra.mxu1 %v5438_v43 }
  0x51   :  { %v7623_v41 = vld [vmem:[#allocation9 + $0x6dc] sm:$0xf0] }
  0x52   :  { %v5149_v44 = vld [vmem:[#allocation9 + $0x80] sm:$0xf]  ;;  %v5950_v49 = vor.u32 %v7623_v41, %v5949_v40  ;;  %3520 = vmatpush.bf16.msra.mxu2 %v5694_v47 }
  0x53   :  { %v7423_v45 = vld [vmem:[#allocation9 + $0x9c] sm:$0xf0] }
  0x54   :  { %v5405_v46 = vld [vmem:[#allocation9 + $0x280] sm:$0xf]  ;;  %v5150_v54 = vor.u32 %v7423_v45, %v5149_v44  ;;  %3533 = vmatpush.bf16.msra.mxu3 %v5950_v49 }
  0x55   :  { %v7487_v48 = vld [vmem:[#allocation9 + $0x29c] sm:$0xf0] }
  0x56   :  { %v5661_v50 = vld [vmem:[#allocation9 + $0x480] sm:$0xf]  ;;  %v5406_v23 = vor.u32 %v7487_v48, %v5405_v46  ;;  %3495 = vmatpush.bf16.msra.mxu0 %v5150_v54 }
  0x57   :  { %v7551_v51 = vld [vmem:[#allocation9 + $0x49c] sm:$0xf0] }
  0x58   :  { %v5917_v52 = vld [vmem:[#allocation9 + $0x680] sm:$0xf]  ;;  %v5662_v58 = vor.u32 %v7551_v51, %v5661_v50  ;;  %3508 = vmatpush.bf16.msra.mxu1 %v5406_v23 }
  0x59   :  { %v7615_v53 = vld [vmem:[#allocation9 + $0x69c] sm:$0xf0] }
  0x5a   :  { %v5117_v55 = vld [vmem:[#allocation9 + $0x40] sm:$0xf]  ;;  %v5918_v60 = vor.u32 %v7615_v53, %v5917_v52  ;;  %3521 = vmatpush.bf16.msra.mxu2 %v5662_v58 }
  0x5b   :  { %v7415_v56 = vld [vmem:[#allocation9 + $0x5c] sm:$0xf0] }
  0x5c   :  { %v5373_v57 = vld [vmem:[#allocation9 + $0x240] sm:$0xf]  ;;  %v5118_v1 = vor.u32 %v7415_v56, %v5117_v55  ;;  %3534 = vmatpush.bf16.msra.mxu3 %v5918_v60 }
  0x5d   :  { %v7479_v59 = vld [vmem:[#allocation9 + $0x25c] sm:$0xf0] }
  0x5e   :  { %v5629_v61 = vld [vmem:[#allocation9 + $0x440] sm:$0xf]  ;;  %v5374_v4 = vor.u32 %v7479_v59, %v5373_v57  ;;  %3496 = vmatpush.bf16.msra.mxu0 %v5118_v1 }
  0x5f   :  { %v7543_v62 = vld [vmem:[#allocation9 + $0x45c] sm:$0xf0] }
  0x60   :  { %v5885_v63 = vld [vmem:[#allocation9 + $0x640] sm:$0xf]  ;;  %v5630_v8 = vor.u32 %v7543_v62, %v5629_v61  ;;  %3509 = vmatpush.bf16.msra.mxu1 %v5374_v4 }
  0x61   :  { %v7607_v0 = vld [vmem:[#allocation9 + $0x65c] sm:$0xf0] }
  0x62   :  { %v5085_v2 = vld [vmem:[#allocation9] sm:$0xf]  ;;  %v5886_v12 = vor.u32 %v7607_v0, %v5885_v63  ;;  %3522 = vmatpush.bf16.msra.mxu2 %v5630_v8 }
  0x63   :  { %v7407_v3 = vld [vmem:[#allocation9 + $0x1c] sm:$0xf0] }
  0x64   :  { %v5341_v5 = vld [vmem:[#allocation9 + $0x200] sm:$0xf]  ;;  %v5086_v16 = vor.u32 %v7407_v3, %v5085_v2  ;;  %3535 = vmatpush.bf16.msra.mxu3 %v5886_v12 }
  0x65   :  { %v7471_v6 = vld [vmem:[#allocation9 + $0x21c] sm:$0xf0] }
  0x66   :  { %v6333_v7 = vld [vmem:[#allocation9 + $0x9c0] sm:$0xf]  ;;  %v5342_v20 = vor.u32 %v7471_v6, %v5341_v5  ;;  %3497 = vmatpush.bf16.msra.mxu0 %v5086_v16 }
  0x67   :  { %v7719_v9 = vld [vmem:[#allocation9 + $0x9dc] sm:$0xf0] }
  0x68   :  { %v6589_v10 = vld [vmem:[#allocation9 + $0xbc0] sm:$0xf]  ;;  %v6334_v21 = vor.u32 %v7719_v9, %v6333_v7  ;;  %3510 = vmatpush.bf16.msra.mxu1 %v5342_v20 }
  0x69   :  { %v7783_v11 = vld [vmem:[#allocation9 + $0xbdc] sm:$0xf0] }
  0x6a   :  { %v5597_v13 = vld [vmem:[#allocation9 + $0x400] sm:$0xf]  ;;  %v6590_v25 = vor.u32 %v7783_v11, %v6589_v10  ;;  %3542 = vmatpush.bf16.msrb.mxu0 %v6334_v21 }
  0x6b   :  { %v7535_v14 = vld [vmem:[#allocation9 + $0x41c] sm:$0xf0] }
  0x6c   :  { %v5853_v15 = vld [vmem:[#allocation9 + $0x600] sm:$0xf]  ;;  %v5598_v28 = vor.u32 %v7535_v14, %v5597_v13  ;;  %3555 = vmatpush.bf16.msrb.mxu1 %v6590_v25 }
  0x6d   :  { %v7599_v17 = vld [vmem:[#allocation9 + $0x61c] sm:$0xf0] }
  0x6e   :  { %v6845_v18 = vld [vmem:[#allocation9 + $0xdc0] sm:$0xf]  ;;  %v5854_v31 = vor.u32 %v7599_v17, %v5853_v15  ;;  %3523 = vmatpush.bf16.msra.mxu2 %v5598_v28 }
  0x6f   :  { %v7847_v19 = vld [vmem:[#allocation9 + $0xddc] sm:$0xf0] }
  0x70   :  { %v7101_v22 = vld [vmem:[#allocation9 + $0xfc0] sm:$0xf]  ;;  %v6846_v32 = vor.u32 %v7847_v19, %v6845_v18  ;;  %3536 = vmatpush.bf16.msra.mxu3 %v5854_v31 }
  0x71   :  { %v7911_v24 = vld [vmem:[#allocation9 + $0xfdc] sm:$0xf0] }
  0x72   :  { %v6301_v26 = vld [vmem:[#allocation9 + $0x980] sm:$0xf]  ;;  %v7102_v33 = vor.u32 %v7911_v24, %v7101_v22  ;;  %3568 = vmatpush.bf16.msrb.mxu2 %v6846_v32 }
  0x73   :  { %v7711_v27 = vld [vmem:[#allocation9 + $0x99c] sm:$0xf0] }
  0x74   :  { %v6557_v29 = vld [vmem:[#allocation9 + $0xb80] sm:$0xf]  ;;  %v6302_v36 = vor.u32 %v7711_v27, %v6301_v26  ;;  %3581 = vmatpush.bf16.msrb.mxu3 %v7102_v33 }
  0x75   :  { %v7775_v30 = vld [vmem:[#allocation9 + $0xb9c] sm:$0xf0] }
  0x76   :  { %v6813_v34 = vld [vmem:[#allocation9 + $0xd80] sm:$0xf]  ;;  %v6558_v39 = vor.u32 %v7775_v30, %v6557_v29  ;;  %3543 = vmatpush.bf16.msrb.mxu0 %v6302_v36 }
  0x77   :  { %v7839_v35 = vld [vmem:[#allocation9 + $0xd9c] sm:$0xf0] }
  0x78   :  { %v7069_v37 = vld [vmem:[#allocation9 + $0xf80] sm:$0xf]  ;;  %v6814_v44 = vor.u32 %v7839_v35, %v6813_v34  ;;  %3556 = vmatpush.bf16.msrb.mxu1 %v6558_v39 }
  0x79   :  { %v7903_v38 = vld [vmem:[#allocation9 + $0xf9c] sm:$0xf0] }
  0x7a   :  { %v6269_v40 = vld [vmem:[#allocation9 + $0x940] sm:$0xf]  ;;  %v7070_v45 = vor.u32 %v7903_v38, %v7069_v37  ;;  %3569 = vmatpush.bf16.msrb.mxu2 %v6814_v44 }
  0x7b   :  { %v7703_v41 = vld [vmem:[#allocation9 + $0x95c] sm:$0xf0] }
  0x7c   :  { %v6525_v42 = vld [vmem:[#allocation9 + $0xb40] sm:$0xf]  ;;  %v6270_v48 = vor.u32 %v7703_v41, %v6269_v40  ;;  %3582 = vmatpush.bf16.msrb.mxu3 %v7070_v45 }
  0x7d   :  { %v7767_v43 = vld [vmem:[#allocation9 + $0xb5c] sm:$0xf0] }
  0x7e   :  { %v6781_v46 = vld [vmem:[#allocation9 + $0xd40] sm:$0xf]  ;;  %v6526_v51 = vor.u32 %v7767_v43, %v6525_v42  ;;  %3544 = vmatpush.bf16.msrb.mxu0 %v6270_v48 }
  0x7f   :  { %v7831_v47 = vld [vmem:[#allocation9 + $0xd5c] sm:$0xf0] }
  0x80   :  { %v7037_v49 = vld [vmem:[#allocation9 + $0xf40] sm:$0xf]  ;;  %v6782_v55 = vor.u32 %v7831_v47, %v6781_v46  ;;  %3557 = vmatpush.bf16.msrb.mxu1 %v6526_v51 }
  0x81   :  { %v7895_v50 = vld [vmem:[#allocation9 + $0xf5c] sm:$0xf0] }
  0x82   :  { %v6237_v52 = vld [vmem:[#allocation9 + $0x900] sm:$0xf]  ;;  %v7038_v56 = vor.u32 %v7895_v50, %v7037_v49  ;;  %3570 = vmatpush.bf16.msrb.mxu2 %v6782_v55  ;;  %v8287_v50 = vld [vmem:[#allocation8] sm:$0xff] }
  0x83   :  { %v7695_v53 = vld [vmem:[#allocation9 + $0x91c] sm:$0xf0]  ;;  %v148_v51 = vperm.slane %v8287_v50, 0 }
  0x84   :  { %v6493_v54 = vld [vmem:[#allocation9 + $0xb00] sm:$0xf]  ;;  %v6238_v57 = vor.u32 %v7695_v53, %v6237_v52  ;;  %3583 = vmatpush.bf16.msrb.mxu3 %v7038_v56  ;;  %v149_v52 = vperm.slane %v8287_v50, 1 }
  0x85   :  { %v7759_v23 = vld [vmem:[#allocation9 + $0xb1c] sm:$0xf0] }
  0x86   :  { %v6494_v58 = vor.u32 %v7759_v23, %v6493_v54  ;;  %v6205_v59 = vld [vmem:[#allocation9 + $0x8c0] sm:$0xf]  ;;  %3545 = vmatpush.bf16.msrb.mxu0 %v6238_v57 }
  0x87   :  { %v7687_v60 = vld [vmem:[#allocation9 + $0x8dc] sm:$0xf0] }
  0x88   :  { %v6461_v61 = vld [vmem:[#allocation9 + $0xac0] sm:$0xf]  ;;  %v6206_v63 = vor.u32 %v7687_v60, %v6205_v59  ;;  %3558 = vmatpush.bf16.msrb.mxu1 %v6494_v58  ;;  %v150_v58 = vperm.slane %v8287_v50, 2  ;;  %v151_v59 = vperm.slane %v8287_v50, 3  ;;  %v7459_v60 = vld [vmem:[#allocation9 + $0x1c4] sm:$0xf] }
  0x89   :  { %v7751_v62 = vld [vmem:[#allocation9 + $0xadc] sm:$0xf0] }
  0x8a   :  { %v6462_v0 = vor.u32 %v7751_v62, %v6461_v61  ;;  %3546 = vmatpush.bf16.msrb.mxu0 %v6206_v63  ;;  %v6749_v1 = vld [vmem:[#allocation9 + $0xd00] sm:$0xf]  ;;  %v5311_v62 = vld [vmem:[#allocation9 + $0x1e0] sm:$0xf0] }
  0x8b   :  { %v7823_v2 = vld [vmem:[#allocation9 + $0xd1c] sm:$0xf0]  ;;  %v7523_v63 = vld [vmem:[#allocation9 + $0x3c4] sm:$0xf] }
  0x8c   :  { %3559 = vmatpush.bf16.msrb.mxu1 %v6462_v0  ;;  %v7005_v3 = vld [vmem:[#allocation9 + $0xf00] sm:$0xf]  ;;  %v6750_v4 = vor.u32 %v7823_v2, %v6749_v1  ;;  %v5567_v0 = vld [vmem:[#allocation9 + $0x3e0] sm:$0xf0] }
  0x8d   :  { %v7887_v5 = vld [vmem:[#allocation9 + $0xf1c] sm:$0xf0] }
  0x8e   :  { %v7006_v6 = vor.u32 %v7887_v5, %v7005_v3  ;;  %v6173_v7 = vld [vmem:[#allocation9 + $0x880] sm:$0xf]  ;;  %3571 = vmatpush.bf16.msrb.mxu2 %v6750_v4 }
  0x8f   :  { %v7679_v8 = vld [vmem:[#allocation9 + $0x89c] sm:$0xf0] }
  0x90   :  { %v6174_v9 = vor.u32 %v7679_v8, %v6173_v7  ;;  %v6429_v10 = vld [vmem:[#allocation9 + $0xa80] sm:$0xf]  ;;  %3584 = vmatpush.bf16.msrb.mxu3 %v7006_v6 }
  0x91   :  { %v7743_v11 = vld [vmem:[#allocation9 + $0xa9c] sm:$0xf0] }
  0x92   :  { %v6430_v12 = vor.u32 %v7743_v11, %v6429_v10  ;;  %v6717_v13 = vld [vmem:[#allocation9 + $0xcc0] sm:$0xf]  ;;  %3547 = vmatpush.bf16.msrb.mxu0 %v6174_v9  ;;  %v5314_v9 = vor.u32 %v7459_v60, %v5311_v62  ;;  %v5570_v10 = vor.u32 %v7523_v63, %v5567_v0  ;;  %v7451_v11 = vld [vmem:[#allocation9 + $0x184] sm:$0xf]  ;;  %v155_v62 = vperm.slane %v8287_v50, 7 }
  0x93   :  { %v7815_v14 = vld [vmem:[#allocation9 + $0xcdc] sm:$0xf0]  ;;  %v7571_v60 = vld [vmem:[#allocation9 + $0x544] sm:$0xf] }
  0x94   :  { %v6973_v15 = vld [vmem:[#allocation9 + $0xec0] sm:$0xf]  ;;  %v6718_v16 = vor.u32 %v7815_v14, %v6717_v13  ;;  %3560 = vmatpush.bf16.msrb.mxu1 %v6430_v12  ;;  %v5279_v12 = vld [vmem:[#allocation9 + $0x1a0] sm:$0xf0] }
  0x95   :  { %v7879_v17 = vld [vmem:[#allocation9 + $0xedc] sm:$0xf0] }
  0x96   :  { %v6974_v18 = vor.u32 %v7879_v17, %v6973_v15  ;;  %v6141_v19 = vld [vmem:[#allocation9 + $0x840] sm:$0xf]  ;;  %3572 = vmatpush.bf16.msrb.mxu2 %v6718_v16  ;;  %v7515_v16 = vld [vmem:[#allocation9 + $0x384] sm:$0xf] }
  0x97   :  { %v7671_v20 = vld [vmem:[#allocation9 + $0x85c] sm:$0xf0]  ;;  %v5535_v17 = vld [vmem:[#allocation9 + $0x3a0] sm:$0xf0] }
  0x98   :  { %v6397_v21 = vld [vmem:[#allocation9 + $0xa40] sm:$0xf]  ;;  %v6142_v22 = vor.u32 %v7671_v20, %v6141_v19  ;;  %3585 = vmatpush.bf16.msrb.mxu3 %v6974_v18  ;;  %v152_v19 = vperm.slane %v8287_v50, 4  ;;  %v7587_v20 = vld [vmem:[#allocation9 + $0x5c4] sm:$0xf] }
  0x99   :  { %v7735_v24 = vld [vmem:[#allocation9 + $0xa5c] sm:$0xf0] }
  0x9a   :  { %v6398_v25 = vor.u32 %v7735_v24, %v6397_v21  ;;  %v6685_v26 = vld [vmem:[#allocation9 + $0xc80] sm:$0xf]  ;;  %3548 = vmatpush.bf16.msrb.mxu0 %v6142_v22  ;;  %v5823_v21 = vld [vmem:[#allocation9 + $0x5e0] sm:$0xf0] }
  0x9b   :  { %v7807_v27 = vld [vmem:[#allocation9 + $0xc9c] sm:$0xf0]  ;;  %v7651_v22 = vld [vmem:[#allocation9 + $0x7c4] sm:$0xf] }
  0x9c   :  { %v6686_v28 = vor.u32 %v7807_v27, %v6685_v26  ;;  %v6941_v29 = vld [vmem:[#allocation9 + $0xe80] sm:$0xf]  ;;  %3561 = vmatpush.bf16.msrb.mxu1 %v6398_v25  ;;  %v6079_v24 = vld [vmem:[#allocation9 + $0x7e0] sm:$0xf0]  ;;  %v5282_v27 = vor.u32 %v7451_v11, %v5279_v12 }
  0x9d   :  { %v7871_v30 = vld [vmem:[#allocation9 + $0xe9c] sm:$0xf0]  ;;  %v7443_v25 = vld [vmem:[#allocation9 + $0x144] sm:$0xf] }
  0x9e   :  { %v6942_v31 = vor.u32 %v7871_v30, %v6941_v29  ;;  %v6109_v32 = vld [vmem:[#allocation9 + $0x800] sm:$0xf]  ;;  %3573 = vmatpush.bf16.msrb.mxu2 %v6686_v28  ;;  %v5538_v28 = vor.u32 %v7515_v16, %v5535_v17  ;;  %v5247_v29 = vld [vmem:[#allocation9 + $0x160] sm:$0xf0] }
  0x9f   :  { %v7663_v33 = vld [vmem:[#allocation9 + $0x81c] sm:$0xf0]  ;;  %v7507_v30 = vld [vmem:[#allocation9 + $0x344] sm:$0xf] }
  0xa0   :  { %v6365_v34 = vld [vmem:[#allocation9 + $0xa00] sm:$0xf]  ;;  %v6110_v35 = vor.u32 %v7663_v33, %v6109_v32  ;;  %3586 = vmatpush.bf16.msrb.mxu3 %v6942_v31  ;;  %v5503_v31 = vld [vmem:[#allocation9 + $0x360] sm:$0xf0]  ;;  %v153_v32 = vperm.slane %v8287_v50, 5 }
  0xa1   :  { %v7727_v36 = vld [vmem:[#allocation9 + $0xa1c] sm:$0xf0]  ;;  %v7563_v17 = vld [vmem:[#allocation9 + $0x504] sm:$0xf] }
  0xa2   :  { %v6366_v37 = vor.u32 %v7727_v36, %v6365_v34  ;;  %v6653_v38 = vld [vmem:[#allocation9 + $0xc40] sm:$0xf]  ;;  %3549 = vmatpush.bf16.msrb.mxu0 %v6110_v35 }
  0xa3   :  { %v7799_v39 = vld [vmem:[#allocation9 + $0xc5c] sm:$0xf0] }
  0xa4   :  { %v6909_v40 = vld [vmem:[#allocation9 + $0xe40] sm:$0xf]  ;;  %3562 = vmatpush.bf16.msrb.mxu1 %v6366_v37  ;;  %v6654_v42 = vor.u32 %v7799_v39, %v6653_v38  ;;  %v5826_v38 = vor.u32 %v7587_v20, %v5823_v21  ;;  %v6082_v39 = vor.u32 %v7651_v22, %v6079_v24  ;;  %v5727_v20 = vld [vmem:[#allocation9 + $0x520] sm:$0xf0] }
  0xa5   :  { %v7863_v41 = vld [vmem:[#allocation9 + $0xe5c] sm:$0xf0]  ;;  %v7627_v21 = vld [vmem:[#allocation9 + $0x704] sm:$0xf] }
  0xa6   :  { %v6910_v43 = vor.u32 %v7863_v41, %v6909_v40  ;;  %3574 = vmatpush.bf16.msrb.mxu2 %v6654_v42  ;;  %v6621_v44 = vld [vmem:[#allocation9 + $0xc00] sm:$0xf]  ;;  %v5250_v40 = vor.u32 %v7443_v25, %v5247_v29  ;;  %v5506_v41 = vor.u32 %v7507_v30, %v5503_v31  ;;  %v7579_v42 = vld [vmem:[#allocation9 + $0x584] sm:$0xf] }
  0xa7   :  { %v7791_v45 = vld [vmem:[#allocation9 + $0xc1c] sm:$0xf0]  ;;  %v257_v53 = vpop.f32.mrf.mxu0  ;;  %v5983_v22 = vld [vmem:[#allocation9 + $0x720] sm:$0xf0] }
  0xa8   :  { %3587 = vmatpush.bf16.msrb.mxu3 %v6910_v43  ;;  %v6622_v46 = vor.u32 %v7791_v45, %v6621_v44  ;;  %v6877_v47 = vld [vmem:[#allocation9 + $0xe00] sm:$0xf]  ;;  %v258_v54 = vadd.f32 %v257_v53, %v148_v51  ;;  %v270_v23 = vpop.f32.mrf.mxu1  ;;  %v5791_v43 = vld [vmem:[#allocation9 + $0x5a0] sm:$0xf0] }
  0xa9   :  { %v7855_v48 = vld [vmem:[#allocation9 + $0xe1c] sm:$0xf0]  ;;  %v271_v55 = vadd.f32 %v270_v23, %v149_v52  ;;  %v7435_v51 = vld [vmem:[#allocation9 + $0x104] sm:$0xf] }
  0xaa   :  { %v6878_v49 = vor.u32 %v7855_v48, %v6877_v47  ;;  %3575 = vmatpush.bf16.msrb.mxu2 %v6622_v46  ;;  %v352_v56 = vmax.f32 %v258_v54, 0.0  ;;  %v7643_v48 = vld [vmem:[#allocation9 + $0x784] sm:$0xf] }
  0xab   :  { %v353_v57 = vmax.f32 %v271_v55, 0.0  ;;  %v5215_v53 = vld [vmem:[#allocation9 + $0x120] sm:$0xf0] }
  0xac   :  { %3588 = vmatpush.bf16.msrb.mxu3 %v6878_v49  ;;  %v6047_v49 = vld [vmem:[#allocation9 + $0x7a0] sm:$0xf0]  ;;  %v5218_v63 = vor.u32 %v7435_v51, %v5215_v53 }
  0xad   :  { %v360_v61 = vpack.c.bf16 %v353_v57, %v352_v56  ;;  %v7499_v54 = vld [vmem:[#allocation9 + $0x304] sm:$0xf]  ;;  %v5794_v57 = vor.u32 %v7579_v42, %v5791_v43 }
  0xae   :  { %v5471_v23 = vld [vmem:[#allocation9 + $0x320] sm:$0xf0] }
  0xaf   :  { %v283_v1 = vpop.f32.mrf.mxu2  ;;  %v906_v2 = vunpack.c.l.b16 %v360_v61  ;;  %v907_v3 = vunpack.c.h.b16 %v360_v61  ;;  %v259_v6 = vpop.f32.mrf.mxu0  ;;  %v5759_v61 = vld [vmem:[#allocation9 + $0x560] sm:$0xf0]  ;;  %v5474_v0 = vor.u32 %v7499_v54, %v5471_v23 }
  0xb0   :  { %v284_v4 = vadd.f32 %v283_v1, %v150_v58  ;;  %v296_v5 = vpop.f32.mrf.mxu3  ;;  %v272_v8 = vpop.f32.mrf.mxu1  ;;  %v6050_v58 = vor.u32 %v7643_v48, %v6047_v49  ;;  %v7635_v1 = vld [vmem:[#allocation9 + $0x744] sm:$0xf] }
  0xb1   :  { %v297_v7 = vadd.f32 %v296_v5, %v151_v59  ;;  %v8293_v13 = vpack.c.b16 %v906_v2, %v906_v2  ;;  %v8295_v14 = vpack.c.b16 %v907_v3, %v907_v3  ;;  %v154_v59 = vperm.slane %v8287_v50, 6  ;;  %v6015_v2 = vld [vmem:[#allocation9 + $0x760] sm:$0xf0] }
  0xb2   :  { %v354_v15 = vmax.f32 %v284_v4, 0.0  ;;  %v7427_v4 = vld [vmem:[#allocation9 + $0xc4] sm:$0xf]  ;;  %v6018_v16 = vor.u32 %v7635_v1, %v6015_v2 }
  0xb3   :  { %v355_v18 = vmax.f32 %v297_v7, 0.0  ;;  %3498 = vmatmul.bf16.vlgmr.msra.gmra.mxu0 %v8293_v13  ;;  %3511 = vmatmul.bf16.vlgmr.msra.gmra.mxu1 %v8295_v14  ;;  %v5183_v5 = vld [vmem:[#allocation9 + $0xe0] sm:$0xf0]  ;;  %v5762_v7 = vor.u32 %v7571_v60, %v5759_v61 }
  0xb4   :  { %3594 = vmatpush.bf16.msra.mxu0 %v5314_v9  ;;  %3607 = vmatpush.bf16.msra.mxu1 %v5570_v10  ;;  %v7491_v8 = vld [vmem:[#allocation9 + $0x2c4] sm:$0xf] }
  0xb5   :  { %v361_v26 = vpack.c.bf16 %v355_v18, %v354_v15  ;;  %v5439_v9 = vld [vmem:[#allocation9 + $0x2e0] sm:$0xf0] }
  0xb6   :  { %v7419_v29 = vld [vmem:[#allocation9 + $0x84] sm:$0xf] }
  0xb7   :  { %v908_v33 = vunpack.c.l.b16 %v361_v26  ;;  %v909_v34 = vunpack.c.h.b16 %v361_v26  ;;  %v285_v35 = vpop.f32.mrf.mxu2  ;;  %v309_v37 = vpop.f32.mrf.mxu0  ;;  %v5151_v30 = vld [vmem:[#allocation9 + $0xa0] sm:$0xf0] }
  0xb8   :  { %v298_v36 = vpop.f32.mrf.mxu3  ;;  %3595 = vmatpush.bf16.msra.mxu0 %v5282_v27  ;;  %3608 = vmatpush.bf16.msra.mxu1 %v5538_v28  ;;  %v310_v46 = vadd.f32 %v309_v37, %v152_v19  ;;  %v322_v47 = vpop.f32.mrf.mxu1  ;;  %v5186_v19 = vor.u32 %v7427_v4, %v5183_v5  ;;  %v5442_v28 = vor.u32 %v7491_v8, %v5439_v9  ;;  %v7411_v43 = vld [vmem:[#allocation9 + $0x44] sm:$0xf] }
  0xb9   :  { %v8301_v44 = vpack.c.b16 %v908_v33, %v908_v33  ;;  %v8303_v45 = vpack.c.b16 %v909_v34, %v909_v34  ;;  %v323_v52 = vadd.f32 %v322_v47, %v153_v32  ;;  %v7483_v32 = vld [vmem:[#allocation9 + $0x284] sm:$0xf]  ;;  %v5730_v34 = vor.u32 %v7563_v17, %v5727_v20 }
  0xba   :  { %v356_v55 = vmax.f32 %v310_v46, 0.0  ;;  %v5407_v33 = vld [vmem:[#allocation9 + $0x2a0] sm:$0xf0]  ;;  %v5986_v35 = vor.u32 %v7627_v21, %v5983_v22 }
  0xbb   :  { %3524 = vmatmul.bf16.vlgmr.msra.gmra.mxu2 %v8301_v44  ;;  %3537 = vmatmul.bf16.vlgmr.msra.gmra.mxu3 %v8303_v45  ;;  %v357_v56 = vmax.f32 %v323_v52, 0.0  ;;  %v7555_v36 = vld [vmem:[#allocation9 + $0x4c4] sm:$0xf]  ;;  %v5410_v42 = vor.u32 %v7483_v32, %v5407_v33 }
  0xbc   :  { %3620 = vmatpush.bf16.msra.mxu2 %v5826_v38  ;;  %3633 = vmatpush.bf16.msra.mxu3 %v6082_v39  ;;  %v5695_v38 = vld [vmem:[#allocation9 + $0x4e0] sm:$0xf0] }
  0xbd   :  { %3596 = vmatpush.bf16.msra.mxu0 %v5250_v40  ;;  %3609 = vmatpush.bf16.msra.mxu1 %v5506_v41  ;;  %v362_v3 = vpack.c.bf16 %v357_v56, %v356_v55  ;;  %v7619_v39 = vld [vmem:[#allocation9 + $0x6c4] sm:$0xf]  ;;  %v5154_v41 = vor.u32 %v7419_v29, %v5151_v30  ;;  %v5698_v53 = vor.u32 %v7555_v36, %v5695_v38 }
  0xbe   :  { %v5951_v40 = vld [vmem:[#allocation9 + $0x6e0] sm:$0xf0] }
  0xbf   :  { %v335_v6 = vpop.f32.mrf.mxu2  ;;  %v910_v10 = vunpack.c.l.b16 %v362_v3  ;;  %v911_v11 = vunpack.c.h.b16 %v362_v3  ;;  %v311_v50 = vpop.f32.mrf.mxu0  ;;  %v5119_v49 = vld [vmem:[#allocation9 + $0x60] sm:$0xf0]  ;;  %v5954_v54 = vor.u32 %v7619_v39, %v5951_v40 }
  0xc0   :  { %3621 = vmatpush.bf16.msra.mxu2 %v5794_v57  ;;  %3634 = vmatpush.bf16.msra.mxu3 %v6050_v58  ;;  %v336_v12 = vadd.f32 %v335_v6, %v154_v59  ;;  %v348_v15 = vpop.f32.mrf.mxu3  ;;  %v324_v24 = vpop.f32.mrf.mxu1  ;;  %v7475_v51 = vld [vmem:[#allocation9 + $0x244] sm:$0xf]  ;;  %v5122_v61 = vor.u32 %v7411_v43, %v5119_v49 }
  0xc1   :  { %v349_v18 = vadd.f32 %v348_v15, %v155_v62  ;;  %3597 = vmatpush.bf16.msra.mxu0 %v5218_v63  ;;  %3610 = vmatpush.bf16.msra.mxu1 %v5474_v0  ;;  %v8309_v25 = vpack.c.b16 %v910_v10, %v910_v10  ;;  %v8311_v26 = vpack.c.b16 %v911_v11, %v911_v11  ;;  %v5375_v52 = vld [vmem:[#allocation9 + $0x260] sm:$0xf0] }
  0xc2   :  { %v358_v27 = vmax.f32 %v336_v12, 0.0  ;;  %v7547_v55 = vld [vmem:[#allocation9 + $0x484] sm:$0xf]  ;;  %v5378_v62 = vor.u32 %v7475_v51, %v5375_v52 }
  0xc3   :  { %v359_v31 = vmax.f32 %v349_v18, 0.0  ;;  %3550 = vmatmul.bf16.vlgmr.msrb.gmra.mxu0 %v8309_v25  ;;  %3563 = vmatmul.bf16.vlgmr.msrb.gmra.mxu1 %v8311_v26  ;;  %v5663_v58 = vld [vmem:[#allocation9 + $0x4a0] sm:$0xf0] }
  0xc4   :  { %3622 = vmatpush.bf16.msra.mxu2 %v5762_v7  ;;  %3635 = vmatpush.bf16.msra.mxu3 %v6018_v16  ;;  %v7611_v59 = vld [vmem:[#allocation9 + $0x684] sm:$0xf]  ;;  %v5666_v5 = vor.u32 %v7547_v55, %v5663_v58 }
  0xc5   :  { %v363_v37 = vpack.c.bf16 %v359_v31, %v358_v27  ;;  %3598 = vmatpush.bf16.msra.mxu0 %v5186_v19  ;;  %3611 = vmatpush.bf16.msra.mxu1 %v5442_v28  ;;  %v5919_v60 = vld [vmem:[#allocation9 + $0x6a0] sm:$0xf0] }
  0xc6   :  { %v7403_v63 = vld [vmem:[#allocation9 + $0x4] sm:$0xf]  ;;  %v5922_v6 = vor.u32 %v7611_v59, %v5919_v60 }
  0xc7   :  { %v912_v46 = vunpack.c.l.b16 %v363_v37  ;;  %v913_v47 = vunpack.c.h.b16 %v363_v37  ;;  %v337_v48 = vpop.f32.mrf.mxu2  ;;  %v5087_v0 = vld [vmem:[#allocation9 + $0x20] sm:$0xf0] }
  0xc8   :  { %3623 = vmatpush.bf16.msra.mxu2 %v5730_v34  ;;  %3636 = vmatpush.bf16.msra.mxu3 %v5986_v35  ;;  %v350_v23 = vpop.f32.mrf.mxu3  ;;  %v7467_v1 = vld [vmem:[#allocation9 + $0x204] sm:$0xf]  ;;  %v5090_v15 = vor.u32 %v7403_v63, %v5087_v0 }
  0xc9   :  { %v8315_v56 = vpack.c.b16 %v912_v46, %v912_v46  ;;  %v8317_v57 = vpack.c.b16 %v913_v47, %v913_v47  ;;  %3599 = vmatpush.bf16.msra.mxu0 %v5154_v41  ;;  %3612 = vmatpush.bf16.msra.mxu1 %v5410_v42  ;;  %v5343_v2 = vld [vmem:[#allocation9 + $0x220] sm:$0xf0] }
  0xca   :  { %v7715_v3 = vld [vmem:[#allocation9 + $0x9c4] sm:$0xf]  ;;  %v5346_v16 = vor.u32 %v7467_v1, %v5343_v2 }
  0xcb   :  { %3576 = vmatmul.bf16.vlgmr.msrb.gmra.mxu2 %v8315_v56  ;;  %3589 = vmatmul.bf16.vlgmr.msrb.gmra.mxu3 %v8317_v57  ;;  %v6335_v4 = vld [vmem:[#allocation9 + $0x9e0] sm:$0xf0] }
  0xcc   :  { %3624 = vmatpush.bf16.msra.mxu2 %v5698_v53  ;;  %3637 = vmatpush.bf16.msra.mxu3 %v5954_v54  ;;  %v7779_v7 = vld [vmem:[#allocation9 + $0xbc4] sm:$0xf]  ;;  %v6338_v17 = vor.u32 %v7715_v3, %v6335_v4 }
  0xcd   :  { %v6591_v8 = vld [vmem:[#allocation9 + $0xbe0] sm:$0xf0]  ;;  %3600 = vmatpush.bf16.msra.mxu0 %v5122_v61  ;;  %3613 = vmatpush.bf16.msra.mxu1 %v5378_v62 }
  0xce   :  { %v7539_v9 = vld [vmem:[#allocation9 + $0x444] sm:$0xf]  ;;  %v6594_v50 = vor.u32 %v7779_v7, %v6591_v8 }
  0xcf   :  { %v5631_v10 = vld [vmem:[#allocation9 + $0x460] sm:$0xf0] }
  0xd0   :  { %v7603_v11 = vld [vmem:[#allocation9 + $0x644] sm:$0xf]  ;;  %3625 = vmatpush.bf16.msra.mxu2 %v5666_v5  ;;  %3638 = vmatpush.bf16.msra.mxu3 %v5922_v6  ;;  %v5634_v21 = vor.u32 %v7539_v9, %v5631_v10 }
  0xd1   :  { %v5887_v12 = vld [vmem:[#allocation9 + $0x660] sm:$0xf0]  ;;  %3601 = vmatpush.bf16.msra.mxu0 %v5090_v15  ;;  %3614 = vmatpush.bf16.msra.mxu1 %v5346_v16 }
  0xd2   :  { %v7707_v18 = vld [vmem:[#allocation9 + $0x984] sm:$0xf]  ;;  %v5890_v22 = vor.u32 %v7603_v11, %v5887_v12 }
  0xd3   :  { %v6303_v19 = vld [vmem:[#allocation9 + $0x9a0] sm:$0xf0] }
  0xd4   :  { %v7771_v20 = vld [vmem:[#allocation9 + $0xb84] sm:$0xf]  ;;  %v6306_v35 = vor.u32 %v7707_v18, %v6303_v19  ;;  %3626 = vmatpush.bf16.msra.mxu2 %v5634_v21  ;;  %3639 = vmatpush.bf16.msra.mxu3 %v5890_v22 }
  0xd5   :  { %v6559_v24 = vld [vmem:[#allocation9 + $0xba0] sm:$0xf0]  ;;  %3646 = vmatpush.bf16.msrb.mxu0 %v6338_v17  ;;  %3659 = vmatpush.bf16.msrb.mxu1 %v6594_v50 }
  0xd6   :  { %v7531_v27 = vld [vmem:[#allocation9 + $0x404] sm:$0xf]  ;;  %v6562_v36 = vor.u32 %v7771_v20, %v6559_v24  ;;  %3602 = vmatmul.bf16.vlgmr.msra.gmra.mxu0 %v8293_v13  ;;  %3615 = vmatmul.bf16.vlgmr.msra.gmra.mxu1 %v8295_v14 }
  0xd7   :  { %v5599_v28 = vld [vmem:[#allocation9 + $0x420] sm:$0xf0] }
  0xd8   :  { %v7595_v29 = vld [vmem:[#allocation9 + $0x604] sm:$0xf]  ;;  %v5602_v38 = vor.u32 %v7531_v27, %v5599_v28 }
  0xd9   :  { %v5855_v30 = vld [vmem:[#allocation9 + $0x620] sm:$0xf0]  ;;  %3647 = vmatpush.bf16.msrb.mxu0 %v6306_v35  ;;  %3660 = vmatpush.bf16.msrb.mxu1 %v6562_v36 }
  0xda   :  { %v7843_v31 = vld [vmem:[#allocation9 + $0xdc4] sm:$0xf]  ;;  %v5858_v39 = vor.u32 %v7595_v29, %v5855_v30  ;;  %3627 = vmatpush.bf16.msra.mxu2 %v5602_v38 }
  0xdb   :  { %v6847_v32 = vld [vmem:[#allocation9 + $0xde0] sm:$0xf0] }
  0xdc   :  { %v7907_v33 = vld [vmem:[#allocation9 + $0xfc4] sm:$0xf]  ;;  %v6850_v43 = vor.u32 %v7843_v31, %v6847_v32  ;;  %3640 = vmatpush.bf16.msra.mxu3 %v5858_v39 }
  0xdd   :  { %v7103_v34 = vld [vmem:[#allocation9 + $0xfe0] sm:$0xf0]  ;;  %3628 = vmatmul.bf16.vlgmr.msra.gmra.mxu2 %v8301_v44 }
  0xde   :  { %v7699_v37 = vld [vmem:[#allocation9 + $0x944] sm:$0xf]  ;;  %v7106_v46 = vor.u32 %v7907_v33, %v7103_v34  ;;  %3672 = vmatpush.bf16.msrb.mxu2 %v6850_v43 }
  0xdf   :  { %v6271_v40 = vld [vmem:[#allocation9 + $0x960] sm:$0xf0]  ;;  %3641 = vmatmul.bf16.vlgmr.msra.gmra.mxu3 %v8303_v45 }
  0xe0   :  { %v7763_v41 = vld [vmem:[#allocation9 + $0xb44] sm:$0xf]  ;;  %v6274_v52 = vor.u32 %v7699_v37, %v6271_v40  ;;  %3685 = vmatpush.bf16.msrb.mxu3 %v7106_v46 }
  0xe1   :  { %v6527_v42 = vld [vmem:[#allocation9 + $0xb60] sm:$0xf0] }
  0xe2   :  { %v7835_v47 = vld [vmem:[#allocation9 + $0xd84] sm:$0xf]  ;;  %v6530_v53 = vor.u32 %v7763_v41, %v6527_v42  ;;  %3648 = vmatpush.bf16.msrb.mxu0 %v6274_v52 }
  0xe3   :  { %v6815_v48 = vld [vmem:[#allocation9 + $0xda0] sm:$0xf0] }
  0xe4   :  { %v7899_v49 = vld [vmem:[#allocation9 + $0xf84] sm:$0xf]  ;;  %v6818_v59 = vor.u32 %v7835_v47, %v6815_v48  ;;  %3661 = vmatpush.bf16.msrb.mxu1 %v6530_v53 }
  0xe5   :  { %v7071_v51 = vld [vmem:[#allocation9 + $0xfa0] sm:$0xf0] }
  0xe6   :  { %v7691_v54 = vld [vmem:[#allocation9 + $0x904] sm:$0xf]  ;;  %v7074_v60 = vor.u32 %v7899_v49, %v7071_v51  ;;  %3673 = vmatpush.bf16.msrb.mxu2 %v6818_v59  ;;  %v5317_v49 = vld [vmem:[#allocation9 + $0x1c8] sm:$0xf] }
  0xe7   :  { %v6239_v23 = vld [vmem:[#allocation9 + $0x920] sm:$0xf0]  ;;  %v7464_v51 = vld [vmem:[#allocation9 + $0x1e4] sm:$0xf0] }
  0xe8   :  { %v7755_v55 = vld [vmem:[#allocation9 + $0xb04] sm:$0xf]  ;;  %v6242_v1 = vor.u32 %v7691_v54, %v6239_v23  ;;  %3686 = vmatpush.bf16.msrb.mxu3 %v7074_v60  ;;  %v5573_v54 = vld [vmem:[#allocation9 + $0x3c8] sm:$0xf] }
  0xe9   :  { %v6495_v58 = vld [vmem:[#allocation9 + $0xb20] sm:$0xf0]  ;;  %v7528_v23 = vld [vmem:[#allocation9 + $0x3e4] sm:$0xf0] }
  0xea   :  { %v7827_v61 = vld [vmem:[#allocation9 + $0xd44] sm:$0xf]  ;;  %v6498_v2 = vor.u32 %v7755_v55, %v6495_v58  ;;  %3649 = vmatpush.bf16.msrb.mxu0 %v6242_v1  ;;  %v5285_v1 = vld [vmem:[#allocation9 + $0x188] sm:$0xf] }
  0xeb   :  { %v6783_v62 = vld [vmem:[#allocation9 + $0xd60] sm:$0xf0] }
  0xec   :  { %v7891_v63 = vld [vmem:[#allocation9 + $0xf44] sm:$0xf]  ;;  %v6786_v7 = vor.u32 %v7827_v61, %v6783_v62  ;;  %3662 = vmatpush.bf16.msrb.mxu1 %v6498_v2  ;;  %v7456_v2 = vld [vmem:[#allocation9 + $0x1a4] sm:$0xf0] }
  0xed   :  { %v7039_v0 = vld [vmem:[#allocation9 + $0xf60] sm:$0xf0] }
  0xee   :  { %v7683_v3 = vld [vmem:[#allocation9 + $0x8c4] sm:$0xf]  ;;  %v7042_v8 = vor.u32 %v7891_v63, %v7039_v0  ;;  %3674 = vmatpush.bf16.msrb.mxu2 %v6786_v7  ;;  %v5318_v63 = vor.u32 %v7464_v51, %v5317_v49  ;;  %v5574_v0 = vor.u32 %v7528_v23, %v5573_v54  ;;  %v5189_v49 = vld [vmem:[#allocation9 + $0xc8] sm:$0xf] }
  0xef   :  { %v6207_v4 = vld [vmem:[#allocation9 + $0x8e0] sm:$0xf0]  ;;  %v7432_v51 = vld [vmem:[#allocation9 + $0xe4] sm:$0xf0] }
  0xf0   :  { %v7747_v5 = vld [vmem:[#allocation9 + $0xac4] sm:$0xf]  ;;  %v6210_v15 = vor.u32 %v7683_v3, %v6207_v4  ;;  %3687 = vmatpush.bf16.msrb.mxu3 %v7042_v8  ;;  %v5541_v3 = vld [vmem:[#allocation9 + $0x388] sm:$0xf] }
  0xf1   :  { %v6463_v6 = vld [vmem:[#allocation9 + $0xae0] sm:$0xf0]  ;;  %v5445_v54 = vld [vmem:[#allocation9 + $0x2c8] sm:$0xf] }
  0xf2   :  { %v7819_v9 = vld [vmem:[#allocation9 + $0xd04] sm:$0xf]  ;;  %v6466_v16 = vor.u32 %v7747_v5, %v6463_v6  ;;  %3650 = vmatpush.bf16.msrb.mxu0 %v6210_v15  ;;  %v7520_v6 = vld [vmem:[#allocation9 + $0x3a4] sm:$0xf0] }
  0xf3   :  { %v6751_v10 = vld [vmem:[#allocation9 + $0xd20] sm:$0xf0]  ;;  %v6085_v15 = vld [vmem:[#allocation9 + $0x7c8] sm:$0xf] }
  0xf4   :  { %v7883_v11 = vld [vmem:[#allocation9 + $0xf04] sm:$0xf]  ;;  %v6754_v20 = vor.u32 %v7819_v9, %v6751_v10  ;;  %3663 = vmatpush.bf16.msrb.mxu1 %v6466_v16  ;;  %v7656_v16 = vld [vmem:[#allocation9 + $0x7e4] sm:$0xf0] }
  0xf5   :  { %v7007_v12 = vld [vmem:[#allocation9 + $0xf20] sm:$0xf0]  ;;  %v7496_v23 = vld [vmem:[#allocation9 + $0x2e4] sm:$0xf0] }
  0xf6   :  { %v7675_v17 = vld [vmem:[#allocation9 + $0x884] sm:$0xf]  ;;  %v7010_v21 = vor.u32 %v7883_v11, %v7007_v12  ;;  %3675 = vmatpush.bf16.msrb.mxu2 %v6754_v20  ;;  %v5829_v11 = vld [vmem:[#allocation9 + $0x5c8] sm:$0xf] }
  0xf7   :  { %v6175_v50 = vld [vmem:[#allocation9 + $0x8a0] sm:$0xf0]  ;;  %v7592_v12 = vld [vmem:[#allocation9 + $0x5e4] sm:$0xf0] }
  0xf8   :  { %v7739_v18 = vld [vmem:[#allocation9 + $0xa84] sm:$0xf]  ;;  %v6178_v29 = vor.u32 %v7675_v17, %v6175_v50  ;;  %3688 = vmatpush.bf16.msrb.mxu3 %v7010_v21  ;;  %v5286_v17 = vor.u32 %v7456_v2, %v5285_v1  ;;  %v5542_v50 = vor.u32 %v7520_v6, %v5541_v3  ;;  %v5253_v20 = vld [vmem:[#allocation9 + $0x148] sm:$0xf] }
  0xf9   :  { %v6431_v19 = vld [vmem:[#allocation9 + $0xaa0] sm:$0xf0]  ;;  %v7448_v21 = vld [vmem:[#allocation9 + $0x164] sm:$0xf0] }
  0xfa   :  { %v7811_v22 = vld [vmem:[#allocation9 + $0xcc4] sm:$0xf]  ;;  %v6434_v30 = vor.u32 %v7739_v18, %v6431_v19  ;;  %3651 = vmatpush.bf16.msrb.mxu0 %v6178_v29  ;;  %v5797_v29 = vld [vmem:[#allocation9 + $0x588] sm:$0xf] }
  0xfb   :  { %v6719_v24 = vld [vmem:[#allocation9 + $0xce0] sm:$0xf0]  ;;  %v5413_v3 = vld [vmem:[#allocation9 + $0x288] sm:$0xf] }
  0xfc   :  { %v7875_v27 = vld [vmem:[#allocation9 + $0xec4] sm:$0xf]  ;;  %v6722_v35 = vor.u32 %v7811_v22, %v6719_v24  ;;  %3664 = vmatpush.bf16.msrb.mxu1 %v6434_v30  ;;  %v5830_v22 = vor.u32 %v7592_v12, %v5829_v11  ;;  %v6086_v24 = vor.u32 %v7656_v16, %v6085_v15  ;;  %v7584_v30 = vld [vmem:[#allocation9 + $0x5a4] sm:$0xf0] }
  0xfd   :  { %v6975_v28 = vld [vmem:[#allocation9 + $0xee0] sm:$0xf0]  ;;  %v7560_v6 = vld [vmem:[#allocation9 + $0x4e4] sm:$0xf0] }
  0xfe   :  { %v7667_v31 = vld [vmem:[#allocation9 + $0x844] sm:$0xf]  ;;  %v6978_v36 = vor.u32 %v7875_v27, %v6975_v28  ;;  %3676 = vmatpush.bf16.msrb.mxu2 %v6722_v35  ;;  %v5509_v27 = vld [vmem:[#allocation9 + $0x348] sm:$0xf] }
  0xff   :  { %v6143_v32 = vld [vmem:[#allocation9 + $0x860] sm:$0xf0]  ;;  %v7512_v28 = vld [vmem:[#allocation9 + $0x364] sm:$0xf0] }
 0x100   :  { %v7731_v33 = vld [vmem:[#allocation9 + $0xa44] sm:$0xf]  ;;  %v6146_v41 = vor.u32 %v7667_v31, %v6143_v32  ;;  %3689 = vmatpush.bf16.msrb.mxu3 %v6978_v36  ;;  %v6053_v31 = vld [vmem:[#allocation9 + $0x788] sm:$0xf] }
 0x101   :  { %v6399_v34 = vld [vmem:[#allocation9 + $0xa60] sm:$0xf0]  ;;  %v7648_v32 = vld [vmem:[#allocation9 + $0x7a4] sm:$0xf0] }
 0x102   :  { %v7803_v37 = vld [vmem:[#allocation9 + $0xc84] sm:$0xf]  ;;  %v6402_v42 = vor.u32 %v7731_v33, %v6399_v34  ;;  %3652 = vmatpush.bf16.msrb.mxu0 %v6146_v41  ;;  %v5254_v33 = vor.u32 %v7448_v21, %v5253_v20  ;;  %v5510_v34 = vor.u32 %v7512_v28, %v5509_v27  ;;  %v5221_v35 = vld [vmem:[#allocation9 + $0x108] sm:$0xf] }
 0x103   :  { %v6687_v38 = vld [vmem:[#allocation9 + $0xca0] sm:$0xf0]  ;;  %v7440_v36 = vld [vmem:[#allocation9 + $0x124] sm:$0xf0] }
 0x104   :  { %v7867_v39 = vld [vmem:[#allocation9 + $0xe84] sm:$0xf]  ;;  %v6690_v52 = vor.u32 %v7803_v37, %v6687_v38  ;;  %3665 = vmatpush.bf16.msrb.mxu1 %v6402_v42  ;;  %v5798_v37 = vor.u32 %v7584_v30, %v5797_v29  ;;  %v6054_v38 = vor.u32 %v7648_v32, %v6053_v31  ;;  %v5765_v41 = vld [vmem:[#allocation9 + $0x548] sm:$0xf] }
 0x105   :  { %v6943_v40 = vld [vmem:[#allocation9 + $0xea0] sm:$0xf0]  ;;  %v7576_v42 = vld [vmem:[#allocation9 + $0x564] sm:$0xf0] }
 0x106   :  { %v7659_v43 = vld [vmem:[#allocation9 + $0x804] sm:$0xf]  ;;  %v6946_v53 = vor.u32 %v7867_v39, %v6943_v40  ;;  %3677 = vmatpush.bf16.msrb.mxu2 %v6690_v52  ;;  %v5477_v39 = vld [vmem:[#allocation9 + $0x308] sm:$0xf]  ;;  %v5766_v52 = vor.u32 %v7576_v42, %v5765_v41 }
 0x107   :  { %v6111_v46 = vld [vmem:[#allocation9 + $0x820] sm:$0xf0]  ;;  %v7504_v40 = vld [vmem:[#allocation9 + $0x324] sm:$0xf0] }
 0x108   :  { %v7723_v47 = vld [vmem:[#allocation9 + $0xa04] sm:$0xf]  ;;  %v6114_v61 = vor.u32 %v7659_v43, %v6111_v46  ;;  %3690 = vmatpush.bf16.msrb.mxu3 %v6946_v53  ;;  %v6021_v43 = vld [vmem:[#allocation9 + $0x748] sm:$0xf] }
 0x109   :  { %v6367_v48 = vld [vmem:[#allocation9 + $0xa20] sm:$0xf0]  ;;  %v7640_v46 = vld [vmem:[#allocation9 + $0x764] sm:$0xf0] }
 0x10a   :  { %v7795_v55 = vld [vmem:[#allocation9 + $0xc44] sm:$0xf]  ;;  %v6370_v62 = vor.u32 %v7723_v47, %v6367_v48  ;;  %3653 = vmatpush.bf16.msrb.mxu0 %v6114_v61  ;;  %v5222_v47 = vor.u32 %v7440_v36, %v5221_v35  ;;  %v5478_v48 = vor.u32 %v7504_v40, %v5477_v39  ;;  %v6022_v53 = vor.u32 %v7640_v46, %v6021_v43  ;;  %v5125_v11 = vld [vmem:[#allocation9 + $0x48] sm:$0xf] }
 0x10b   :  { %v6655_v58 = vld [vmem:[#allocation9 + $0xc60] sm:$0xf0]  ;;  %v5190_v61 = vor.u32 %v7432_v51, %v5189_v49  ;;  %v7416_v12 = vld [vmem:[#allocation9 + $0x64] sm:$0xf0] }
 0x10c   :  { %v7859_v59 = vld [vmem:[#allocation9 + $0xe44] sm:$0xf]  ;;  %v6658_v4 = vor.u32 %v7795_v55, %v6655_v58  ;;  %3666 = vmatpush.bf16.msrb.mxu1 %v6370_v62  ;;  %v5733_v55 = vld [vmem:[#allocation9 + $0x508] sm:$0xf]  ;;  %v5446_v62 = vor.u32 %v7496_v23, %v5445_v54 }
 0x10d   :  { %v6911_v60 = vld [vmem:[#allocation9 + $0xe60] sm:$0xf0]  ;;  %3654 = vmatmul.bf16.vlgmr.msrb.gmra.mxu0 %v8309_v25  ;;  %v7568_v58 = vld [vmem:[#allocation9 + $0x524] sm:$0xf0] }
 0x10e   :  { %v6914_v5 = vor.u32 %v7859_v59, %v6911_v60  ;;  %v7787_v7 = vld [vmem:[#allocation9 + $0xc04] sm:$0xf]  ;;  %3698 = vmatpush.bf16.msra.mxu0 %v5318_v63  ;;  %3678 = vmatpush.bf16.msrb.mxu2 %v6658_v4  ;;  %v5989_v59 = vld [vmem:[#allocation9 + $0x708] sm:$0xf]  ;;  %v5734_v1 = vor.u32 %v7568_v58, %v5733_v55 }
 0x10f   :  { %v6623_v8 = vld [vmem:[#allocation9 + $0xc20] sm:$0xf0]  ;;  %3667 = vmatmul.bf16.vlgmr.msrb.gmra.mxu1 %v8311_v26  ;;  %v7632_v60 = vld [vmem:[#allocation9 + $0x724] sm:$0xf0] }
 0x110   :  { %v7851_v9 = vld [vmem:[#allocation9 + $0xe04] sm:$0xf]  ;;  %3711 = vmatpush.bf16.msra.mxu1 %v5574_v0  ;;  %3691 = vmatpush.bf16.msrb.mxu3 %v6914_v5  ;;  %v6626_v18 = vor.u32 %v7787_v7, %v6623_v8  ;;  %v5157_v63 = vld [vmem:[#allocation9 + $0x88] sm:$0xf]  ;;  %v5990_v2 = vor.u32 %v7632_v60, %v5989_v59 }
 0x111   :  { %v6879_v10 = vld [vmem:[#allocation9 + $0xe20] sm:$0xf0]  ;;  %v7424_v0 = vld [vmem:[#allocation9 + $0xa4] sm:$0xf0] }
 0x112   :  { %v6882_v19 = vor.u32 %v7851_v9, %v6879_v10  ;;  %3699 = vmatpush.bf16.msra.mxu0 %v5286_v17  ;;  %3679 = vmatpush.bf16.msrb.mxu2 %v6626_v18  ;;  %v7488_v4 = vld [vmem:[#allocation9 + $0x2a4] sm:$0xf0]  ;;  %v5158_v9 = vor.u32 %v7424_v0, %v5157_v63 }
 0x113   :  { %v5701_v5 = vld [vmem:[#allocation9 + $0x4c8] sm:$0xf]  ;;  %v5414_v10 = vor.u32 %v7488_v4, %v5413_v3 }
 0x114   :  { %3712 = vmatpush.bf16.msra.mxu1 %v5542_v50  ;;  %3692 = vmatpush.bf16.msrb.mxu3 %v6882_v19  ;;  %v5957_v7 = vld [vmem:[#allocation9 + $0x6c8] sm:$0xf]  ;;  %v5702_v15 = vor.u32 %v7560_v6, %v5701_v5 }
 0x115   :  { %3680 = vmatmul.bf16.vlgmr.msrb.gmra.mxu2 %v8315_v56  ;;  %v7624_v8 = vld [vmem:[#allocation9 + $0x6e4] sm:$0xf0] }
 0x116   :  { %3724 = vmatpush.bf16.msra.mxu2 %v5830_v22  ;;  %3700 = vmatpush.bf16.msra.mxu0 %v5254_v33  ;;  %v5958_v16 = vor.u32 %v7624_v8, %v5957_v7  ;;  %v5381_v17 = vld [vmem:[#allocation9 + $0x248] sm:$0xf]  ;;  %v5126_v22 = vor.u32 %v7416_v12, %v5125_v11 }
 0x117   :  { %3693 = vmatmul.bf16.vlgmr.msrb.gmra.mxu3 %v8317_v57  ;;  %v7480_v50 = vld [vmem:[#allocation9 + $0x264] sm:$0xf0] }
 0x118   :  { %3737 = vmatpush.bf16.msra.mxu3 %v6086_v24  ;;  %3713 = vmatpush.bf16.msra.mxu1 %v5510_v34  ;;  %v5669_v18 = vld [vmem:[#allocation9 + $0x488] sm:$0xf]  ;;  %v5382_v24 = vor.u32 %v7480_v50, %v5381_v17 }
 0x119   :  { %v7552_v19 = vld [vmem:[#allocation9 + $0x4a4] sm:$0xf0] }
 0x11a   :  { %3725 = vmatpush.bf16.msra.mxu2 %v5798_v37  ;;  %3701 = vmatpush.bf16.msra.mxu0 %v5222_v47  ;;  %v5925_v20 = vld [vmem:[#allocation9 + $0x688] sm:$0xf]  ;;  %v5670_v30 = vor.u32 %v7552_v19, %v5669_v18 }
 0x11b   :  { %v7616_v21 = vld [vmem:[#allocation9 + $0x6a4] sm:$0xf0] }
 0x11c   :  { %3738 = vmatpush.bf16.msra.mxu3 %v6054_v38  ;;  %3714 = vmatpush.bf16.msra.mxu1 %v5478_v48  ;;  %v5093_v27 = vld [vmem:[#allocation9 + $0x8] sm:$0xf]  ;;  %v5926_v31 = vor.u32 %v7616_v21, %v5925_v20 }
 0x11d   :  { %v7408_v28 = vld [vmem:[#allocation9 + $0x24] sm:$0xf0] }
 0x11e   :  { %3726 = vmatpush.bf16.msra.mxu2 %v5766_v52  ;;  %3702 = vmatpush.bf16.msra.mxu0 %v5190_v61  ;;  %v5349_v29 = vld [vmem:[#allocation9 + $0x208] sm:$0xf]  ;;  %v5094_v41 = vor.u32 %v7408_v28, %v5093_v27 }
 0x11f   :  { %v7472_v32 = vld [vmem:[#allocation9 + $0x224] sm:$0xf0] }
 0x120   :  { %3739 = vmatpush.bf16.msra.mxu3 %v6022_v53  ;;  %3715 = vmatpush.bf16.msra.mxu1 %v5446_v62  ;;  %v6341_v33 = vld [vmem:[#allocation9 + $0x9c8] sm:$0xf]  ;;  %v5350_v42 = vor.u32 %v7472_v32, %v5349_v29 }
 0x121   :  { %v7720_v34 = vld [vmem:[#allocation9 + $0x9e4] sm:$0xf0] }
 0x122   :  { %3727 = vmatpush.bf16.msra.mxu2 %v5734_v1  ;;  %3703 = vmatpush.bf16.msra.mxu0 %v5158_v9  ;;  %v6597_v35 = vld [vmem:[#allocation9 + $0xbc8] sm:$0xf]  ;;  %v6342_v43 = vor.u32 %v7720_v34, %v6341_v33 }
 0x123   :  { %v7784_v36 = vld [vmem:[#allocation9 + $0xbe4] sm:$0xf0] }
 0x124   :  { %3740 = vmatpush.bf16.msra.mxu3 %v5990_v2  ;;  %3716 = vmatpush.bf16.msra.mxu1 %v5414_v10  ;;  %v5637_v37 = vld [vmem:[#allocation9 + $0x448] sm:$0xf]  ;;  %v6598_v46 = vor.u32 %v7784_v36, %v6597_v35 }
 0x125   :  { %v7544_v38 = vld [vmem:[#allocation9 + $0x464] sm:$0xf0] }
 0x126   :  { %3728 = vmatpush.bf16.msra.mxu2 %v5702_v15  ;;  %v5893_v39 = vld [vmem:[#allocation9 + $0x648] sm:$0xf]  ;;  %3704 = vmatpush.bf16.msra.mxu0 %v5126_v22  ;;  %v5638_v51 = vor.u32 %v7544_v38, %v5637_v37 }
 0x127   :  { %v7608_v40 = vld [vmem:[#allocation9 + $0x664] sm:$0xf0] }
 0x128   :  { %3741 = vmatpush.bf16.msra.mxu3 %v5958_v16  ;;  %3717 = vmatpush.bf16.msra.mxu1 %v5382_v24  ;;  %v6309_v47 = vld [vmem:[#allocation9 + $0x988] sm:$0xf]  ;;  %v5894_v52 = vor.u32 %v7608_v40, %v5893_v39 }
 0x129   :  { %v7712_v48 = vld [vmem:[#allocation9 + $0x9a4] sm:$0xf0] }
 0x12a   :  { %3729 = vmatpush.bf16.msra.mxu2 %v5670_v30  ;;  %v6565_v49 = vld [vmem:[#allocation9 + $0xb88] sm:$0xf]  ;;  %3705 = vmatpush.bf16.msra.mxu0 %v5094_v41  ;;  %v6310_v63 = vor.u32 %v7712_v48, %v6309_v47 }
 0x12b   :  { %v7776_v53 = vld [vmem:[#allocation9 + $0xba4] sm:$0xf0] }
 0x12c   :  { %3742 = vmatpush.bf16.msra.mxu3 %v5926_v31  ;;  %v5605_v54 = vld [vmem:[#allocation9 + $0x408] sm:$0xf]  ;;  %3718 = vmatpush.bf16.msra.mxu1 %v5350_v42  ;;  %v6566_v0 = vor.u32 %v7776_v53, %v6565_v49 }
 0x12d   :  { %v7536_v23 = vld [vmem:[#allocation9 + $0x424] sm:$0xf0]  ;;  %3706 = vmatmul.bf16.vlgmr.msra.gmra.mxu0 %v8293_v13 }
 0x12e   :  { %v5861_v55 = vld [vmem:[#allocation9 + $0x608] sm:$0xf]  ;;  %3750 = vmatpush.bf16.msrb.mxu0 %v6342_v43  ;;  %3730 = vmatpush.bf16.msra.mxu2 %v5638_v51  ;;  %v5606_v1 = vor.u32 %v7536_v23, %v5605_v54 }
 0x12f   :  { %v7600_v58 = vld [vmem:[#allocation9 + $0x624] sm:$0xf0]  ;;  %3719 = vmatmul.bf16.vlgmr.msra.gmra.mxu1 %v8295_v14 }
 0x130   :  { %v6853_v59 = vld [vmem:[#allocation9 + $0xdc8] sm:$0xf]  ;;  %3763 = vmatpush.bf16.msrb.mxu1 %v6598_v46  ;;  %3743 = vmatpush.bf16.msra.mxu3 %v5894_v52  ;;  %v5862_v2 = vor.u32 %v7600_v58, %v5861_v55 }
 0x131   :  { %v7848_v60 = vld [vmem:[#allocation9 + $0xde4] sm:$0xf0] }
 0x132   :  { %v7109_v61 = vld [vmem:[#allocation9 + $0xfc8] sm:$0xf]  ;;  %v6854_v5 = vor.u32 %v7848_v60, %v6853_v59  ;;  %3751 = vmatpush.bf16.msrb.mxu0 %v6310_v63  ;;  %3731 = vmatpush.bf16.msra.mxu2 %v5606_v1 }
 0x133   :  { %v7912_v62 = vld [vmem:[#allocation9 + $0xfe4] sm:$0xf0] }
 0x134   :  { %v6277_v3 = vld [vmem:[#allocation9 + $0x948] sm:$0xf]  ;;  %v7110_v6 = vor.u32 %v7912_v62, %v7109_v61  ;;  %3764 = vmatpush.bf16.msrb.mxu1 %v6566_v0  ;;  %3744 = vmatpush.bf16.msra.mxu3 %v5862_v2 }
 0x135   :  { %v7704_v4 = vld [vmem:[#allocation9 + $0x964] sm:$0xf0]  ;;  %3732 = vmatmul.bf16.vlgmr.msra.gmra.mxu2 %v8301_v44 }
 0x136   :  { %v6533_v7 = vld [vmem:[#allocation9 + $0xb48] sm:$0xf]  ;;  %v6278_v15 = vor.u32 %v7704_v4, %v6277_v3  ;;  %3776 = vmatpush.bf16.msrb.mxu2 %v6854_v5 }
 0x137   :  { %v7768_v8 = vld [vmem:[#allocation9 + $0xb64] sm:$0xf0]  ;;  %3745 = vmatmul.bf16.vlgmr.msra.gmra.mxu3 %v8303_v45 }
 0x138   :  { %v6821_v9 = vld [vmem:[#allocation9 + $0xd88] sm:$0xf]  ;;  %v6534_v16 = vor.u32 %v7768_v8, %v6533_v7  ;;  %3789 = vmatpush.bf16.msrb.mxu3 %v7110_v6  ;;  %3752 = vmatpush.bf16.msrb.mxu0 %v6278_v15  ;;  %v7460_v15 = vld [vmem:[#allocation9 + $0x1cc] sm:$0xf] }
 0x139   :  { %v7840_v10 = vld [vmem:[#allocation9 + $0xda4] sm:$0xf0] }
 0x13a   :  { %v7077_v11 = vld [vmem:[#allocation9 + $0xf88] sm:$0xf]  ;;  %v6822_v18 = vor.u32 %v7840_v10, %v6821_v9  ;;  %3765 = vmatpush.bf16.msrb.mxu1 %v6534_v16  ;;  %v5319_v16 = vld [vmem:[#allocation9 + $0x1e8] sm:$0xf0] }
 0x13b   :  { %v7904_v12 = vld [vmem:[#allocation9 + $0xfa4] sm:$0xf0] }
 0x13c   :  { %v6245_v17 = vld [vmem:[#allocation9 + $0x908] sm:$0xf]  ;;  %v7078_v19 = vor.u32 %v7904_v12, %v7077_v11  ;;  %3777 = vmatpush.bf16.msrb.mxu2 %v6822_v18 }
 0x13d   :  { %v7696_v50 = vld [vmem:[#allocation9 + $0x924] sm:$0xf0] }
 0x13e   :  { %v6501_v20 = vld [vmem:[#allocation9 + $0xb08] sm:$0xf]  ;;  %v6246_v29 = vor.u32 %v7696_v50, %v6245_v17  ;;  %3790 = vmatpush.bf16.msrb.mxu3 %v7078_v19  ;;  %v7524_v17 = vld [vmem:[#allocation9 + $0x3cc] sm:$0xf] }
 0x13f   :  { %v7760_v21 = vld [vmem:[#allocation9 + $0xb24] sm:$0xf0]  ;;  %v5575_v50 = vld [vmem:[#allocation9 + $0x3e8] sm:$0xf0] }
 0x140   :  { %v6789_v22 = vld [vmem:[#allocation9 + $0xd48] sm:$0xf]  ;;  %v6502_v30 = vor.u32 %v7760_v21, %v6501_v20  ;;  %3753 = vmatpush.bf16.msrb.mxu0 %v6246_v29  ;;  %v5578_v29 = vor.u32 %v7524_v17, %v5575_v50 }
 0x141   :  { %v7832_v24 = vld [vmem:[#allocation9 + $0xd64] sm:$0xf0] }
 0x142   :  { %v7045_v27 = vld [vmem:[#allocation9 + $0xf48] sm:$0xf]  ;;  %v6790_v33 = vor.u32 %v7832_v24, %v6789_v22  ;;  %3766 = vmatpush.bf16.msrb.mxu1 %v6502_v30  ;;  %v5287_v30 = vld [vmem:[#allocation9 + $0x1a8] sm:$0xf0] }
 0x143   :  { %v7896_v28 = vld [vmem:[#allocation9 + $0xf64] sm:$0xf0] }
 0x144   :  { %v6213_v31 = vld [vmem:[#allocation9 + $0x8c8] sm:$0xf]  ;;  %v7046_v34 = vor.u32 %v7896_v28, %v7045_v27  ;;  %3778 = vmatpush.bf16.msrb.mxu2 %v6790_v33  ;;  %v7452_v27 = vld [vmem:[#allocation9 + $0x18c] sm:$0xf]  ;;  %v5322_v28 = vor.u32 %v7460_v15, %v5319_v16 }
 0x145   :  { %v7688_v32 = vld [vmem:[#allocation9 + $0x8e4] sm:$0xf0]  ;;  %v6023_v15 = vld [vmem:[#allocation9 + $0x768] sm:$0xf0] }
 0x146   :  { %v6469_v35 = vld [vmem:[#allocation9 + $0xac8] sm:$0xf]  ;;  %v6214_v41 = vor.u32 %v7688_v32, %v6213_v31  ;;  %3791 = vmatpush.bf16.msrb.mxu3 %v7046_v34  ;;  %v7516_v31 = vld [vmem:[#allocation9 + $0x38c] sm:$0xf] }
 0x147   :  { %v7752_v36 = vld [vmem:[#allocation9 + $0xae4] sm:$0xf0]  ;;  %v5543_v32 = vld [vmem:[#allocation9 + $0x3a8] sm:$0xf0] }
 0x148   :  { %v6757_v37 = vld [vmem:[#allocation9 + $0xd08] sm:$0xf]  ;;  %v6470_v42 = vor.u32 %v7752_v36, %v6469_v35  ;;  %3754 = vmatpush.bf16.msrb.mxu0 %v6214_v41  ;;  %v7652_v41 = vld [vmem:[#allocation9 + $0x7cc] sm:$0xf] }
 0x149   :  { %v7824_v38 = vld [vmem:[#allocation9 + $0xd24] sm:$0xf0] }
 0x14a   :  { %v7013_v39 = vld [vmem:[#allocation9 + $0xf08] sm:$0xf]  ;;  %v6758_v47 = vor.u32 %v7824_v38, %v6757_v37  ;;  %3767 = vmatpush.bf16.msrb.mxu1 %v6470_v42  ;;  %v6087_v42 = vld [vmem:[#allocation9 + $0x7e8] sm:$0xf0] }
 0x14b   :  { %v7888_v40 = vld [vmem:[#allocation9 + $0xf24] sm:$0xf0] }
 0x14c   :  { %v6181_v43 = vld [vmem:[#allocation9 + $0x888] sm:$0xf]  ;;  %v7014_v48 = vor.u32 %v7888_v40, %v7013_v39  ;;  %3779 = vmatpush.bf16.msrb.mxu2 %v6758_v47  ;;  %v7588_v39 = vld [vmem:[#allocation9 + $0x5cc] sm:$0xf]  ;;  %v5546_v47 = vor.u32 %v7516_v31, %v5543_v32 }
 0x14d   :  { %v7680_v46 = vld [vmem:[#allocation9 + $0x8a4] sm:$0xf0]  ;;  %v5831_v40 = vld [vmem:[#allocation9 + $0x5e8] sm:$0xf0] }
 0x14e   :  { %v6437_v49 = vld [vmem:[#allocation9 + $0xa88] sm:$0xf]  ;;  %v6182_v55 = vor.u32 %v7680_v46, %v6181_v43  ;;  %3792 = vmatpush.bf16.msrb.mxu3 %v7014_v48  ;;  %v8333_v43 = vld [vmem:[#allocation11] sm:$0xff]  ;;  %v5290_v46 = vor.u32 %v7452_v27, %v5287_v30  ;;  %v7564_v27 = vld [vmem:[#allocation9 + $0x50c] sm:$0xf] }
 0x14f   :  { %v7744_v51 = vld [vmem:[#allocation9 + $0xaa4] sm:$0xf0]  ;;  %v5991_v30 = vld [vmem:[#allocation9 + $0x728] sm:$0xf0] }
 0x150   :  { %v6725_v52 = vld [vmem:[#allocation9 + $0xcc8] sm:$0xf]  ;;  %v6438_v58 = vor.u32 %v7744_v51, %v6437_v49  ;;  %3755 = vmatpush.bf16.msrb.mxu0 %v6182_v55  ;;  %v7444_v51 = vld [vmem:[#allocation9 + $0x14c] sm:$0xf] }
 0x151   :  { %v7816_v53 = vld [vmem:[#allocation9 + $0xce4] sm:$0xf0]  ;;  %v5511_v55 = vld [vmem:[#allocation9 + $0x368] sm:$0xf0] }
 0x152   :  { %v6981_v54 = vld [vmem:[#allocation9 + $0xec8] sm:$0xf]  ;;  %v6726_v61 = vor.u32 %v7816_v53, %v6725_v52  ;;  %3768 = vmatpush.bf16.msrb.mxu1 %v6438_v58  ;;  %v5255_v52 = vld [vmem:[#allocation9 + $0x168] sm:$0xf0]  ;;  %v886_v58 = vperm.slane %v8333_v43, 0 }
 0x153   :  { %v7880_v23 = vld [vmem:[#allocation9 + $0xee4] sm:$0xf0]  ;;  %v7508_v53 = vld [vmem:[#allocation9 + $0x34c] sm:$0xf] }
 0x154   :  { %v6149_v59 = vld [vmem:[#allocation9 + $0x848] sm:$0xf]  ;;  %v6982_v62 = vor.u32 %v7880_v23, %v6981_v54  ;;  %3780 = vmatpush.bf16.msrb.mxu2 %v6726_v61  ;;  %v5834_v54 = vor.u32 %v7588_v39, %v5831_v40  ;;  %v6090_v23 = vor.u32 %v7652_v41, %v6087_v42  ;;  %v7644_v61 = vld [vmem:[#allocation9 + $0x78c] sm:$0xf] }
 0x155   :  { %v7672_v60 = vld [vmem:[#allocation9 + $0x864] sm:$0xf0]  ;;  %v7484_v39 = vld [vmem:[#allocation9 + $0x28c] sm:$0xf] }
 0x156   :  { %v6405_v63 = vld [vmem:[#allocation9 + $0xa48] sm:$0xf]  ;;  %v6150_v5 = vor.u32 %v7672_v60, %v6149_v59  ;;  %3793 = vmatpush.bf16.msrb.mxu3 %v6982_v62  ;;  %v7580_v59 = vld [vmem:[#allocation9 + $0x58c] sm:$0xf] }
 0x157   :  { %v7736_v0 = vld [vmem:[#allocation9 + $0xa64] sm:$0xf0]  ;;  %v5799_v60 = vld [vmem:[#allocation9 + $0x5a8] sm:$0xf0] }
 0x158   :  { %v6693_v1 = vld [vmem:[#allocation9 + $0xc88] sm:$0xf]  ;;  %v6406_v6 = vor.u32 %v7736_v0, %v6405_v63  ;;  %3756 = vmatpush.bf16.msrb.mxu0 %v6150_v5  ;;  %v6055_v62 = vld [vmem:[#allocation9 + $0x7a8] sm:$0xf0]  ;;  %v5258_v63 = vor.u32 %v7444_v51, %v5255_v52  ;;  %v5514_v0 = vor.u32 %v7508_v53, %v5511_v55  ;;  %v3525_v53 = vpop.f32.mrf.mxu2 }
 0x159   :  { %v7808_v2 = vld [vmem:[#allocation9 + $0xca4] sm:$0xf0]  ;;  %v5415_v40 = vld [vmem:[#allocation9 + $0x2a8] sm:$0xf0] }
 0x15a   :  { %v6949_v3 = vld [vmem:[#allocation9 + $0xe88] sm:$0xf]  ;;  %v6694_v10 = vor.u32 %v7808_v2, %v6693_v1  ;;  %3769 = vmatpush.bf16.msrb.mxu1 %v6406_v6  ;;  %v3499_v1 = vpop.f32.mrf.mxu0  ;;  %v3512_v2 = vpop.f32.mrf.mxu1  ;;  %v5802_v6 = vor.u32 %v7580_v59, %v5799_v60  ;;  %v7556_v41 = vld [vmem:[#allocation9 + $0x4cc] sm:$0xf] }
 0x15b   :  { %v7872_v4 = vld [vmem:[#allocation9 + $0xea4] sm:$0xf0]  ;;  %v3500_v5 = vadd.f32 %v3499_v1, %v886_v58  ;;  %v5703_v42 = vld [vmem:[#allocation9 + $0x4e8] sm:$0xf0] }
 0x15c   :  { %v6117_v7 = vld [vmem:[#allocation9 + $0x808] sm:$0xf]  ;;  %v6950_v11 = vor.u32 %v7872_v4, %v6949_v3  ;;  %3781 = vmatpush.bf16.msrb.mxu2 %v6694_v10  ;;  %v7436_v3 = vld [vmem:[#allocation9 + $0x10c] sm:$0xf] }
 0x15d   :  { %v7664_v8 = vld [vmem:[#allocation9 + $0x824] sm:$0xf0]  ;;  %v5223_v4 = vld [vmem:[#allocation9 + $0x128] sm:$0xf0]  ;;  %v3513_v16 = vadd.f32 %v3512_v2, %v3500_v5 }
 0x15e   :  { %v6373_v9 = vld [vmem:[#allocation9 + $0xa08] sm:$0xf]  ;;  %v6118_v22 = vor.u32 %v7664_v8, %v6117_v7  ;;  %3794 = vmatpush.bf16.msrb.mxu3 %v6950_v11  ;;  %v6058_v7 = vor.u32 %v7644_v61, %v6055_v62  ;;  %v7500_v8 = vld [vmem:[#allocation9 + $0x30c] sm:$0xf]  ;;  %v5226_v17 = vor.u32 %v7436_v3, %v5223_v4 }
 0x15f   :  { %v7728_v12 = vld [vmem:[#allocation9 + $0xa24] sm:$0xf0]  ;;  %v7572_v10 = vld [vmem:[#allocation9 + $0x54c] sm:$0xf]  ;;  %v3526_v61 = vadd.f32 %v3525_v53, %v3513_v16 }
 0x160   :  { %v6661_v18 = vld [vmem:[#allocation9 + $0xc48] sm:$0xf]  ;;  %v6374_v24 = vor.u32 %v7728_v12, %v6373_v9  ;;  %3757 = vmatpush.bf16.msrb.mxu0 %v6118_v22  ;;  %v5479_v9 = vld [vmem:[#allocation9 + $0x328] sm:$0xf0] }
 0x161   :  { %v7800_v19 = vld [vmem:[#allocation9 + $0xc64] sm:$0xf0]  ;;  %v5767_v11 = vld [vmem:[#allocation9 + $0x568] sm:$0xf0]  ;;  %v5482_v50 = vor.u32 %v7500_v8, %v5479_v9 }
 0x162   :  { %v6917_v20 = vld [vmem:[#allocation9 + $0xe48] sm:$0xf]  ;;  %v6662_v33 = vor.u32 %v7800_v19, %v6661_v18  ;;  %3770 = vmatpush.bf16.msrb.mxu1 %v6374_v24  ;;  %v7636_v12 = vld [vmem:[#allocation9 + $0x74c] sm:$0xf] }
 0x163   :  { %v7864_v21 = vld [vmem:[#allocation9 + $0xe64] sm:$0xf0]  ;;  %3758 = vmatmul.bf16.vlgmr.msrb.gmra.mxu0 %v8309_v25  ;;  %v7428_v18 = vld [vmem:[#allocation9 + $0xcc] sm:$0xf] }
 0x164   :  { %v6918_v34 = vor.u32 %v7864_v21, %v6917_v20  ;;  %v6629_v35 = vld [vmem:[#allocation9 + $0xc08] sm:$0xf]  ;;  %3802 = vmatpush.bf16.msra.mxu0 %v5322_v28  ;;  %3782 = vmatpush.bf16.msrb.mxu2 %v6662_v33  ;;  %v5191_v19 = vld [vmem:[#allocation9 + $0xe8] sm:$0xf0]  ;;  %v5770_v20 = vor.u32 %v7572_v10, %v5767_v11  ;;  %v6026_v21 = vor.u32 %v7636_v12, %v6023_v15  ;;  %v3501_v33 = vpop.f32.mrf.mxu0 }
 0x165   :  { %v7792_v36 = vld [vmem:[#allocation9 + $0xc24] sm:$0xf0]  ;;  %3771 = vmatmul.bf16.vlgmr.msrb.gmra.mxu1 %v8311_v26  ;;  %v7492_v22 = vld [vmem:[#allocation9 + $0x2cc] sm:$0xf]  ;;  %v5194_v31 = vor.u32 %v7428_v18, %v5191_v19 }
 0x166   :  { %v6885_v37 = vld [vmem:[#allocation9 + $0xe08] sm:$0xf]  ;;  %3815 = vmatpush.bf16.msra.mxu1 %v5578_v29  ;;  %3795 = vmatpush.bf16.msrb.mxu3 %v6918_v34  ;;  %v6630_v48 = vor.u32 %v7792_v36, %v6629_v35  ;;  %v5447_v24 = vld [vmem:[#allocation9 + $0x2e8] sm:$0xf0]  ;;  %v3514_v34 = vpop.f32.mrf.mxu1 }
 0x167   :  { %v7856_v38 = vld [vmem:[#allocation9 + $0xe24] sm:$0xf0]  ;;  %v5735_v28 = vld [vmem:[#allocation9 + $0x528] sm:$0xf0]  ;;  %v5450_v32 = vor.u32 %v7492_v22, %v5447_v24 }
 0x168   :  { %v6886_v49 = vor.u32 %v7856_v38, %v6885_v37  ;;  %3803 = vmatpush.bf16.msra.mxu0 %v5290_v46  ;;  %3783 = vmatpush.bf16.msrb.mxu2 %v6630_v48  ;;  %v7628_v29 = vld [vmem:[#allocation9 + $0x70c] sm:$0xf]  ;;  %v5738_v37 = vor.u32 %v7564_v27, %v5735_v28  ;;  %v3527_v28 = vpop.f32.mrf.mxu2 }
 0x169   :  { %v7420_v35 = vld [vmem:[#allocation9 + $0x8c] sm:$0xf]  ;;  %v5994_v38 = vor.u32 %v7628_v29, %v5991_v30 }
 0x16a   :  { %3816 = vmatpush.bf16.msra.mxu1 %v5546_v47  ;;  %3796 = vmatpush.bf16.msrb.mxu3 %v6886_v49  ;;  %v5159_v36 = vld [vmem:[#allocation9 + $0xa8] sm:$0xf0]  ;;  %v5418_v49 = vor.u32 %v7484_v39, %v5415_v40 }
 0x16b   :  { %3784 = vmatmul.bf16.vlgmr.msrb.gmra.mxu2 %v8315_v56  ;;  %v7620_v46 = vld [vmem:[#allocation9 + $0x6cc] sm:$0xf]  ;;  %v5162_v48 = vor.u32 %v7420_v35, %v5159_v36 }
 0x16c   :  { %3828 = vmatpush.bf16.msra.mxu2 %v5834_v54  ;;  %3804 = vmatpush.bf16.msra.mxu0 %v5258_v63  ;;  %v5959_v47 = vld [vmem:[#allocation9 + $0x6e8] sm:$0xf0]  ;;  %v3538_v54 = vpop.f32.mrf.mxu3 }
 0x16d   :  { %3797 = vmatmul.bf16.vlgmr.msrb.gmra.mxu3 %v8317_v57  ;;  %v7412_v51 = vld [vmem:[#allocation9 + $0x4c] sm:$0xf]  ;;  %v5962_v55 = vor.u32 %v7620_v46, %v5959_v47  ;;  %v3539_v1 = vadd.f32 %v3538_v54, %v3526_v61 }
 0x16e   :  { %3841 = vmatpush.bf16.msra.mxu3 %v6090_v23  ;;  %3817 = vmatpush.bf16.msra.mxu1 %v5514_v0  ;;  %v5127_v52 = vld [vmem:[#allocation9 + $0x68] sm:$0xf0]  ;;  %v5706_v23 = vor.u32 %v7556_v41, %v5703_v42  ;;  %v3564_v8 = vpop.f32.mrf.mxu1 }
 0x16f   :  { %v7476_v58 = vld [vmem:[#allocation9 + $0x24c] sm:$0xf]  ;;  %v5130_v2 = vor.u32 %v7412_v51, %v5127_v52 }
 0x170   :  { %3829 = vmatpush.bf16.msra.mxu2 %v5802_v6  ;;  %3805 = vmatpush.bf16.msra.mxu0 %v5226_v17  ;;  %v5383_v59 = vld [vmem:[#allocation9 + $0x268] sm:$0xf0] }
 0x171   :  { %v7548_v60 = vld [vmem:[#allocation9 + $0x48c] sm:$0xf]  ;;  %v5386_v3 = vor.u32 %v7476_v58, %v5383_v59 }
 0x172   :  { %3842 = vmatpush.bf16.msra.mxu3 %v6058_v7  ;;  %3818 = vmatpush.bf16.msra.mxu1 %v5482_v50  ;;  %v5671_v62 = vld [vmem:[#allocation9 + $0x4a8] sm:$0xf0]  ;;  %v3551_v7 = vpop.f32.mrf.mxu0 }
 0x173   :  { %v7612_v63 = vld [vmem:[#allocation9 + $0x68c] sm:$0xf]  ;;  %v5674_v9 = vor.u32 %v7548_v60, %v5671_v62  ;;  %v3552_v16 = vadd.f32 %v3551_v7, %v3539_v1 }
 0x174   :  { %3830 = vmatpush.bf16.msra.mxu2 %v5770_v20  ;;  %3806 = vmatpush.bf16.msra.mxu0 %v5194_v31  ;;  %v5927_v0 = vld [vmem:[#allocation9 + $0x6a8] sm:$0xf0]  ;;  %v3540_v29 = vpop.f32.mrf.mxu3 }
 0x175   :  { %v7404_v4 = vld [vmem:[#allocation9 + $0xc] sm:$0xf]  ;;  %v5930_v10 = vor.u32 %v7612_v63, %v5927_v0  ;;  %v3565_v22 = vadd.f32 %v3564_v8, %v3552_v16  ;;  %v887_v8 = vperm.slane %v8333_v43, 1 }
 0x176   :  { %3843 = vmatpush.bf16.msra.mxu3 %v6026_v21  ;;  %3819 = vmatpush.bf16.msra.mxu1 %v5450_v32  ;;  %v5095_v5 = vld [vmem:[#allocation9 + $0x28] sm:$0xf0]  ;;  %v3566_v51 = vpop.f32.mrf.mxu1 }
 0x177   :  { %v7468_v6 = vld [vmem:[#allocation9 + $0x20c] sm:$0xf]  ;;  %v5098_v24 = vor.u32 %v7404_v4, %v5095_v5 }
 0x178   :  { %3831 = vmatpush.bf16.msra.mxu2 %v5738_v37  ;;  %3807 = vmatpush.bf16.msra.mxu0 %v5162_v48  ;;  %v5351_v11 = vld [vmem:[#allocation9 + $0x228] sm:$0xf0] }
 0x179   :  { %v7716_v12 = vld [vmem:[#allocation9 + $0x9cc] sm:$0xf]  ;;  %v5354_v27 = vor.u32 %v7468_v6, %v5351_v11 }
 0x17a   :  { %3844 = vmatpush.bf16.msra.mxu3 %v5994_v38  ;;  %3820 = vmatpush.bf16.msra.mxu1 %v5418_v49  ;;  %v6343_v15 = vld [vmem:[#allocation9 + $0x9e8] sm:$0xf0]  ;;  %v3553_v49 = vpop.f32.mrf.mxu0 }
 0x17b   :  { %v7780_v17 = vld [vmem:[#allocation9 + $0xbcc] sm:$0xf]  ;;  %v6346_v30 = vor.u32 %v7716_v12, %v6343_v15 }
 0x17c   :  { %3832 = vmatpush.bf16.msra.mxu2 %v5706_v23  ;;  %v6599_v50 = vld [vmem:[#allocation9 + $0xbe8] sm:$0xf0]  ;;  %3808 = vmatpush.bf16.msra.mxu0 %v5130_v2  ;;  %v3590_v4 = vpop.f32.mrf.mxu3 }
 0x17d   :  { %v7540_v18 = vld [vmem:[#allocation9 + $0x44c] sm:$0xf]  ;;  %v6602_v31 = vor.u32 %v7780_v17, %v6599_v50 }
 0x17e   :  { %3845 = vmatpush.bf16.msra.mxu3 %v5962_v55  ;;  %v5639_v19 = vld [vmem:[#allocation9 + $0x468] sm:$0xf0]  ;;  %3821 = vmatpush.bf16.msra.mxu1 %v5386_v3  ;;  %v3577_v3 = vpop.f32.mrf.mxu2 }
 0x17f   :  { %v7604_v20 = vld [vmem:[#allocation9 + $0x64c] sm:$0xf]  ;;  %v5642_v35 = vor.u32 %v7540_v18, %v5639_v19  ;;  %v3578_v5 = vadd.f32 %v3577_v3, %v3565_v22  ;;  %v3616_v22 = vpop.f32.mrf.mxu1 }
 0x180   :  { %v5895_v21 = vld [vmem:[#allocation9 + $0x668] sm:$0xf0]  ;;  %3833 = vmatpush.bf16.msra.mxu2 %v5674_v9  ;;  %3809 = vmatpush.bf16.msra.mxu0 %v5098_v24 }
 0x181   :  { %v7708_v32 = vld [vmem:[#allocation9 + $0x98c] sm:$0xf]  ;;  %v5898_v36 = vor.u32 %v7604_v20, %v5895_v21  ;;  %v8343_v50 = vadd.f32 %v3590_v4, %v3578_v5 }
 0x182   :  { %3846 = vmatpush.bf16.msra.mxu3 %v5930_v10  ;;  %v6311_v33 = vld [vmem:[#allocation9 + $0x9a8] sm:$0xf0]  ;;  %3822 = vmatpush.bf16.msra.mxu1 %v5354_v27  ;;  %v3603_v21 = vpop.f32.mrf.mxu0 }
 0x183   :  { %v7772_v34 = vld [vmem:[#allocation9 + $0xb8c] sm:$0xf]  ;;  %v6314_v52 = vor.u32 %v7708_v32, %v6311_v33  ;;  %3810 = vmatmul.bf16.vlgmr.msra.gmra.mxu0 %v8293_v13  ;;  %v3604_v24 = vadd.f32 %v3603_v21, %v887_v8 }
 0x184   :  { %v6567_v37 = vld [vmem:[#allocation9 + $0xba8] sm:$0xf0]  ;;  %3854 = vmatpush.bf16.msrb.mxu0 %v6346_v30  ;;  %3834 = vmatpush.bf16.msra.mxu2 %v5642_v35 }
 0x185   :  { %v7532_v38 = vld [vmem:[#allocation9 + $0x40c] sm:$0xf]  ;;  %v6570_v53 = vor.u32 %v7772_v34, %v6567_v37  ;;  %3823 = vmatmul.bf16.vlgmr.msra.gmra.mxu1 %v8295_v14 }
 0x186   :  { %v5607_v39 = vld [vmem:[#allocation9 + $0x428] sm:$0xf0]  ;;  %3867 = vmatpush.bf16.msrb.mxu1 %v6602_v31  ;;  %3847 = vmatpush.bf16.msra.mxu3 %v5898_v36  ;;  %v3617_v36 = vadd.f32 %v3616_v22, %v3604_v24  ;;  %v5325_v22 = vld [vmem:[#allocation9 + $0x1d0] sm:$0xf] }
 0x187   :  { %v7596_v40 = vld [vmem:[#allocation9 + $0x60c] sm:$0xf]  ;;  %v5610_v54 = vor.u32 %v7532_v38, %v5607_v39  ;;  %v7465_v24 = vld [vmem:[#allocation9 + $0x1ec] sm:$0xf0] }
 0x188   :  { %v5863_v41 = vld [vmem:[#allocation9 + $0x628] sm:$0xf0]  ;;  %3855 = vmatpush.bf16.msrb.mxu0 %v6314_v52 }
 0x189   :  { %v7844_v42 = vld [vmem:[#allocation9 + $0xdcc] sm:$0xf]  ;;  %v5866_v23 = vor.u32 %v7596_v40, %v5863_v41  ;;  %3835 = vmatpush.bf16.msra.mxu2 %v5610_v54  ;;  %v3579_v40 = vpop.f32.mrf.mxu2  ;;  %v3592_v41 = vpop.f32.mrf.mxu3 }
 0x18a   :  { %v6855_v46 = vld [vmem:[#allocation9 + $0xde8] sm:$0xf0]  ;;  %3868 = vmatpush.bf16.msrb.mxu1 %v6570_v53  ;;  %v5549_v40 = vld [vmem:[#allocation9 + $0x390] sm:$0xf] }
 0x18b   :  { %v7908_v47 = vld [vmem:[#allocation9 + $0xfcc] sm:$0xf]  ;;  %v6858_v59 = vor.u32 %v7844_v42, %v6855_v46  ;;  %3848 = vmatpush.bf16.msra.mxu3 %v5866_v23 }
 0x18c   :  { %v7111_v48 = vld [vmem:[#allocation9 + $0xfe8] sm:$0xf0]  ;;  %3836 = vmatmul.bf16.vlgmr.msra.gmra.mxu2 %v8301_v44 }
 0x18d   :  { %v7700_v55 = vld [vmem:[#allocation9 + $0x94c] sm:$0xf]  ;;  %v7114_v60 = vor.u32 %v7908_v47, %v7111_v48  ;;  %3880 = vmatpush.bf16.msrb.mxu2 %v6858_v59  ;;  %v3605_v59 = vpop.f32.mrf.mxu0 }
 0x18e   :  { %v6279_v58 = vld [vmem:[#allocation9 + $0x968] sm:$0xf0]  ;;  %3849 = vmatmul.bf16.vlgmr.msra.gmra.mxu3 %v8303_v45 }
 0x18f   :  { %v7764_v61 = vld [vmem:[#allocation9 + $0xb4c] sm:$0xf]  ;;  %v6282_v6 = vor.u32 %v7700_v55, %v6279_v58  ;;  %3893 = vmatpush.bf16.msrb.mxu3 %v7114_v60  ;;  %v3618_v60 = vpop.f32.mrf.mxu1 }
 0x190   :  { %v6535_v62 = vld [vmem:[#allocation9 + $0xb68] sm:$0xf0] }
 0x191   :  { %v7836_v63 = vld [vmem:[#allocation9 + $0xd8c] sm:$0xf]  ;;  %v6538_v7 = vor.u32 %v7764_v61, %v6535_v62  ;;  %3856 = vmatpush.bf16.msrb.mxu0 %v6282_v6 }
 0x192   :  { %v6823_v0 = vld [vmem:[#allocation9 + $0xda8] sm:$0xf0] }
 0x193   :  { %v7900_v1 = vld [vmem:[#allocation9 + $0xf8c] sm:$0xf]  ;;  %v6826_v11 = vor.u32 %v7836_v63, %v6823_v0  ;;  %3869 = vmatpush.bf16.msrb.mxu1 %v6538_v7 }
 0x194   :  { %v7079_v2 = vld [vmem:[#allocation9 + $0xfa8] sm:$0xf0] }
 0x195   :  { %v7692_v9 = vld [vmem:[#allocation9 + $0x90c] sm:$0xf]  ;;  %v7082_v12 = vor.u32 %v7900_v1, %v7079_v2  ;;  %3881 = vmatpush.bf16.msrb.mxu2 %v6826_v11 }
 0x196   :  { %v6247_v10 = vld [vmem:[#allocation9 + $0x928] sm:$0xf0] }
 0x197   :  { %v7756_v15 = vld [vmem:[#allocation9 + $0xb0c] sm:$0xf]  ;;  %v6250_v27 = vor.u32 %v7692_v9, %v6247_v10  ;;  %3894 = vmatpush.bf16.msrb.mxu3 %v7082_v12  ;;  %v3629_v9 = vpop.f32.mrf.mxu2  ;;  %v3642_v10 = vpop.f32.mrf.mxu3 }
 0x198   :  { %v6503_v16 = vld [vmem:[#allocation9 + $0xb28] sm:$0xf0] }
 0x199   :  { %v7828_v17 = vld [vmem:[#allocation9 + $0xd4c] sm:$0xf]  ;;  %v6506_v28 = vor.u32 %v7756_v15, %v6503_v16  ;;  %3857 = vmatpush.bf16.msrb.mxu0 %v6250_v27  ;;  %v5581_v27 = vld [vmem:[#allocation9 + $0x3d0] sm:$0xf] }
 0x19a   :  { %v6791_v18 = vld [vmem:[#allocation9 + $0xd68] sm:$0xf0] }
 0x19b   :  { %v7892_v19 = vld [vmem:[#allocation9 + $0xf4c] sm:$0xf]  ;;  %v6794_v31 = vor.u32 %v7828_v17, %v6791_v18  ;;  %3870 = vmatpush.bf16.msrb.mxu1 %v6506_v28  ;;  %v3630_v18 = vadd.f32 %v3629_v9, %v3617_v36  ;;  %v7529_v28 = vld [vmem:[#allocation9 + $0x3ec] sm:$0xf0]  ;;  %v5326_v36 = vor.u32 %v7465_v24, %v5325_v22 }
 0x19c   :  { %v7047_v20 = vld [vmem:[#allocation9 + $0xf68] sm:$0xf0]  ;;  %v7577_v22 = vld [vmem:[#allocation9 + $0x56c] sm:$0xf0] }
 0x19d   :  { %v7684_v29 = vld [vmem:[#allocation9 + $0x8cc] sm:$0xf]  ;;  %v7050_v32 = vor.u32 %v7892_v19, %v7047_v20  ;;  %3882 = vmatpush.bf16.msrb.mxu2 %v6794_v31  ;;  %v6029_v24 = vld [vmem:[#allocation9 + $0x750] sm:$0xf] }
 0x19e   :  { %v6215_v30 = vld [vmem:[#allocation9 + $0x8e8] sm:$0xf0] }
 0x19f   :  { %v7748_v33 = vld [vmem:[#allocation9 + $0xacc] sm:$0xf]  ;;  %v6218_v42 = vor.u32 %v7684_v29, %v6215_v30  ;;  %3895 = vmatpush.bf16.msrb.mxu3 %v7050_v32  ;;  %v8347_v30 = vadd.f32 %v3642_v10, %v3630_v18  ;;  %v7505_v18 = vld [vmem:[#allocation9 + $0x32c] sm:$0xf0] }
 0x1a0   :  { %v6471_v34 = vld [vmem:[#allocation9 + $0xae8] sm:$0xf0] }
 0x1a1   :  { %v7820_v35 = vld [vmem:[#allocation9 + $0xd0c] sm:$0xf]  ;;  %v6474_v46 = vor.u32 %v7748_v33, %v6471_v34  ;;  %3858 = vmatpush.bf16.msrb.mxu0 %v6218_v42 }
 0x1a2   :  { %v6759_v37 = vld [vmem:[#allocation9 + $0xd28] sm:$0xf0] }
 0x1a3   :  { %v7884_v38 = vld [vmem:[#allocation9 + $0xf0c] sm:$0xf]  ;;  %v6762_v49 = vor.u32 %v7820_v35, %v6759_v37  ;;  %3871 = vmatpush.bf16.msrb.mxu1 %v6474_v46  ;;  %v5582_v37 = vor.u32 %v7529_v28, %v5581_v27  ;;  %v7521_v46 = vld [vmem:[#allocation9 + $0x3ac] sm:$0xf0] }
 0x1a4   :  { %v7015_v39 = vld [vmem:[#allocation9 + $0xf28] sm:$0xf0]  ;;  %v5550_v60 = vor.u32 %v7521_v46, %v5549_v40  ;;  %v7641_v27 = vld [vmem:[#allocation9 + $0x76c] sm:$0xf0] }
 0x1a5   :  { %v7676_v47 = vld [vmem:[#allocation9 + $0x88c] sm:$0xf]  ;;  %v7018_v51 = vor.u32 %v7884_v38, %v7015_v39  ;;  %3883 = vmatpush.bf16.msrb.mxu2 %v6762_v49  ;;  %v5293_v38 = vld [vmem:[#allocation9 + $0x190] sm:$0xf] }
 0x1a6   :  { %v6183_v48 = vld [vmem:[#allocation9 + $0x8a8] sm:$0xf0]  ;;  %v7457_v39 = vld [vmem:[#allocation9 + $0x1ac] sm:$0xf0] }
 0x1a7   :  { %v7740_v52 = vld [vmem:[#allocation9 + $0xa8c] sm:$0xf]  ;;  %v6186_v61 = vor.u32 %v7676_v47, %v6183_v48  ;;  %3896 = vmatpush.bf16.msrb.mxu3 %v7018_v51  ;;  %v5294_v59 = vor.u32 %v7457_v39, %v5293_v38  ;;  %v7497_v38 = vld [vmem:[#allocation9 + $0x2ec] sm:$0xf0] }
 0x1a8   :  { %v6439_v53 = vld [vmem:[#allocation9 + $0xaa8] sm:$0xf0]  ;;  %v5741_v39 = vld [vmem:[#allocation9 + $0x510] sm:$0xf] }
 0x1a9   :  { %v7812_v54 = vld [vmem:[#allocation9 + $0xccc] sm:$0xf]  ;;  %v6442_v62 = vor.u32 %v7740_v52, %v6439_v53  ;;  %3859 = vmatpush.bf16.msrb.mxu0 %v6186_v61  ;;  %v5837_v52 = vld [vmem:[#allocation9 + $0x5d0] sm:$0xf]  ;;  %v3631_v53 = vpop.f32.mrf.mxu2 }
 0x1aa   :  { %v6727_v23 = vld [vmem:[#allocation9 + $0xce8] sm:$0xf0]  ;;  %v7569_v40 = vld [vmem:[#allocation9 + $0x52c] sm:$0xf0] }
 0x1ab   :  { %v7876_v55 = vld [vmem:[#allocation9 + $0xecc] sm:$0xf]  ;;  %v6730_v1 = vor.u32 %v7812_v54, %v6727_v23  ;;  %3872 = vmatpush.bf16.msrb.mxu1 %v6442_v62  ;;  %v3644_v54 = vpop.f32.mrf.mxu3  ;;  %v7593_v23 = vld [vmem:[#allocation9 + $0x5ec] sm:$0xf0] }
 0x1ac   :  { %v6983_v58 = vld [vmem:[#allocation9 + $0xee8] sm:$0xf0]  ;;  %v7489_v53 = vld [vmem:[#allocation9 + $0x2ac] sm:$0xf0] }
 0x1ad   :  { %v7668_v63 = vld [vmem:[#allocation9 + $0x84c] sm:$0xf]  ;;  %v6986_v2 = vor.u32 %v7876_v55, %v6983_v58  ;;  %3884 = vmatpush.bf16.msrb.mxu2 %v6730_v1  ;;  %v6093_v55 = vld [vmem:[#allocation9 + $0x7d0] sm:$0xf]  ;;  %v5838_v1 = vor.u32 %v7593_v23, %v5837_v52 }
 0x1ae   :  { %v6151_v0 = vld [vmem:[#allocation9 + $0x868] sm:$0xf0]  ;;  %v7657_v58 = vld [vmem:[#allocation9 + $0x7ec] sm:$0xf0] }
 0x1af   :  { %v7732_v3 = vld [vmem:[#allocation9 + $0xa4c] sm:$0xf]  ;;  %v6154_v11 = vor.u32 %v7668_v63, %v6151_v0  ;;  %3897 = vmatpush.bf16.msrb.mxu3 %v6986_v2  ;;  %v5261_v63 = vld [vmem:[#allocation9 + $0x150] sm:$0xf]  ;;  %v6094_v2 = vor.u32 %v7657_v58, %v6093_v55 }
 0x1b0   :  { %v6407_v4 = vld [vmem:[#allocation9 + $0xa68] sm:$0xf0]  ;;  %v7449_v0 = vld [vmem:[#allocation9 + $0x16c] sm:$0xf0] }
 0x1b1   :  { %v7804_v5 = vld [vmem:[#allocation9 + $0xc8c] sm:$0xf]  ;;  %v6410_v12 = vor.u32 %v7732_v3, %v6407_v4  ;;  %3860 = vmatpush.bf16.msrb.mxu0 %v6154_v11  ;;  %v5517_v3 = vld [vmem:[#allocation9 + $0x350] sm:$0xf]  ;;  %v5262_v9 = vor.u32 %v7449_v0, %v5261_v63 }
 0x1b2   :  { %v6695_v6 = vld [vmem:[#allocation9 + $0xca8] sm:$0xf0]  ;;  %v7513_v4 = vld [vmem:[#allocation9 + $0x36c] sm:$0xf0] }
 0x1b3   :  { %v7868_v7 = vld [vmem:[#allocation9 + $0xe8c] sm:$0xf]  ;;  %v6698_v19 = vor.u32 %v7804_v5, %v6695_v6  ;;  %3873 = vmatpush.bf16.msrb.mxu1 %v6410_v12  ;;  %v5805_v5 = vld [vmem:[#allocation9 + $0x590] sm:$0xf]  ;;  %v5518_v10 = vor.u32 %v7513_v4, %v5517_v3 }
 0x1b4   :  { %v6951_v8 = vld [vmem:[#allocation9 + $0xea8] sm:$0xf0]  ;;  %v7585_v6 = vld [vmem:[#allocation9 + $0x5ac] sm:$0xf0] }
 0x1b5   :  { %v7660_v15 = vld [vmem:[#allocation9 + $0x80c] sm:$0xf]  ;;  %v6954_v20 = vor.u32 %v7868_v7, %v6951_v8  ;;  %3885 = vmatpush.bf16.msrb.mxu2 %v6698_v19  ;;  %v6061_v7 = vld [vmem:[#allocation9 + $0x790] sm:$0xf] }
 0x1b6   :  { %v6119_v16 = vld [vmem:[#allocation9 + $0x828] sm:$0xf0]  ;;  %v7649_v8 = vld [vmem:[#allocation9 + $0x7ac] sm:$0xf0] }
 0x1b7   :  { %v7724_v17 = vld [vmem:[#allocation9 + $0xa0c] sm:$0xf]  ;;  %v6122_v34 = vor.u32 %v7660_v15, %v6119_v16  ;;  %3898 = vmatpush.bf16.msrb.mxu3 %v6954_v20  ;;  %v5229_v11 = vld [vmem:[#allocation9 + $0x110] sm:$0xf]  ;;  %v5806_v15 = vor.u32 %v7585_v6, %v5805_v5  ;;  %v6062_v16 = vor.u32 %v7649_v8, %v6061_v7  ;;  %v3655_v20 = vpop.f32.mrf.mxu0  ;;  %v3681_v6 = vpop.f32.mrf.mxu2 }
 0x1b8   :  { %v6375_v21 = vld [vmem:[#allocation9 + $0xa28] sm:$0xf0]  ;;  %v7441_v12 = vld [vmem:[#allocation9 + $0x12c] sm:$0xf0]  ;;  %v3656_v28 = vadd.f32 %v3655_v20, %v8347_v30  ;;  %v3694_v7 = vpop.f32.mrf.mxu3 }
 0x1b9   :  { %v7796_v29 = vld [vmem:[#allocation9 + $0xc4c] sm:$0xf]  ;;  %v6378_v35 = vor.u32 %v7724_v17, %v6375_v21  ;;  %3861 = vmatpush.bf16.msrb.mxu0 %v6122_v34  ;;  %v5485_v17 = vld [vmem:[#allocation9 + $0x310] sm:$0xf]  ;;  %v3668_v21 = vpop.f32.mrf.mxu1 }
 0x1ba   :  { %v6663_v31 = vld [vmem:[#allocation9 + $0xc68] sm:$0xf0]  ;;  %v5773_v19 = vld [vmem:[#allocation9 + $0x550] sm:$0xf]  ;;  %v3669_v34 = vadd.f32 %v3668_v21, %v3656_v28 }
 0x1bb   :  { %v7860_v32 = vld [vmem:[#allocation9 + $0xe4c] sm:$0xf]  ;;  %v6666_v41 = vor.u32 %v7796_v29, %v6663_v31  ;;  %3874 = vmatpush.bf16.msrb.mxu1 %v6378_v35  ;;  %v5230_v29 = vor.u32 %v7441_v12, %v5229_v11  ;;  %v5486_v31 = vor.u32 %v7505_v18, %v5485_v17  ;;  %v5774_v35 = vor.u32 %v7577_v22, %v5773_v19  ;;  %v5421_v52 = vld [vmem:[#allocation9 + $0x290] sm:$0xf] }
 0x1bc   :  { %v6919_v33 = vld [vmem:[#allocation9 + $0xe68] sm:$0xf0]  ;;  %3862 = vmatmul.bf16.vlgmr.msrb.gmra.mxu0 %v8309_v25  ;;  %v5709_v54 = vld [vmem:[#allocation9 + $0x4d0] sm:$0xf]  ;;  %v3682_v11 = vadd.f32 %v3681_v6, %v3669_v34 }
 0x1bd   :  { %v6922_v42 = vor.u32 %v7860_v32, %v6919_v33  ;;  %v7788_v47 = vld [vmem:[#allocation9 + $0xc0c] sm:$0xf]  ;;  %3906 = vmatpush.bf16.msra.mxu0 %v5326_v36  ;;  %3886 = vmatpush.bf16.msrb.mxu2 %v6666_v41  ;;  %v5197_v32 = vld [vmem:[#allocation9 + $0xd0] sm:$0xf]  ;;  %v6030_v36 = vor.u32 %v7641_v27, %v6029_v24 }
 0x1be   :  { %v6631_v48 = vld [vmem:[#allocation9 + $0xc28] sm:$0xf0]  ;;  %3875 = vmatmul.bf16.vlgmr.msrb.gmra.mxu1 %v8311_v26  ;;  %v7433_v33 = vld [vmem:[#allocation9 + $0xec] sm:$0xf0]  ;;  %v3695_v20 = vadd.f32 %v3694_v7, %v3682_v11  ;;  %v888_v11 = vperm.slane %v8333_v43, 2 }
 0x1bf   :  { %v7852_v49 = vld [vmem:[#allocation9 + $0xe0c] sm:$0xf]  ;;  %3919 = vmatpush.bf16.msra.mxu1 %v5582_v37  ;;  %3899 = vmatpush.bf16.msrb.mxu3 %v6922_v42  ;;  %v6634_v61 = vor.u32 %v7788_v47, %v6631_v48  ;;  %v5453_v37 = vld [vmem:[#allocation9 + $0x2d0] sm:$0xf]  ;;  %v5198_v30 = vor.u32 %v7433_v33, %v5197_v32  ;;  %v3657_v23 = vpop.f32.mrf.mxu0  ;;  %v4322_v33 = vmax.f32 %v8343_v50, 0.0 }
 0x1c0   :  { %v6887_v51 = vld [vmem:[#allocation9 + $0xe28] sm:$0xf0]  ;;  %v5997_v41 = vld [vmem:[#allocation9 + $0x710] sm:$0xf]  ;;  %v5454_v46 = vor.u32 %v7497_v38, %v5453_v37  ;;  %v4323_v34 = vmax.f32 %v3695_v20, 0.0  ;;  %v3696_v50 = vpop.f32.mrf.mxu3 }
 0x1c1   :  { %v6890_v62 = vor.u32 %v7852_v49, %v6887_v51  ;;  %3907 = vmatpush.bf16.msra.mxu0 %v5294_v59  ;;  %3887 = vmatpush.bf16.msrb.mxu2 %v6634_v61  ;;  %v7633_v42 = vld [vmem:[#allocation9 + $0x72c] sm:$0xf0]  ;;  %v5742_v49 = vor.u32 %v7569_v40, %v5741_v39  ;;  %v3670_v55 = vpop.f32.mrf.mxu1 }
 0x1c2   :  { %v5165_v47 = vld [vmem:[#allocation9 + $0x90] sm:$0xf]  ;;  %v5998_v51 = vor.u32 %v7633_v42, %v5997_v41  ;;  %v8355_v39 = vpack.c.bf16 %v4323_v34, %v4322_v33 }
 0x1c3   :  { %3920 = vmatpush.bf16.msra.mxu1 %v5550_v60  ;;  %3900 = vmatpush.bf16.msrb.mxu3 %v6890_v62  ;;  %v7425_v48 = vld [vmem:[#allocation9 + $0xac] sm:$0xf0]  ;;  %v5422_v62 = vor.u32 %v7489_v53, %v5421_v52 }
 0x1c4   :  { %3888 = vmatmul.bf16.vlgmr.msrb.gmra.mxu2 %v8315_v56  ;;  %v7561_v58 = vld [vmem:[#allocation9 + $0x4ec] sm:$0xf0]  ;;  %v5166_v61 = vor.u32 %v7425_v48, %v5165_v47 }
 0x1c5   :  { %3932 = vmatpush.bf16.msra.mxu2 %v5838_v1  ;;  %3908 = vmatpush.bf16.msra.mxu0 %v5262_v9  ;;  %v5965_v59 = vld [vmem:[#allocation9 + $0x6d0] sm:$0xf]  ;;  %v5710_v1 = vor.u32 %v7561_v58, %v5709_v54 }
 0x1c6   :  { %3901 = vmatmul.bf16.vlgmr.msrb.gmra.mxu3 %v8317_v57  ;;  %v7625_v60 = vld [vmem:[#allocation9 + $0x6ec] sm:$0xf0] }
 0x1c7   :  { %3945 = vmatpush.bf16.msra.mxu3 %v6094_v2  ;;  %3921 = vmatpush.bf16.msra.mxu1 %v5518_v10  ;;  %v5133_v63 = vld [vmem:[#allocation9 + $0x50] sm:$0xf]  ;;  %v5966_v2 = vor.u32 %v7625_v60, %v5965_v59 }
 0x1c8   :  { %v7417_v0 = vld [vmem:[#allocation9 + $0x6c] sm:$0xf0] }
 0x1c9   :  { %3933 = vmatpush.bf16.msra.mxu2 %v5806_v15  ;;  %3909 = vmatpush.bf16.msra.mxu0 %v5230_v29  ;;  %v5389_v3 = vld [vmem:[#allocation9 + $0x250] sm:$0xf]  ;;  %v5134_v15 = vor.u32 %v7417_v0, %v5133_v63 }
 0x1ca   :  { %v7481_v4 = vld [vmem:[#allocation9 + $0x26c] sm:$0xf0] }
 0x1cb   :  { %3946 = vmatpush.bf16.msra.mxu3 %v6062_v16  ;;  %3922 = vmatpush.bf16.msra.mxu1 %v5486_v31  ;;  %v5677_v5 = vld [vmem:[#allocation9 + $0x490] sm:$0xf]  ;;  %v5390_v16 = vor.u32 %v7481_v4, %v5389_v3 }
 0x1cc   :  { %v7553_v8 = vld [vmem:[#allocation9 + $0x4ac] sm:$0xf0] }
 0x1cd   :  { %3934 = vmatpush.bf16.msra.mxu2 %v5774_v35  ;;  %3910 = vmatpush.bf16.msra.mxu0 %v5198_v30  ;;  %v5933_v9 = vld [vmem:[#allocation9 + $0x690] sm:$0xf]  ;;  %v5678_v21 = vor.u32 %v7553_v8, %v5677_v5 }
 0x1ce   :  { %v7617_v10 = vld [vmem:[#allocation9 + $0x6ac] sm:$0xf0] }
 0x1cf   :  { %3947 = vmatpush.bf16.msra.mxu3 %v6030_v36  ;;  %3923 = vmatpush.bf16.msra.mxu1 %v5454_v46  ;;  %v5101_v12 = vld [vmem:[#allocation9 + $0x10] sm:$0xf]  ;;  %v5934_v22 = vor.u32 %v7617_v10, %v5933_v9 }
 0x1d0   :  { %v7409_v17 = vld [vmem:[#allocation9 + $0x2c] sm:$0xf0] }
 0x1d1   :  { %3935 = vmatpush.bf16.msra.mxu2 %v5742_v49  ;;  %3911 = vmatpush.bf16.msra.mxu0 %v5166_v61  ;;  %v5357_v18 = vld [vmem:[#allocation9 + $0x210] sm:$0xf]  ;;  %v5102_v37 = vor.u32 %v7409_v17, %v5101_v12  ;;  %v3683_v49 = vpop.f32.mrf.mxu2 }
 0x1d2   :  { %v7473_v19 = vld [vmem:[#allocation9 + $0x22c] sm:$0xf0] }
 0x1d3   :  { %3948 = vmatpush.bf16.msra.mxu3 %v5998_v51  ;;  %3924 = vmatpush.bf16.msra.mxu1 %v5422_v62  ;;  %v6349_v24 = vld [vmem:[#allocation9 + $0x9d0] sm:$0xf]  ;;  %v5358_v38 = vor.u32 %v7473_v19, %v5357_v18 }
 0x1d4   :  { %v7721_v27 = vld [vmem:[#allocation9 + $0x9ec] sm:$0xf0] }
 0x1d5   :  { %3936 = vmatpush.bf16.msra.mxu2 %v5710_v1  ;;  %v6605_v28 = vld [vmem:[#allocation9 + $0xbd0] sm:$0xf]  ;;  %3912 = vmatpush.bf16.msra.mxu0 %v5134_v15  ;;  %v6350_v40 = vor.u32 %v7721_v27, %v6349_v24  ;;  %v3707_v24 = vpop.f32.mrf.mxu0  ;;  %v3720_v27 = vpop.f32.mrf.mxu1 }
 0x1d6   :  { %v7785_v29 = vld [vmem:[#allocation9 + $0xbec] sm:$0xf0]  ;;  %v3708_v43 = vadd.f32 %v3707_v24, %v888_v11 }
 0x1d7   :  { %3949 = vmatpush.bf16.msra.mxu3 %v5966_v2  ;;  %v5645_v31 = vld [vmem:[#allocation9 + $0x450] sm:$0xf]  ;;  %3925 = vmatpush.bf16.msra.mxu1 %v5390_v16  ;;  %v6606_v41 = vor.u32 %v7785_v29, %v6605_v28 }
 0x1d8   :  { %v7545_v32 = vld [vmem:[#allocation9 + $0x46c] sm:$0xf0] }
 0x1d9   :  { %v5901_v35 = vld [vmem:[#allocation9 + $0x650] sm:$0xf]  ;;  %3937 = vmatpush.bf16.msra.mxu2 %v5678_v21  ;;  %v5646_v47 = vor.u32 %v7545_v32, %v5645_v31  ;;  %3913 = vmatpush.bf16.msra.mxu0 %v5102_v37 }
 0x1da   :  { %v7609_v36 = vld [vmem:[#allocation9 + $0x66c] sm:$0xf0] }
 0x1db   :  { %3950 = vmatpush.bf16.msra.mxu3 %v5934_v22  ;;  %v6317_v42 = vld [vmem:[#allocation9 + $0x990] sm:$0xf]  ;;  %v5902_v48 = vor.u32 %v7609_v36, %v5901_v35  ;;  %3926 = vmatpush.bf16.msra.mxu1 %v5358_v38  ;;  %v3721_v36 = vadd.f32 %v3720_v27, %v3708_v43  ;;  %v5583_v43 = vld [vmem:[#allocation9 + $0x3f0] sm:$0xf0] }
 0x1dc   :  { %v7713_v30 = vld [vmem:[#allocation9 + $0x9ac] sm:$0xf0]  ;;  %3914 = vmatmul.bf16.vlgmr.msra.gmra.mxu0 %v8293_v13 }
 0x1dd   :  { %v6573_v46 = vld [vmem:[#allocation9 + $0xb90] sm:$0xf]  ;;  %3958 = vmatpush.bf16.msrb.mxu0 %v6350_v40  ;;  %v6318_v61 = vor.u32 %v7713_v30, %v6317_v42  ;;  %3938 = vmatpush.bf16.msra.mxu2 %v5646_v47 }
 0x1de   :  { %v7777_v51 = vld [vmem:[#allocation9 + $0xbac] sm:$0xf0]  ;;  %3927 = vmatmul.bf16.vlgmr.msra.gmra.mxu1 %v8295_v14 }
 0x1df   :  { %v5613_v52 = vld [vmem:[#allocation9 + $0x410] sm:$0xf]  ;;  %3971 = vmatpush.bf16.msrb.mxu1 %v6606_v41  ;;  %v6574_v62 = vor.u32 %v7777_v51, %v6573_v46  ;;  %3951 = vmatpush.bf16.msra.mxu3 %v5902_v48 }
 0x1e0   :  { %v7537_v53 = vld [vmem:[#allocation9 + $0x42c] sm:$0xf0] }
 0x1e1   :  { %v5869_v54 = vld [vmem:[#allocation9 + $0x610] sm:$0xf]  ;;  %v5614_v63 = vor.u32 %v7537_v53, %v5613_v52  ;;  %3959 = vmatpush.bf16.msrb.mxu0 %v6318_v61 }
 0x1e2   :  { %v7601_v23 = vld [vmem:[#allocation9 + $0x62c] sm:$0xf0] }
 0x1e3   :  { %v6861_v55 = vld [vmem:[#allocation9 + $0xdd0] sm:$0xf]  ;;  %v5870_v0 = vor.u32 %v7601_v23, %v5869_v54  ;;  %3972 = vmatpush.bf16.msrb.mxu1 %v6574_v62  ;;  %3939 = vmatpush.bf16.msra.mxu2 %v5614_v63 }
 0x1e4   :  { %v7849_v58 = vld [vmem:[#allocation9 + $0xdec] sm:$0xf0] }
 0x1e5   :  { %v7117_v59 = vld [vmem:[#allocation9 + $0xfd0] sm:$0xf]  ;;  %v6862_v3 = vor.u32 %v7849_v58, %v6861_v55  ;;  %3952 = vmatpush.bf16.msra.mxu3 %v5870_v0  ;;  %v3709_v58 = vpop.f32.mrf.mxu0 }
 0x1e6   :  { %v7913_v60 = vld [vmem:[#allocation9 + $0xfec] sm:$0xf0]  ;;  %3940 = vmatmul.bf16.vlgmr.msra.gmra.mxu2 %v8301_v44  ;;  %v7653_v58 = vld [vmem:[#allocation9 + $0x7d4] sm:$0xf] }
 0x1e7   :  { %v6285_v1 = vld [vmem:[#allocation9 + $0x950] sm:$0xf]  ;;  %v7118_v4 = vor.u32 %v7913_v60, %v7117_v59  ;;  %3984 = vmatpush.bf16.msrb.mxu2 %v6862_v3  ;;  %v3722_v59 = vpop.f32.mrf.mxu1 }
 0x1e8   :  { %v7705_v2 = vld [vmem:[#allocation9 + $0x96c] sm:$0xf0]  ;;  %3953 = vmatmul.bf16.vlgmr.msra.gmra.mxu3 %v8303_v45  ;;  %v6095_v59 = vld [vmem:[#allocation9 + $0x7f0] sm:$0xf0] }
 0x1e9   :  { %v6541_v5 = vld [vmem:[#allocation9 + $0xb50] sm:$0xf]  ;;  %v6286_v12 = vor.u32 %v7705_v2, %v6285_v1  ;;  %3997 = vmatpush.bf16.msrb.mxu3 %v7118_v4 }
 0x1ea   :  { %v7769_v6 = vld [vmem:[#allocation9 + $0xb6c] sm:$0xf0] }
 0x1eb   :  { %v6829_v7 = vld [vmem:[#allocation9 + $0xd90] sm:$0xf]  ;;  %v6542_v15 = vor.u32 %v7769_v6, %v6541_v5  ;;  %3960 = vmatpush.bf16.msrb.mxu0 %v6286_v12 }
 0x1ec   :  { %v7841_v8 = vld [vmem:[#allocation9 + $0xdac] sm:$0xf0] }
 0x1ed   :  { %v7085_v9 = vld [vmem:[#allocation9 + $0xf90] sm:$0xf]  ;;  %v6830_v18 = vor.u32 %v7841_v8, %v6829_v7  ;;  %3973 = vmatpush.bf16.msrb.mxu1 %v6542_v15  ;;  %v3733_v8 = vpop.f32.mrf.mxu2 }
 0x1ee   :  { %v7905_v10 = vld [vmem:[#allocation9 + $0xfac] sm:$0xf0]  ;;  %v3734_v15 = vadd.f32 %v3733_v8, %v3721_v36  ;;  %v7645_v8 = vld [vmem:[#allocation9 + $0x794] sm:$0xf] }
 0x1ef   :  { %v6253_v16 = vld [vmem:[#allocation9 + $0x910] sm:$0xf]  ;;  %v7086_v19 = vor.u32 %v7905_v10, %v7085_v9  ;;  %3985 = vmatpush.bf16.msrb.mxu2 %v6830_v18  ;;  %v3746_v9 = vpop.f32.mrf.mxu3 }
 0x1f0   :  { %v7697_v17 = vld [vmem:[#allocation9 + $0x92c] sm:$0xf0] }
 0x1f1   :  { %v6509_v20 = vld [vmem:[#allocation9 + $0xb10] sm:$0xf]  ;;  %v6254_v32 = vor.u32 %v7697_v17, %v6253_v16  ;;  %3998 = vmatpush.bf16.msrb.mxu3 %v7086_v19 }
 0x1f2   :  { %v7761_v21 = vld [vmem:[#allocation9 + $0xb2c] sm:$0xf0] }
 0x1f3   :  { %v6797_v22 = vld [vmem:[#allocation9 + $0xd50] sm:$0xf]  ;;  %v6510_v33 = vor.u32 %v7761_v21, %v6509_v20  ;;  %3961 = vmatpush.bf16.msrb.mxu0 %v6254_v32  ;;  %v8362_v21 = vadd.f32 %v3746_v9, %v3734_v15  ;;  %v6063_v9 = vld [vmem:[#allocation9 + $0x7b0] sm:$0xf0] }
 0x1f4   :  { %v7833_v28 = vld [vmem:[#allocation9 + $0xd6c] sm:$0xf0]  ;;  %v5231_v15 = vld [vmem:[#allocation9 + $0x130] sm:$0xf0] }
 0x1f5   :  { %v7053_v29 = vld [vmem:[#allocation9 + $0xf50] sm:$0xf]  ;;  %v6798_v37 = vor.u32 %v7833_v28, %v6797_v22  ;;  %3974 = vmatpush.bf16.msrb.mxu1 %v6510_v33  ;;  %v7461_v28 = vld [vmem:[#allocation9 + $0x1d4] sm:$0xf] }
 0x1f6   :  { %v7897_v31 = vld [vmem:[#allocation9 + $0xf6c] sm:$0xf0] }
 0x1f7   :  { %v6221_v34 = vld [vmem:[#allocation9 + $0x8d0] sm:$0xf]  ;;  %v7054_v38 = vor.u32 %v7897_v31, %v7053_v29  ;;  %3986 = vmatpush.bf16.msrb.mxu2 %v6798_v37  ;;  %v5327_v29 = vld [vmem:[#allocation9 + $0x1f0] sm:$0xf0] }
 0x1f8   :  { %v7689_v35 = vld [vmem:[#allocation9 + $0x8ec] sm:$0xf0]  ;;  %v7525_v31 = vld [vmem:[#allocation9 + $0x3d4] sm:$0xf] }
 0x1f9   :  { %v6477_v40 = vld [vmem:[#allocation9 + $0xad0] sm:$0xf]  ;;  %v6222_v48 = vor.u32 %v7689_v35, %v6221_v34  ;;  %3999 = vmatpush.bf16.msrb.mxu3 %v7054_v38  ;;  %v5330_v38 = vor.u32 %v7461_v28, %v5327_v29  ;;  %v7637_v28 = vld [vmem:[#allocation9 + $0x754] sm:$0xf] }
 0x1fa   :  { %v7753_v41 = vld [vmem:[#allocation9 + $0xaec] sm:$0xf0]  ;;  %v6031_v29 = vld [vmem:[#allocation9 + $0x770] sm:$0xf0] }
 0x1fb   :  { %v6765_v42 = vld [vmem:[#allocation9 + $0xd10] sm:$0xf]  ;;  %v6478_v49 = vor.u32 %v7753_v41, %v6477_v40  ;;  %3962 = vmatpush.bf16.msrb.mxu0 %v6222_v48  ;;  %v5586_v40 = vor.u32 %v7525_v31, %v5583_v43  ;;  %v7453_v41 = vld [vmem:[#allocation9 + $0x194] sm:$0xf]  ;;  %v3735_v48 = vpop.f32.mrf.mxu2 }
 0x1fc   :  { %v7825_v30 = vld [vmem:[#allocation9 + $0xd2c] sm:$0xf0]  ;;  %v7421_v48 = vld [vmem:[#allocation9 + $0x94] sm:$0xf] }
 0x1fd   :  { %v7021_v46 = vld [vmem:[#allocation9 + $0xf10] sm:$0xf]  ;;  %v6766_v52 = vor.u32 %v7825_v30, %v6765_v42  ;;  %3975 = vmatpush.bf16.msrb.mxu1 %v6478_v49  ;;  %v5295_v42 = vld [vmem:[#allocation9 + $0x1b0] sm:$0xf0]  ;;  %v3748_v49 = vpop.f32.mrf.mxu3 }
 0x1fe   :  { %v7889_v47 = vld [vmem:[#allocation9 + $0xf2c] sm:$0xf0]  ;;  %v7517_v30 = vld [vmem:[#allocation9 + $0x394] sm:$0xf] }
 0x1ff   :  { %v6189_v50 = vld [vmem:[#allocation9 + $0x890] sm:$0xf]  ;;  %v7022_v53 = vor.u32 %v7889_v47, %v7021_v46  ;;  %3987 = vmatpush.bf16.msrb.mxu2 %v6766_v52  ;;  %v5167_v49 = vld [vmem:[#allocation9 + $0xb0] sm:$0xf0] }
 0x200   :  { %v7681_v51 = vld [vmem:[#allocation9 + $0x8ac] sm:$0xf0] }
 0x201   :  { %v6445_v54 = vld [vmem:[#allocation9 + $0xa90] sm:$0xf]  ;;  %v6190_v63 = vor.u32 %v7681_v51, %v6189_v50  ;;  %4000 = vmatpush.bf16.msrb.mxu3 %v7022_v53  ;;  %v5551_v50 = vld [vmem:[#allocation9 + $0x3b0] sm:$0xf0] }
 0x202   :  { %v7745_v23 = vld [vmem:[#allocation9 + $0xaac] sm:$0xf0] }
 0x203   :  { %v6733_v55 = vld [vmem:[#allocation9 + $0xcd0] sm:$0xf]  ;;  %v6446_v0 = vor.u32 %v7745_v23, %v6445_v54  ;;  %3963 = vmatpush.bf16.msrb.mxu0 %v6190_v63  ;;  %v7589_v23 = vld [vmem:[#allocation9 + $0x5d4] sm:$0xf] }
 0x204   :  { %v7817_v60 = vld [vmem:[#allocation9 + $0xcec] sm:$0xf0] }
 0x205   :  { %v6989_v61 = vld [vmem:[#allocation9 + $0xed0] sm:$0xf]  ;;  %v6734_v3 = vor.u32 %v7817_v60, %v6733_v55  ;;  %3976 = vmatpush.bf16.msrb.mxu1 %v6446_v0  ;;  %v5839_v55 = vld [vmem:[#allocation9 + $0x5f0] sm:$0xf0]  ;;  %v5298_v60 = vor.u32 %v7453_v41, %v5295_v42 }
 0x206   :  { %v7881_v62 = vld [vmem:[#allocation9 + $0xeec] sm:$0xf0]  ;;  %v7445_v0 = vld [vmem:[#allocation9 + $0x154] sm:$0xf] }
 0x207   :  { %v6157_v1 = vld [vmem:[#allocation9 + $0x850] sm:$0xf]  ;;  %v6990_v4 = vor.u32 %v7881_v62, %v6989_v61  ;;  %3988 = vmatpush.bf16.msrb.mxu2 %v6734_v3  ;;  %v5554_v61 = vor.u32 %v7517_v30, %v5551_v50  ;;  %v6098_v3 = vor.u32 %v7653_v58, %v6095_v59  ;;  %v7565_v41 = vld [vmem:[#allocation9 + $0x514] sm:$0xf] }
 0x208   :  { %v7673_v2 = vld [vmem:[#allocation9 + $0x86c] sm:$0xf0]  ;;  %v5743_v42 = vld [vmem:[#allocation9 + $0x530] sm:$0xf0] }
 0x209   :  { %v6413_v5 = vld [vmem:[#allocation9 + $0xa50] sm:$0xf]  ;;  %v6158_v16 = vor.u32 %v7673_v2, %v6157_v1  ;;  %4001 = vmatpush.bf16.msrb.mxu3 %v6990_v4  ;;  %v5263_v1 = vld [vmem:[#allocation9 + $0x170] sm:$0xf0]  ;;  %v5842_v2 = vor.u32 %v7589_v23, %v5839_v55  ;;  %v5746_v50 = vor.u32 %v7565_v41, %v5743_v42 }
 0x20a   :  { %v7737_v6 = vld [vmem:[#allocation9 + $0xa6c] sm:$0xf0]  ;;  %v7509_v4 = vld [vmem:[#allocation9 + $0x354] sm:$0xf] }
 0x20b   :  { %v6701_v7 = vld [vmem:[#allocation9 + $0xc90] sm:$0xf]  ;;  %v6414_v17 = vor.u32 %v7737_v6, %v6413_v5  ;;  %3964 = vmatpush.bf16.msrb.mxu0 %v6158_v16  ;;  %v5519_v5 = vld [vmem:[#allocation9 + $0x370] sm:$0xf0] }
 0x20c   :  { %v7809_v10 = vld [vmem:[#allocation9 + $0xcac] sm:$0xf0]  ;;  %v7581_v6 = vld [vmem:[#allocation9 + $0x594] sm:$0xf] }
 0x20d   :  { %v6957_v11 = vld [vmem:[#allocation9 + $0xe90] sm:$0xf]  ;;  %v6702_v22 = vor.u32 %v7809_v10, %v6701_v7  ;;  %3977 = vmatpush.bf16.msrb.mxu1 %v6414_v17  ;;  %v5807_v7 = vld [vmem:[#allocation9 + $0x5b0] sm:$0xf0]  ;;  %v5266_v10 = vor.u32 %v7445_v0, %v5263_v1  ;;  %v6066_v17 = vor.u32 %v7645_v8, %v6063_v9 }
 0x20e   :  { %v7873_v12 = vld [vmem:[#allocation9 + $0xeac] sm:$0xf0]  ;;  %v5810_v16 = vor.u32 %v7581_v6, %v5807_v7  ;;  %v7629_v30 = vld [vmem:[#allocation9 + $0x714] sm:$0xf]  ;;  %v3785_v6 = vpop.f32.mrf.mxu2  ;;  %v3798_v7 = vpop.f32.mrf.mxu3 }
 0x20f   :  { %v6125_v18 = vld [vmem:[#allocation9 + $0x810] sm:$0xf]  ;;  %v6958_v24 = vor.u32 %v7873_v12, %v6957_v11  ;;  %3989 = vmatpush.bf16.msrb.mxu2 %v6702_v22  ;;  %v5522_v11 = vor.u32 %v7509_v4, %v5519_v5  ;;  %v7437_v12 = vld [vmem:[#allocation9 + $0x114] sm:$0xf]  ;;  %v3759_v22 = vpop.f32.mrf.mxu0 }
 0x210   :  { %v7665_v19 = vld [vmem:[#allocation9 + $0x82c] sm:$0xf0]  ;;  %v3760_v31 = vadd.f32 %v3759_v22, %v8362_v21  ;;  %v5234_v43 = vor.u32 %v7437_v12, %v5231_v15  ;;  %v5711_v58 = vld [vmem:[#allocation9 + $0x4f0] sm:$0xf0] }
 0x211   :  { %v6381_v20 = vld [vmem:[#allocation9 + $0xa10] sm:$0xf]  ;;  %v6126_v36 = vor.u32 %v7665_v19, %v6125_v18  ;;  %4002 = vmatpush.bf16.msrb.mxu3 %v6958_v24  ;;  %v7501_v18 = vld [vmem:[#allocation9 + $0x314] sm:$0xf]  ;;  %v3772_v24 = vpop.f32.mrf.mxu1 }
 0x212   :  { %v7729_v27 = vld [vmem:[#allocation9 + $0xa2c] sm:$0xf0]  ;;  %v5487_v19 = vld [vmem:[#allocation9 + $0x330] sm:$0xf0] }
 0x213   :  { %v6669_v32 = vld [vmem:[#allocation9 + $0xc50] sm:$0xf]  ;;  %v6382_v37 = vor.u32 %v7729_v27, %v6381_v20  ;;  %3965 = vmatpush.bf16.msrb.mxu0 %v6126_v36  ;;  %v7573_v20 = vld [vmem:[#allocation9 + $0x554] sm:$0xf] }
 0x214   :  { %v7801_v33 = vld [vmem:[#allocation9 + $0xc6c] sm:$0xf0]  ;;  %v5775_v27 = vld [vmem:[#allocation9 + $0x570] sm:$0xf0] }
 0x215   :  { %v6925_v34 = vld [vmem:[#allocation9 + $0xe50] sm:$0xf]  ;;  %v6670_v46 = vor.u32 %v7801_v33, %v6669_v32  ;;  %3978 = vmatpush.bf16.msrb.mxu1 %v6382_v37  ;;  %v5490_v32 = vor.u32 %v7501_v18, %v5487_v19  ;;  %v7429_v33 = vld [vmem:[#allocation9 + $0xd4] sm:$0xf]  ;;  %v5778_v36 = vor.u32 %v7573_v20, %v5775_v27  ;;  %v6034_v37 = vor.u32 %v7637_v28, %v6031_v29 }
 0x216   :  { %v7865_v35 = vld [vmem:[#allocation9 + $0xe6c] sm:$0xf0]  ;;  %3966 = vmatmul.bf16.vlgmr.msrb.gmra.mxu0 %v8309_v25  ;;  %v7621_v59 = vld [vmem:[#allocation9 + $0x6d4] sm:$0xf] }
 0x217   :  { %v6926_v47 = vor.u32 %v7865_v35, %v6925_v34  ;;  %v6637_v51 = vld [vmem:[#allocation9 + $0xc10] sm:$0xf]  ;;  %4010 = vmatpush.bf16.msra.mxu0 %v5330_v38  ;;  %3990 = vmatpush.bf16.msrb.mxu2 %v6670_v46  ;;  %v5199_v34 = vld [vmem:[#allocation9 + $0xf0] sm:$0xf0]  ;;  %v3773_v35 = vadd.f32 %v3772_v24, %v3760_v31  ;;  %v3761_v23 = vpop.f32.mrf.mxu0 }
 0x218   :  { %v7793_v52 = vld [vmem:[#allocation9 + $0xc2c] sm:$0xf0]  ;;  %3979 = vmatmul.bf16.vlgmr.msrb.gmra.mxu1 %v8311_v26  ;;  %v7493_v38 = vld [vmem:[#allocation9 + $0x2d4] sm:$0xf]  ;;  %v5202_v21 = vor.u32 %v7429_v33, %v5199_v34 }
 0x219   :  { %v6893_v53 = vld [vmem:[#allocation9 + $0xe10] sm:$0xf]  ;;  %4023 = vmatpush.bf16.msra.mxu1 %v5586_v40  ;;  %4003 = vmatpush.bf16.msrb.mxu3 %v6926_v47  ;;  %v6638_v62 = vor.u32 %v7793_v52, %v6637_v51  ;;  %v5455_v40 = vld [vmem:[#allocation9 + $0x2f0] sm:$0xf0]  ;;  %v3774_v55 = vpop.f32.mrf.mxu1 }
 0x21a   :  { %v7857_v54 = vld [vmem:[#allocation9 + $0xe2c] sm:$0xf0]  ;;  %v5999_v46 = vld [vmem:[#allocation9 + $0x730] sm:$0xf0]  ;;  %v5458_v47 = vor.u32 %v7493_v38, %v5455_v40 }
 0x21b   :  { %v6894_v63 = vor.u32 %v7857_v54, %v6893_v53  ;;  %4011 = vmatpush.bf16.msra.mxu0 %v5298_v60  ;;  %3991 = vmatpush.bf16.msrb.mxu2 %v6638_v62  ;;  %v6002_v51 = vor.u32 %v7629_v30, %v5999_v46  ;;  %v7485_v52 = vld [vmem:[#allocation9 + $0x294] sm:$0xf] }
 0x21c   :  { %v5423_v53 = vld [vmem:[#allocation9 + $0x2b0] sm:$0xf0] }
 0x21d   :  { %4024 = vmatpush.bf16.msra.mxu1 %v5554_v61  ;;  %4004 = vmatpush.bf16.msrb.mxu3 %v6894_v63  ;;  %v7557_v54 = vld [vmem:[#allocation9 + $0x4d4] sm:$0xf]  ;;  %v5170_v61 = vor.u32 %v7421_v48, %v5167_v49  ;;  %v5426_v62 = vor.u32 %v7485_v52, %v5423_v53 }
 0x21e   :  { %3992 = vmatmul.bf16.vlgmr.msrb.gmra.mxu2 %v8315_v56  ;;  %v5967_v60 = vld [vmem:[#allocation9 + $0x6f0] sm:$0xf0]  ;;  %v5714_v1 = vor.u32 %v7557_v54, %v5711_v58 }
 0x21f   :  { %4036 = vmatpush.bf16.msra.mxu2 %v5842_v2  ;;  %4012 = vmatpush.bf16.msra.mxu0 %v5266_v10  ;;  %v7413_v63 = vld [vmem:[#allocation9 + $0x54] sm:$0xf]  ;;  %v5970_v2 = vor.u32 %v7621_v59, %v5967_v60 }
 0x220   :  { %4005 = vmatmul.bf16.vlgmr.msrb.gmra.mxu3 %v8317_v57  ;;  %v5135_v0 = vld [vmem:[#allocation9 + $0x70] sm:$0xf0] }
 0x221   :  { %4049 = vmatpush.bf16.msra.mxu3 %v6098_v3  ;;  %4025 = vmatpush.bf16.msra.mxu1 %v5522_v11  ;;  %v7477_v3 = vld [vmem:[#allocation9 + $0x254] sm:$0xf]  ;;  %v3786_v11 = vadd.f32 %v3785_v6, %v3773_v35  ;;  %v5138_v12 = vor.u32 %v7413_v63, %v5135_v0 }
 0x222   :  { %v5391_v4 = vld [vmem:[#allocation9 + $0x270] sm:$0xf0] }
 0x223   :  { %4037 = vmatpush.bf16.msra.mxu2 %v5810_v16  ;;  %4013 = vmatpush.bf16.msra.mxu0 %v5234_v43  ;;  %v7549_v5 = vld [vmem:[#allocation9 + $0x494] sm:$0xf]  ;;  %v5394_v15 = vor.u32 %v7477_v3, %v5391_v4  ;;  %v8369_v19 = vadd.f32 %v3798_v7, %v3786_v11 }
 0x224   :  { %v5679_v8 = vld [vmem:[#allocation9 + $0x4b0] sm:$0xf0] }
 0x225   :  { %4050 = vmatpush.bf16.msra.mxu3 %v6066_v17  ;;  %4026 = vmatpush.bf16.msra.mxu1 %v5490_v32  ;;  %v7613_v9 = vld [vmem:[#allocation9 + $0x694] sm:$0xf]  ;;  %v5682_v20 = vor.u32 %v7549_v5, %v5679_v8  ;;  %v8373_v8 = vld [vmem:[#allocation11] sm:$0xff] }
 0x226   :  { %v5935_v10 = vld [vmem:[#allocation9 + $0x6b0] sm:$0xf0] }
 0x227   :  { %4038 = vmatpush.bf16.msra.mxu2 %v5778_v36  ;;  %4014 = vmatpush.bf16.msra.mxu0 %v5202_v21  ;;  %v7405_v16 = vld [vmem:[#allocation9 + $0x14] sm:$0xf]  ;;  %v5938_v22 = vor.u32 %v7613_v9, %v5935_v10  ;;  %v3787_v21 = vpop.f32.mrf.mxu2  ;;  %v889_v9 = vperm.slane %v8373_v8, 3 }
 0x228   :  { %v5103_v17 = vld [vmem:[#allocation9 + $0x30] sm:$0xf0] }
 0x229   :  { %4051 = vmatpush.bf16.msra.mxu3 %v6034_v37  ;;  %4027 = vmatpush.bf16.msra.mxu1 %v5458_v47  ;;  %v7469_v18 = vld [vmem:[#allocation9 + $0x214] sm:$0xf]  ;;  %v5106_v35 = vor.u32 %v7405_v16, %v5103_v17  ;;  %v3800_v47 = vpop.f32.mrf.mxu3 }
 0x22a   :  { %v5359_v24 = vld [vmem:[#allocation9 + $0x230] sm:$0xf0] }
 0x22b   :  { %4039 = vmatpush.bf16.msra.mxu2 %v5746_v50  ;;  %4015 = vmatpush.bf16.msra.mxu0 %v5170_v61  ;;  %v7717_v27 = vld [vmem:[#allocation9 + $0x9d4] sm:$0xf]  ;;  %v5362_v36 = vor.u32 %v7469_v18, %v5359_v24  ;;  %v3811_v24 = vpop.f32.mrf.mxu0 }
 0x22c   :  { %v6351_v28 = vld [vmem:[#allocation9 + $0x9f0] sm:$0xf0] }
 0x22d   :  { %4052 = vmatpush.bf16.msra.mxu3 %v6002_v51  ;;  %4028 = vmatpush.bf16.msra.mxu1 %v5426_v62  ;;  %v7781_v29 = vld [vmem:[#allocation9 + $0xbd4] sm:$0xf]  ;;  %v6354_v37 = vor.u32 %v7717_v27, %v6351_v28  ;;  %v3824_v27 = vpop.f32.mrf.mxu1 }
 0x22e   :  { %v6607_v31 = vld [vmem:[#allocation9 + $0xbf0] sm:$0xf0] }
 0x22f   :  { %4040 = vmatpush.bf16.msra.mxu2 %v5714_v1  ;;  %v7541_v43 = vld [vmem:[#allocation9 + $0x454] sm:$0xf]  ;;  %4016 = vmatpush.bf16.msra.mxu0 %v5138_v12  ;;  %v6610_v38 = vor.u32 %v7781_v29, %v6607_v31 }
 0x230   :  { %v5647_v32 = vld [vmem:[#allocation9 + $0x470] sm:$0xf0] }
 0x231   :  { %4053 = vmatpush.bf16.msra.mxu3 %v5970_v2  ;;  %v7605_v33 = vld [vmem:[#allocation9 + $0x654] sm:$0xf]  ;;  %4029 = vmatpush.bf16.msra.mxu1 %v5394_v15  ;;  %v5650_v30 = vor.u32 %v7541_v43, %v5647_v32  ;;  %v3812_v43 = vadd.f32 %v3811_v24, %v889_v9  ;;  %v3850_v9 = vpop.f32.mrf.mxu3 }
 0x232   :  { %v5903_v34 = vld [vmem:[#allocation9 + $0x670] sm:$0xf0] }
 0x233   :  { %4041 = vmatpush.bf16.msra.mxu2 %v5682_v20  ;;  %v7709_v40 = vld [vmem:[#allocation9 + $0x994] sm:$0xf]  ;;  %v5906_v46 = vor.u32 %v7605_v33, %v5903_v34  ;;  %4017 = vmatpush.bf16.msra.mxu0 %v5106_v35 }
 0x234   :  { %v6319_v41 = vld [vmem:[#allocation9 + $0x9b0] sm:$0xf0] }
 0x235   :  { %4054 = vmatpush.bf16.msra.mxu3 %v5938_v22  ;;  %v7773_v42 = vld [vmem:[#allocation9 + $0xb94] sm:$0xf]  ;;  %4030 = vmatpush.bf16.msra.mxu1 %v5362_v36  ;;  %v6322_v58 = vor.u32 %v7709_v40, %v6319_v41  ;;  %v3825_v36 = vadd.f32 %v3824_v27, %v3812_v43  ;;  %v7466_v43 = vld [vmem:[#allocation9 + $0x1f4] sm:$0xf0] }
 0x236   :  { %v6575_v48 = vld [vmem:[#allocation9 + $0xbb0] sm:$0xf0]  ;;  %4018 = vmatmul.bf16.vlgmr.msra.gmra.mxu0 %v8293_v13 }
 0x237   :  { %v7533_v49 = vld [vmem:[#allocation9 + $0x414] sm:$0xf]  ;;  %4062 = vmatpush.bf16.msrb.mxu0 %v6354_v37  ;;  %v6578_v59 = vor.u32 %v7773_v42, %v6575_v48  ;;  %4042 = vmatpush.bf16.msra.mxu2 %v5650_v30 }
 0x238   :  { %v5615_v50 = vld [vmem:[#allocation9 + $0x430] sm:$0xf0]  ;;  %4031 = vmatmul.bf16.vlgmr.msra.gmra.mxu1 %v8295_v14 }
 0x239   :  { %v7597_v51 = vld [vmem:[#allocation9 + $0x614] sm:$0xf]  ;;  %4075 = vmatpush.bf16.msrb.mxu1 %v6610_v38  ;;  %4055 = vmatpush.bf16.msra.mxu3 %v5906_v46  ;;  %v5618_v60 = vor.u32 %v7533_v49, %v5615_v50 }
 0x23a   :  { %v5871_v52 = vld [vmem:[#allocation9 + $0x630] sm:$0xf0] }
 0x23b   :  { %v7845_v53 = vld [vmem:[#allocation9 + $0xdd4] sm:$0xf]  ;;  %v5874_v61 = vor.u32 %v7597_v51, %v5871_v52  ;;  %4063 = vmatpush.bf16.msrb.mxu0 %v6322_v58  ;;  %4043 = vmatpush.bf16.msra.mxu2 %v5618_v60  ;;  %v3826_v58 = vpop.f32.mrf.mxu1 }
 0x23c   :  { %v6863_v54 = vld [vmem:[#allocation9 + $0xdf0] sm:$0xf0]  ;;  %v7594_v58 = vld [vmem:[#allocation9 + $0x5f4] sm:$0xf0] }
 0x23d   :  { %v7909_v23 = vld [vmem:[#allocation9 + $0xfd4] sm:$0xf]  ;;  %v6866_v0 = vor.u32 %v7845_v53, %v6863_v54  ;;  %4076 = vmatpush.bf16.msrb.mxu1 %v6578_v59  ;;  %4056 = vmatpush.bf16.msra.mxu3 %v5874_v61 }
 0x23e   :  { %v7119_v55 = vld [vmem:[#allocation9 + $0xff0] sm:$0xf0]  ;;  %4044 = vmatmul.bf16.vlgmr.msra.gmra.mxu2 %v8301_v44 }
 0x23f   :  { %v7701_v62 = vld [vmem:[#allocation9 + $0x954] sm:$0xf]  ;;  %v7122_v1 = vor.u32 %v7909_v23, %v7119_v55  ;;  %4088 = vmatpush.bf16.msrb.mxu2 %v6866_v0  ;;  %v3813_v55 = vpop.f32.mrf.mxu0 }
 0x240   :  { %v6287_v63 = vld [vmem:[#allocation9 + $0x970] sm:$0xf0]  ;;  %4057 = vmatmul.bf16.vlgmr.msra.gmra.mxu3 %v8303_v45  ;;  %v5845_v55 = vld [vmem:[#allocation9 + $0x5d8] sm:$0xf] }
 0x241   :  { %v7765_v2 = vld [vmem:[#allocation9 + $0xb54] sm:$0xf]  ;;  %v6290_v10 = vor.u32 %v7701_v62, %v6287_v63  ;;  %4101 = vmatpush.bf16.msrb.mxu3 %v7122_v1 }
 0x242   :  { %v6543_v3 = vld [vmem:[#allocation9 + $0xb70] sm:$0xf0] }
 0x243   :  { %v7837_v4 = vld [vmem:[#allocation9 + $0xd94] sm:$0xf]  ;;  %v6546_v11 = vor.u32 %v7765_v2, %v6543_v3  ;;  %4064 = vmatpush.bf16.msrb.mxu0 %v6290_v10 }
 0x244   :  { %v6831_v5 = vld [vmem:[#allocation9 + $0xdb0] sm:$0xf0] }
 0x245   :  { %v7901_v6 = vld [vmem:[#allocation9 + $0xf94] sm:$0xf]  ;;  %v6834_v16 = vor.u32 %v7837_v4, %v6831_v5  ;;  %4077 = vmatpush.bf16.msrb.mxu1 %v6546_v11 }
 0x246   :  { %v7087_v7 = vld [vmem:[#allocation9 + $0xfb0] sm:$0xf0] }
 0x247   :  { %v7693_v12 = vld [vmem:[#allocation9 + $0x914] sm:$0xf]  ;;  %v7090_v17 = vor.u32 %v7901_v6, %v7087_v7  ;;  %4089 = vmatpush.bf16.msrb.mxu2 %v6834_v16  ;;  %v3837_v7 = vpop.f32.mrf.mxu2 }
 0x248   :  { %v6255_v15 = vld [vmem:[#allocation9 + $0x930] sm:$0xf0] }
 0x249   :  { %v7757_v18 = vld [vmem:[#allocation9 + $0xb14] sm:$0xf]  ;;  %v6258_v32 = vor.u32 %v7693_v12, %v6255_v15  ;;  %4102 = vmatpush.bf16.msrb.mxu3 %v7090_v17  ;;  %v3838_v15 = vadd.f32 %v3837_v7, %v3825_v36  ;;  %v5813_v7 = vld [vmem:[#allocation9 + $0x598] sm:$0xf] }
 0x24a   :  { %v6511_v20 = vld [vmem:[#allocation9 + $0xb30] sm:$0xf0] }
 0x24b   :  { %v7829_v22 = vld [vmem:[#allocation9 + $0xd54] sm:$0xf]  ;;  %v6514_v33 = vor.u32 %v7757_v18, %v6511_v20  ;;  %4065 = vmatpush.bf16.msrb.mxu0 %v6258_v32  ;;  %v8378_v24 = vadd.f32 %v3850_v9, %v3838_v15  ;;  %v5589_v32 = vld [vmem:[#allocation9 + $0x3d8] sm:$0xf] }
 0x24c   :  { %v6799_v28 = vld [vmem:[#allocation9 + $0xd70] sm:$0xf0]  ;;  %v7586_v9 = vld [vmem:[#allocation9 + $0x5b4] sm:$0xf0] }
 0x24d   :  { %v7893_v29 = vld [vmem:[#allocation9 + $0xf54] sm:$0xf]  ;;  %v6802_v37 = vor.u32 %v7829_v22, %v6799_v28  ;;  %4078 = vmatpush.bf16.msrb.mxu1 %v6514_v33  ;;  %v7530_v33 = vld [vmem:[#allocation9 + $0x3f4] sm:$0xf0] }
 0x24e   :  { %v7055_v31 = vld [vmem:[#allocation9 + $0xf70] sm:$0xf0] }
 0x24f   :  { %v7685_v34 = vld [vmem:[#allocation9 + $0x8d4] sm:$0xf]  ;;  %v7058_v38 = vor.u32 %v7893_v29, %v7055_v31  ;;  %4090 = vmatpush.bf16.msrb.mxu2 %v6802_v37  ;;  %v5333_v31 = vld [vmem:[#allocation9 + $0x1d8] sm:$0xf] }
 0x250   :  { %v6223_v35 = vld [vmem:[#allocation9 + $0x8f0] sm:$0xf0] }
 0x251   :  { %v7749_v40 = vld [vmem:[#allocation9 + $0xad4] sm:$0xf]  ;;  %v6226_v47 = vor.u32 %v7685_v34, %v6223_v35  ;;  %4103 = vmatpush.bf16.msrb.mxu3 %v7058_v38 }
 0x252   :  { %v6479_v41 = vld [vmem:[#allocation9 + $0xaf0] sm:$0xf0] }
 0x253   :  { %v7821_v42 = vld [vmem:[#allocation9 + $0xd14] sm:$0xf]  ;;  %v6482_v48 = vor.u32 %v7749_v40, %v6479_v41  ;;  %4066 = vmatpush.bf16.msrb.mxu0 %v6226_v47  ;;  %v5334_v41 = vor.u32 %v7466_v43, %v5333_v31  ;;  %v3876_v31 = vpop.f32.mrf.mxu1  ;;  %v7578_v43 = vld [vmem:[#allocation9 + $0x574] sm:$0xf0] }
 0x254   :  { %v6767_v30 = vld [vmem:[#allocation9 + $0xd30] sm:$0xf0] }
 0x255   :  { %v7885_v46 = vld [vmem:[#allocation9 + $0xf14] sm:$0xf]  ;;  %v6770_v51 = vor.u32 %v7821_v42, %v6767_v30  ;;  %4079 = vmatpush.bf16.msrb.mxu1 %v6482_v48  ;;  %v5590_v42 = vor.u32 %v7530_v33, %v5589_v32  ;;  %v5301_v30 = vld [vmem:[#allocation9 + $0x198] sm:$0xf] }
 0x256   :  { %v7023_v21 = vld [vmem:[#allocation9 + $0xf30] sm:$0xf0]  ;;  %v6037_v32 = vld [vmem:[#allocation9 + $0x758] sm:$0xf] }
 0x257   :  { %v7677_v49 = vld [vmem:[#allocation9 + $0x894] sm:$0xf]  ;;  %v7026_v52 = vor.u32 %v7885_v46, %v7023_v21  ;;  %4091 = vmatpush.bf16.msrb.mxu2 %v6770_v51  ;;  %v7458_v46 = vld [vmem:[#allocation9 + $0x1b4] sm:$0xf0] }
 0x258   :  { %v6191_v50 = vld [vmem:[#allocation9 + $0x8b0] sm:$0xf0]  ;;  %v5557_v21 = vld [vmem:[#allocation9 + $0x398] sm:$0xf] }
 0x259   :  { %v7741_v53 = vld [vmem:[#allocation9 + $0xa94] sm:$0xf]  ;;  %v6194_v62 = vor.u32 %v7677_v49, %v6191_v50  ;;  %4104 = vmatpush.bf16.msrb.mxu3 %v7026_v52  ;;  %v3839_v49 = vpop.f32.mrf.mxu2  ;;  %v3852_v50 = vpop.f32.mrf.mxu3  ;;  %v7522_v51 = vld [vmem:[#allocation9 + $0x3b4] sm:$0xf0] }
 0x25a   :  { %v6447_v54 = vld [vmem:[#allocation9 + $0xab0] sm:$0xf0]  ;;  %v7642_v33 = vld [vmem:[#allocation9 + $0x774] sm:$0xf0] }
 0x25b   :  { %v7813_v23 = vld [vmem:[#allocation9 + $0xcd4] sm:$0xf]  ;;  %v6450_v63 = vor.u32 %v7741_v53, %v6447_v54  ;;  %4067 = vmatpush.bf16.msrb.mxu0 %v6194_v62  ;;  %v5558_v62 = vor.u32 %v7522_v51, %v5557_v21  ;;  %v5749_v21 = vld [vmem:[#allocation9 + $0x518] sm:$0xf] }
 0x25c   :  { %v6735_v59 = vld [vmem:[#allocation9 + $0xcf0] sm:$0xf0]  ;;  %v7634_v49 = vld [vmem:[#allocation9 + $0x734] sm:$0xf0] }
 0x25d   :  { %v7877_v60 = vld [vmem:[#allocation9 + $0xed4] sm:$0xf]  ;;  %v6738_v2 = vor.u32 %v7813_v23, %v6735_v59  ;;  %4080 = vmatpush.bf16.msrb.mxu1 %v6450_v63  ;;  %v6101_v59 = vld [vmem:[#allocation9 + $0x7d8] sm:$0xf] }
 0x25e   :  { %v6991_v61 = vld [vmem:[#allocation9 + $0xef0] sm:$0xf0]  ;;  %v5173_v51 = vld [vmem:[#allocation9 + $0x98] sm:$0xf] }
 0x25f   :  { %v7669_v0 = vld [vmem:[#allocation9 + $0x854] sm:$0xf]  ;;  %v6994_v3 = vor.u32 %v7877_v60, %v6991_v61  ;;  %4092 = vmatpush.bf16.msrb.mxu2 %v6738_v2  ;;  %v7658_v60 = vld [vmem:[#allocation9 + $0x7f4] sm:$0xf0]  ;;  %v5302_v61 = vor.u32 %v7458_v46, %v5301_v30 }
 0x260   :  { %v6159_v1 = vld [vmem:[#allocation9 + $0x870] sm:$0xf0]  ;;  %v7450_v2 = vld [vmem:[#allocation9 + $0x174] sm:$0xf0] }
 0x261   :  { %v7733_v4 = vld [vmem:[#allocation9 + $0xa54] sm:$0xf]  ;;  %v6162_v16 = vor.u32 %v7669_v0, %v6159_v1  ;;  %4105 = vmatpush.bf16.msrb.mxu3 %v6994_v3  ;;  %v5269_v1 = vld [vmem:[#allocation9 + $0x158] sm:$0xf]  ;;  %v5846_v3 = vor.u32 %v7594_v58, %v5845_v55 }
 0x262   :  { %v6415_v5 = vld [vmem:[#allocation9 + $0xa70] sm:$0xf0]  ;;  %v5461_v30 = vld [vmem:[#allocation9 + $0x2d8] sm:$0xf] }
 0x263   :  { %v7805_v6 = vld [vmem:[#allocation9 + $0xc94] sm:$0xf]  ;;  %v6418_v17 = vor.u32 %v7733_v4, %v6415_v5  ;;  %4068 = vmatpush.bf16.msrb.mxu0 %v6162_v16  ;;  %v6102_v4 = vor.u32 %v7658_v60, %v6101_v59  ;;  %v5525_v5 = vld [vmem:[#allocation9 + $0x358] sm:$0xf]  ;;  %v3878_v60 = vpop.f32.mrf.mxu1 }
 0x264   :  { %v6703_v10 = vld [vmem:[#allocation9 + $0xcb0] sm:$0xf0]  ;;  %v5237_v16 = vld [vmem:[#allocation9 + $0x118] sm:$0xf] }
 0x265   :  { %v7869_v11 = vld [vmem:[#allocation9 + $0xe94] sm:$0xf]  ;;  %v6706_v27 = vor.u32 %v7805_v6, %v6703_v10  ;;  %4081 = vmatpush.bf16.msrb.mxu1 %v6418_v17  ;;  %v7514_v6 = vld [vmem:[#allocation9 + $0x374] sm:$0xf0] }
 0x266   :  { %v6959_v12 = vld [vmem:[#allocation9 + $0xeb0] sm:$0xf0]  ;;  %v6069_v10 = vld [vmem:[#allocation9 + $0x798] sm:$0xf]  ;;  %v5526_v15 = vor.u32 %v7514_v6, %v5525_v5 }
 0x267   :  { %v7661_v18 = vld [vmem:[#allocation9 + $0x814] sm:$0xf]  ;;  %v6962_v28 = vor.u32 %v7869_v11, %v6959_v12  ;;  %4093 = vmatpush.bf16.msrb.mxu2 %v6706_v27  ;;  %v7650_v11 = vld [vmem:[#allocation9 + $0x7b4] sm:$0xf0]  ;;  %v5270_v12 = vor.u32 %v7450_v2, %v5269_v1 }
 0x268   :  { %v6127_v20 = vld [vmem:[#allocation9 + $0x830] sm:$0xf0]  ;;  %v7442_v17 = vld [vmem:[#allocation9 + $0x134] sm:$0xf0] }
 0x269   :  { %v7725_v22 = vld [vmem:[#allocation9 + $0xa14] sm:$0xf]  ;;  %v6130_v38 = vor.u32 %v7661_v18, %v6127_v20  ;;  %4106 = vmatpush.bf16.msrb.mxu3 %v6962_v28  ;;  %v5814_v18 = vor.u32 %v7586_v9, %v5813_v7  ;;  %v6070_v20 = vor.u32 %v7650_v11, %v6069_v10  ;;  %v7506_v27 = vld [vmem:[#allocation9 + $0x334] sm:$0xf0]  ;;  %v3889_v10 = vpop.f32.mrf.mxu2  ;;  %v3902_v11 = vpop.f32.mrf.mxu3 }
 0x26a   :  { %v6383_v29 = vld [vmem:[#allocation9 + $0xa30] sm:$0xf0]  ;;  %v5781_v28 = vld [vmem:[#allocation9 + $0x558] sm:$0xf] }
 0x26b   :  { %v7797_v34 = vld [vmem:[#allocation9 + $0xc54] sm:$0xf]  ;;  %v6386_v40 = vor.u32 %v7725_v22, %v6383_v29  ;;  %4069 = vmatpush.bf16.msrb.mxu0 %v6130_v38  ;;  %v5493_v22 = vld [vmem:[#allocation9 + $0x318] sm:$0xf]  ;;  %v3863_v29 = vpop.f32.mrf.mxu0 }
 0x26c   :  { %v6671_v35 = vld [vmem:[#allocation9 + $0xc70] sm:$0xf0]  ;;  %v7434_v38 = vld [vmem:[#allocation9 + $0xf4] sm:$0xf0] }
 0x26d   :  { %v7861_v36 = vld [vmem:[#allocation9 + $0xe54] sm:$0xf]  ;;  %v6674_v47 = vor.u32 %v7797_v34, %v6671_v35  ;;  %4082 = vmatpush.bf16.msrb.mxu1 %v6386_v40  ;;  %v3864_v34 = vadd.f32 %v3863_v29, %v8378_v24  ;;  %v5238_v35 = vor.u32 %v7442_v17, %v5237_v16  ;;  %v7498_v46 = vld [vmem:[#allocation9 + $0x2f4] sm:$0xf0] }
 0x26e   :  { %v6927_v37 = vld [vmem:[#allocation9 + $0xe70] sm:$0xf0]  ;;  %4070 = vmatmul.bf16.vlgmr.msrb.gmra.mxu0 %v8309_v25  ;;  %v5462_v50 = vor.u32 %v7498_v46, %v5461_v30  ;;  %v7490_v55 = vld [vmem:[#allocation9 + $0x2b4] sm:$0xf0] }
 0x26f   :  { %v6930_v48 = vor.u32 %v7861_v36, %v6927_v37  ;;  %v7789_v52 = vld [vmem:[#allocation9 + $0xc14] sm:$0xf]  ;;  %4114 = vmatpush.bf16.msra.mxu0 %v5334_v41  ;;  %4094 = vmatpush.bf16.msrb.mxu2 %v6674_v47  ;;  %v5494_v36 = vor.u32 %v7506_v27, %v5493_v22  ;;  %v5205_v37 = vld [vmem:[#allocation9 + $0xd8] sm:$0xf]  ;;  %v3877_v40 = vadd.f32 %v3876_v31, %v3864_v34 }
 0x270   :  { %v6639_v53 = vld [vmem:[#allocation9 + $0xc30] sm:$0xf0]  ;;  %4083 = vmatmul.bf16.vlgmr.msrb.gmra.mxu1 %v8311_v26  ;;  %v5782_v41 = vor.u32 %v7578_v43, %v5781_v28  ;;  %v7570_v47 = vld [vmem:[#allocation9 + $0x534] sm:$0xf0]  ;;  %v5206_v24 = vor.u32 %v7434_v38, %v5205_v37 }
 0x271   :  { %v7853_v54 = vld [vmem:[#allocation9 + $0xe14] sm:$0xf]  ;;  %4127 = vmatpush.bf16.msra.mxu1 %v5590_v42  ;;  %4107 = vmatpush.bf16.msrb.mxu3 %v6930_v48  ;;  %v6642_v63 = vor.u32 %v7789_v52, %v6639_v53  ;;  %v6038_v42 = vor.u32 %v7642_v33, %v6037_v32  ;;  %v6005_v48 = vld [vmem:[#allocation9 + $0x718] sm:$0xf]  ;;  %v5750_v53 = vor.u32 %v7570_v47, %v5749_v21 }
 0x272   :  { %v6895_v23 = vld [vmem:[#allocation9 + $0xe30] sm:$0xf0]  ;;  %v7426_v52 = vld [vmem:[#allocation9 + $0xb4] sm:$0xf0]  ;;  %v3890_v17 = vadd.f32 %v3889_v10, %v3877_v40  ;;  %v4324_v40 = vmax.f32 %v8369_v19, 0.0  ;;  %v3904_v19 = vpop.f32.mrf.mxu3 }
 0x273   :  { %v6898_v0 = vor.u32 %v7853_v54, %v6895_v23  ;;  %4115 = vmatpush.bf16.msra.mxu0 %v5302_v61  ;;  %4095 = vmatpush.bf16.msrb.mxu2 %v6642_v63  ;;  %v6006_v54 = vor.u32 %v7634_v49, %v6005_v48  ;;  %v5429_v23 = vld [vmem:[#allocation9 + $0x298] sm:$0xf]  ;;  %v3865_v59 = vpop.f32.mrf.mxu0 }
 0x274   :  { %v5717_v58 = vld [vmem:[#allocation9 + $0x4d8] sm:$0xf]  ;;  %v5430_v1 = vor.u32 %v7490_v55, %v5429_v23  ;;  %v3903_v31 = vadd.f32 %v3902_v11, %v3890_v17 }
 0x275   :  { %4128 = vmatpush.bf16.msra.mxu1 %v5558_v62  ;;  %4108 = vmatpush.bf16.msrb.mxu3 %v6898_v0  ;;  %v7562_v61 = vld [vmem:[#allocation9 + $0x4f4] sm:$0xf0]  ;;  %v5174_v0 = vor.u32 %v7426_v52, %v5173_v51 }
 0x276   :  { %4096 = vmatmul.bf16.vlgmr.msrb.gmra.mxu2 %v8315_v56  ;;  %v5973_v62 = vld [vmem:[#allocation9 + $0x6d8] sm:$0xf] }
 0x277   :  { %4140 = vmatpush.bf16.msra.mxu2 %v5846_v3  ;;  %4116 = vmatpush.bf16.msra.mxu0 %v5270_v12  ;;  %v7626_v63 = vld [vmem:[#allocation9 + $0x6f4] sm:$0xf0] }
 0x278   :  { %4109 = vmatmul.bf16.vlgmr.msrb.gmra.mxu3 %v8317_v57  ;;  %v5141_v2 = vld [vmem:[#allocation9 + $0x58] sm:$0xf]  ;;  %v5974_v5 = vor.u32 %v7626_v63, %v5973_v62 }
 0x279   :  { %4153 = vmatpush.bf16.msra.mxu3 %v6102_v4  ;;  %4129 = vmatpush.bf16.msra.mxu1 %v5526_v15  ;;  %v7418_v3 = vld [vmem:[#allocation9 + $0x74] sm:$0xf0]  ;;  %v5718_v4 = vor.u32 %v7562_v61, %v5717_v58 }
 0x27a   :  { %v5397_v6 = vld [vmem:[#allocation9 + $0x258] sm:$0xf] }
 0x27b   :  { %4141 = vmatpush.bf16.msra.mxu2 %v5814_v18  ;;  %4117 = vmatpush.bf16.msra.mxu0 %v5238_v35  ;;  %v7482_v7 = vld [vmem:[#allocation9 + $0x274] sm:$0xf0] }
 0x27c   :  { %v5685_v9 = vld [vmem:[#allocation9 + $0x498] sm:$0xf]  ;;  %v5398_v22 = vor.u32 %v7482_v7, %v5397_v6 }
 0x27d   :  { %4154 = vmatpush.bf16.msra.mxu3 %v6070_v20  ;;  %4130 = vmatpush.bf16.msra.mxu1 %v5494_v36  ;;  %v7554_v12 = vld [vmem:[#allocation9 + $0x4b4] sm:$0xf0]  ;;  %v5142_v20 = vor.u32 %v7418_v3, %v5141_v2 }
 0x27e   :  { %v5941_v15 = vld [vmem:[#allocation9 + $0x698] sm:$0xf]  ;;  %v5686_v43 = vor.u32 %v7554_v12, %v5685_v9 }
 0x27f   :  { %4142 = vmatpush.bf16.msra.mxu2 %v5782_v41  ;;  %4118 = vmatpush.bf16.msra.mxu0 %v5206_v24  ;;  %v7618_v16 = vld [vmem:[#allocation9 + $0x6b4] sm:$0xf0]  ;;  %v4325_v41 = vmax.f32 %v3903_v31, 0.0 }
 0x280   :  { %v5109_v18 = vld [vmem:[#allocation9 + $0x18] sm:$0xf]  ;;  %v5942_v32 = vor.u32 %v7618_v16, %v5941_v15 }
 0x281   :  { %4155 = vmatpush.bf16.msra.mxu3 %v6038_v42  ;;  %4131 = vmatpush.bf16.msra.mxu1 %v5462_v50  ;;  %v7410_v27 = vld [vmem:[#allocation9 + $0x34] sm:$0xf0]  ;;  %v8386_v47 = vpack.c.bf16 %v4325_v41, %v4324_v40 }
 0x282   :  { %v5365_v28 = vld [vmem:[#allocation9 + $0x218] sm:$0xf]  ;;  %v5110_v46 = vor.u32 %v7410_v27, %v5109_v18  ;;  %v890_v18 = vperm.slane %v8373_v8, 4 }
 0x283   :  { %4143 = vmatpush.bf16.msra.mxu2 %v5750_v53  ;;  %4119 = vmatpush.bf16.msra.mxu0 %v5174_v0  ;;  %v7474_v29 = vld [vmem:[#allocation9 + $0x234] sm:$0xf0] }
 0x284   :  { %v6357_v33 = vld [vmem:[#allocation9 + $0x9d8] sm:$0xf]  ;;  %v5366_v21 = vor.u32 %v7474_v29, %v5365_v28 }
 0x285   :  { %4156 = vmatpush.bf16.msra.mxu3 %v6006_v54  ;;  %4132 = vmatpush.bf16.msra.mxu1 %v5430_v1  ;;  %v7722_v34 = vld [vmem:[#allocation9 + $0x9f4] sm:$0xf0]  ;;  %v3891_v54 = vpop.f32.mrf.mxu2 }
 0x286   :  { %v6613_v35 = vld [vmem:[#allocation9 + $0xbd8] sm:$0xf]  ;;  %v6358_v48 = vor.u32 %v7722_v34, %v6357_v33  ;;  %v3915_v34 = vpop.f32.mrf.mxu0 }
 0x287   :  { %4144 = vmatpush.bf16.msra.mxu2 %v5718_v4  ;;  %v7786_v36 = vld [vmem:[#allocation9 + $0xbf4] sm:$0xf0]  ;;  %4120 = vmatpush.bf16.msra.mxu0 %v5142_v20  ;;  %v3916_v8 = vadd.f32 %v3915_v34, %v890_v18 }
 0x288   :  { %v5653_v37 = vld [vmem:[#allocation9 + $0x458] sm:$0xf]  ;;  %v6614_v49 = vor.u32 %v7786_v36, %v6613_v35  ;;  %v3928_v35 = vpop.f32.mrf.mxu1 }
 0x289   :  { %4157 = vmatpush.bf16.msra.mxu3 %v5974_v5  ;;  %v7546_v38 = vld [vmem:[#allocation9 + $0x474] sm:$0xf0]  ;;  %4133 = vmatpush.bf16.msra.mxu1 %v5398_v22 }
 0x28a   :  { %v5909_v42 = vld [vmem:[#allocation9 + $0x658] sm:$0xf]  ;;  %v5654_v52 = vor.u32 %v7546_v38, %v5653_v37 }
 0x28b   :  { %v7610_v30 = vld [vmem:[#allocation9 + $0x674] sm:$0xf0]  ;;  %4145 = vmatpush.bf16.msra.mxu2 %v5686_v43  ;;  %4121 = vmatpush.bf16.msra.mxu0 %v5110_v46  ;;  %v3929_v46 = vadd.f32 %v3928_v35, %v3916_v8  ;;  %v7526_v8 = vld [vmem:[#allocation9 + $0x3dc] sm:$0xf] }
 0x28c   :  { %v6325_v24 = vld [vmem:[#allocation9 + $0x998] sm:$0xf]  ;;  %v5910_v53 = vor.u32 %v7610_v30, %v5909_v42 }
 0x28d   :  { %4158 = vmatpush.bf16.msra.mxu3 %v5942_v32  ;;  %v7714_v50 = vld [vmem:[#allocation9 + $0x9b4] sm:$0xf0]  ;;  %4134 = vmatpush.bf16.msra.mxu1 %v5366_v21 }
 0x28e   :  { %v6581_v51 = vld [vmem:[#allocation9 + $0xb98] sm:$0xf]  ;;  %v6326_v1 = vor.u32 %v7714_v50, %v6325_v24  ;;  %4122 = vmatmul.bf16.vlgmr.msra.gmra.mxu0 %v8293_v13 }
 0x28f   :  { %v7778_v23 = vld [vmem:[#allocation9 + $0xbb4] sm:$0xf0]  ;;  %4166 = vmatpush.bf16.msrb.mxu0 %v6358_v48  ;;  %4146 = vmatpush.bf16.msra.mxu2 %v5654_v52 }
 0x290   :  { %v5621_v55 = vld [vmem:[#allocation9 + $0x418] sm:$0xf]  ;;  %v6582_v2 = vor.u32 %v7778_v23, %v6581_v51  ;;  %4135 = vmatmul.bf16.vlgmr.msra.gmra.mxu1 %v8295_v14 }
 0x291   :  { %v7538_v58 = vld [vmem:[#allocation9 + $0x434] sm:$0xf0]  ;;  %4179 = vmatpush.bf16.msrb.mxu1 %v6614_v49  ;;  %4159 = vmatpush.bf16.msra.mxu3 %v5910_v53 }
 0x292   :  { %v5877_v59 = vld [vmem:[#allocation9 + $0x618] sm:$0xf]  ;;  %v5622_v3 = vor.u32 %v7538_v58, %v5621_v55 }
 0x293   :  { %v7602_v60 = vld [vmem:[#allocation9 + $0x634] sm:$0xf0]  ;;  %4167 = vmatpush.bf16.msrb.mxu0 %v6326_v1 }
 0x294   :  { %v6869_v61 = vld [vmem:[#allocation9 + $0xdd8] sm:$0xf]  ;;  %v5878_v4 = vor.u32 %v7602_v60, %v5877_v59  ;;  %4147 = vmatpush.bf16.msra.mxu2 %v5622_v3 }
 0x295   :  { %v7850_v62 = vld [vmem:[#allocation9 + $0xdf4] sm:$0xf0]  ;;  %4180 = vmatpush.bf16.msrb.mxu1 %v6582_v2 }
 0x296   :  { %v7125_v63 = vld [vmem:[#allocation9 + $0xfd8] sm:$0xf]  ;;  %v6870_v7 = vor.u32 %v7850_v62, %v6869_v61  ;;  %4160 = vmatpush.bf16.msra.mxu3 %v5878_v4 }
 0x297   :  { %v7914_v0 = vld [vmem:[#allocation9 + $0xff4] sm:$0xf0]  ;;  %4148 = vmatmul.bf16.vlgmr.msra.gmra.mxu2 %v8301_v44 }
 0x298   :  { %v6293_v5 = vld [vmem:[#allocation9 + $0x958] sm:$0xf]  ;;  %v7126_v9 = vor.u32 %v7914_v0, %v7125_v63  ;;  %4192 = vmatpush.bf16.msrb.mxu2 %v6870_v7  ;;  %v3917_v63 = vpop.f32.mrf.mxu0  ;;  %v3930_v0 = vpop.f32.mrf.mxu1 }
 0x299   :  { %v7706_v6 = vld [vmem:[#allocation9 + $0x974] sm:$0xf0]  ;;  %4161 = vmatmul.bf16.vlgmr.msra.gmra.mxu3 %v8303_v45  ;;  %v5847_v63 = vld [vmem:[#allocation9 + $0x5f8] sm:$0xf0] }
 0x29a   :  { %v6549_v10 = vld [vmem:[#allocation9 + $0xb58] sm:$0xf]  ;;  %v6294_v20 = vor.u32 %v7706_v6, %v6293_v5  ;;  %4205 = vmatpush.bf16.msrb.mxu3 %v7126_v9  ;;  %v7654_v0 = vld [vmem:[#allocation9 + $0x7dc] sm:$0xf] }
 0x29b   :  { %v7770_v11 = vld [vmem:[#allocation9 + $0xb74] sm:$0xf0] }
 0x29c   :  { %v6837_v12 = vld [vmem:[#allocation9 + $0xd98] sm:$0xf]  ;;  %v6550_v22 = vor.u32 %v7770_v11, %v6549_v10  ;;  %4168 = vmatpush.bf16.msrb.mxu0 %v6294_v20 }
 0x29d   :  { %v7842_v15 = vld [vmem:[#allocation9 + $0xdb4] sm:$0xf0] }
 0x29e   :  { %v7093_v16 = vld [vmem:[#allocation9 + $0xf98] sm:$0xf]  ;;  %v6838_v29 = vor.u32 %v7842_v15, %v6837_v12  ;;  %4181 = vmatpush.bf16.msrb.mxu1 %v6550_v22 }
 0x29f   :  { %v7906_v17 = vld [vmem:[#allocation9 + $0xfb4] sm:$0xf0] }
 0x2a0   :  { %v6261_v27 = vld [vmem:[#allocation9 + $0x918] sm:$0xf]  ;;  %v7094_v31 = vor.u32 %v7906_v17, %v7093_v16  ;;  %4193 = vmatpush.bf16.msrb.mxu2 %v6838_v29  ;;  %v3941_v16 = vpop.f32.mrf.mxu2  ;;  %v3954_v17 = vpop.f32.mrf.mxu3 }
 0x2a1   :  { %v7698_v28 = vld [vmem:[#allocation9 + $0x934] sm:$0xf0] }
 0x2a2   :  { %v6517_v43 = vld [vmem:[#allocation9 + $0xb18] sm:$0xf]  ;;  %v6262_v40 = vor.u32 %v7698_v28, %v6261_v27  ;;  %4206 = vmatpush.bf16.msrb.mxu3 %v7094_v31  ;;  %v3942_v27 = vadd.f32 %v3941_v16, %v3929_v46  ;;  %v5815_v16 = vld [vmem:[#allocation9 + $0x5b8] sm:$0xf0] }
 0x2a3   :  { %v7762_v32 = vld [vmem:[#allocation9 + $0xb34] sm:$0xf0] }
 0x2a4   :  { %v6805_v33 = vld [vmem:[#allocation9 + $0xd58] sm:$0xf]  ;;  %v6518_v41 = vor.u32 %v7762_v32, %v6517_v43  ;;  %4169 = vmatpush.bf16.msrb.mxu0 %v6262_v40  ;;  %v5591_v40 = vld [vmem:[#allocation9 + $0x3f8] sm:$0xf0] }
 0x2a5   :  { %v7834_v36 = vld [vmem:[#allocation9 + $0xd74] sm:$0xf0] }
 0x2a6   :  { %v7061_v37 = vld [vmem:[#allocation9 + $0xf58] sm:$0xf]  ;;  %v6806_v21 = vor.u32 %v7834_v36, %v6805_v33  ;;  %4182 = vmatpush.bf16.msrb.mxu1 %v6518_v41  ;;  %v8393_v33 = vadd.f32 %v3954_v17, %v3942_v27  ;;  %v7646_v17 = vld [vmem:[#allocation9 + $0x79c] sm:$0xf] }
 0x2a7   :  { %v7898_v38 = vld [vmem:[#allocation9 + $0xf74] sm:$0xf0]  ;;  %v7438_v27 = vld [vmem:[#allocation9 + $0x11c] sm:$0xf] }
 0x2a8   :  { %v6229_v42 = vld [vmem:[#allocation9 + $0x8d8] sm:$0xf]  ;;  %v7062_v48 = vor.u32 %v7898_v38, %v7061_v37  ;;  %4194 = vmatpush.bf16.msrb.mxu2 %v6806_v21  ;;  %v7462_v37 = vld [vmem:[#allocation9 + $0x1dc] sm:$0xf] }
 0x2a9   :  { %v7690_v30 = vld [vmem:[#allocation9 + $0x8f4] sm:$0xf0]  ;;  %v5335_v38 = vld [vmem:[#allocation9 + $0x1f8] sm:$0xf0] }
 0x2aa   :  { %v6485_v49 = vld [vmem:[#allocation9 + $0xad8] sm:$0xf]  ;;  %v6230_v54 = vor.u32 %v7690_v30, %v6229_v42  ;;  %4207 = vmatpush.bf16.msrb.mxu3 %v7062_v48 }
 0x2ab   :  { %v7754_v24 = vld [vmem:[#allocation9 + $0xaf4] sm:$0xf0] }
 0x2ac   :  { %v6773_v50 = vld [vmem:[#allocation9 + $0xd18] sm:$0xf]  ;;  %v6486_v19 = vor.u32 %v7754_v24, %v6485_v49  ;;  %4170 = vmatpush.bf16.msrb.mxu0 %v6230_v54  ;;  %v5338_v49 = vor.u32 %v7462_v37, %v5335_v38  ;;  %v5594_v24 = vor.u32 %v7526_v8, %v5591_v40  ;;  %v5783_v37 = vld [vmem:[#allocation9 + $0x578] sm:$0xf0] }
 0x2ad   :  { %v7826_v51 = vld [vmem:[#allocation9 + $0xd34] sm:$0xf0]  ;;  %v7638_v38 = vld [vmem:[#allocation9 + $0x75c] sm:$0xf] }
 0x2ae   :  { %v7029_v52 = vld [vmem:[#allocation9 + $0xf18] sm:$0xf]  ;;  %v6774_v58 = vor.u32 %v7826_v51, %v6773_v50  ;;  %4183 = vmatpush.bf16.msrb.mxu1 %v6486_v19  ;;  %v7454_v50 = vld [vmem:[#allocation9 + $0x19c] sm:$0xf]  ;;  %v3943_v19 = vpop.f32.mrf.mxu2 }
 0x2af   :  { %v7890_v53 = vld [vmem:[#allocation9 + $0xf34] sm:$0xf0]  ;;  %v5303_v51 = vld [vmem:[#allocation9 + $0x1b8] sm:$0xf0] }
 0x2b0   :  { %v6197_v23 = vld [vmem:[#allocation9 + $0x898] sm:$0xf]  ;;  %v7030_v59 = vor.u32 %v7890_v53, %v7029_v52  ;;  %4195 = vmatpush.bf16.msrb.mxu2 %v6774_v58  ;;  %v7518_v52 = vld [vmem:[#allocation9 + $0x39c] sm:$0xf] }
 0x2b1   :  { %v7682_v55 = vld [vmem:[#allocation9 + $0x8b4] sm:$0xf0]  ;;  %v6039_v8 = vld [vmem:[#allocation9 + $0x778] sm:$0xf0] }
 0x2b2   :  { %v6453_v60 = vld [vmem:[#allocation9 + $0xa98] sm:$0xf]  ;;  %v6198_v4 = vor.u32 %v7682_v55, %v6197_v23  ;;  %4208 = vmatpush.bf16.msrb.mxu3 %v7030_v59  ;;  %v3956_v23 = vpop.f32.mrf.mxu3  ;;  %v5559_v55 = vld [vmem:[#allocation9 + $0x3b8] sm:$0xf0] }
 0x2b3   :  { %v7746_v61 = vld [vmem:[#allocation9 + $0xab4] sm:$0xf0]  ;;  %v7422_v23 = vld [vmem:[#allocation9 + $0x9c] sm:$0xf] }
 0x2b4   :  { %v6741_v62 = vld [vmem:[#allocation9 + $0xcd8] sm:$0xf]  ;;  %v6454_v5 = vor.u32 %v7746_v61, %v6453_v60  ;;  %4171 = vmatpush.bf16.msrb.mxu0 %v6198_v4 }
 0x2b5   :  { %v7818_v1 = vld [vmem:[#allocation9 + $0xcf4] sm:$0xf0] }
 0x2b6   :  { %v6997_v2 = vld [vmem:[#allocation9 + $0xed8] sm:$0xf]  ;;  %v6742_v9 = vor.u32 %v7818_v1, %v6741_v62  ;;  %4184 = vmatpush.bf16.msrb.mxu1 %v6454_v5  ;;  %v7590_v62 = vld [vmem:[#allocation9 + $0x5dc] sm:$0xf] }
 0x2b7   :  { %v7882_v3 = vld [vmem:[#allocation9 + $0xef4] sm:$0xf0]  ;;  %v6103_v1 = vld [vmem:[#allocation9 + $0x7f8] sm:$0xf0] }
 0x2b8   :  { %v6165_v6 = vld [vmem:[#allocation9 + $0x858] sm:$0xf]  ;;  %v6998_v10 = vor.u32 %v7882_v3, %v6997_v2  ;;  %4196 = vmatpush.bf16.msrb.mxu2 %v6742_v9  ;;  %v5306_v2 = vor.u32 %v7454_v50, %v5303_v51  ;;  %v5562_v3 = vor.u32 %v7518_v52, %v5559_v55  ;;  %v5850_v9 = vor.u32 %v7590_v62, %v5847_v63  ;;  %v5463_v50 = vld [vmem:[#allocation9 + $0x2f8] sm:$0xf0] }
 0x2b9   :  { %v7674_v7 = vld [vmem:[#allocation9 + $0x874] sm:$0xf0]  ;;  %v7566_v51 = vld [vmem:[#allocation9 + $0x51c] sm:$0xf] }
 0x2ba   :  { %v6421_v11 = vld [vmem:[#allocation9 + $0xa58] sm:$0xf]  ;;  %v6166_v28 = vor.u32 %v7674_v7, %v6165_v6  ;;  %4209 = vmatpush.bf16.msrb.mxu3 %v6998_v10  ;;  %v7446_v6 = vld [vmem:[#allocation9 + $0x15c] sm:$0xf]  ;;  %v6106_v10 = vor.u32 %v7654_v0, %v6103_v1 }
 0x2bb   :  { %v7738_v12 = vld [vmem:[#allocation9 + $0xa74] sm:$0xf0]  ;;  %v5271_v7 = vld [vmem:[#allocation9 + $0x178] sm:$0xf0] }
 0x2bc   :  { %v6709_v15 = vld [vmem:[#allocation9 + $0xc98] sm:$0xf]  ;;  %v6422_v29 = vor.u32 %v7738_v12, %v6421_v11  ;;  %4172 = vmatpush.bf16.msrb.mxu0 %v6166_v28  ;;  %v7510_v11 = vld [vmem:[#allocation9 + $0x35c] sm:$0xf] }
 0x2bd   :  { %v7810_v18 = vld [vmem:[#allocation9 + $0xcb4] sm:$0xf0]  ;;  %v5527_v12 = vld [vmem:[#allocation9 + $0x378] sm:$0xf0] }
 0x2be   :  { %v6965_v20 = vld [vmem:[#allocation9 + $0xe98] sm:$0xf]  ;;  %v6710_v34 = vor.u32 %v7810_v18, %v6709_v15  ;;  %4185 = vmatpush.bf16.msrb.mxu1 %v6422_v29  ;;  %v7582_v15 = vld [vmem:[#allocation9 + $0x59c] sm:$0xf] }
 0x2bf   :  { %v7874_v22 = vld [vmem:[#allocation9 + $0xeb4] sm:$0xf0]  ;;  %v6071_v18 = vld [vmem:[#allocation9 + $0x7b8] sm:$0xf0]  ;;  %v5818_v29 = vor.u32 %v7582_v15, %v5815_v16  ;;  %v3993_v16 = vpop.f32.mrf.mxu2 }
 0x2c0   :  { %v6133_v31 = vld [vmem:[#allocation9 + $0x818] sm:$0xf]  ;;  %v6966_v35 = vor.u32 %v7874_v22, %v6965_v20  ;;  %4197 = vmatpush.bf16.msrb.mxu2 %v6710_v34  ;;  %v5274_v20 = vor.u32 %v7446_v6, %v5271_v7  ;;  %v5530_v22 = vor.u32 %v7510_v11, %v5527_v12  ;;  %v5239_v28 = vld [vmem:[#allocation9 + $0x138] sm:$0xf0] }
 0x2c1   :  { %v7666_v43 = vld [vmem:[#allocation9 + $0x834] sm:$0xf0]  ;;  %v7574_v34 = vld [vmem:[#allocation9 + $0x55c] sm:$0xf] }
 0x2c2   :  { %v6389_v32 = vld [vmem:[#allocation9 + $0xa18] sm:$0xf]  ;;  %v6134_v21 = vor.u32 %v7666_v43, %v6133_v31  ;;  %4210 = vmatpush.bf16.msrb.mxu3 %v6966_v35  ;;  %v6074_v31 = vor.u32 %v7646_v17, %v6071_v18  ;;  %v7502_v43 = vld [vmem:[#allocation9 + $0x31c] sm:$0xf]  ;;  %v3967_v35 = vpop.f32.mrf.mxu0  ;;  %v4006_v17 = vpop.f32.mrf.mxu3 }
 0x2c3   :  { %v7730_v36 = vld [vmem:[#allocation9 + $0xa34] sm:$0xf0]  ;;  %v3968_v40 = vadd.f32 %v3967_v35, %v8393_v33  ;;  %v5751_v52 = vld [vmem:[#allocation9 + $0x538] sm:$0xf0] }
 0x2c4   :  { %v6677_v41 = vld [vmem:[#allocation9 + $0xc58] sm:$0xf]  ;;  %v6390_v48 = vor.u32 %v7730_v36, %v6389_v32  ;;  %4173 = vmatpush.bf16.msrb.mxu0 %v6134_v21  ;;  %v5495_v32 = vld [vmem:[#allocation9 + $0x338] sm:$0xf0]  ;;  %v3980_v36 = vpop.f32.mrf.mxu1 }
 0x2c5   :  { %v7802_v42 = vld [vmem:[#allocation9 + $0xc74] sm:$0xf0]  ;;  %v3981_v21 = vadd.f32 %v3980_v36, %v3968_v40  ;;  %v5175_v55 = vld [vmem:[#allocation9 + $0xb8] sm:$0xf0] }
 0x2c6   :  { %v6933_v30 = vld [vmem:[#allocation9 + $0xe58] sm:$0xf]  ;;  %v6678_v53 = vor.u32 %v7802_v42, %v6677_v41  ;;  %4186 = vmatpush.bf16.msrb.mxu1 %v6390_v48  ;;  %v5242_v41 = vor.u32 %v7438_v27, %v5239_v28  ;;  %v5498_v42 = vor.u32 %v7502_v43, %v5495_v32  ;;  %v5786_v48 = vor.u32 %v7574_v34, %v5783_v37  ;;  %v7558_v62 = vld [vmem:[#allocation9 + $0x4dc] sm:$0xf] }
 0x2c7   :  { %v7866_v46 = vld [vmem:[#allocation9 + $0xe74] sm:$0xf0]  ;;  %4174 = vmatmul.bf16.vlgmr.msrb.gmra.mxu0 %v8309_v25  ;;  %v5719_v1 = vld [vmem:[#allocation9 + $0x4f8] sm:$0xf0]  ;;  %v3994_v27 = vadd.f32 %v3993_v16, %v3981_v21 }
 0x2c8   :  { %v6934_v54 = vor.u32 %v7866_v46, %v6933_v30  ;;  %v6645_v58 = vld [vmem:[#allocation9 + $0xc18] sm:$0xf]  ;;  %4218 = vmatpush.bf16.msra.mxu0 %v5338_v49  ;;  %4198 = vmatpush.bf16.msrb.mxu2 %v6678_v53  ;;  %v7430_v30 = vld [vmem:[#allocation9 + $0xdc] sm:$0xf]  ;;  %v6042_v49 = vor.u32 %v7638_v38, %v6039_v8 }
 0x2c9   :  { %v7794_v59 = vld [vmem:[#allocation9 + $0xc34] sm:$0xf0]  ;;  %4187 = vmatmul.bf16.vlgmr.msrb.gmra.mxu1 %v8311_v26  ;;  %v5207_v46 = vld [vmem:[#allocation9 + $0xf8] sm:$0xf0]  ;;  %v8400_v34 = vadd.f32 %v4006_v17, %v3994_v27 }
 0x2ca   :  { %v6901_v60 = vld [vmem:[#allocation9 + $0xe18] sm:$0xf]  ;;  %4231 = vmatpush.bf16.msra.mxu1 %v5594_v24  ;;  %4211 = vmatpush.bf16.msrb.mxu3 %v6934_v54  ;;  %v6646_v4 = vor.u32 %v7794_v59, %v6645_v58  ;;  %v7494_v24 = vld [vmem:[#allocation9 + $0x2dc] sm:$0xf]  ;;  %v5210_v33 = vor.u32 %v7430_v30, %v5207_v46  ;;  %v5754_v58 = vor.u32 %v7566_v51, %v5751_v52  ;;  %v3969_v63 = vpop.f32.mrf.mxu0 }
 0x2cb   :  { %v7858_v61 = vld [vmem:[#allocation9 + $0xe34] sm:$0xf0]  ;;  %v7630_v53 = vld [vmem:[#allocation9 + $0x71c] sm:$0xf]  ;;  %v5466_v19 = vor.u32 %v7494_v24, %v5463_v50 }
 0x2cc   :  { %v6902_v5 = vor.u32 %v7858_v61, %v6901_v60  ;;  %4219 = vmatpush.bf16.msra.mxu0 %v5306_v2  ;;  %4199 = vmatpush.bf16.msrb.mxu2 %v6646_v4  ;;  %v6007_v54 = vld [vmem:[#allocation9 + $0x738] sm:$0xf0]  ;;  %v3982_v0 = vpop.f32.mrf.mxu1  ;;  %v5178_v4 = vor.u32 %v7422_v23, %v5175_v55  ;;  %v4008_v23 = vpop.f32.mrf.mxu3 }
 0x2cd   :  { %v6010_v59 = vor.u32 %v7630_v53, %v6007_v54  ;;  %v7486_v60 = vld [vmem:[#allocation9 + $0x29c] sm:$0xf] }
 0x2ce   :  { %4232 = vmatpush.bf16.msra.mxu1 %v5562_v3  ;;  %4212 = vmatpush.bf16.msrb.mxu3 %v6902_v5  ;;  %v5431_v61 = vld [vmem:[#allocation9 + $0x2b8] sm:$0xf0] }
 0x2cf   :  { %4200 = vmatmul.bf16.vlgmr.msrb.gmra.mxu2 %v8315_v56  ;;  %v7622_v2 = vld [vmem:[#allocation9 + $0x6dc] sm:$0xf]  ;;  %v5434_v5 = vor.u32 %v7486_v60, %v5431_v61 }
 0x2d0   :  { %4244 = vmatpush.bf16.msra.mxu2 %v5850_v9  ;;  %4220 = vmatpush.bf16.msra.mxu0 %v5274_v20  ;;  %v5975_v3 = vld [vmem:[#allocation9 + $0x6f8] sm:$0xf0]  ;;  %v5722_v9 = vor.u32 %v7558_v62, %v5719_v1 }
 0x2d1   :  { %4213 = vmatmul.bf16.vlgmr.msrb.gmra.mxu3 %v8317_v57  ;;  %v7414_v6 = vld [vmem:[#allocation9 + $0x5c] sm:$0xf] }
 0x2d2   :  { %4257 = vmatpush.bf16.msra.mxu3 %v6106_v10  ;;  %4233 = vmatpush.bf16.msra.mxu1 %v5530_v22  ;;  %v5143_v7 = vld [vmem:[#allocation9 + $0x78] sm:$0xf0]  ;;  %v5978_v10 = vor.u32 %v7622_v2, %v5975_v3 }
 0x2d3   :  { %v7478_v11 = vld [vmem:[#allocation9 + $0x25c] sm:$0xf]  ;;  %v5146_v28 = vor.u32 %v7414_v6, %v5143_v7 }
 0x2d4   :  { %4245 = vmatpush.bf16.msra.mxu2 %v5818_v29  ;;  %4221 = vmatpush.bf16.msra.mxu0 %v5242_v41  ;;  %v5399_v12 = vld [vmem:[#allocation9 + $0x278] sm:$0xf0] }
 0x2d5   :  { %v7550_v15 = vld [vmem:[#allocation9 + $0x49c] sm:$0xf]  ;;  %v5402_v29 = vor.u32 %v7478_v11, %v5399_v12 }
 0x2d6   :  { %4258 = vmatpush.bf16.msra.mxu3 %v6074_v31  ;;  %4234 = vmatpush.bf16.msra.mxu1 %v5498_v42  ;;  %v5687_v18 = vld [vmem:[#allocation9 + $0x4b8] sm:$0xf0] }
 0x2d7   :  { %v7614_v20 = vld [vmem:[#allocation9 + $0x69c] sm:$0xf]  ;;  %v5690_v35 = vor.u32 %v7550_v15, %v5687_v18 }
 0x2d8   :  { %4246 = vmatpush.bf16.msra.mxu2 %v5786_v48  ;;  %4222 = vmatpush.bf16.msra.mxu0 %v5210_v33  ;;  %v5943_v22 = vld [vmem:[#allocation9 + $0x6b8] sm:$0xf0] }
 0x2d9   :  { %v7406_v31 = vld [vmem:[#allocation9 + $0x1c] sm:$0xf]  ;;  %v5946_v36 = vor.u32 %v7614_v20, %v5943_v22 }
 0x2da   :  { %4259 = vmatpush.bf16.msra.mxu3 %v6042_v49  ;;  %4235 = vmatpush.bf16.msra.mxu1 %v5466_v19  ;;  %v5111_v43 = vld [vmem:[#allocation9 + $0x38] sm:$0xf0]  ;;  %v3995_v19 = vpop.f32.mrf.mxu2 }
 0x2db   :  { %v7470_v32 = vld [vmem:[#allocation9 + $0x21c] sm:$0xf]  ;;  %v5114_v48 = vor.u32 %v7406_v31, %v5111_v43 }
 0x2dc   :  { %4247 = vmatpush.bf16.msra.mxu2 %v5754_v58  ;;  %4223 = vmatpush.bf16.msra.mxu0 %v5178_v4  ;;  %v5367_v37 = vld [vmem:[#allocation9 + $0x238] sm:$0xf0] }
 0x2dd   :  { %v7718_v38 = vld [vmem:[#allocation9 + $0x9dc] sm:$0xf]  ;;  %v5370_v49 = vor.u32 %v7470_v32, %v5367_v37  ;;  %v8404_v32 = vpop.f32.mrf.mxu0 }
 0x2de   :  { %4260 = vmatpush.bf16.msra.mxu3 %v6010_v59  ;;  %4236 = vmatpush.bf16.msra.mxu1 %v5434_v5  ;;  %v6359_v8 = vld [vmem:[#allocation9 + $0x9f8] sm:$0xf0] }
 0x2df   :  { %v7782_v40 = vld [vmem:[#allocation9 + $0xbdc] sm:$0xf]  ;;  %v6362_v24 = vor.u32 %v7718_v38, %v6359_v8 }
 0x2e0   :  { %4248 = vmatpush.bf16.msra.mxu2 %v5722_v9  ;;  %v6615_v41 = vld [vmem:[#allocation9 + $0xbf8] sm:$0xf0]  ;;  %4224 = vmatpush.bf16.msra.mxu0 %v5146_v28 }
 0x2e1   :  { %v7542_v42 = vld [vmem:[#allocation9 + $0x45c] sm:$0xf]  ;;  %v6618_v50 = vor.u32 %v7782_v40, %v6615_v41 }
 0x2e2   :  { %4261 = vmatpush.bf16.msra.mxu3 %v5978_v10  ;;  %v5655_v30 = vld [vmem:[#allocation9 + $0x478] sm:$0xf0]  ;;  %4237 = vmatpush.bf16.msra.mxu1 %v5402_v29 }
 0x2e3   :  { %v7606_v46 = vld [vmem:[#allocation9 + $0x65c] sm:$0xf]  ;;  %v5658_v54 = vor.u32 %v7542_v42, %v5655_v30 }
 0x2e4   :  { %v5911_v21 = vld [vmem:[#allocation9 + $0x678] sm:$0xf0]  ;;  %4249 = vmatpush.bf16.msra.mxu2 %v5690_v35  ;;  %4225 = vmatpush.bf16.msra.mxu0 %v5114_v48  ;;  %v8406_v35 = vpop.f32.mrf.mxu1 }
 0x2e5   :  { %v7710_v51 = vld [vmem:[#allocation9 + $0x99c] sm:$0xf]  ;;  %v5914_v33 = vor.u32 %v7606_v46, %v5911_v21 }
 0x2e6   :  { %4262 = vmatpush.bf16.msra.mxu3 %v5946_v36  ;;  %v6327_v52 = vld [vmem:[#allocation9 + $0x9b8] sm:$0xf0]  ;;  %4238 = vmatpush.bf16.msra.mxu1 %v5370_v49 }
 0x2e7   :  { %v7774_v53 = vld [vmem:[#allocation9 + $0xb9c] sm:$0xf]  ;;  %v6330_v2 = vor.u32 %v7710_v51, %v6327_v52  ;;  %4226 = vmatmul.bf16.vlgmr.msra.gmra.mxu0 %v8293_v13 }
 0x2e8   :  { %v6583_v55 = vld [vmem:[#allocation9 + $0xbb8] sm:$0xf0]  ;;  %4270 = vmatpush.bf16.msrb.mxu0 %v6362_v24  ;;  %4250 = vmatpush.bf16.msra.mxu2 %v5658_v54 }
 0x2e9   :  { %v7534_v58 = vld [vmem:[#allocation9 + $0x41c] sm:$0xf]  ;;  %v6586_v3 = vor.u32 %v7774_v53, %v6583_v55  ;;  %4239 = vmatmul.bf16.vlgmr.msra.gmra.mxu1 %v8295_v14 }
 0x2ea   :  { %v5623_v59 = vld [vmem:[#allocation9 + $0x438] sm:$0xf0]  ;;  %4283 = vmatpush.bf16.msrb.mxu1 %v6618_v50  ;;  %4263 = vmatpush.bf16.msra.mxu3 %v5914_v33 }
 0x2eb   :  { %v7598_v60 = vld [vmem:[#allocation9 + $0x61c] sm:$0xf]  ;;  %v5626_v4 = vor.u32 %v7534_v58, %v5623_v59  ;;  %v4021_v58 = vpop.f32.mrf.mxu0 }
 0x2ec   :  { %v5879_v61 = vld [vmem:[#allocation9 + $0x638] sm:$0xf0]  ;;  %4271 = vmatpush.bf16.msrb.mxu0 %v6330_v2  ;;  %v4034_v59 = vpop.f32.mrf.mxu1  ;;  %v7936_v58 = vld [vmem:[#allocation12 + $0xa8] sm:$0xff] }
 0x2ed   :  { %v7846_v62 = vld [vmem:[#allocation9 + $0xddc] sm:$0xf]  ;;  %v5882_v5 = vor.u32 %v7598_v60, %v5879_v61  ;;  %4251 = vmatpush.bf16.msra.mxu2 %v5626_v4  ;;  %v7944_v59 = vld [vmem:[#allocation12 + $0xe8] sm:$0xff] }
 0x2ee   :  { %v6871_v63 = vld [vmem:[#allocation9 + $0xdf8] sm:$0xf0]  ;;  %4284 = vmatpush.bf16.msrb.mxu1 %v6586_v3 }
 0x2ef   :  { %v7910_v0 = vld [vmem:[#allocation9 + $0xfdc] sm:$0xf]  ;;  %v6874_v9 = vor.u32 %v7846_v62, %v6871_v63  ;;  %4264 = vmatpush.bf16.msra.mxu3 %v5882_v5 }
 0x2f0   :  { %v7127_v1 = vld [vmem:[#allocation9 + $0xff8] sm:$0xf0]  ;;  %4252 = vmatmul.bf16.vlgmr.msra.gmra.mxu2 %v8301_v44 }
 0x2f1   :  { %v7702_v6 = vld [vmem:[#allocation9 + $0x95c] sm:$0xf]  ;;  %v7130_v10 = vor.u32 %v7910_v0, %v7127_v1  ;;  %4296 = vmatpush.bf16.msrb.mxu2 %v6874_v9  ;;  %v8410_v9 = vpop.f32.mrf.mxu2 }
 0x2f2   :  { %v6295_v7 = vld [vmem:[#allocation9 + $0x978] sm:$0xf0]  ;;  %4265 = vmatmul.bf16.vlgmr.msra.gmra.mxu3 %v8303_v45 }
 0x2f3   :  { %v7766_v11 = vld [vmem:[#allocation9 + $0xb5c] sm:$0xf]  ;;  %v6298_v20 = vor.u32 %v7702_v6, %v6295_v7  ;;  %4309 = vmatpush.bf16.msrb.mxu3 %v7130_v10  ;;  %v8412_v10 = vpop.f32.mrf.mxu3 }
 0x2f4   :  { %v6551_v12 = vld [vmem:[#allocation9 + $0xb78] sm:$0xf0] }
 0x2f5   :  { %v7838_v15 = vld [vmem:[#allocation9 + $0xd9c] sm:$0xf]  ;;  %v6554_v22 = vor.u32 %v7766_v11, %v6551_v12  ;;  %4272 = vmatpush.bf16.msrb.mxu0 %v6298_v20 }
 0x2f6   :  { %v6839_v16 = vld [vmem:[#allocation9 + $0xdb8] sm:$0xf0] }
 0x2f7   :  { %v7902_v17 = vld [vmem:[#allocation9 + $0xf9c] sm:$0xf]  ;;  %v6842_v13 = vor.u32 %v7838_v15, %v6839_v16  ;;  %4285 = vmatpush.bf16.msrb.mxu1 %v6554_v22 }
 0x2f8   :  { %v7095_v18 = vld [vmem:[#allocation9 + $0xfb8] sm:$0xf0] }
 0x2f9   :  { %v7694_v27 = vld [vmem:[#allocation9 + $0x91c] sm:$0xf]  ;;  %v7098_v14 = vor.u32 %v7902_v17, %v7095_v18  ;;  %4297 = vmatpush.bf16.msrb.mxu2 %v6842_v13 }
 0x2fa   :  { %v6263_v28 = vld [vmem:[#allocation9 + $0x938] sm:$0xf0] }
 0x2fb   :  { %v7758_v29 = vld [vmem:[#allocation9 + $0xb1c] sm:$0xf]  ;;  %v6266_v8 = vor.u32 %v7694_v27, %v6263_v28  ;;  %4310 = vmatpush.bf16.msrb.mxu3 %v7098_v14 }
 0x2fc   :  { %v6519_v31 = vld [vmem:[#allocation9 + $0xb38] sm:$0xf0] }
 0x2fd   :  { %v7830_v43 = vld [vmem:[#allocation9 + $0xd5c] sm:$0xf]  ;;  %v6522_v40 = vor.u32 %v7758_v29, %v6519_v31  ;;  %4273 = vmatpush.bf16.msrb.mxu0 %v6266_v8  ;;  %v7930_v8 = vld [vmem:[#allocation12 + $0x78] sm:$0xff] }
 0x2fe   :  { %v6807_v36 = vld [vmem:[#allocation9 + $0xd78] sm:$0xf0] }
 0x2ff   :  { %v7894_v37 = vld [vmem:[#allocation9 + $0xf5c] sm:$0xf]  ;;  %v6810_v30 = vor.u32 %v7830_v43, %v6807_v36  ;;  %4286 = vmatpush.bf16.msrb.mxu1 %v6522_v40 }
 0x300   :  { %v7063_v38 = vld [vmem:[#allocation9 + $0xf78] sm:$0xf0] }
 0x301   :  { %v7686_v41 = vld [vmem:[#allocation9 + $0x8dc] sm:$0xf]  ;;  %v7066_v46 = vor.u32 %v7894_v37, %v7063_v38  ;;  %4298 = vmatpush.bf16.msrb.mxu2 %v6810_v30  ;;  %v7922_v38 = vld [vmem:[#allocation12 + $0x38] sm:$0xff]  ;;  %v4060_v30 = vpop.f32.mrf.mxu3 }
 0x302   :  { %v6231_v42 = vld [vmem:[#allocation9 + $0x8f8] sm:$0xf0] }
 0x303   :  { %v7750_v21 = vld [vmem:[#allocation9 + $0xadc] sm:$0xf]  ;;  %v6234_v44 = vor.u32 %v7686_v41, %v6231_v42  ;;  %4311 = vmatpush.bf16.msrb.mxu3 %v7066_v46  ;;  %v4047_v42 = vpop.f32.mrf.mxu2 }
 0x304   :  { %v6487_v48 = vld [vmem:[#allocation9 + $0xaf8] sm:$0xf0]  ;;  %v4481_v42 = vunpack.c.h.b16 %v8386_v47 }
 0x305   :  { %v7822_v49 = vld [vmem:[#allocation9 + $0xd1c] sm:$0xf]  ;;  %v6490_v45 = vor.u32 %v7750_v21, %v6487_v48  ;;  %4274 = vmatpush.bf16.msrb.mxu0 %v6234_v44 }
 0x306   :  { %v6775_v24 = vld [vmem:[#allocation9 + $0xd38] sm:$0xf0] }
 0x307   :  { %v7886_v50 = vld [vmem:[#allocation9 + $0xf1c] sm:$0xf]  ;;  %v6778_v54 = vor.u32 %v7822_v49, %v6775_v24  ;;  %4287 = vmatpush.bf16.msrb.mxu1 %v6490_v45  ;;  %v7938_v45 = vld [vmem:[#allocation12 + $0xb8] sm:$0xff] }
 0x308   :  { %v7031_v51 = vld [vmem:[#allocation9 + $0xf38] sm:$0xf0] }
 0x309   :  { %v7678_v52 = vld [vmem:[#allocation9 + $0x89c] sm:$0xf]  ;;  %v7034_v33 = vor.u32 %v7886_v50, %v7031_v51  ;;  %4299 = vmatpush.bf16.msrb.mxu2 %v6778_v54  ;;  %v7928_v54 = vld [vmem:[#allocation12 + $0x68] sm:$0xff] }
 0x30a   :  { %v6199_v53 = vld [vmem:[#allocation9 + $0x8b8] sm:$0xf0] }
 0x30b   :  { %v7742_v19 = vld [vmem:[#allocation9 + $0xa9c] sm:$0xf]  ;;  %v6202_v63 = vor.u32 %v7678_v52, %v6199_v53  ;;  %4312 = vmatpush.bf16.msrb.mxu3 %v7034_v33  ;;  %v7946_v52 = vld [vmem:[#allocation12 + $0xf8] sm:$0xff]  ;;  %v7920_v53 = vld [vmem:[#allocation12 + $0x28] sm:$0xff] }
 0x30c   :  { %v6455_v23 = vld [vmem:[#allocation9 + $0xab8] sm:$0xf0] }
 0x30d   :  { %v7814_v55 = vld [vmem:[#allocation9 + $0xcdc] sm:$0xf]  ;;  %v6458_v0 = vor.u32 %v7742_v19, %v6455_v23  ;;  %4275 = vmatpush.bf16.msrb.mxu0 %v6202_v63  ;;  %v8416_v23 = vpop.f32.mrf.mxu0  ;;  %v7943_v63 = vld [vmem:[#allocation12 + $0xe0] sm:$0xff] }
 0x30e   :  { %v6743_v60 = vld [vmem:[#allocation9 + $0xcf8] sm:$0xf0] }
 0x30f   :  { %v7878_v61 = vld [vmem:[#allocation9 + $0xedc] sm:$0xf]  ;;  %v6746_v3 = vor.u32 %v7814_v55, %v6743_v60  ;;  %4288 = vmatpush.bf16.msrb.mxu1 %v6458_v0  ;;  %v8418_v55 = vpop.f32.mrf.mxu1  ;;  %v7918_v60 = vld [vmem:[#allocation12 + $0x18] sm:$0xff] }
 0x310   :  { %v6999_v62 = vld [vmem:[#allocation9 + $0xef8] sm:$0xf0] }
 0x311   :  { %v7670_v1 = vld [vmem:[#allocation9 + $0x85c] sm:$0xf]  ;;  %v7002_v4 = vor.u32 %v7878_v61, %v6999_v62  ;;  %4300 = vmatpush.bf16.msrb.mxu2 %v6746_v3  ;;  %v7926_v61 = vld [vmem:[#allocation12 + $0x58] sm:$0xff]  ;;  %v7935_v62 = vld [vmem:[#allocation12 + $0xa0] sm:$0xff] }
 0x312   :  { %v6167_v2 = vld [vmem:[#allocation9 + $0x878] sm:$0xf0] }
 0x313   :  { %v7734_v5 = vld [vmem:[#allocation9 + $0xa5c] sm:$0xf]  ;;  %v6170_v16 = vor.u32 %v7670_v1, %v6167_v2  ;;  %4313 = vmatpush.bf16.msrb.mxu3 %v7002_v4  ;;  %v8422_v2 = vld [vmem:[#allocation11] sm:$0xff] }
 0x314   :  { %v6423_v6 = vld [vmem:[#allocation9 + $0xa78] sm:$0xf0]  ;;  %v891_v3 = vperm.slane %v8422_v2, 5  ;;  %v7934_v4 = vld [vmem:[#allocation12 + $0x98] sm:$0xff] }
 0x315   :  { %v7806_v7 = vld [vmem:[#allocation9 + $0xc9c] sm:$0xf]  ;;  %v6426_v17 = vor.u32 %v7734_v5, %v6423_v6  ;;  %4276 = vmatpush.bf16.msrb.mxu0 %v6170_v16  ;;  %v4073_v0 = vpop.f32.mrf.mxu0  ;;  %v7942_v5 = vld [vmem:[#allocation12 + $0xd8] sm:$0xff]  ;;  %v8425_v6 = vpop.f32.mrf.mxu2 }
 0x316   :  { %v6711_v11 = vld [vmem:[#allocation9 + $0xcb8] sm:$0xf0]  ;;  %v7956_v0 = vld [vmem:[#allocation12 + $0x148] sm:$0xff] }
 0x317   :  { %v7870_v12 = vld [vmem:[#allocation9 + $0xe9c] sm:$0xf]  ;;  %v6714_v20 = vor.u32 %v7806_v7, %v6711_v11  ;;  %4289 = vmatpush.bf16.msrb.mxu1 %v6426_v17  ;;  %v8427_v7 = vpop.f32.mrf.mxu3  ;;  %v7916_v11 = vld [vmem:[#allocation12 + $0x8] sm:$0xff] }
 0x318   :  { %v6967_v15 = vld [vmem:[#allocation9 + $0xeb8] sm:$0xf0] }
 0x319   :  { %v7662_v18 = vld [vmem:[#allocation9 + $0x81c] sm:$0xf]  ;;  %v6970_v22 = vor.u32 %v7870_v12, %v6967_v15  ;;  %4301 = vmatpush.bf16.msrb.mxu2 %v6714_v20  ;;  %v7924_v12 = vld [vmem:[#allocation12 + $0x48] sm:$0xff]  ;;  %v4020_v15 = vadd.f32 %v8404_v32, %v891_v3  ;;  %v7923_v20 = vld [vmem:[#allocation12 + $0x40] sm:$0xff] }
 0x31a   :  { %v6135_v27 = vld [vmem:[#allocation9 + $0x838] sm:$0xf0]  ;;  %v7940_v32 = vld [vmem:[#allocation12 + $0xc8] sm:$0xff]  ;;  %v7955_v3 = vld [vmem:[#allocation12 + $0x140] sm:$0xff] }
 0x31b   :  { %v7726_v28 = vld [vmem:[#allocation9 + $0xa1c] sm:$0xf]  ;;  %v6138_v36 = vor.u32 %v7662_v18, %v6135_v27  ;;  %4314 = vmatpush.bf16.msrb.mxu3 %v6970_v22  ;;  %v7915_v18 = vld [vmem:[#allocation12] sm:$0xff]  ;;  %v4478_v22 = vunpack.c.l.b16 %v8355_v39  ;;  %v4479_v27 = vunpack.c.h.b16 %v8355_v39 }
 0x31c   :  { %v6391_v13 = vld [vmem:[#allocation9 + $0xa38] sm:$0xf0] }
 0x31d   :  { %v7798_v14 = vld [vmem:[#allocation9 + $0xc5c] sm:$0xf]  ;;  %v6394_v37 = vor.u32 %v7726_v28, %v6391_v13  ;;  %4277 = vmatpush.bf16.msrb.mxu0 %v6138_v36  ;;  %v4033_v28 = vadd.f32 %v8406_v35, %v4020_v15  ;;  %v7954_v13 = vld [vmem:[#allocation12 + $0x138] sm:$0xff]  ;;  %v7931_v35 = vld [vmem:[#allocation12 + $0x80] sm:$0xff] }
 0x31e   :  { %v6679_v29 = vld [vmem:[#allocation9 + $0xc78] sm:$0xf0] }
 0x31f   :  { %v7862_v31 = vld [vmem:[#allocation9 + $0xe5c] sm:$0xf]  ;;  %v6682_v40 = vor.u32 %v7798_v14, %v6679_v29  ;;  %4290 = vmatpush.bf16.msrb.mxu1 %v6394_v37  ;;  %v7962_v14 = vld [vmem:[#allocation12 + $0x178] sm:$0xff]  ;;  %v7932_v29 = vld [vmem:[#allocation12 + $0x88] sm:$0xff]  ;;  %v4046_v36 = vadd.f32 %v8410_v9, %v4033_v28  ;;  %v4486_v37 = vpack.c.b16 %v4478_v22, %v4478_v22 }
 0x320   :  { %v6935_v43 = vld [vmem:[#allocation9 + $0xe78] sm:$0xf0]  ;;  %4278 = vmatmul.bf16.vlgmr.msrb.gmra.mxu0 %v8309_v25  ;;  %v7919_v25 = vld [vmem:[#allocation12 + $0x20] sm:$0xff]  ;;  %v7970_v28 = vld [vmem:[#allocation12 + $0x1b8] sm:$0xff] }
 0x321   :  { %v6938_v41 = vor.u32 %v7862_v31, %v6935_v43  ;;  %v7790_v46 = vld [vmem:[#allocation9 + $0xc1c] sm:$0xf]  ;;  %4886 = vmatpush.bf16.msra.mxu0 %v7922_v38  ;;  %4302 = vmatpush.bf16.msrb.mxu2 %v6682_v40  ;;  %v4099_v31 = vpop.f32.mrf.mxu2  ;;  %v4112_v43 = vpop.f32.mrf.mxu3  ;;  %v4487_v38 = vpack.c.b16 %v4479_v27, %v4479_v27  ;;  %v7939_v40 = vld [vmem:[#allocation12 + $0xc0] sm:$0xff]  ;;  %v4059_v30 = vadd.f32 %v8412_v10, %v4046_v36 }
 0x322   :  { %v6647_v21 = vld [vmem:[#allocation9 + $0xc38] sm:$0xf0]  ;;  %4291 = vmatmul.bf16.vlgmr.msrb.gmra.mxu1 %v8311_v26  ;;  %v7927_v26 = vld [vmem:[#allocation12 + $0x60] sm:$0xff] }
 0x323   :  { %v7854_v48 = vld [vmem:[#allocation9 + $0xe1c] sm:$0xf]  ;;  %4899 = vmatpush.bf16.msra.mxu1 %v7930_v8  ;;  %4315 = vmatpush.bf16.msrb.mxu3 %v6938_v41  ;;  %v6650_v51 = vor.u32 %v7790_v46, %v6647_v21  ;;  %v4480_v41 = vunpack.c.l.b16 %v8386_v47  ;;  %v4072_v9 = vadd.f32 %v8416_v23, %v4059_v30  ;;  %v892_v46 = vperm.slane %v8422_v2, 6  ;;  %v7952_v21 = vld [vmem:[#allocation12 + $0x128] sm:$0xff] }
 0x324   :  { %v6903_v49 = vld [vmem:[#allocation9 + $0xe38] sm:$0xf0] }
 0x325   :  { %v7921_v24 = vld [vmem:[#allocation12 + $0x30] sm:$0xff]  ;;  %v6906_v44 = vor.u32 %v7854_v48, %v6903_v49  ;;  %4303 = vmatpush.bf16.msrb.mxu2 %v6650_v51  ;;  %v7960_v48 = vld [vmem:[#allocation12 + $0x168] sm:$0xff]  ;;  %v4488_v49 = vpack.c.b16 %v4480_v41, %v4480_v41  ;;  %v4085_v47 = vadd.f32 %v8418_v55, %v4072_v9 }
 0x326   :  { %v7929_v50 = vld [vmem:[#allocation12 + $0x70] sm:$0xff]  ;;  %4887 = vmatpush.bf16.msra.mxu0 %v7921_v24  ;;  %v4489_v24 = vpack.c.b16 %v4481_v42, %v4481_v42 }
 0x327   :  { %4900 = vmatpush.bf16.msra.mxu1 %v7929_v50  ;;  %4316 = vmatpush.bf16.msrb.mxu3 %v6906_v44  ;;  %v7937_v33 = vld [vmem:[#allocation12 + $0xb0] sm:$0xff]  ;;  %v4123_v50 = vpop.f32.mrf.mxu0  ;;  %v7951_v44 = vld [vmem:[#allocation12 + $0x120] sm:$0xff] }
 0x328   :  { %v7945_v19 = vld [vmem:[#allocation12 + $0xf0] sm:$0xff]  ;;  %4304 = vmatmul.bf16.vlgmr.msrb.gmra.mxu2 %v8315_v56  ;;  %v4086_v56 = vpop.f32.mrf.mxu1  ;;  %v4124_v10 = vadd.f32 %v4123_v50, %v892_v46 }
 0x329   :  { %4912 = vmatpush.bf16.msra.mxu2 %v7938_v45  ;;  %v7925_v1 = vld [vmem:[#allocation12 + $0x50] sm:$0xff]  ;;  %v7959_v45 = vld [vmem:[#allocation12 + $0x160] sm:$0xff] }
 0x32a   :  { %4317 = vmatmul.bf16.vlgmr.msrb.gmra.mxu3 %v8317_v57  ;;  %4888 = vmatpush.bf16.msra.mxu0 %v7920_v53  ;;  %v7917_v57 = vld [vmem:[#allocation12 + $0x10] sm:$0xff] }
 0x32b   :  { %4925 = vmatpush.bf16.msra.mxu3 %v7946_v52  ;;  %4901 = vmatpush.bf16.msra.mxu1 %v7928_v54  ;;  %v7933_v16 = vld [vmem:[#allocation12 + $0x90] sm:$0xff]  ;;  %v4098_v52 = vadd.f32 %v8425_v6, %v4085_v47  ;;  %v7950_v54 = vld [vmem:[#allocation12 + $0x118] sm:$0xff]  ;;  %v7971_v47 = vld [vmem:[#allocation12 + $0x1c0] sm:$0xff] }
 0x32c   :  { %v7941_v17 = vld [vmem:[#allocation12 + $0xd0] sm:$0xff] }
 0x32d   :  { %4913 = vmatpush.bf16.msra.mxu2 %v7937_v33  ;;  %v7953_v8 = vld [vmem:[#allocation12 + $0x130] sm:$0xff]  ;;  %v7958_v33 = vld [vmem:[#allocation12 + $0x158] sm:$0xff] }
 0x32e   :  { %4889 = vmatpush.bf16.msra.mxu0 %v7919_v25  ;;  %v7961_v39 = vld [vmem:[#allocation12 + $0x170] sm:$0xff] }
 0x32f   :  { %4926 = vmatpush.bf16.msra.mxu3 %v7945_v19  ;;  %4902 = vmatpush.bf16.msra.mxu1 %v7927_v26  ;;  %v4111_v19 = vadd.f32 %v8427_v7, %v4098_v52  ;;  %v4125_v23 = vpop.f32.mrf.mxu0  ;;  %v7949_v55 = vld [vmem:[#allocation12 + $0x110] sm:$0xff] }
 0x330   :  { %v4136_v51 = vpop.f32.mrf.mxu1  ;;  %v7957_v26 = vld [vmem:[#allocation12 + $0x150] sm:$0xff] }
 0x331   :  { %4914 = vmatpush.bf16.msra.mxu2 %v7936_v58  ;;  %v4137_v53 = vadd.f32 %v4136_v51, %v4124_v10  ;;  %v4327_v58 = vmax.f32 %v4111_v19, 0.0  ;;  %v7977_v31 = vld [vmem:[#allocation12 + $0x1f0] sm:$0xff]  ;;  %v7963_v51 = vld [vmem:[#allocation12 + $0x180] sm:$0xff]  ;;  %v893_v10 = vperm.slane %v8422_v2, 7 }
 0x332   :  { %4890 = vmatpush.bf16.msra.mxu0 %v7918_v60  ;;  %v4162_v60 = vpop.f32.mrf.mxu3  ;;  %v7965_v46 = vld [vmem:[#allocation12 + $0x190] sm:$0xff] }
 0x333   :  { %4927 = vmatpush.bf16.msra.mxu3 %v7944_v59  ;;  %4903 = vmatpush.bf16.msra.mxu1 %v7926_v61  ;;  %v4149_v59 = vpop.f32.mrf.mxu2  ;;  %v4326_v61 = vmax.f32 %v8400_v34, 0.0 }
 0x335   :  { %4915 = vmatpush.bf16.msra.mxu2 %v7935_v62  ;;  %v4150_v62 = vadd.f32 %v4149_v59, %v4137_v53  ;;  %v4332_v56 = vpack.c.bf16 %v4327_v58, %v4326_v61 }
 0x336   :  { %4891 = vmatpush.bf16.msra.mxu0 %v7917_v57 }
 0x337   :  { %4928 = vmatpush.bf16.msra.mxu3 %v7943_v63  ;;  %4904 = vmatpush.bf16.msra.mxu1 %v7925_v1  ;;  %v7948_v63 = vld [vmem:[#allocation12 + $0x108] sm:$0xff]  ;;  %v4163_v57 = vadd.f32 %v4162_v60, %v4150_v62  ;;  %v7947_v1 = vld [vmem:[#allocation12 + $0x100] sm:$0xff] }
 0x338   :  { %v4138_v25 = vpop.f32.mrf.mxu1 }
 0x339   :  { %4916 = vmatpush.bf16.msra.mxu2 %v7934_v4  ;;  %v4482_v4 = vunpack.c.l.b16 %v4332_v56 }
 0x33a   :  { %4892 = vmatpush.bf16.msra.mxu0 %v7916_v11  ;;  %v4164_v7 = vpop.f32.mrf.mxu3 }
 0x33b   :  { %4929 = vmatpush.bf16.msra.mxu3 %v7942_v5  ;;  %4905 = vmatpush.bf16.msra.mxu1 %v7924_v12  ;;  %v4483_v5 = vunpack.c.h.b16 %v4332_v56  ;;  %v4151_v6 = vpop.f32.mrf.mxu2  ;;  %v4490_v11 = vpack.c.b16 %v4482_v4, %v4482_v4 }
 0x33c   :  { %v7991_v6 = vld [vmem:[#allocation14] ss:$0 sm:$0xff] }
 0x33d   :  { %4917 = vmatpush.bf16.msra.mxu2 %v7933_v16  ;;  %v4491_v12 = vpack.c.b16 %v4483_v5, %v4483_v5 }
 0x33e   :  { %4893 = vmatpush.bf16.msra.mxu0 %v7915_v18 }
 0x33f   :  { %4930 = vmatpush.bf16.msra.mxu3 %v7941_v17  ;;  %4906 = vmatpush.bf16.msra.mxu1 %v7923_v20 }
 0x341   :  { %4918 = vmatpush.bf16.msra.mxu2 %v7932_v29  ;;  %4894 = vmatmul.bf16.vlgmr.msra.gmra.mxu0 %v4486_v37  ;;  %v7968_v37 = vld [vmem:[#allocation12 + $0x1a8] sm:$0xff] }
 0x342   :  { %4938 = vmatpush.bf16.msrb.mxu0 %v7954_v13  ;;  %4907 = vmatmul.bf16.vlgmr.msra.gmra.mxu1 %v4487_v38  ;;  %v7978_v13 = vld [vmem:[#allocation12 + $0x1f8] sm:$0xff]  ;;  %v7976_v38 = vld [vmem:[#allocation12 + $0x1e8] sm:$0xff] }
 0x343   :  { %4951 = vmatpush.bf16.msrb.mxu1 %v7962_v14  ;;  %4931 = vmatpush.bf16.msra.mxu3 %v7940_v32  ;;  %v7969_v32 = vld [vmem:[#allocation12 + $0x1b0] sm:$0xff] }
 0x344   :  { %v4175_v34 = vpop.f32.mrf.mxu0 }
 0x345   :  { %4919 = vmatpush.bf16.msra.mxu2 %v7931_v35  ;;  %v4176_v16 = vadd.f32 %v4175_v34, %v4163_v57  ;;  %v7966_v35 = vld [vmem:[#allocation12 + $0x198] sm:$0xff] }
 0x346   :  { %4939 = vmatpush.bf16.msrb.mxu0 %v7953_v8  ;;  %v4188_v15 = vpop.f32.mrf.mxu1  ;;  %v7967_v8 = vld [vmem:[#allocation12 + $0x1a0] sm:$0xff] }
 0x347   :  { %4952 = vmatpush.bf16.msrb.mxu1 %v7961_v39  ;;  %4932 = vmatpush.bf16.msra.mxu3 %v7939_v40  ;;  %v4189_v17 = vadd.f32 %v4188_v15, %v4176_v16  ;;  %v7975_v39 = vld [vmem:[#allocation12 + $0x1e0] sm:$0xff]  ;;  %v7974_v40 = vld [vmem:[#allocation12 + $0x1d8] sm:$0xff] }
 0x348   :  { %4920 = vmatmul.bf16.vlgmr.msra.gmra.mxu2 %v4488_v49  ;;  %v7972_v49 = vld [vmem:[#allocation12 + $0x1c8] sm:$0xff] }
 0x349   :  { %4964 = vmatpush.bf16.msrb.mxu2 %v7970_v28 }
 0x34a   :  { %4933 = vmatmul.bf16.vlgmr.msra.gmra.mxu3 %v4489_v24  ;;  %4940 = vmatpush.bf16.msrb.mxu0 %v7952_v21  ;;  %v7973_v21 = vld [vmem:[#allocation12 + $0x1d0] sm:$0xff] }
 0x34b   :  { %4953 = vmatpush.bf16.msrb.mxu1 %v7960_v48  ;;  %4977 = vmatpush.bf16.msrb.mxu3 %v7978_v13  ;;  %v7964_v48 = vld [vmem:[#allocation12 + $0x188] sm:$0xff] }
 0x34c   :  { %v4177_v18 = vpop.f32.mrf.mxu0 }
 0x34d   :  { %4965 = vmatpush.bf16.msrb.mxu2 %v7969_v32 }
 0x34e   :  { %4941 = vmatpush.bf16.msrb.mxu0 %v7951_v44  ;;  %v4190_v20 = vpop.f32.mrf.mxu1 }
 0x34f   :  { %4954 = vmatpush.bf16.msrb.mxu1 %v7959_v45  ;;  %4978 = vmatpush.bf16.msrb.mxu3 %v7977_v31 }
 0x351   :  { %4966 = vmatpush.bf16.msrb.mxu2 %v7968_v37 }
 0x352   :  { %4942 = vmatpush.bf16.msrb.mxu0 %v7950_v54  ;;  %v4201_v22 = vpop.f32.mrf.mxu2 }
 0x353   :  { %4955 = vmatpush.bf16.msrb.mxu1 %v7958_v33  ;;  %4979 = vmatpush.bf16.msrb.mxu3 %v7976_v38 }
 0x354   :  { %v4214_v27 = vpop.f32.mrf.mxu3 }
 0x355   :  { %4967 = vmatpush.bf16.msrb.mxu2 %v7967_v8 }
 0x356   :  { %4943 = vmatpush.bf16.msrb.mxu0 %v7949_v55  ;;  %v4202_v55 = vadd.f32 %v4201_v22, %v4189_v17 }
 0x357   :  { %4956 = vmatpush.bf16.msrb.mxu1 %v7957_v26  ;;  %4980 = vmatpush.bf16.msrb.mxu3 %v7975_v39 }
 0x358   :  { %v4215_v60 = vadd.f32 %v4214_v27, %v4202_v55 }
 0x359   :  { %4968 = vmatpush.bf16.msrb.mxu2 %v7966_v35 }
 0x35a   :  { %4944 = vmatpush.bf16.msrb.mxu0 %v7948_v63  ;;  %v4203_v14 = vpop.f32.mrf.mxu2  ;;  %v4328_v63 = vmax.f32 %v4215_v60, 0.0 }
 0x35b   :  { %4957 = vmatpush.bf16.msrb.mxu1 %v7956_v0  ;;  %4981 = vmatpush.bf16.msrb.mxu3 %v7974_v40 }
 0x35c   :  { %v4216_v29 = vpop.f32.mrf.mxu3 }
 0x35d   :  { %4969 = vmatpush.bf16.msrb.mxu2 %v7965_v46 }
 0x35e   :  { %4945 = vmatpush.bf16.msrb.mxu0 %v7947_v1 }
 0x35f   :  { %4958 = vmatpush.bf16.msrb.mxu1 %v7955_v3  ;;  %4982 = vmatpush.bf16.msrb.mxu3 %v7973_v21 }
 0x361   :  { %4946 = vmatmul.bf16.vlgmr.msrb.gmra.mxu0 %v4490_v11  ;;  %4970 = vmatpush.bf16.msrb.mxu2 %v7964_v48 }
 0x362   :  { %4959 = vmatmul.bf16.vlgmr.msrb.gmra.mxu1 %v4491_v12 }
 0x363   :  { %4983 = vmatpush.bf16.msrb.mxu3 %v7972_v49 }
 0x364   :  { %v4227_v43 = vpop.f32.mrf.mxu0 }
 0x365   :  { %4971 = vmatpush.bf16.msrb.mxu2 %v7963_v51  ;;  %v4228_v44 = vadd.f32 %v4227_v43, %v893_v10 }
 0x366   :  { %v4240_v36 = vpop.f32.mrf.mxu1 }
 0x367   :  { %4984 = vmatpush.bf16.msrb.mxu3 %v7971_v47  ;;  %v4241_v45 = vadd.f32 %v4240_v36, %v4228_v44 }
 0x36c   :  { %v4229_v41 = vpop.f32.mrf.mxu0 }
 0x36e   :  { %v4242_v42 = vpop.f32.mrf.mxu1 }
 0x373   :  { %v4253_v30 = vpop.f32.mrf.mxu2 }
 0x374   :  { %v4254_v54 = vadd.f32 %v4253_v30, %v4241_v45 }
 0x375   :  { %v4266_v9 = vpop.f32.mrf.mxu3 }
 0x376   :  { %v4267_v33 = vadd.f32 %v4266_v9, %v4254_v54 }
 0x37b   :  { %v4255_v24 = vpop.f32.mrf.mxu2 }
 0x37d   :  { %v4268_v50 = vpop.f32.mrf.mxu3 }
 0x39d   :  { %v4279_v52 = vpop.f32.mrf.mxu0 }
 0x39e   :  { %v4280_v19 = vadd.f32 %v4279_v52, %v4267_v33 }
 0x39f   :  { %v4292_v53 = vpop.f32.mrf.mxu1 }
 0x3a0   :  { %v4293_v26 = vadd.f32 %v4292_v53, %v4280_v19 }
 0x3a5   :  { %v4281_v23 = vpop.f32.mrf.mxu0 }
 0x3a7   :  { %v4294_v25 = vpop.f32.mrf.mxu1 }
 0x3ab   :  { %v4305_v58 = vpop.f32.mrf.mxu2 }
 0x3ac   :  { %v4306_v61 = vadd.f32 %v4305_v58, %v4293_v26 }
 0x3ad   :  { %v4318_v59 = vpop.f32.mrf.mxu3 }
 0x3ae   :  { %v4319_v62 = vadd.f32 %v4318_v59, %v4306_v61 }
 0x3b0   :  { %v4329_v2 = vmax.f32 %v4319_v62, 0.0 }
 0x3b2   :  { %v4333_v0 = vpack.c.bf16 %v4329_v2, %v4328_v63 }
 0x3b3   :  { %v4307_v56 = vpop.f32.mrf.mxu2 }
 0x3b4   :  { %v4484_v1 = vunpack.c.l.b16 %v4333_v0  ;;  %v4485_v3 = vunpack.c.h.b16 %v4333_v0 }
 0x3b5   :  { %v4320_v57 = vpop.f32.mrf.mxu3 }
 0x3b6   :  { %v4492_v4 = vpack.c.b16 %v4484_v1, %v4484_v1  ;;  %v4493_v5 = vpack.c.b16 %v4485_v3, %v4485_v3 }
 0x3b8   :  { %4972 = vmatmul.bf16.vlgmr.msrb.gmra.mxu2 %v4492_v4  ;;  %4985 = vmatmul.bf16.vlgmr.msrb.gmra.mxu3 %v4493_v5 }
 0x3be   :  { %v4895_v7 = vpop.f32.mrf.mxu0 }
 0x3bf   :  { %v4908_v11 = vpop.f32.mrf.mxu1  ;;  %v4896_v12 = vadd.f32 %v7991_v6, %v4895_v7 }
 0x3c1   :  { %v4909_v34 = vadd.f32 %v4908_v11, %v4896_v12 }
 0x3c6   :  { %v4897_v15 = vpop.f32.mrf.mxu0 }
 0x3c7   :  { %v4910_v16 = vpop.f32.mrf.mxu1 }
 0x3cb   :  { %v4921_v17 = vpop.f32.mrf.mxu2 }
 0x3cc   :  { %v4922_v20 = vadd.f32 %v4921_v17, %v4909_v34 }
 0x3cd   :  { %v4934_v18 = vpop.f32.mrf.mxu3 }
 0x3ce   :  { %v4935_v22 = vadd.f32 %v4934_v18, %v4922_v20 }
 0x3d3   :  { %v4923_v27 = vpop.f32.mrf.mxu2 }
 0x3d5   :  { %v4936_v28 = vpop.f32.mrf.mxu3 }
 0x3de   :  { %v4947_v13 = vpop.f32.mrf.mxu0 }
 0x3df   :  { %v4960_v14 = vpop.f32.mrf.mxu1  ;;  %v4948_v29 = vadd.f32 %v4947_v13, %v4935_v22 }
 0x3e1   :  { %v4961_v32 = vadd.f32 %v4960_v14, %v4948_v29 }
 0x3e6   :  { %v4949_v31 = vpop.f32.mrf.mxu0 }
 0x3e7   :  { %v4962_v43 = vpop.f32.mrf.mxu1 }
 0x43b   :  { %v4973_v36 = vpop.f32.mrf.mxu2  ;;  %v4986_v37 = vpop.f32.mrf.mxu3 }
 0x43c   :  { %v4974_v38 = vadd.f32 %v4973_v36, %v4961_v32 }
 0x43e   :  { %v4987_v8 = vadd.f32 %v4986_v37, %v4974_v38 }
 0x440   :  { %4990 = vst [vmem:[#allocation15] sm:$0xff] %v4987_v8 }
 0x441   :  { %5001 = dma.vmem_to_hbm [thread:$0]  %s4997_s6, 128, %s4999_s14, [#allocation5]  }
 0x443   :  { %v4975_v39 = vpop.f32.mrf.mxu2  ;;  %v4988_v35 = vpop.f32.mrf.mxu3 }
 0x444   :  { %8194 = dma.done.wait [#allocation5], 128  }
 0x445   :  { %8195 = vsyncadd [#allocation5], 4294967168 }
 0x446   :  { %5006 = vsyncpa [#allocation4], 1 }
 0x447   :  { %5007 = vsyncpa [#allocation7], 1 }
 0x448   :  { %5008 = vsyncpa [#allocation10], 1 }
 0x449   :  { %5009 = vsyncpa [#allocation13], 1 }
 0x44a   :  { %5010 = vsyncpa [#allocation5], 1 }

// kernel: tpu_custom_call.1
= control target key start
LH: loop header
LB: loop body
LE: loop exit
PB: predicated region body
PF: predicated region fallthrough
CT: control target
= control target key end

     0   :  { %12 = vsyncpa [#allocation4], 0  ;;  %s8447_s0 = inlined_call_operand.hbm [shape: bf16[8,32], index: 0, kind: input, shape index: {}]   ;;  %s8448_s1 = inlined_call_operand.hbm [shape: bf16[32,1024], index: 1, kind: input, shape index: {}]   ;;  %s8449_s2 = inlined_call_operand.hbm [shape: f32[1,1024], index: 2, kind: input, shape index: {}]   ;;  %s8450_s3 = inlined_call_operand.hbm [shape: bf16[1024,1024], index: 3, kind: input, shape index: {}]   ;;  %s8451_s4 = inlined_call_operand.hbm [shape: f32[1,1024], index: 4, kind: input, shape index: {}]   ;;  %s8452_s5 = inlined_call_operand.hbm [shape: bf16[1024,128], index: 5, kind: input, shape index: {}]   ;;  %s8453_s6 = inlined_call_operand.hbm [shape: f32[1,128], index: 6, kind: input, shape index: {}]   ;;  %s8454_s7 = inlined_call_operand.hbm [shape: f32[8,128], index: 7, kind: output, shape index: {}]  }
   0x1   :  { %13 = vsyncpa [#allocation7], 0 }
   0x2   :  { %14 = vsyncpa [#allocation10], 0 }
   0x3   :  { %15 = vsyncpa [#allocation13], 0  ;;  %s32_s26 = sshll.u32 %s8448_s1, 4  ;;  %s33_s26 = int_to_ptr.hbm [resolvable:$true] %s32_s26 }
   0x4   :  { %16 = vsyncpa [#allocation5], 0  ;;  %s8196_s27 = smov [#allocation6]   ;;  %s56_s8 = sshll.u32 %s8450_s3, 4  ;;  %s57_s8 = int_to_ptr.hbm [resolvable:$true] %s56_s8 }
   0x5   :  { %s34_s28 = sshll.u32 %s8196_s27, 4  ;;  %s8197_s9 = smov 512   ;;  %s35_s28 = int_to_ptr.vmem [resolvable:$true] %s34_s28 }
   0x6   :  { %s8198_s10 = smov 32   ;;  %s8199_s11 = smov [#allocation9]  }
   0x7   :  { %40 = dma.hbm_to_vmem [thread:$0]  %s33_s26, 2048, %s35_s28, [#allocation7], %s8197_s9, %s8197_s9, %s8198_s10  }
   0x8   :  { %s58_s12 = sshll.u32 %s8199_s11, 4  ;;  %s80_s15 = sshll.u32 %s8452_s5, 4  ;;  %s59_s12 = int_to_ptr.vmem [resolvable:$true] %s58_s12  ;;  %s81_s15 = int_to_ptr.hbm [resolvable:$true] %s80_s15 }
   0x9   :  { %64 = dma.hbm_to_vmem [thread:$0]  %s57_s8, 65536, %s59_s12, [#allocation10], %s8197_s9, %s8197_s9, %s8198_s10  }
   0xa   :  { %s8200_s1 = smov [#allocation12]   ;;  %s22_s3 = sshll.u32 %s8447_s0, 4  ;;  %s23_s3 = int_to_ptr.hbm [resolvable:$true] %s22_s3 }
   0xb   :  { %s82_s16 = sshll.u32 %s8200_s1, 4  ;;  %s8201_s19 = smov 64   ;;  %s83_s16 = int_to_ptr.vmem [resolvable:$true] %s82_s16 }
   0xc   :  { %s8202_s20 = smov 4   ;;  %s8203_s21 = smov [#allocation3]  }
   0xd   :  { %88 = dma.hbm_to_vmem [thread:$0]  %s81_s15, 8192, %s83_s16, [#allocation13], %s8201_s19, %s8201_s19, %s8202_s20  }
   0xe   :  { %s24_s22 = sshll.u32 %s8203_s21, 4  ;;  %s46_s5 = sshll.u32 %s8449_s2, 4  ;;  %s25_s22 = int_to_ptr.vmem [resolvable:$true] %s24_s22  ;;  %s47_s5 = int_to_ptr.hbm [resolvable:$true] %s46_s5 }
   0xf   :  { %27 = dma.hbm_to_vmem [thread:$0]  %s23_s3, 64, %s25_s22, [#allocation4]  }
  0x10   :  { %s70_s27 = sshll.u32 %s8451_s4, 4  ;;  %s8204_s28 = smov [#allocation8]   ;;  %s71_s27 = int_to_ptr.hbm [resolvable:$true] %s70_s27 }
  0x11   :  { %s48_s29 = sshll.u32 %s8204_s28, 4  ;;  %s8205_s0 = smov [#allocation11]   ;;  %s49_s29 = int_to_ptr.vmem [resolvable:$true] %s48_s29 }
  0x12   :  { %51 = dma.hbm_to_vmem [thread:$0]  %s47_s5, 128, %s49_s29, [#allocation7]  }
  0x13   :  { %s72_s30 = sshll.u32 %s8205_s0, 4  ;;  %s94_s10 = sshll.u32 %s8453_s6, 4  ;;  %s73_s30 = int_to_ptr.vmem [resolvable:$true] %s72_s30  ;;  %s95_s10 = int_to_ptr.hbm [resolvable:$true] %s94_s10 }
  0x14   :  { %75 = dma.hbm_to_vmem [thread:$0]  %s71_s27, 128, %s73_s30, [#allocation10]  }
  0x15   :  { %s8206_s2 = smov [#allocation14]  }
  0x16   :  { %s96_s11 = sshll.u32 %s8206_s2, 4  ;;  %s97_s11 = int_to_ptr.vmem [resolvable:$true] %s96_s11 }
  0x17   :  { %99 = dma.hbm_to_vmem [thread:$0]  %s95_s10, 16, %s97_s11, [#allocation13]  }
  0x18   :  { %8186 = dma.done.wait [#allocation4], 64  }
  0x19   :  { %8187 = vsyncadd [#allocation4], 4294967232 }
  0x1a   :  { %8188 = dma.done.wait [#allocation7], 2176  }
  0x1b   :  { %8189 = vsyncadd [#allocation7], 4294965120 }
  0x1c   :  { %8190 = dma.done.wait [#allocation10], 65664  }
  0x1d   :  { %8191 = vsyncadd [#allocation10], 4294901632 }
  0x1e   :  { %8192 = dma.done.wait [#allocation13], 8208  }
  0x1f   :  { %8193 = vsyncadd [#allocation13], 4294959088  ;;  %vm244_vm0 = vcmask 261120   ;;  %v5045_v0 = vld [vmem:[#allocation6 + $0x40] sm:$0xf]  ;;  %s8207_s4 = smov [#allocation15]  }
  0x20   :  { %v7399_v1 = vld [vmem:[#allocation6 + $0x5c] sm:$0xf0]  ;;  %v7395_v2 = vld [vmem:[#allocation6 + $0x44] sm:$0xf]  ;;  %v5053_v5 = vld [vmem:[#allocation6 + $0x48] sm:$0xf] }
  0x21   :  { %v5046_v3 = vor.u32 %v7399_v1, %v5045_v0  ;;  %v5047_v4 = vld [vmem:[#allocation6 + $0x60] sm:$0xf0]  ;;  %v7400_v6 = vld [vmem:[#allocation6 + $0x64] sm:$0xf0]  ;;  %v7396_v9 = vld [vmem:[#allocation6 + $0x4c] sm:$0xf] }
  0x22   :  { %v5050_v7 = vor.u32 %v7395_v2, %v5047_v4  ;;  %v5054_v8 = vor.u32 %v7400_v6, %v5053_v5  ;;  %v5055_v10 = vld [vmem:[#allocation6 + $0x68] sm:$0xf0]  ;;  %v5013_v11 = vld [vmem:[#allocation6] sm:$0xf]  ;;  %v7387_v14 = vld [vmem:[#allocation6 + $0x4] sm:$0xf] }
  0x23   :  { %254 = vmatpush.bf16.msra.mxu0 %v5046_v3  ;;  %v5058_v12 = vor.u32 %v7396_v9, %v5055_v10  ;;  %v7391_v13 = vld [vmem:[#allocation6 + $0x1c] sm:$0xf0]  ;;  %v5015_v15 = vld [vmem:[#allocation6 + $0x20] sm:$0xf0]  ;;  %v5021_v18 = vld [vmem:[#allocation6 + $0x8] sm:$0xf] }
  0x24   :  { %267 = vmatpush.bf16.msra.mxu1 %v5050_v7  ;;  %280 = vmatpush.bf16.msra.mxu2 %v5054_v8  ;;  %v5014_v16 = vor.u32 %v7391_v13, %v5013_v11  ;;  %v5018_v17 = vor.u32 %v7387_v14, %v5015_v15  ;;  %v7392_v19 = vld [vmem:[#allocation6 + $0x24] sm:$0xf0]  ;;  %v7388_v20 = vld [vmem:[#allocation6 + $0xc] sm:$0xf]  ;;  %v8269_v23 = vld [vmem:[#allocation3] sm:$0xf] }
  0x25   :  { %293 = vmatpush.bf16.msra.mxu3 %v5058_v12  ;;  %v5022_v21 = vor.u32 %v7392_v19, %v5021_v18  ;;  %v5023_v22 = vld [vmem:[#allocation6 + $0x28] sm:$0xf0]  ;;  %v5061_v24 = vld [vmem:[#allocation6 + $0x50] sm:$0xf]  ;;  %v7397_v27 = vld [vmem:[#allocation6 + $0x54] sm:$0xf] }
  0x26   :  { %v5026_v25 = vor.u32 %v7388_v20, %v5023_v22  ;;  %v7401_v26 = vld [vmem:[#allocation6 + $0x6c] sm:$0xf0]  ;;  %v5063_v28 = vld [vmem:[#allocation6 + $0x70] sm:$0xf0]  ;;  %v5069_v31 = vld [vmem:[#allocation6 + $0x58] sm:$0xf] }
  0x27   :  { %255 = vmatpush.bf16.msra.mxu0 %v5014_v16  ;;  %v5062_v29 = vor.u32 %v7401_v26, %v5061_v24  ;;  %v5066_v30 = vor.u32 %v7397_v27, %v5063_v28  ;;  %v7402_v32 = vld [vmem:[#allocation6 + $0x74] sm:$0xf0]  ;;  %v7398_v33 = vld [vmem:[#allocation6 + $0x5c] sm:$0xf]  ;;  %v5029_v36 = vld [vmem:[#allocation6 + $0x10] sm:$0xf] }
  0x28   :  { %268 = vmatpush.bf16.msra.mxu1 %v5018_v17  ;;  %281 = vmatpush.bf16.msra.mxu2 %v5022_v21  ;;  %v5070_v34 = vor.u32 %v7402_v32, %v5069_v31  ;;  %v5071_v35 = vld [vmem:[#allocation6 + $0x78] sm:$0xf0]  ;;  %v7393_v37 = vld [vmem:[#allocation6 + $0x2c] sm:$0xf0]  ;;  %v7389_v40 = vld [vmem:[#allocation6 + $0x14] sm:$0xf] }
  0x29   :  { %294 = vmatpush.bf16.msra.mxu3 %v5026_v25  ;;  %v5074_v38 = vor.u32 %v7398_v33, %v5071_v35  ;;  %v5030_v39 = vor.u32 %v7393_v37, %v5029_v36  ;;  %v5031_v41 = vld [vmem:[#allocation6 + $0x30] sm:$0xf0]  ;;  %v5037_v42 = vld [vmem:[#allocation6 + $0x18] sm:$0xf]  ;;  %v7390_v45 = vld [vmem:[#allocation6 + $0x1c] sm:$0xf] }
  0x2a   :  { %5075 = vmatmul.msk.bf16.vlgmr.msra.gmra.mxu0 %vm244_vm0, %v8269_v23  ;;  %v5034_v43 = vor.u32 %v7389_v40, %v5031_v41  ;;  %v7394_v44 = vld [vmem:[#allocation6 + $0x34] sm:$0xf0]  ;;  %v5039_v46 = vld [vmem:[#allocation6 + $0x38] sm:$0xf0]  ;;  %v5309_v47 = vld [vmem:[#allocation9 + $0x1c0] sm:$0xf] }
  0x2b   :  { %306 = vmatpush.bf16.msrb.mxu0 %v5062_v29  ;;  %5076 = vmatmul.msk.bf16.vlgmr.msra.gmra.mxu1 %vm244_vm0, %v8269_v23  ;;  %v7463_v48 = vld [vmem:[#allocation9 + $0x1dc] sm:$0xf0]  ;;  %v5038_v50 = vor.u32 %v7394_v44, %v5037_v42  ;;  %v5042_v55 = vor.u32 %v7390_v45, %v5039_v46  ;;  %s4996_s6 = sshll.u32 %s8207_s4, 4  ;;  %s4998_s14 = sshll.u32 %s8454_s7, 4  ;;  %s4997_s6 = int_to_ptr.vmem [resolvable:$true] %s4996_s6  ;;  %s4999_s14 = int_to_ptr.hbm [resolvable:$true] %s4998_s14 }
  0x2c   :  { %319 = vmatpush.bf16.msrb.mxu1 %v5066_v30  ;;  %5077 = vmatmul.msk.bf16.vlgmr.msra.gmra.mxu2 %vm244_vm0, %v8269_v23  ;;  %v5565_v49 = vld [vmem:[#allocation9 + $0x3c0] sm:$0xf]  ;;  %v5310_v51 = vor.u32 %v7463_v48, %v5309_v47 }
  0x2d   :  { %5078 = vmatmul.msk.bf16.vlgmr.msra.gmra.mxu3 %vm244_vm0, %v8269_v23  ;;  %332 = vmatpush.bf16.msrb.mxu2 %v5070_v34  ;;  %v7527_v52 = vld [vmem:[#allocation9 + $0x3dc] sm:$0xf0] }
  0x2e   :  { %v5277_v53 = vld [vmem:[#allocation9 + $0x180] sm:$0xf]  ;;  %345 = vmatpush.bf16.msrb.mxu3 %v5074_v38  ;;  %v5566_v56 = vor.u32 %v7527_v52, %v5565_v49 }
  0x2f   :  { %v7455_v54 = vld [vmem:[#allocation9 + $0x19c] sm:$0xf0]  ;;  %307 = vmatpush.bf16.msrb.mxu0 %v5030_v39 }
  0x30   :  { %v5533_v57 = vld [vmem:[#allocation9 + $0x380] sm:$0xf]  ;;  %320 = vmatpush.bf16.msrb.mxu1 %v5034_v43  ;;  %v5278_v60 = vor.u32 %v7455_v54, %v5277_v53 }
  0x31   :  { %v7519_v58 = vld [vmem:[#allocation9 + $0x39c] sm:$0xf0]  ;;  %333 = vmatpush.bf16.msrb.mxu2 %v5038_v50 }
  0x32   :  { %v5821_v59 = vld [vmem:[#allocation9 + $0x5c0] sm:$0xf]  ;;  %v5534_v0 = vor.u32 %v7519_v58, %v5533_v57  ;;  %346 = vmatpush.bf16.msrb.mxu3 %v5042_v55 }
  0x33   :  { %3490 = vmatpush.bf16.msra.mxu0 %v5310_v51  ;;  %v7591_v61 = vld [vmem:[#allocation9 + $0x5dc] sm:$0xf0] }
  0x34   :  { %v6077_v62 = vld [vmem:[#allocation9 + $0x7c0] sm:$0xf]  ;;  %3503 = vmatpush.bf16.msra.mxu1 %v5566_v56  ;;  %v5822_v1 = vor.u32 %v7591_v61, %v5821_v59 }
  0x35   :  { %v7655_v63 = vld [vmem:[#allocation9 + $0x7dc] sm:$0xf0] }
  0x36   :  { %v6078_v2 = vor.u32 %v7655_v63, %v6077_v62  ;;  %v5245_v3 = vld [vmem:[#allocation9 + $0x140] sm:$0xf]  ;;  %3516 = vmatpush.bf16.msra.mxu2 %v5822_v1 }
  0x37   :  { %v7447_v4 = vld [vmem:[#allocation9 + $0x15c] sm:$0xf0]  ;;  %3491 = vmatpush.bf16.msra.mxu0 %v5278_v60 }
  0x38   :  { %v5501_v5 = vld [vmem:[#allocation9 + $0x340] sm:$0xf]  ;;  %3529 = vmatpush.bf16.msra.mxu3 %v6078_v2  ;;  %v5246_v12 = vor.u32 %v7447_v4, %v5245_v3  ;;  %3504 = vmatpush.bf16.msra.mxu1 %v5534_v0 }
  0x39   :  { %v7511_v6 = vld [vmem:[#allocation9 + $0x35c] sm:$0xf0] }
  0x3a   :  { %v5789_v7 = vld [vmem:[#allocation9 + $0x580] sm:$0xf]  ;;  %v5502_v14 = vor.u32 %v7511_v6, %v5501_v5  ;;  %5079 = vmatmul.msk.bf16.vlgmr.msrb.gmra.mxu0 %vm244_vm0, %v8269_v23 }
  0x3b   :  { %v7583_v8 = vld [vmem:[#allocation9 + $0x59c] sm:$0xf0]  ;;  %3492 = vmatpush.bf16.msra.mxu0 %v5246_v12  ;;  %5080 = vmatmul.msk.bf16.vlgmr.msrb.gmra.mxu1 %vm244_vm0, %v8269_v23 }
  0x3c   :  { %v5790_v9 = vor.u32 %v7583_v8, %v5789_v7  ;;  %v6045_v10 = vld [vmem:[#allocation9 + $0x780] sm:$0xf]  ;;  %3505 = vmatpush.bf16.msra.mxu1 %v5502_v14  ;;  %5081 = vmatmul.msk.bf16.vlgmr.msrb.gmra.mxu2 %vm244_vm0, %v8269_v23 }
  0x3d   :  { %v7647_v11 = vld [vmem:[#allocation9 + $0x79c] sm:$0xf0]  ;;  %5082 = vmatmul.msk.bf16.vlgmr.msrb.gmra.mxu3 %vm244_vm0, %v8269_v23 }
  0x3e   :  { %v6046_v13 = vor.u32 %v7647_v11, %v6045_v10  ;;  %v5757_v15 = vld [vmem:[#allocation9 + $0x540] sm:$0xf]  ;;  %3517 = vmatpush.bf16.msra.mxu2 %v5790_v9 }
  0x3f   :  { %v7575_v16 = vld [vmem:[#allocation9 + $0x55c] sm:$0xf0] }
  0x40   :  { %v6013_v17 = vld [vmem:[#allocation9 + $0x740] sm:$0xf]  ;;  %v5758_v22 = vor.u32 %v7575_v16, %v5757_v15  ;;  %3530 = vmatpush.bf16.msra.mxu3 %v6046_v13 }
  0x41   :  { %v7639_v18 = vld [vmem:[#allocation9 + $0x75c] sm:$0xf0] }
  0x42   :  { %v5213_v19 = vld [vmem:[#allocation9 + $0x100] sm:$0xf]  ;;  %v6014_v25 = vor.u32 %v7639_v18, %v6013_v17  ;;  %3518 = vmatpush.bf16.msra.mxu2 %v5758_v22 }
  0x43   :  { %v7439_v20 = vld [vmem:[#allocation9 + $0x11c] sm:$0xf0] }
  0x44   :  { %v5469_v21 = vld [vmem:[#allocation9 + $0x300] sm:$0xf]  ;;  %v5214_v30 = vor.u32 %v7439_v20, %v5213_v19  ;;  %3531 = vmatpush.bf16.msra.mxu3 %v6014_v25 }
  0x45   :  { %v7503_v24 = vld [vmem:[#allocation9 + $0x31c] sm:$0xf0] }
  0x46   :  { %v5725_v26 = vld [vmem:[#allocation9 + $0x500] sm:$0xf]  ;;  %v5470_v31 = vor.u32 %v7503_v24, %v5469_v21  ;;  %3493 = vmatpush.bf16.msra.mxu0 %v5214_v30 }
  0x47   :  { %v7567_v27 = vld [vmem:[#allocation9 + $0x51c] sm:$0xf0] }
  0x48   :  { %v5981_v28 = vld [vmem:[#allocation9 + $0x700] sm:$0xf]  ;;  %v5726_v35 = vor.u32 %v7567_v27, %v5725_v26  ;;  %3506 = vmatpush.bf16.msra.mxu1 %v5470_v31 }
  0x49   :  { %v7631_v29 = vld [vmem:[#allocation9 + $0x71c] sm:$0xf0] }
  0x4a   :  { %v5181_v32 = vld [vmem:[#allocation9 + $0xc0] sm:$0xf]  ;;  %v5982_v37 = vor.u32 %v7631_v29, %v5981_v28  ;;  %3519 = vmatpush.bf16.msra.mxu2 %v5726_v35 }
  0x4b   :  { %v7431_v33 = vld [vmem:[#allocation9 + $0xdc] sm:$0xf0] }
  0x4c   :  { %v5437_v34 = vld [vmem:[#allocation9 + $0x2c0] sm:$0xf]  ;;  %v5182_v42 = vor.u32 %v7431_v33, %v5181_v32  ;;  %3532 = vmatpush.bf16.msra.mxu3 %v5982_v37 }
  0x4d   :  { %v7495_v36 = vld [vmem:[#allocation9 + $0x2dc] sm:$0xf0] }
  0x4e   :  { %v5693_v38 = vld [vmem:[#allocation9 + $0x4c0] sm:$0xf]  ;;  %v5438_v43 = vor.u32 %v7495_v36, %v5437_v34  ;;  %3494 = vmatpush.bf16.msra.mxu0 %v5182_v42 }
  0x4f   :  { %v7559_v39 = vld [vmem:[#allocation9 + $0x4dc] sm:$0xf0] }
  0x50   :  { %v5949_v40 = vld [vmem:[#allocation9 + $0x6c0] sm:$0xf]  ;;  %v5694_v47 = vor.u32 %v7559_v39, %v5693_v38  ;;  %3507 = vmatpush.bf16.msra.mxu1 %v5438_v43 }
  0x51   :  { %v7623_v41 = vld [vmem:[#allocation9 + $0x6dc] sm:$0xf0] }
  0x52   :  { %v5149_v44 = vld [vmem:[#allocation9 + $0x80] sm:$0xf]  ;;  %v5950_v49 = vor.u32 %v7623_v41, %v5949_v40  ;;  %3520 = vmatpush.bf16.msra.mxu2 %v5694_v47 }
  0x53   :  { %v7423_v45 = vld [vmem:[#allocation9 + $0x9c] sm:$0xf0] }
  0x54   :  { %v5405_v46 = vld [vmem:[#allocation9 + $0x280] sm:$0xf]  ;;  %v5150_v54 = vor.u32 %v7423_v45, %v5149_v44  ;;  %3533 = vmatpush.bf16.msra.mxu3 %v5950_v49 }
  0x55   :  { %v7487_v48 = vld [vmem:[#allocation9 + $0x29c] sm:$0xf0] }
  0x56   :  { %v5661_v50 = vld [vmem:[#allocation9 + $0x480] sm:$0xf]  ;;  %v5406_v23 = vor.u32 %v7487_v48, %v5405_v46  ;;  %3495 = vmatpush.bf16.msra.mxu0 %v5150_v54 }
  0x57   :  { %v7551_v51 = vld [vmem:[#allocation9 + $0x49c] sm:$0xf0] }
  0x58   :  { %v5917_v52 = vld [vmem:[#allocation9 + $0x680] sm:$0xf]  ;;  %v5662_v58 = vor.u32 %v7551_v51, %v5661_v50  ;;  %3508 = vmatpush.bf16.msra.mxu1 %v5406_v23 }
  0x59   :  { %v7615_v53 = vld [vmem:[#allocation9 + $0x69c] sm:$0xf0] }
  0x5a   :  { %v5117_v55 = vld [vmem:[#allocation9 + $0x40] sm:$0xf]  ;;  %v5918_v60 = vor.u32 %v7615_v53, %v5917_v52  ;;  %3521 = vmatpush.bf16.msra.mxu2 %v5662_v58 }
  0x5b   :  { %v7415_v56 = vld [vmem:[#allocation9 + $0x5c] sm:$0xf0] }
  0x5c   :  { %v5373_v57 = vld [vmem:[#allocation9 + $0x240] sm:$0xf]  ;;  %v5118_v1 = vor.u32 %v7415_v56, %v5117_v55  ;;  %3534 = vmatpush.bf16.msra.mxu3 %v5918_v60 }
  0x5d   :  { %v7479_v59 = vld [vmem:[#allocation9 + $0x25c] sm:$0xf0] }
  0x5e   :  { %v5629_v61 = vld [vmem:[#allocation9 + $0x440] sm:$0xf]  ;;  %v5374_v4 = vor.u32 %v7479_v59, %v5373_v57  ;;  %3496 = vmatpush.bf16.msra.mxu0 %v5118_v1 }
  0x5f   :  { %v7543_v62 = vld [vmem:[#allocation9 + $0x45c] sm:$0xf0] }
  0x60   :  { %v5885_v63 = vld [vmem:[#allocation9 + $0x640] sm:$0xf]  ;;  %v5630_v8 = vor.u32 %v7543_v62, %v5629_v61  ;;  %3509 = vmatpush.bf16.msra.mxu1 %v5374_v4 }
  0x61   :  { %v7607_v0 = vld [vmem:[#allocation9 + $0x65c] sm:$0xf0] }
  0x62   :  { %v5085_v2 = vld [vmem:[#allocation9] sm:$0xf]  ;;  %v5886_v12 = vor.u32 %v7607_v0, %v5885_v63  ;;  %3522 = vmatpush.bf16.msra.mxu2 %v5630_v8 }
  0x63   :  { %v7407_v3 = vld [vmem:[#allocation9 + $0x1c] sm:$0xf0] }
  0x64   :  { %v5341_v5 = vld [vmem:[#allocation9 + $0x200] sm:$0xf]  ;;  %v5086_v16 = vor.u32 %v7407_v3, %v5085_v2  ;;  %3535 = vmatpush.bf16.msra.mxu3 %v5886_v12 }
  0x65   :  { %v7471_v6 = vld [vmem:[#allocation9 + $0x21c] sm:$0xf0] }
  0x66   :  { %v6333_v7 = vld [vmem:[#allocation9 + $0x9c0] sm:$0xf]  ;;  %v5342_v20 = vor.u32 %v7471_v6, %v5341_v5  ;;  %3497 = vmatpush.bf16.msra.mxu0 %v5086_v16 }
  0x67   :  { %v7719_v9 = vld [vmem:[#allocation9 + $0x9dc] sm:$0xf0] }
  0x68   :  { %v6589_v10 = vld [vmem:[#allocation9 + $0xbc0] sm:$0xf]  ;;  %v6334_v21 = vor.u32 %v7719_v9, %v6333_v7  ;;  %3510 = vmatpush.bf16.msra.mxu1 %v5342_v20 }
  0x69   :  { %v7783_v11 = vld [vmem:[#allocation9 + $0xbdc] sm:$0xf0] }
  0x6a   :  { %v5597_v13 = vld [vmem:[#allocation9 + $0x400] sm:$0xf]  ;;  %v6590_v25 = vor.u32 %v7783_v11, %v6589_v10  ;;  %3542 = vmatpush.bf16.msrb.mxu0 %v6334_v21 }
  0x6b   :  { %v7535_v14 = vld [vmem:[#allocation9 + $0x41c] sm:$0xf0] }
  0x6c   :  { %v5853_v15 = vld [vmem:[#allocation9 + $0x600] sm:$0xf]  ;;  %v5598_v28 = vor.u32 %v7535_v14, %v5597_v13  ;;  %3555 = vmatpush.bf16.msrb.mxu1 %v6590_v25 }
  0x6d   :  { %v7599_v17 = vld [vmem:[#allocation9 + $0x61c] sm:$0xf0] }
  0x6e   :  { %v6845_v18 = vld [vmem:[#allocation9 + $0xdc0] sm:$0xf]  ;;  %v5854_v31 = vor.u32 %v7599_v17, %v5853_v15  ;;  %3523 = vmatpush.bf16.msra.mxu2 %v5598_v28 }
  0x6f   :  { %v7847_v19 = vld [vmem:[#allocation9 + $0xddc] sm:$0xf0] }
  0x70   :  { %v7101_v22 = vld [vmem:[#allocation9 + $0xfc0] sm:$0xf]  ;;  %v6846_v32 = vor.u32 %v7847_v19, %v6845_v18  ;;  %3536 = vmatpush.bf16.msra.mxu3 %v5854_v31 }
  0x71   :  { %v7911_v24 = vld [vmem:[#allocation9 + $0xfdc] sm:$0xf0] }
  0x72   :  { %v6301_v26 = vld [vmem:[#allocation9 + $0x980] sm:$0xf]  ;;  %v7102_v33 = vor.u32 %v7911_v24, %v7101_v22  ;;  %3568 = vmatpush.bf16.msrb.mxu2 %v6846_v32 }
  0x73   :  { %v7711_v27 = vld [vmem:[#allocation9 + $0x99c] sm:$0xf0] }
  0x74   :  { %v6557_v29 = vld [vmem:[#allocation9 + $0xb80] sm:$0xf]  ;;  %v6302_v36 = vor.u32 %v7711_v27, %v6301_v26  ;;  %3581 = vmatpush.bf16.msrb.mxu3 %v7102_v33 }
  0x75   :  { %v7775_v30 = vld [vmem:[#allocation9 + $0xb9c] sm:$0xf0] }
  0x76   :  { %v6813_v34 = vld [vmem:[#allocation9 + $0xd80] sm:$0xf]  ;;  %v6558_v39 = vor.u32 %v7775_v30, %v6557_v29  ;;  %3543 = vmatpush.bf16.msrb.mxu0 %v6302_v36 }
  0x77   :  { %v7839_v35 = vld [vmem:[#allocation9 + $0xd9c] sm:$0xf0] }
  0x78   :  { %v7069_v37 = vld [vmem:[#allocation9 + $0xf80] sm:$0xf]  ;;  %v6814_v44 = vor.u32 %v7839_v35, %v6813_v34  ;;  %3556 = vmatpush.bf16.msrb.mxu1 %v6558_v39 }
  0x79   :  { %v7903_v38 = vld [vmem:[#allocation9 + $0xf9c] sm:$0xf0] }
  0x7a   :  { %v6269_v40 = vld [vmem:[#allocation9 + $0x940] sm:$0xf]  ;;  %v7070_v45 = vor.u32 %v7903_v38, %v7069_v37  ;;  %3569 = vmatpush.bf16.msrb.mxu2 %v6814_v44 }
  0x7b   :  { %v7703_v41 = vld [vmem:[#allocation9 + $0x95c] sm:$0xf0] }
  0x7c   :  { %v6525_v42 = vld [vmem:[#allocation9 + $0xb40] sm:$0xf]  ;;  %v6270_v48 = vor.u32 %v7703_v41, %v6269_v40  ;;  %3582 = vmatpush.bf16.msrb.mxu3 %v7070_v45 }
  0x7d   :  { %v7767_v43 = vld [vmem:[#allocation9 + $0xb5c] sm:$0xf0] }
  0x7e   :  { %v6781_v46 = vld [vmem:[#allocation9 + $0xd40] sm:$0xf]  ;;  %v6526_v51 = vor.u32 %v7767_v43, %v6525_v42  ;;  %3544 = vmatpush.bf16.msrb.mxu0 %v6270_v48 }
  0x7f   :  { %v7831_v47 = vld [vmem:[#allocation9 + $0xd5c] sm:$0xf0] }
  0x80   :  { %v7037_v49 = vld [vmem:[#allocation9 + $0xf40] sm:$0xf]  ;;  %v6782_v55 = vor.u32 %v7831_v47, %v6781_v46  ;;  %3557 = vmatpush.bf16.msrb.mxu1 %v6526_v51 }
  0x81   :  { %v7895_v50 = vld [vmem:[#allocation9 + $0xf5c] sm:$0xf0] }
  0x82   :  { %v6237_v52 = vld [vmem:[#allocation9 + $0x900] sm:$0xf]  ;;  %v7038_v56 = vor.u32 %v7895_v50, %v7037_v49  ;;  %3570 = vmatpush.bf16.msrb.mxu2 %v6782_v55  ;;  %v8287_v50 = vld [vmem:[#allocation8] sm:$0xff] }
  0x83   :  { %v7695_v53 = vld [vmem:[#allocation9 + $0x91c] sm:$0xf0]  ;;  %v148_v51 = vperm.slane %v8287_v50, 0 }
  0x84   :  { %v6493_v54 = vld [vmem:[#allocation9 + $0xb00] sm:$0xf]  ;;  %v6238_v57 = vor.u32 %v7695_v53, %v6237_v52  ;;  %3583 = vmatpush.bf16.msrb.mxu3 %v7038_v56  ;;  %v149_v52 = vperm.slane %v8287_v50, 1 }
  0x85   :  { %v7759_v23 = vld [vmem:[#allocation9 + $0xb1c] sm:$0xf0] }
  0x86   :  { %v6494_v58 = vor.u32 %v7759_v23, %v6493_v54  ;;  %v6205_v59 = vld [vmem:[#allocation9 + $0x8c0] sm:$0xf]  ;;  %3545 = vmatpush.bf16.msrb.mxu0 %v6238_v57 }
  0x87   :  { %v7687_v60 = vld [vmem:[#allocation9 + $0x8dc] sm:$0xf0] }
  0x88   :  { %v6461_v61 = vld [vmem:[#allocation9 + $0xac0] sm:$0xf]  ;;  %v6206_v63 = vor.u32 %v7687_v60, %v6205_v59  ;;  %3558 = vmatpush.bf16.msrb.mxu1 %v6494_v58  ;;  %v150_v58 = vperm.slane %v8287_v50, 2  ;;  %v151_v59 = vperm.slane %v8287_v50, 3  ;;  %v7459_v60 = vld [vmem:[#allocation9 + $0x1c4] sm:$0xf] }
  0x89   :  { %v7751_v62 = vld [vmem:[#allocation9 + $0xadc] sm:$0xf0] }
  0x8a   :  { %v6462_v0 = vor.u32 %v7751_v62, %v6461_v61  ;;  %3546 = vmatpush.bf16.msrb.mxu0 %v6206_v63  ;;  %v6749_v1 = vld [vmem:[#allocation9 + $0xd00] sm:$0xf]  ;;  %v5311_v62 = vld [vmem:[#allocation9 + $0x1e0] sm:$0xf0] }
  0x8b   :  { %v7823_v2 = vld [vmem:[#allocation9 + $0xd1c] sm:$0xf0]  ;;  %v7523_v63 = vld [vmem:[#allocation9 + $0x3c4] sm:$0xf] }
  0x8c   :  { %3559 = vmatpush.bf16.msrb.mxu1 %v6462_v0  ;;  %v7005_v3 = vld [vmem:[#allocation9 + $0xf00] sm:$0xf]  ;;  %v6750_v4 = vor.u32 %v7823_v2, %v6749_v1  ;;  %v5567_v0 = vld [vmem:[#allocation9 + $0x3e0] sm:$0xf0] }
  0x8d   :  { %v7887_v5 = vld [vmem:[#allocation9 + $0xf1c] sm:$0xf0] }
  0x8e   :  { %v7006_v6 = vor.u32 %v7887_v5, %v7005_v3  ;;  %v6173_v7 = vld [vmem:[#allocation9 + $0x880] sm:$0xf]  ;;  %3571 = vmatpush.bf16.msrb.mxu2 %v6750_v4 }
  0x8f   :  { %v7679_v8 = vld [vmem:[#allocation9 + $0x89c] sm:$0xf0] }
  0x90   :  { %v6174_v9 = vor.u32 %v7679_v8, %v6173_v7  ;;  %v6429_v10 = vld [vmem:[#allocation9 + $0xa80] sm:$0xf]  ;;  %3584 = vmatpush.bf16.msrb.mxu3 %v7006_v6 }
  0x91   :  { %v7743_v11 = vld [vmem:[#allocation9 + $0xa9c] sm:$0xf0] }
  0x92   :  { %v6430_v12 = vor.u32 %v7743_v11, %v6429_v10  ;;  %v6717_v13 = vld [vmem:[#allocation9 + $0xcc0] sm:$0xf]  ;;  %3547 = vmatpush.bf16.msrb.mxu0 %v6174_v9  ;;  %v5314_v9 = vor.u32 %v7459_v60, %v5311_v62  ;;  %v5570_v10 = vor.u32 %v7523_v63, %v5567_v0  ;;  %v7451_v11 = vld [vmem:[#allocation9 + $0x184] sm:$0xf]  ;;  %v155_v62 = vperm.slane %v8287_v50, 7 }
  0x93   :  { %v7815_v14 = vld [vmem:[#allocation9 + $0xcdc] sm:$0xf0]  ;;  %v7571_v60 = vld [vmem:[#allocation9 + $0x544] sm:$0xf] }
  0x94   :  { %v6973_v15 = vld [vmem:[#allocation9 + $0xec0] sm:$0xf]  ;;  %v6718_v16 = vor.u32 %v7815_v14, %v6717_v13  ;;  %3560 = vmatpush.bf16.msrb.mxu1 %v6430_v12  ;;  %v5279_v12 = vld [vmem:[#allocation9 + $0x1a0] sm:$0xf0] }
  0x95   :  { %v7879_v17 = vld [vmem:[#allocation9 + $0xedc] sm:$0xf0] }
  0x96   :  { %v6974_v18 = vor.u32 %v7879_v17, %v6973_v15  ;;  %v6141_v19 = vld [vmem:[#allocation9 + $0x840] sm:$0xf]  ;;  %3572 = vmatpush.bf16.msrb.mxu2 %v6718_v16  ;;  %v7515_v16 = vld [vmem:[#allocation9 + $0x384] sm:$0xf] }
  0x97   :  { %v7671_v20 = vld [vmem:[#allocation9 + $0x85c] sm:$0xf0]  ;;  %v5535_v17 = vld [vmem:[#allocation9 + $0x3a0] sm:$0xf0] }
  0x98   :  { %v6397_v21 = vld [vmem:[#allocation9 + $0xa40] sm:$0xf]  ;;  %v6142_v22 = vor.u32 %v7671_v20, %v6141_v19  ;;  %3585 = vmatpush.bf16.msrb.mxu3 %v6974_v18  ;;  %v152_v19 = vperm.slane %v8287_v50, 4  ;;  %v7587_v20 = vld [vmem:[#allocation9 + $0x5c4] sm:$0xf] }
  0x99   :  { %v7735_v24 = vld [vmem:[#allocation9 + $0xa5c] sm:$0xf0] }
  0x9a   :  { %v6398_v25 = vor.u32 %v7735_v24, %v6397_v21  ;;  %v6685_v26 = vld [vmem:[#allocation9 + $0xc80] sm:$0xf]  ;;  %3548 = vmatpush.bf16.msrb.mxu0 %v6142_v22  ;;  %v5823_v21 = vld [vmem:[#allocation9 + $0x5e0] sm:$0xf0] }
  0x9b   :  { %v7807_v27 = vld [vmem:[#allocation9 + $0xc9c] sm:$0xf0]  ;;  %v7651_v22 = vld [vmem:[#allocation9 + $0x7c4] sm:$0xf] }
  0x9c   :  { %v6686_v28 = vor.u32 %v7807_v27, %v6685_v26  ;;  %v6941_v29 = vld [vmem:[#allocation9 + $0xe80] sm:$0xf]  ;;  %3561 = vmatpush.bf16.msrb.mxu1 %v6398_v25  ;;  %v6079_v24 = vld [vmem:[#allocation9 + $0x7e0] sm:$0xf0]  ;;  %v5282_v27 = vor.u32 %v7451_v11, %v5279_v12 }
  0x9d   :  { %v7871_v30 = vld [vmem:[#allocation9 + $0xe9c] sm:$0xf0]  ;;  %v7443_v25 = vld [vmem:[#allocation9 + $0x144] sm:$0xf] }
  0x9e   :  { %v6942_v31 = vor.u32 %v7871_v30, %v6941_v29  ;;  %v6109_v32 = vld [vmem:[#allocation9 + $0x800] sm:$0xf]  ;;  %3573 = vmatpush.bf16.msrb.mxu2 %v6686_v28  ;;  %v5538_v28 = vor.u32 %v7515_v16, %v5535_v17  ;;  %v5247_v29 = vld [vmem:[#allocation9 + $0x160] sm:$0xf0] }
  0x9f   :  { %v7663_v33 = vld [vmem:[#allocation9 + $0x81c] sm:$0xf0]  ;;  %v7507_v30 = vld [vmem:[#allocation9 + $0x344] sm:$0xf] }
  0xa0   :  { %v6365_v34 = vld [vmem:[#allocation9 + $0xa00] sm:$0xf]  ;;  %v6110_v35 = vor.u32 %v7663_v33, %v6109_v32  ;;  %3586 = vmatpush.bf16.msrb.mxu3 %v6942_v31  ;;  %v5503_v31 = vld [vmem:[#allocation9 + $0x360] sm:$0xf0]  ;;  %v153_v32 = vperm.slane %v8287_v50, 5 }
  0xa1   :  { %v7727_v36 = vld [vmem:[#allocation9 + $0xa1c] sm:$0xf0]  ;;  %v7563_v17 = vld [vmem:[#allocation9 + $0x504] sm:$0xf] }
  0xa2   :  { %v6366_v37 = vor.u32 %v7727_v36, %v6365_v34  ;;  %v6653_v38 = vld [vmem:[#allocation9 + $0xc40] sm:$0xf]  ;;  %3549 = vmatpush.bf16.msrb.mxu0 %v6110_v35 }
  0xa3   :  { %v7799_v39 = vld [vmem:[#allocation9 + $0xc5c] sm:$0xf0] }
  0xa4   :  { %v6909_v40 = vld [vmem:[#allocation9 + $0xe40] sm:$0xf]  ;;  %3562 = vmatpush.bf16.msrb.mxu1 %v6366_v37  ;;  %v6654_v42 = vor.u32 %v7799_v39, %v6653_v38  ;;  %v5826_v38 = vor.u32 %v7587_v20, %v5823_v21  ;;  %v6082_v39 = vor.u32 %v7651_v22, %v6079_v24  ;;  %v5727_v20 = vld [vmem:[#allocation9 + $0x520] sm:$0xf0] }
  0xa5   :  { %v7863_v41 = vld [vmem:[#allocation9 + $0xe5c] sm:$0xf0]  ;;  %v7627_v21 = vld [vmem:[#allocation9 + $0x704] sm:$0xf] }
  0xa6   :  { %v6910_v43 = vor.u32 %v7863_v41, %v6909_v40  ;;  %3574 = vmatpush.bf16.msrb.mxu2 %v6654_v42  ;;  %v6621_v44 = vld [vmem:[#allocation9 + $0xc00] sm:$0xf]  ;;  %v5250_v40 = vor.u32 %v7443_v25, %v5247_v29  ;;  %v5506_v41 = vor.u32 %v7507_v30, %v5503_v31  ;;  %v7579_v42 = vld [vmem:[#allocation9 + $0x584] sm:$0xf] }
  0xa7   :  { %v7791_v45 = vld [vmem:[#allocation9 + $0xc1c] sm:$0xf0]  ;;  %v257_v53 = vpop.f32.mrf.mxu0  ;;  %v5983_v22 = vld [vmem:[#allocation9 + $0x720] sm:$0xf0] }
  0xa8   :  { %3587 = vmatpush.bf16.msrb.mxu3 %v6910_v43  ;;  %v6622_v46 = vor.u32 %v7791_v45, %v6621_v44  ;;  %v6877_v47 = vld [vmem:[#allocation9 + $0xe00] sm:$0xf]  ;;  %v258_v54 = vadd.f32 %v257_v53, %v148_v51  ;;  %v270_v23 = vpop.f32.mrf.mxu1  ;;  %v5791_v43 = vld [vmem:[#allocation9 + $0x5a0] sm:$0xf0] }
  0xa9   :  { %v7855_v48 = vld [vmem:[#allocation9 + $0xe1c] sm:$0xf0]  ;;  %v271_v55 = vadd.f32 %v270_v23, %v149_v52  ;;  %v7435_v51 = vld [vmem:[#allocation9 + $0x104] sm:$0xf] }
  0xaa   :  { %v6878_v49 = vor.u32 %v7855_v48, %v6877_v47  ;;  %3575 = vmatpush.bf16.msrb.mxu2 %v6622_v46  ;;  %v352_v56 = vmax.f32 %v258_v54, 0.0  ;;  %v7643_v48 = vld [vmem:[#allocation9 + $0x784] sm:$0xf] }
  0xab   :  { %v353_v57 = vmax.f32 %v271_v55, 0.0  ;;  %v5215_v53 = vld [vmem:[#allocation9 + $0x120] sm:$0xf0] }
  0xac   :  { %3588 = vmatpush.bf16.msrb.mxu3 %v6878_v49  ;;  %v6047_v49 = vld [vmem:[#allocation9 + $0x7a0] sm:$0xf0]  ;;  %v5218_v63 = vor.u32 %v7435_v51, %v5215_v53 }
  0xad   :  { %v360_v61 = vpack.c.bf16 %v353_v57, %v352_v56  ;;  %v7499_v54 = vld [vmem:[#allocation9 + $0x304] sm:$0xf]  ;;  %v5794_v57 = vor.u32 %v7579_v42, %v5791_v43 }
  0xae   :  { %v5471_v23 = vld [vmem:[#allocation9 + $0x320] sm:$0xf0] }
  0xaf   :  { %v283_v1 = vpop.f32.mrf.mxu2  ;;  %v906_v2 = vunpack.c.l.b16 %v360_v61  ;;  %v907_v3 = vunpack.c.h.b16 %v360_v61  ;;  %v259_v6 = vpop.f32.mrf.mxu0  ;;  %v5759_v61 = vld [vmem:[#allocation9 + $0x560] sm:$0xf0]  ;;  %v5474_v0 = vor.u32 %v7499_v54, %v5471_v23 }
  0xb0   :  { %v284_v4 = vadd.f32 %v283_v1, %v150_v58  ;;  %v296_v5 = vpop.f32.mrf.mxu3  ;;  %v272_v8 = vpop.f32.mrf.mxu1  ;;  %v6050_v58 = vor.u32 %v7643_v48, %v6047_v49  ;;  %v7635_v1 = vld [vmem:[#allocation9 + $0x744] sm:$0xf] }
  0xb1   :  { %v297_v7 = vadd.f32 %v296_v5, %v151_v59  ;;  %v8293_v13 = vpack.c.b16 %v906_v2, %v906_v2  ;;  %v8295_v14 = vpack.c.b16 %v907_v3, %v907_v3  ;;  %v154_v59 = vperm.slane %v8287_v50, 6  ;;  %v6015_v2 = vld [vmem:[#allocation9 + $0x760] sm:$0xf0] }
  0xb2   :  { %v354_v15 = vmax.f32 %v284_v4, 0.0  ;;  %v7427_v4 = vld [vmem:[#allocation9 + $0xc4] sm:$0xf]  ;;  %v6018_v16 = vor.u32 %v7635_v1, %v6015_v2 }
  0xb3   :  { %v355_v18 = vmax.f32 %v297_v7, 0.0  ;;  %3498 = vmatmul.bf16.vlgmr.msra.gmra.mxu0 %v8293_v13  ;;  %3511 = vmatmul.bf16.vlgmr.msra.gmra.mxu1 %v8295_v14  ;;  %v5183_v5 = vld [vmem:[#allocation9 + $0xe0] sm:$0xf0]  ;;  %v5762_v7 = vor.u32 %v7571_v60, %v5759_v61 }
  0xb4   :  { %3594 = vmatpush.bf16.msra.mxu0 %v5314_v9  ;;  %3607 = vmatpush.bf16.msra.mxu1 %v5570_v10  ;;  %v7491_v8 = vld [vmem:[#allocation9 + $0x2c4] sm:$0xf] }
  0xb5   :  { %v361_v26 = vpack.c.bf16 %v355_v18, %v354_v15  ;;  %v5439_v9 = vld [vmem:[#allocation9 + $0x2e0] sm:$0xf0] }
  0xb6   :  { %v7419_v29 = vld [vmem:[#allocation9 + $0x84] sm:$0xf] }
  0xb7   :  { %v908_v33 = vunpack.c.l.b16 %v361_v26  ;;  %v909_v34 = vunpack.c.h.b16 %v361_v26  ;;  %v285_v35 = vpop.f32.mrf.mxu2  ;;  %v309_v37 = vpop.f32.mrf.mxu0  ;;  %v5151_v30 = vld [vmem:[#allocation9 + $0xa0] sm:$0xf0] }
  0xb8   :  { %v298_v36 = vpop.f32.mrf.mxu3  ;;  %3595 = vmatpush.bf16.msra.mxu0 %v5282_v27  ;;  %3608 = vmatpush.bf16.msra.mxu1 %v5538_v28  ;;  %v310_v46 = vadd.f32 %v309_v37, %v152_v19  ;;  %v322_v47 = vpop.f32.mrf.mxu1  ;;  %v5186_v19 = vor.u32 %v7427_v4, %v5183_v5  ;;  %v5442_v28 = vor.u32 %v7491_v8, %v5439_v9  ;;  %v7411_v43 = vld [vmem:[#allocation9 + $0x44] sm:$0xf] }
  0xb9   :  { %v8301_v44 = vpack.c.b16 %v908_v33, %v908_v33  ;;  %v8303_v45 = vpack.c.b16 %v909_v34, %v909_v34  ;;  %v323_v52 = vadd.f32 %v322_v47, %v153_v32  ;;  %v7483_v32 = vld [vmem:[#allocation9 + $0x284] sm:$0xf]  ;;  %v5730_v34 = vor.u32 %v7563_v17, %v5727_v20 }
  0xba   :  { %v356_v55 = vmax.f32 %v310_v46, 0.0  ;;  %v5407_v33 = vld [vmem:[#allocation9 + $0x2a0] sm:$0xf0]  ;;  %v5986_v35 = vor.u32 %v7627_v21, %v5983_v22 }
  0xbb   :  { %3524 = vmatmul.bf16.vlgmr.msra.gmra.mxu2 %v8301_v44  ;;  %3537 = vmatmul.bf16.vlgmr.msra.gmra.mxu3 %v8303_v45  ;;  %v357_v56 = vmax.f32 %v323_v52, 0.0  ;;  %v7555_v36 = vld [vmem:[#allocation9 + $0x4c4] sm:$0xf]  ;;  %v5410_v42 = vor.u32 %v7483_v32, %v5407_v33 }
  0xbc   :  { %3620 = vmatpush.bf16.msra.mxu2 %v5826_v38  ;;  %3633 = vmatpush.bf16.msra.mxu3 %v6082_v39  ;;  %v5695_v38 = vld [vmem:[#allocation9 + $0x4e0] sm:$0xf0] }
  0xbd   :  { %3596 = vmatpush.bf16.msra.mxu0 %v5250_v40  ;;  %3609 = vmatpush.bf16.msra.mxu1 %v5506_v41  ;;  %v362_v3 = vpack.c.bf16 %v357_v56, %v356_v55  ;;  %v7619_v39 = vld [vmem:[#allocation9 + $0x6c4] sm:$0xf]  ;;  %v5154_v41 = vor.u32 %v7419_v29, %v5151_v30  ;;  %v5698_v53 = vor.u32 %v7555_v36, %v5695_v38 }
  0xbe   :  { %v5951_v40 = vld [vmem:[#allocation9 + $0x6e0] sm:$0xf0] }
  0xbf   :  { %v335_v6 = vpop.f32.mrf.mxu2  ;;  %v910_v10 = vunpack.c.l.b16 %v362_v3  ;;  %v911_v11 = vunpack.c.h.b16 %v362_v3  ;;  %v311_v50 = vpop.f32.mrf.mxu0  ;;  %v5119_v49 = vld [vmem:[#allocation9 + $0x60] sm:$0xf0]  ;;  %v5954_v54 = vor.u32 %v7619_v39, %v5951_v40 }
  0xc0   :  { %3621 = vmatpush.bf16.msra.mxu2 %v5794_v57  ;;  %3634 = vmatpush.bf16.msra.mxu3 %v6050_v58  ;;  %v336_v12 = vadd.f32 %v335_v6, %v154_v59  ;;  %v348_v15 = vpop.f32.mrf.mxu3  ;;  %v324_v24 = vpop.f32.mrf.mxu1  ;;  %v7475_v51 = vld [vmem:[#allocation9 + $0x244] sm:$0xf]  ;;  %v5122_v61 = vor.u32 %v7411_v43, %v5119_v49 }
  0xc1   :  { %v349_v18 = vadd.f32 %v348_v15, %v155_v62  ;;  %3597 = vmatpush.bf16.msra.mxu0 %v5218_v63  ;;  %3610 = vmatpush.bf16.msra.mxu1 %v5474_v0  ;;  %v8309_v25 = vpack.c.b16 %v910_v10, %v910_v10  ;;  %v8311_v26 = vpack.c.b16 %v911_v11, %v911_v11  ;;  %v5375_v52 = vld [vmem:[#allocation9 + $0x260] sm:$0xf0] }
  0xc2   :  { %v358_v27 = vmax.f32 %v336_v12, 0.0  ;;  %v7547_v55 = vld [vmem:[#allocation9 + $0x484] sm:$0xf]  ;;  %v5378_v62 = vor.u32 %v7475_v51, %v5375_v52 }
  0xc3   :  { %v359_v31 = vmax.f32 %v349_v18, 0.0  ;;  %3550 = vmatmul.bf16.vlgmr.msrb.gmra.mxu0 %v8309_v25  ;;  %3563 = vmatmul.bf16.vlgmr.msrb.gmra.mxu1 %v8311_v26  ;;  %v5663_v58 = vld [vmem:[#allocation9 + $0x4a0] sm:$0xf0] }
  0xc4   :  { %3622 = vmatpush.bf16.msra.mxu2 %v5762_v7  ;;  %3635 = vmatpush.bf16.msra.mxu3 %v6018_v16  ;;  %v7611_v59 = vld [vmem:[#allocation9 + $0x684] sm:$0xf]  ;;  %v5666_v5 = vor.u32 %v7547_v55, %v5663_v58 }
  0xc5   :  { %v363_v37 = vpack.c.bf16 %v359_v31, %v358_v27  ;;  %3598 = vmatpush.bf16.msra.mxu0 %v5186_v19  ;;  %3611 = vmatpush.bf16.msra.mxu1 %v5442_v28  ;;  %v5919_v60 = vld [vmem:[#allocation9 + $0x6a0] sm:$0xf0] }
  0xc6   :  { %v7403_v63 = vld [vmem:[#allocation9 + $0x4] sm:$0xf]  ;;  %v5922_v6 = vor.u32 %v7611_v59, %v5919_v60 }
  0xc7   :  { %v912_v46 = vunpack.c.l.b16 %v363_v37  ;;  %v913_v47 = vunpack.c.h.b16 %v363_v37  ;;  %v337_v48 = vpop.f32.mrf.mxu2  ;;  %v5087_v0 = vld [vmem:[#allocation9 + $0x20] sm:$0xf0] }
  0xc8   :  { %3623 = vmatpush.bf16.msra.mxu2 %v5730_v34  ;;  %3636 = vmatpush.bf16.msra.mxu3 %v5986_v35  ;;  %v350_v23 = vpop.f32.mrf.mxu3  ;;  %v7467_v1 = vld [vmem:[#allocation9 + $0x204] sm:$0xf]  ;;  %v5090_v15 = vor.u32 %v7403_v63, %v5087_v0 }
  0xc9   :  { %v8315_v56 = vpack.c.b16 %v912_v46, %v912_v46  ;;  %v8317_v57 = vpack.c.b16 %v913_v47, %v913_v47  ;;  %3599 = vmatpush.bf16.msra.mxu0 %v5154_v41  ;;  %3612 = vmatpush.bf16.msra.mxu1 %v5410_v42  ;;  %v5343_v2 = vld [vmem:[#allocation9 + $0x220] sm:$0xf0] }
  0xca   :  { %v7715_v3 = vld [vmem:[#allocation9 + $0x9c4] sm:$0xf]  ;;  %v5346_v16 = vor.u32 %v7467_v1, %v5343_v2 }
  0xcb   :  { %3576 = vmatmul.bf16.vlgmr.msrb.gmra.mxu2 %v8315_v56  ;;  %3589 = vmatmul.bf16.vlgmr.msrb.gmra.mxu3 %v8317_v57  ;;  %v6335_v4 = vld [vmem:[#allocation9 + $0x9e0] sm:$0xf0] }
  0xcc   :  { %3624 = vmatpush.bf16.msra.mxu2 %v5698_v53  ;;  %3637 = vmatpush.bf16.msra.mxu3 %v5954_v54  ;;  %v7779_v7 = vld [vmem:[#allocation9 + $0xbc4] sm:$0xf]  ;;  %v6338_v17 = vor.u32 %v7715_v3, %v6335_v4 }
  0xcd   :  { %v6591_v8 = vld [vmem:[#allocation9 + $0xbe0] sm:$0xf0]  ;;  %3600 = vmatpush.bf16.msra.mxu0 %v5122_v61  ;;  %3613 = vmatpush.bf16.msra.mxu1 %v5378_v62 }
  0xce   :  { %v7539_v9 = vld [vmem:[#allocation9 + $0x444] sm:$0xf]  ;;  %v6594_v50 = vor.u32 %v7779_v7, %v6591_v8 }
  0xcf   :  { %v5631_v10 = vld [vmem:[#allocation9 + $0x460] sm:$0xf0] }
  0xd0   :  { %v7603_v11 = vld [vmem:[#allocation9 + $0x644] sm:$0xf]  ;;  %3625 = vmatpush.bf16.msra.mxu2 %v5666_v5  ;;  %3638 = vmatpush.bf16.msra.mxu3 %v5922_v6  ;;  %v5634_v21 = vor.u32 %v7539_v9, %v5631_v10 }
  0xd1   :  { %v5887_v12 = vld [vmem:[#allocation9 + $0x660] sm:$0xf0]  ;;  %3601 = vmatpush.bf16.msra.mxu0 %v5090_v15  ;;  %3614 = vmatpush.bf16.msra.mxu1 %v5346_v16 }
  0xd2   :  { %v7707_v18 = vld [vmem:[#allocation9 + $0x984] sm:$0xf]  ;;  %v5890_v22 = vor.u32 %v7603_v11, %v5887_v12 }
  0xd3   :  { %v6303_v19 = vld [vmem:[#allocation9 + $0x9a0] sm:$0xf0] }
  0xd4   :  { %v7771_v20 = vld [vmem:[#allocation9 + $0xb84] sm:$0xf]  ;;  %v6306_v35 = vor.u32 %v7707_v18, %v6303_v19  ;;  %3626 = vmatpush.bf16.msra.mxu2 %v5634_v21  ;;  %3639 = vmatpush.bf16.msra.mxu3 %v5890_v22 }
  0xd5   :  { %v6559_v24 = vld [vmem:[#allocation9 + $0xba0] sm:$0xf0]  ;;  %3646 = vmatpush.bf16.msrb.mxu0 %v6338_v17  ;;  %3659 = vmatpush.bf16.msrb.mxu1 %v6594_v50 }
  0xd6   :  { %v7531_v27 = vld [vmem:[#allocation9 + $0x404] sm:$0xf]  ;;  %v6562_v36 = vor.u32 %v7771_v20, %v6559_v24  ;;  %3602 = vmatmul.bf16.vlgmr.msra.gmra.mxu0 %v8293_v13  ;;  %3615 = vmatmul.bf16.vlgmr.msra.gmra.mxu1 %v8295_v14 }
  0xd7   :  { %v5599_v28 = vld [vmem:[#allocation9 + $0x420] sm:$0xf0] }
  0xd8   :  { %v7595_v29 = vld [vmem:[#allocation9 + $0x604] sm:$0xf]  ;;  %v5602_v38 = vor.u32 %v7531_v27, %v5599_v28 }
  0xd9   :  { %v5855_v30 = vld [vmem:[#allocation9 + $0x620] sm:$0xf0]  ;;  %3647 = vmatpush.bf16.msrb.mxu0 %v6306_v35  ;;  %3660 = vmatpush.bf16.msrb.mxu1 %v6562_v36 }
  0xda   :  { %v7843_v31 = vld [vmem:[#allocation9 + $0xdc4] sm:$0xf]  ;;  %v5858_v39 = vor.u32 %v7595_v29, %v5855_v30  ;;  %3627 = vmatpush.bf16.msra.mxu2 %v5602_v38 }
  0xdb   :  { %v6847_v32 = vld [vmem:[#allocation9 + $0xde0] sm:$0xf0] }
  0xdc   :  { %v7907_v33 = vld [vmem:[#allocation9 + $0xfc4] sm:$0xf]  ;;  %v6850_v43 = vor.u32 %v7843_v31, %v6847_v32  ;;  %3640 = vmatpush.bf16.msra.mxu3 %v5858_v39 }
  0xdd   :  { %v7103_v34 = vld [vmem:[#allocation9 + $0xfe0] sm:$0xf0]  ;;  %3628 = vmatmul.bf16.vlgmr.msra.gmra.mxu2 %v8301_v44 }
  0xde   :  { %v7699_v37 = vld [vmem:[#allocation9 + $0x944] sm:$0xf]  ;;  %v7106_v46 = vor.u32 %v7907_v33, %v7103_v34  ;;  %3672 = vmatpush.bf16.msrb.mxu2 %v6850_v43 }
  0xdf   :  { %v6271_v40 = vld [vmem:[#allocation9 + $0x960] sm:$0xf0]  ;;  %3641 = vmatmul.bf16.vlgmr.msra.gmra.mxu3 %v8303_v45 }
  0xe0   :  { %v7763_v41 = vld [vmem:[#allocation9 + $0xb44] sm:$0xf]  ;;  %v6274_v52 = vor.u32 %v7699_v37, %v6271_v40  ;;  %3685 = vmatpush.bf16.msrb.mxu3 %v7106_v46 }
  0xe1   :  { %v6527_v42 = vld [vmem:[#allocation9 + $0xb60] sm:$0xf0] }
  0xe2   :  { %v7835_v47 = vld [vmem:[#allocation9 + $0xd84] sm:$0xf]  ;;  %v6530_v53 = vor.u32 %v7763_v41, %v6527_v42  ;;  %3648 = vmatpush.bf16.msrb.mxu0 %v6274_v52 }
  0xe3   :  { %v6815_v48 = vld [vmem:[#allocation9 + $0xda0] sm:$0xf0] }
  0xe4   :  { %v7899_v49 = vld [vmem:[#allocation9 + $0xf84] sm:$0xf]  ;;  %v6818_v59 = vor.u32 %v7835_v47, %v6815_v48  ;;  %3661 = vmatpush.bf16.msrb.mxu1 %v6530_v53 }
  0xe5   :  { %v7071_v51 = vld [vmem:[#allocation9 + $0xfa0] sm:$0xf0] }
  0xe6   :  { %v7691_v54 = vld [vmem:[#allocation9 + $0x904] sm:$0xf]  ;;  %v7074_v60 = vor.u32 %v7899_v49, %v7071_v51  ;;  %3673 = vmatpush.bf16.msrb.mxu2 %v6818_v59  ;;  %v5317_v49 = vld [vmem:[#allocation9 + $0x1c8] sm:$0xf] }
  0xe7   :  { %v6239_v23 = vld [vmem:[#allocation9 + $0x920] sm:$0xf0]  ;;  %v7464_v51 = vld [vmem:[#allocation9 + $0x1e4] sm:$0xf0] }
  0xe8   :  { %v7755_v55 = vld [vmem:[#allocation9 + $0xb04] sm:$0xf]  ;;  %v6242_v1 = vor.u32 %v7691_v54, %v6239_v23  ;;  %3686 = vmatpush.bf16.msrb.mxu3 %v7074_v60  ;;  %v5573_v54 = vld [vmem:[#allocation9 + $0x3c8] sm:$0xf] }
  0xe9   :  { %v6495_v58 = vld [vmem:[#allocation9 + $0xb20] sm:$0xf0]  ;;  %v7528_v23 = vld [vmem:[#allocation9 + $0x3e4] sm:$0xf0] }
  0xea   :  { %v7827_v61 = vld [vmem:[#allocation9 + $0xd44] sm:$0xf]  ;;  %v6498_v2 = vor.u32 %v7755_v55, %v6495_v58  ;;  %3649 = vmatpush.bf16.msrb.mxu0 %v6242_v1  ;;  %v5285_v1 = vld [vmem:[#allocation9 + $0x188] sm:$0xf] }
  0xeb   :  { %v6783_v62 = vld [vmem:[#allocation9 + $0xd60] sm:$0xf0] }
  0xec   :  { %v7891_v63 = vld [vmem:[#allocation9 + $0xf44] sm:$0xf]  ;;  %v6786_v7 = vor.u32 %v7827_v61, %v6783_v62  ;;  %3662 = vmatpush.bf16.msrb.mxu1 %v6498_v2  ;;  %v7456_v2 = vld [vmem:[#allocation9 + $0x1a4] sm:$0xf0] }
  0xed   :  { %v7039_v0 = vld [vmem:[#allocation9 + $0xf60] sm:$0xf0] }
  0xee   :  { %v7683_v3 = vld [vmem:[#allocation9 + $0x8c4] sm:$0xf]  ;;  %v7042_v8 = vor.u32 %v7891_v63, %v7039_v0  ;;  %3674 = vmatpush.bf16.msrb.mxu2 %v6786_v7  ;;  %v5318_v63 = vor.u32 %v7464_v51, %v5317_v49  ;;  %v5574_v0 = vor.u32 %v7528_v23, %v5573_v54  ;;  %v5189_v49 = vld [vmem:[#allocation9 + $0xc8] sm:$0xf] }
  0xef   :  { %v6207_v4 = vld [vmem:[#allocation9 + $0x8e0] sm:$0xf0]  ;;  %v7432_v51 = vld [vmem:[#allocation9 + $0xe4] sm:$0xf0] }
  0xf0   :  { %v7747_v5 = vld [vmem:[#allocation9 + $0xac4] sm:$0xf]  ;;  %v6210_v15 = vor.u32 %v7683_v3, %v6207_v4  ;;  %3687 = vmatpush.bf16.msrb.mxu3 %v7042_v8  ;;  %v5541_v3 = vld [vmem:[#allocation9 + $0x388] sm:$0xf] }
  0xf1   :  { %v6463_v6 = vld [vmem:[#allocation9 + $0xae0] sm:$0xf0]  ;;  %v5445_v54 = vld [vmem:[#allocation9 + $0x2c8] sm:$0xf] }
  0xf2   :  { %v7819_v9 = vld [vmem:[#allocation9 + $0xd04] sm:$0xf]  ;;  %v6466_v16 = vor.u32 %v7747_v5, %v6463_v6  ;;  %3650 = vmatpush.bf16.msrb.mxu0 %v6210_v15  ;;  %v7520_v6 = vld [vmem:[#allocation9 + $0x3a4] sm:$0xf0] }
  0xf3   :  { %v6751_v10 = vld [vmem:[#allocation9 + $0xd20] sm:$0xf0]  ;;  %v6085_v15 = vld [vmem:[#allocation9 + $0x7c8] sm:$0xf] }
  0xf4   :  { %v7883_v11 = vld [vmem:[#allocation9 + $0xf04] sm:$0xf]  ;;  %v6754_v20 = vor.u32 %v7819_v9, %v6751_v10  ;;  %3663 = vmatpush.bf16.msrb.mxu1 %v6466_v16  ;;  %v7656_v16 = vld [vmem:[#allocation9 + $0x7e4] sm:$0xf0] }
  0xf5   :  { %v7007_v12 = vld [vmem:[#allocation9 + $0xf20] sm:$0xf0]  ;;  %v7496_v23 = vld [vmem:[#allocation9 + $0x2e4] sm:$0xf0] }
  0xf6   :  { %v7675_v17 = vld [vmem:[#allocation9 + $0x884] sm:$0xf]  ;;  %v7010_v21 = vor.u32 %v7883_v11, %v7007_v12  ;;  %3675 = vmatpush.bf16.msrb.mxu2 %v6754_v20  ;;  %v5829_v11 = vld [vmem:[#allocation9 + $0x5c8] sm:$0xf] }
  0xf7   :  { %v6175_v50 = vld [vmem:[#allocation9 + $0x8a0] sm:$0xf0]  ;;  %v7592_v12 = vld [vmem:[#allocation9 + $0x5e4] sm:$0xf0] }
  0xf8   :  { %v7739_v18 = vld [vmem:[#allocation9 + $0xa84] sm:$0xf]  ;;  %v6178_v29 = vor.u32 %v7675_v17, %v6175_v50  ;;  %3688 = vmatpush.bf16.msrb.mxu3 %v7010_v21  ;;  %v5286_v17 = vor.u32 %v7456_v2, %v5285_v1  ;;  %v5542_v50 = vor.u32 %v7520_v6, %v5541_v3  ;;  %v5253_v20 = vld [vmem:[#allocation9 + $0x148] sm:$0xf] }
  0xf9   :  { %v6431_v19 = vld [vmem:[#allocation9 + $0xaa0] sm:$0xf0]  ;;  %v7448_v21 = vld [vmem:[#allocation9 + $0x164] sm:$0xf0] }
  0xfa   :  { %v7811_v22 = vld [vmem:[#allocation9 + $0xcc4] sm:$0xf]  ;;  %v6434_v30 = vor.u32 %v7739_v18, %v6431_v19  ;;  %3651 = vmatpush.bf16.msrb.mxu0 %v6178_v29  ;;  %v5797_v29 = vld [vmem:[#allocation9 + $0x588] sm:$0xf] }
  0xfb   :  { %v6719_v24 = vld [vmem:[#allocation9 + $0xce0] sm:$0xf0]  ;;  %v5413_v3 = vld [vmem:[#allocation9 + $0x288] sm:$0xf] }
  0xfc   :  { %v7875_v27 = vld [vmem:[#allocation9 + $0xec4] sm:$0xf]  ;;  %v6722_v35 = vor.u32 %v7811_v22, %v6719_v24  ;;  %3664 = vmatpush.bf16.msrb.mxu1 %v6434_v30  ;;  %v5830_v22 = vor.u32 %v7592_v12, %v5829_v11  ;;  %v6086_v24 = vor.u32 %v7656_v16, %v6085_v15  ;;  %v7584_v30 = vld [vmem:[#allocation9 + $0x5a4] sm:$0xf0] }
  0xfd   :  { %v6975_v28 = vld [vmem:[#allocation9 + $0xee0] sm:$0xf0]  ;;  %v7560_v6 = vld [vmem:[#allocation9 + $0x4e4] sm:$0xf0] }
  0xfe   :  { %v7667_v31 = vld [vmem:[#allocation9 + $0x844] sm:$0xf]  ;;  %v6978_v36 = vor.u32 %v7875_v27, %v6975_v28  ;;  %3676 = vmatpush.bf16.msrb.mxu2 %v6722_v35  ;;  %v5509_v27 = vld [vmem:[#allocation9 + $0x348] sm:$0xf] }
  0xff   :  { %v6143_v32 = vld [vmem:[#allocation9 + $0x860] sm:$0xf0]  ;;  %v7512_v28 = vld [vmem:[#allocation9 + $0x364] sm:$0xf0] }
 0x100   :  { %v7731_v33 = vld [vmem:[#allocation9 + $0xa44] sm:$0xf]  ;;  %v6146_v41 = vor.u32 %v7667_v31, %v6143_v32  ;;  %3689 = vmatpush.bf16.msrb.mxu3 %v6978_v36  ;;  %v6053_v31 = vld [vmem:[#allocation9 + $0x788] sm:$0xf] }
 0x101   :  { %v6399_v34 = vld [vmem:[#allocation9 + $0xa60] sm:$0xf0]  ;;  %v7648_v32 = vld [vmem:[#allocation9 + $0x7a4] sm:$0xf0] }
 0x102   :  { %v7803_v37 = vld [vmem:[#allocation9 + $0xc84] sm:$0xf]  ;;  %v6402_v42 = vor.u32 %v7731_v33, %v6399_v34  ;;  %3652 = vmatpush.bf16.msrb.mxu0 %v6146_v41  ;;  %v5254_v33 = vor.u32 %v7448_v21, %v5253_v20  ;;  %v5510_v34 = vor.u32 %v7512_v28, %v5509_v27  ;;  %v5221_v35 = vld [vmem:[#allocation9 + $0x108] sm:$0xf] }
 0x103   :  { %v6687_v38 = vld [vmem:[#allocation9 + $0xca0] sm:$0xf0]  ;;  %v7440_v36 = vld [vmem:[#allocation9 + $0x124] sm:$0xf0] }
 0x104   :  { %v7867_v39 = vld [vmem:[#allocation9 + $0xe84] sm:$0xf]  ;;  %v6690_v52 = vor.u32 %v7803_v37, %v6687_v38  ;;  %3665 = vmatpush.bf16.msrb.mxu1 %v6402_v42  ;;  %v5798_v37 = vor.u32 %v7584_v30, %v5797_v29  ;;  %v6054_v38 = vor.u32 %v7648_v32, %v6053_v31  ;;  %v5765_v41 = vld [vmem:[#allocation9 + $0x548] sm:$0xf] }
 0x105   :  { %v6943_v40 = vld [vmem:[#allocation9 + $0xea0] sm:$0xf0]  ;;  %v7576_v42 = vld [vmem:[#allocation9 + $0x564] sm:$0xf0] }
 0x106   :  { %v7659_v43 = vld [vmem:[#allocation9 + $0x804] sm:$0xf]  ;;  %v6946_v53 = vor.u32 %v7867_v39, %v6943_v40  ;;  %3677 = vmatpush.bf16.msrb.mxu2 %v6690_v52  ;;  %v5477_v39 = vld [vmem:[#allocation9 + $0x308] sm:$0xf]  ;;  %v5766_v52 = vor.u32 %v7576_v42, %v5765_v41 }
 0x107   :  { %v6111_v46 = vld [vmem:[#allocation9 + $0x820] sm:$0xf0]  ;;  %v7504_v40 = vld [vmem:[#allocation9 + $0x324] sm:$0xf0] }
 0x108   :  { %v7723_v47 = vld [vmem:[#allocation9 + $0xa04] sm:$0xf]  ;;  %v6114_v61 = vor.u32 %v7659_v43, %v6111_v46  ;;  %3690 = vmatpush.bf16.msrb.mxu3 %v6946_v53  ;;  %v6021_v43 = vld [vmem:[#allocation9 + $0x748] sm:$0xf] }
 0x109   :  { %v6367_v48 = vld [vmem:[#allocation9 + $0xa20] sm:$0xf0]  ;;  %v7640_v46 = vld [vmem:[#allocation9 + $0x764] sm:$0xf0] }
 0x10a   :  { %v7795_v55 = vld [vmem:[#allocation9 + $0xc44] sm:$0xf]  ;;  %v6370_v62 = vor.u32 %v7723_v47, %v6367_v48  ;;  %3653 = vmatpush.bf16.msrb.mxu0 %v6114_v61  ;;  %v5222_v47 = vor.u32 %v7440_v36, %v5221_v35  ;;  %v5478_v48 = vor.u32 %v7504_v40, %v5477_v39  ;;  %v6022_v53 = vor.u32 %v7640_v46, %v6021_v43  ;;  %v5125_v11 = vld [vmem:[#allocation9 + $0x48] sm:$0xf] }
 0x10b   :  { %v6655_v58 = vld [vmem:[#allocation9 + $0xc60] sm:$0xf0]  ;;  %v5190_v61 = vor.u32 %v7432_v51, %v5189_v49  ;;  %v7416_v12 = vld [vmem:[#allocation9 + $0x64] sm:$0xf0] }
 0x10c   :  { %v7859_v59 = vld [vmem:[#allocation9 + $0xe44] sm:$0xf]  ;;  %v6658_v4 = vor.u32 %v7795_v55, %v6655_v58  ;;  %3666 = vmatpush.bf16.msrb.mxu1 %v6370_v62  ;;  %v5733_v55 = vld [vmem:[#allocation9 + $0x508] sm:$0xf]  ;;  %v5446_v62 = vor.u32 %v7496_v23, %v5445_v54 }
 0x10d   :  { %v6911_v60 = vld [vmem:[#allocation9 + $0xe60] sm:$0xf0]  ;;  %3654 = vmatmul.bf16.vlgmr.msrb.gmra.mxu0 %v8309_v25  ;;  %v7568_v58 = vld [vmem:[#allocation9 + $0x524] sm:$0xf0] }
 0x10e   :  { %v6914_v5 = vor.u32 %v7859_v59, %v6911_v60  ;;  %v7787_v7 = vld [vmem:[#allocation9 + $0xc04] sm:$0xf]  ;;  %3698 = vmatpush.bf16.msra.mxu0 %v5318_v63  ;;  %3678 = vmatpush.bf16.msrb.mxu2 %v6658_v4  ;;  %v5989_v59 = vld [vmem:[#allocation9 + $0x708] sm:$0xf]  ;;  %v5734_v1 = vor.u32 %v7568_v58, %v5733_v55 }
 0x10f   :  { %v6623_v8 = vld [vmem:[#allocation9 + $0xc20] sm:$0xf0]  ;;  %3667 = vmatmul.bf16.vlgmr.msrb.gmra.mxu1 %v8311_v26  ;;  %v7632_v60 = vld [vmem:[#allocation9 + $0x724] sm:$0xf0] }
 0x110   :  { %v7851_v9 = vld [vmem:[#allocation9 + $0xe04] sm:$0xf]  ;;  %3711 = vmatpush.bf16.msra.mxu1 %v5574_v0  ;;  %3691 = vmatpush.bf16.msrb.mxu3 %v6914_v5  ;;  %v6626_v18 = vor.u32 %v7787_v7, %v6623_v8  ;;  %v5157_v63 = vld [vmem:[#allocation9 + $0x88] sm:$0xf]  ;;  %v5990_v2 = vor.u32 %v7632_v60, %v5989_v59 }
 0x111   :  { %v6879_v10 = vld [vmem:[#allocation9 + $0xe20] sm:$0xf0]  ;;  %v7424_v0 = vld [vmem:[#allocation9 + $0xa4] sm:$0xf0] }
 0x112   :  { %v6882_v19 = vor.u32 %v7851_v9, %v6879_v10  ;;  %3699 = vmatpush.bf16.msra.mxu0 %v5286_v17  ;;  %3679 = vmatpush.bf16.msrb.mxu2 %v6626_v18  ;;  %v7488_v4 = vld [vmem:[#allocation9 + $0x2a4] sm:$0xf0]  ;;  %v5158_v9 = vor.u32 %v7424_v0, %v5157_v63 }
 0x113   :  { %v5701_v5 = vld [vmem:[#allocation9 + $0x4c8] sm:$0xf]  ;;  %v5414_v10 = vor.u32 %v7488_v4, %v5413_v3 }
 0x114   :  { %3712 = vmatpush.bf16.msra.mxu1 %v5542_v50  ;;  %3692 = vmatpush.bf16.msrb.mxu3 %v6882_v19  ;;  %v5957_v7 = vld [vmem:[#allocation9 + $0x6c8] sm:$0xf]  ;;  %v5702_v15 = vor.u32 %v7560_v6, %v5701_v5 }
 0x115   :  { %3680 = vmatmul.bf16.vlgmr.msrb.gmra.mxu2 %v8315_v56  ;;  %v7624_v8 = vld [vmem:[#allocation9 + $0x6e4] sm:$0xf0] }
 0x116   :  { %3724 = vmatpush.bf16.msra.mxu2 %v5830_v22  ;;  %3700 = vmatpush.bf16.msra.mxu0 %v5254_v33  ;;  %v5958_v16 = vor.u32 %v7624_v8, %v5957_v7  ;;  %v5381_v17 = vld [vmem:[#allocation9 + $0x248] sm:$0xf]  ;;  %v5126_v22 = vor.u32 %v7416_v12, %v5125_v11 }
 0x117   :  { %3693 = vmatmul.bf16.vlgmr.msrb.gmra.mxu3 %v8317_v57  ;;  %v7480_v50 = vld [vmem:[#allocation9 + $0x264] sm:$0xf0] }
 0x118   :  { %3737 = vmatpush.bf16.msra.mxu3 %v6086_v24  ;;  %3713 = vmatpush.bf16.msra.mxu1 %v5510_v34  ;;  %v5669_v18 = vld [vmem:[#allocation9 + $0x488] sm:$0xf]  ;;  %v5382_v24 = vor.u32 %v7480_v50, %v5381_v17 }
 0x119   :  { %v7552_v19 = vld [vmem:[#allocation9 + $0x4a4] sm:$0xf0] }
 0x11a   :  { %3725 = vmatpush.bf16.msra.mxu2 %v5798_v37  ;;  %3701 = vmatpush.bf16.msra.mxu0 %v5222_v47  ;;  %v5925_v20 = vld [vmem:[#allocation9 + $0x688] sm:$0xf]  ;;  %v5670_v30 = vor.u32 %v7552_v19, %v5669_v18 }
 0x11b   :  { %v7616_v21 = vld [vmem:[#allocation9 + $0x6a4] sm:$0xf0] }
 0x11c   :  { %3738 = vmatpush.bf16.msra.mxu3 %v6054_v38  ;;  %3714 = vmatpush.bf16.msra.mxu1 %v5478_v48  ;;  %v5093_v27 = vld [vmem:[#allocation9 + $0x8] sm:$0xf]  ;;  %v5926_v31 = vor.u32 %v7616_v21, %v5925_v20 }
 0x11d   :  { %v7408_v28 = vld [vmem:[#allocation9 + $0x24] sm:$0xf0] }
 0x11e   :  { %3726 = vmatpush.bf16.msra.mxu2 %v5766_v52  ;;  %3702 = vmatpush.bf16.msra.mxu0 %v5190_v61  ;;  %v5349_v29 = vld [vmem:[#allocation9 + $0x208] sm:$0xf]  ;;  %v5094_v41 = vor.u32 %v7408_v28, %v5093_v27 }
 0x11f   :  { %v7472_v32 = vld [vmem:[#allocation9 + $0x224] sm:$0xf0] }
 0x120   :  { %3739 = vmatpush.bf16.msra.mxu3 %v6022_v53  ;;  %3715 = vmatpush.bf16.msra.mxu1 %v5446_v62  ;;  %v6341_v33 = vld [vmem:[#allocation9 + $0x9c8] sm:$0xf]  ;;  %v5350_v42 = vor.u32 %v7472_v32, %v5349_v29 }
 0x121   :  { %v7720_v34 = vld [vmem:[#allocation9 + $0x9e4] sm:$0xf0] }
 0x122   :  { %3727 = vmatpush.bf16.msra.mxu2 %v5734_v1  ;;  %3703 = vmatpush.bf16.msra.mxu0 %v5158_v9  ;;  %v6597_v35 = vld [vmem:[#allocation9 + $0xbc8] sm:$0xf]  ;;  %v6342_v43 = vor.u32 %v7720_v34, %v6341_v33 }
 0x123   :  { %v7784_v36 = vld [vmem:[#allocation9 + $0xbe4] sm:$0xf0] }
 0x124   :  { %3740 = vmatpush.bf16.msra.mxu3 %v5990_v2  ;;  %3716 = vmatpush.bf16.msra.mxu1 %v5414_v10  ;;  %v5637_v37 = vld [vmem:[#allocation9 + $0x448] sm:$0xf]  ;;  %v6598_v46 = vor.u32 %v7784_v36, %v6597_v35 }
 0x125   :  { %v7544_v38 = vld [vmem:[#allocation9 + $0x464] sm:$0xf0] }
 0x126   :  { %3728 = vmatpush.bf16.msra.mxu2 %v5702_v15  ;;  %v5893_v39 = vld [vmem:[#allocation9 + $0x648] sm:$0xf]  ;;  %3704 = vmatpush.bf16.msra.mxu0 %v5126_v22  ;;  %v5638_v51 = vor.u32 %v7544_v38, %v5637_v37 }
 0x127   :  { %v7608_v40 = vld [vmem:[#allocation9 + $0x664] sm:$0xf0] }
 0x128   :  { %3741 = vmatpush.bf16.msra.mxu3 %v5958_v16  ;;  %3717 = vmatpush.bf16.msra.mxu1 %v5382_v24  ;;  %v6309_v47 = vld [vmem:[#allocation9 + $0x988] sm:$0xf]  ;;  %v5894_v52 = vor.u32 %v7608_v40, %v5893_v39 }
 0x129   :  { %v7712_v48 = vld [vmem:[#allocation9 + $0x9a4] sm:$0xf0] }
 0x12a   :  { %3729 = vmatpush.bf16.msra.mxu2 %v5670_v30  ;;  %v6565_v49 = vld [vmem:[#allocation9 + $0xb88] sm:$0xf]  ;;  %3705 = vmatpush.bf16.msra.mxu0 %v5094_v41  ;;  %v6310_v63 = vor.u32 %v7712_v48, %v6309_v47 }
 0x12b   :  { %v7776_v53 = vld [vmem:[#allocation9 + $0xba4] sm:$0xf0] }
 0x12c   :  { %3742 = vmatpush.bf16.msra.mxu3 %v5926_v31  ;;  %v5605_v54 = vld [vmem:[#allocation9 + $0x408] sm:$0xf]  ;;  %3718 = vmatpush.bf16.msra.mxu1 %v5350_v42  ;;  %v6566_v0 = vor.u32 %v7776_v53, %v6565_v49 }
 0x12d   :  { %v7536_v23 = vld [vmem:[#allocation9 + $0x424] sm:$0xf0]  ;;  %3706 = vmatmul.bf16.vlgmr.msra.gmra.mxu0 %v8293_v13 }
 0x12e   :  { %v5861_v55 = vld [vmem:[#allocation9 + $0x608] sm:$0xf]  ;;  %3750 = vmatpush.bf16.msrb.mxu0 %v6342_v43  ;;  %3730 = vmatpush.bf16.msra.mxu2 %v5638_v51  ;;  %v5606_v1 = vor.u32 %v7536_v23, %v5605_v54 }
 0x12f   :  { %v7600_v58 = vld [vmem:[#allocation9 + $0x624] sm:$0xf0]  ;;  %3719 = vmatmul.bf16.vlgmr.msra.gmra.mxu1 %v8295_v14 }
 0x130   :  { %v6853_v59 = vld [vmem:[#allocation9 + $0xdc8] sm:$0xf]  ;;  %3763 = vmatpush.bf16.msrb.mxu1 %v6598_v46  ;;  %3743 = vmatpush.bf16.msra.mxu3 %v5894_v52  ;;  %v5862_v2 = vor.u32 %v7600_v58, %v5861_v55 }
 0x131   :  { %v7848_v60 = vld [vmem:[#allocation9 + $0xde4] sm:$0xf0] }
 0x132   :  { %v7109_v61 = vld [vmem:[#allocation9 + $0xfc8] sm:$0xf]  ;;  %v6854_v5 = vor.u32 %v7848_v60, %v6853_v59  ;;  %3751 = vmatpush.bf16.msrb.mxu0 %v6310_v63  ;;  %3731 = vmatpush.bf16.msra.mxu2 %v5606_v1 }
 0x133   :  { %v7912_v62 = vld [vmem:[#allocation9 + $0xfe4] sm:$0xf0] }
 0x134   :  { %v6277_v3 = vld [vmem:[#allocation9 + $0x948] sm:$0xf]  ;;  %v7110_v6 = vor.u32 %v7912_v62, %v7109_v61  ;;  %3764 = vmatpush.bf16.msrb.mxu1 %v6566_v0  ;;  %3744 = vmatpush.bf16.msra.mxu3 %v5862_v2 }
 0x135   :  { %v7704_v4 = vld [vmem:[#allocation9 + $0x964] sm:$0xf0]  ;;  %3732 = vmatmul.bf16.vlgmr.msra.gmra.mxu2 %v8301_v44 }
 0x136   :  { %v6533_v7 = vld [vmem:[#allocation9 + $0xb48] sm:$0xf]  ;;  %v6278_v15 = vor.u32 %v7704_v4, %v6277_v3  ;;  %3776 = vmatpush.bf16.msrb.mxu2 %v6854_v5 }
 0x137   :  { %v7768_v8 = vld [vmem:[#allocation9 + $0xb64] sm:$0xf0]  ;;  %3745 = vmatmul.bf16.vlgmr.msra.gmra.mxu3 %v8303_v45 }
 0x138   :  { %v6821_v9 = vld [vmem:[#allocation9 + $0xd88] sm:$0xf]  ;;  %v6534_v16 = vor.u32 %v7768_v8, %v6533_v7  ;;  %3789 = vmatpush.bf16.msrb.mxu3 %v7110_v6  ;;  %3752 = vmatpush.bf16.msrb.mxu0 %v6278_v15  ;;  %v7460_v15 = vld [vmem:[#allocation9 + $0x1cc] sm:$0xf] }
 0x139   :  { %v7840_v10 = vld [vmem:[#allocation9 + $0xda4] sm:$0xf0] }
 0x13a   :  { %v7077_v11 = vld [vmem:[#allocation9 + $0xf88] sm:$0xf]  ;;  %v6822_v18 = vor.u32 %v7840_v10, %v6821_v9  ;;  %3765 = vmatpush.bf16.msrb.mxu1 %v6534_v16  ;;  %v5319_v16 = vld [vmem:[#allocation9 + $0x1e8] sm:$0xf0] }
 0x13b   :  { %v7904_v12 = vld [vmem:[#allocation9 + $0xfa4] sm:$0xf0] }
 0x13c   :  { %v6245_v17 = vld [vmem:[#allocation9 + $0x908] sm:$0xf]  ;;  %v7078_v19 = vor.u32 %v7904_v12, %v7077_v11  ;;  %3777 = vmatpush.bf16.msrb.mxu2 %v6822_v18 }
 0x13d   :  { %v7696_v50 = vld [vmem:[#allocation9 + $0x924] sm:$0xf0] }
 0x13e   :  { %v6501_v20 = vld [vmem:[#allocation9 + $0xb08] sm:$0xf]  ;;  %v6246_v29 = vor.u32 %v7696_v50, %v6245_v17  ;;  %3790 = vmatpush.bf16.msrb.mxu3 %v7078_v19  ;;  %v7524_v17 = vld [vmem:[#allocation9 + $0x3cc] sm:$0xf] }
 0x13f   :  { %v7760_v21 = vld [vmem:[#allocation9 + $0xb24] sm:$0xf0]  ;;  %v5575_v50 = vld [vmem:[#allocation9 + $0x3e8] sm:$0xf0] }
 0x140   :  { %v6789_v22 = vld [vmem:[#allocation9 + $0xd48] sm:$0xf]  ;;  %v6502_v30 = vor.u32 %v7760_v21, %v6501_v20  ;;  %3753 = vmatpush.bf16.msrb.mxu0 %v6246_v29  ;;  %v5578_v29 = vor.u32 %v7524_v17, %v5575_v50 }
 0x141   :  { %v7832_v24 = vld [vmem:[#allocation9 + $0xd64] sm:$0xf0] }
 0x142   :  { %v7045_v27 = vld [vmem:[#allocation9 + $0xf48] sm:$0xf]  ;;  %v6790_v33 = vor.u32 %v7832_v24, %v6789_v22  ;;  %3766 = vmatpush.bf16.msrb.mxu1 %v6502_v30  ;;  %v5287_v30 = vld [vmem:[#allocation9 + $0x1a8] sm:$0xf0] }
 0x143   :  { %v7896_v28 = vld [vmem:[#allocation9 + $0xf64] sm:$0xf0] }
 0x144   :  { %v6213_v31 = vld [vmem:[#allocation9 + $0x8c8] sm:$0xf]  ;;  %v7046_v34 = vor.u32 %v7896_v28, %v7045_v27  ;;  %3778 = vmatpush.bf16.msrb.mxu2 %v6790_v33  ;;  %v7452_v27 = vld [vmem:[#allocation9 + $0x18c] sm:$0xf]  ;;  %v5322_v28 = vor.u32 %v7460_v15, %v5319_v16 }
 0x145   :  { %v7688_v32 = vld [vmem:[#allocation9 + $0x8e4] sm:$0xf0]  ;;  %v6023_v15 = vld [vmem:[#allocation9 + $0x768] sm:$0xf0] }
 0x146   :  { %v6469_v35 = vld [vmem:[#allocation9 + $0xac8] sm:$0xf]  ;;  %v6214_v41 = vor.u32 %v7688_v32, %v6213_v31  ;;  %3791 = vmatpush.bf16.msrb.mxu3 %v7046_v34  ;;  %v7516_v31 = vld [vmem:[#allocation9 + $0x38c] sm:$0xf] }
 0x147   :  { %v7752_v36 = vld [vmem:[#allocation9 + $0xae4] sm:$0xf0]  ;;  %v5543_v32 = vld [vmem:[#allocation9 + $0x3a8] sm:$0xf0] }
 0x148   :  { %v6757_v37 = vld [vmem:[#allocation9 + $0xd08] sm:$0xf]  ;;  %v6470_v42 = vor.u32 %v7752_v36, %v6469_v35  ;;  %3754 = vmatpush.bf16.msrb.mxu0 %v6214_v41  ;;  %v7652_v41 = vld [vmem:[#allocation9 + $0x7cc] sm:$0xf] }
 0x149   :  { %v7824_v38 = vld [vmem:[#allocation9 + $0xd24] sm:$0xf0] }
 0x14a   :  { %v7013_v39 = vld [vmem:[#allocation9 + $0xf08] sm:$0xf]  ;;  %v6758_v47 = vor.u32 %v7824_v38, %v6757_v37  ;;  %3767 = vmatpush.bf16.msrb.mxu1 %v6470_v42  ;;  %v6087_v42 = vld [vmem:[#allocation9 + $0x7e8] sm:$0xf0] }
 0x14b   :  { %v7888_v40 = vld [vmem:[#allocation9 + $0xf24] sm:$0xf0] }
 0x14c   :  { %v6181_v43 = vld [vmem:[#allocation9 + $0x888] sm:$0xf]  ;;  %v7014_v48 = vor.u32 %v7888_v40, %v7013_v39  ;;  %3779 = vmatpush.bf16.msrb.mxu2 %v6758_v47  ;;  %v7588_v39 = vld [vmem:[#allocation9 + $0x5cc] sm:$0xf]  ;;  %v5546_v47 = vor.u32 %v7516_v31, %v5543_v32 }
 0x14d   :  { %v7680_v46 = vld [vmem:[#allocation9 + $0x8a4] sm:$0xf0]  ;;  %v5831_v40 = vld [vmem:[#allocation9 + $0x5e8] sm:$0xf0] }
 0x14e   :  { %v6437_v49 = vld [vmem:[#allocation9 + $0xa88] sm:$0xf]  ;;  %v6182_v55 = vor.u32 %v7680_v46, %v6181_v43  ;;  %3792 = vmatpush.bf16.msrb.mxu3 %v7014_v48  ;;  %v8333_v43 = vld [vmem:[#allocation11] sm:$0xff]  ;;  %v5290_v46 = vor.u32 %v7452_v27, %v5287_v30  ;;  %v7564_v27 = vld [vmem:[#allocation9 + $0x50c] sm:$0xf] }
 0x14f   :  { %v7744_v51 = vld [vmem:[#allocation9 + $0xaa4] sm:$0xf0]  ;;  %v5991_v30 = vld [vmem:[#allocation9 + $0x728] sm:$0xf0] }
 0x150   :  { %v6725_v52 = vld [vmem:[#allocation9 + $0xcc8] sm:$0xf]  ;;  %v6438_v58 = vor.u32 %v7744_v51, %v6437_v49  ;;  %3755 = vmatpush.bf16.msrb.mxu0 %v6182_v55  ;;  %v7444_v51 = vld [vmem:[#allocation9 + $0x14c] sm:$0xf] }
 0x151   :  { %v7816_v53 = vld [vmem:[#allocation9 + $0xce4] sm:$0xf0]  ;;  %v5511_v55 = vld [vmem:[#allocation9 + $0x368] sm:$0xf0] }
 0x152   :  { %v6981_v54 = vld [vmem:[#allocation9 + $0xec8] sm:$0xf]  ;;  %v6726_v61 = vor.u32 %v7816_v53, %v6725_v52  ;;  %3768 = vmatpush.bf16.msrb.mxu1 %v6438_v58  ;;  %v5255_v52 = vld [vmem:[#allocation9 + $0x168] sm:$0xf0]  ;;  %v886_v58 = vperm.slane %v8333_v43, 0 }
 0x153   :  { %v7880_v23 = vld [vmem:[#allocation9 + $0xee4] sm:$0xf0]  ;;  %v7508_v53 = vld [vmem:[#allocation9 + $0x34c] sm:$0xf] }
 0x154   :  { %v6149_v59 = vld [vmem:[#allocation9 + $0x848] sm:$0xf]  ;;  %v6982_v62 = vor.u32 %v7880_v23, %v6981_v54  ;;  %3780 = vmatpush.bf16.msrb.mxu2 %v6726_v61  ;;  %v5834_v54 = vor.u32 %v7588_v39, %v5831_v40  ;;  %v6090_v23 = vor.u32 %v7652_v41, %v6087_v42  ;;  %v7644_v61 = vld [vmem:[#allocation9 + $0x78c] sm:$0xf] }
 0x155   :  { %v7672_v60 = vld [vmem:[#allocation9 + $0x864] sm:$0xf0]  ;;  %v7484_v39 = vld [vmem:[#allocation9 + $0x28c] sm:$0xf] }
 0x156   :  { %v6405_v63 = vld [vmem:[#allocation9 + $0xa48] sm:$0xf]  ;;  %v6150_v5 = vor.u32 %v7672_v60, %v6149_v59  ;;  %3793 = vmatpush.bf16.msrb.mxu3 %v6982_v62  ;;  %v7580_v59 = vld [vmem:[#allocation9 + $0x58c] sm:$0xf] }
 0x157   :  { %v7736_v0 = vld [vmem:[#allocation9 + $0xa64] sm:$0xf0]  ;;  %v5799_v60 = vld [vmem:[#allocation9 + $0x5a8] sm:$0xf0] }
 0x158   :  { %v6693_v1 = vld [vmem:[#allocation9 + $0xc88] sm:$0xf]  ;;  %v6406_v6 = vor.u32 %v7736_v0, %v6405_v63  ;;  %3756 = vmatpush.bf16.msrb.mxu0 %v6150_v5  ;;  %v6055_v62 = vld [vmem:[#allocation9 + $0x7a8] sm:$0xf0]  ;;  %v5258_v63 = vor.u32 %v7444_v51, %v5255_v52  ;;  %v5514_v0 = vor.u32 %v7508_v53, %v5511_v55  ;;  %v3525_v53 = vpop.f32.mrf.mxu2 }
 0x159   :  { %v7808_v2 = vld [vmem:[#allocation9 + $0xca4] sm:$0xf0]  ;;  %v5415_v40 = vld [vmem:[#allocation9 + $0x2a8] sm:$0xf0] }
 0x15a   :  { %v6949_v3 = vld [vmem:[#allocation9 + $0xe88] sm:$0xf]  ;;  %v6694_v10 = vor.u32 %v7808_v2, %v6693_v1  ;;  %3769 = vmatpush.bf16.msrb.mxu1 %v6406_v6  ;;  %v3499_v1 = vpop.f32.mrf.mxu0  ;;  %v3512_v2 = vpop.f32.mrf.mxu1  ;;  %v5802_v6 = vor.u32 %v7580_v59, %v5799_v60  ;;  %v7556_v41 = vld [vmem:[#allocation9 + $0x4cc] sm:$0xf] }
 0x15b   :  { %v7872_v4 = vld [vmem:[#allocation9 + $0xea4] sm:$0xf0]  ;;  %v3500_v5 = vadd.f32 %v3499_v1, %v886_v58  ;;  %v5703_v42 = vld [vmem:[#allocation9 + $0x4e8] sm:$0xf0] }
 0x15c   :  { %v6117_v7 = vld [vmem:[#allocation9 + $0x808] sm:$0xf]  ;;  %v6950_v11 = vor.u32 %v7872_v4, %v6949_v3  ;;  %3781 = vmatpush.bf16.msrb.mxu2 %v6694_v10  ;;  %v7436_v3 = vld [vmem:[#allocation9 + $0x10c] sm:$0xf] }
 0x15d   :  { %v7664_v8 = vld [vmem:[#allocation9 + $0x824] sm:$0xf0]  ;;  %v5223_v4 = vld [vmem:[#allocation9 + $0x128] sm:$0xf0]  ;;  %v3513_v16 = vadd.f32 %v3512_v2, %v3500_v5 }
 0x15e   :  { %v6373_v9 = vld [vmem:[#allocation9 + $0xa08] sm:$0xf]  ;;  %v6118_v22 = vor.u32 %v7664_v8, %v6117_v7  ;;  %3794 = vmatpush.bf16.msrb.mxu3 %v6950_v11  ;;  %v6058_v7 = vor.u32 %v7644_v61, %v6055_v62  ;;  %v7500_v8 = vld [vmem:[#allocation9 + $0x30c] sm:$0xf]  ;;  %v5226_v17 = vor.u32 %v7436_v3, %v5223_v4 }
 0x15f   :  { %v7728_v12 = vld [vmem:[#allocation9 + $0xa24] sm:$0xf0]  ;;  %v7572_v10 = vld [vmem:[#allocation9 + $0x54c] sm:$0xf]  ;;  %v3526_v61 = vadd.f32 %v3525_v53, %v3513_v16 }
 0x160   :  { %v6661_v18 = vld [vmem:[#allocation9 + $0xc48] sm:$0xf]  ;;  %v6374_v24 = vor.u32 %v7728_v12, %v6373_v9  ;;  %3757 = vmatpush.bf16.msrb.mxu0 %v6118_v22  ;;  %v5479_v9 = vld [vmem:[#allocation9 + $0x328] sm:$0xf0] }
 0x161   :  { %v7800_v19 = vld [vmem:[#allocation9 + $0xc64] sm:$0xf0]  ;;  %v5767_v11 = vld [vmem:[#allocation9 + $0x568] sm:$0xf0]  ;;  %v5482_v50 = vor.u32 %v7500_v8, %v5479_v9 }
 0x162   :  { %v6917_v20 = vld [vmem:[#allocation9 + $0xe48] sm:$0xf]  ;;  %v6662_v33 = vor.u32 %v7800_v19, %v6661_v18  ;;  %3770 = vmatpush.bf16.msrb.mxu1 %v6374_v24  ;;  %v7636_v12 = vld [vmem:[#allocation9 + $0x74c] sm:$0xf] }
 0x163   :  { %v7864_v21 = vld [vmem:[#allocation9 + $0xe64] sm:$0xf0]  ;;  %3758 = vmatmul.bf16.vlgmr.msrb.gmra.mxu0 %v8309_v25  ;;  %v7428_v18 = vld [vmem:[#allocation9 + $0xcc] sm:$0xf] }
 0x164   :  { %v6918_v34 = vor.u32 %v7864_v21, %v6917_v20  ;;  %v6629_v35 = vld [vmem:[#allocation9 + $0xc08] sm:$0xf]  ;;  %3802 = vmatpush.bf16.msra.mxu0 %v5322_v28  ;;  %3782 = vmatpush.bf16.msrb.mxu2 %v6662_v33  ;;  %v5191_v19 = vld [vmem:[#allocation9 + $0xe8] sm:$0xf0]  ;;  %v5770_v20 = vor.u32 %v7572_v10, %v5767_v11  ;;  %v6026_v21 = vor.u32 %v7636_v12, %v6023_v15  ;;  %v3501_v33 = vpop.f32.mrf.mxu0 }
 0x165   :  { %v7792_v36 = vld [vmem:[#allocation9 + $0xc24] sm:$0xf0]  ;;  %3771 = vmatmul.bf16.vlgmr.msrb.gmra.mxu1 %v8311_v26  ;;  %v7492_v22 = vld [vmem:[#allocation9 + $0x2cc] sm:$0xf]  ;;  %v5194_v31 = vor.u32 %v7428_v18, %v5191_v19 }
 0x166   :  { %v6885_v37 = vld [vmem:[#allocation9 + $0xe08] sm:$0xf]  ;;  %3815 = vmatpush.bf16.msra.mxu1 %v5578_v29  ;;  %3795 = vmatpush.bf16.msrb.mxu3 %v6918_v34  ;;  %v6630_v48 = vor.u32 %v7792_v36, %v6629_v35  ;;  %v5447_v24 = vld [vmem:[#allocation9 + $0x2e8] sm:$0xf0]  ;;  %v3514_v34 = vpop.f32.mrf.mxu1 }
 0x167   :  { %v7856_v38 = vld [vmem:[#allocation9 + $0xe24] sm:$0xf0]  ;;  %v5735_v28 = vld [vmem:[#allocation9 + $0x528] sm:$0xf0]  ;;  %v5450_v32 = vor.u32 %v7492_v22, %v5447_v24 }
 0x168   :  { %v6886_v49 = vor.u32 %v7856_v38, %v6885_v37  ;;  %3803 = vmatpush.bf16.msra.mxu0 %v5290_v46  ;;  %3783 = vmatpush.bf16.msrb.mxu2 %v6630_v48  ;;  %v7628_v29 = vld [vmem:[#allocation9 + $0x70c] sm:$0xf]  ;;  %v5738_v37 = vor.u32 %v7564_v27, %v5735_v28  ;;  %v3527_v28 = vpop.f32.mrf.mxu2 }
 0x169   :  { %v7420_v35 = vld [vmem:[#allocation9 + $0x8c] sm:$0xf]  ;;  %v5994_v38 = vor.u32 %v7628_v29, %v5991_v30 }
 0x16a   :  { %3816 = vmatpush.bf16.msra.mxu1 %v5546_v47  ;;  %3796 = vmatpush.bf16.msrb.mxu3 %v6886_v49  ;;  %v5159_v36 = vld [vmem:[#allocation9 + $0xa8] sm:$0xf0]  ;;  %v5418_v49 = vor.u32 %v7484_v39, %v5415_v40 }
 0x16b   :  { %3784 = vmatmul.bf16.vlgmr.msrb.gmra.mxu2 %v8315_v56  ;;  %v7620_v46 = vld [vmem:[#allocation9 + $0x6cc] sm:$0xf]  ;;  %v5162_v48 = vor.u32 %v7420_v35, %v5159_v36 }
 0x16c   :  { %3828 = vmatpush.bf16.msra.mxu2 %v5834_v54  ;;  %3804 = vmatpush.bf16.msra.mxu0 %v5258_v63  ;;  %v5959_v47 = vld [vmem:[#allocation9 + $0x6e8] sm:$0xf0]  ;;  %v3538_v54 = vpop.f32.mrf.mxu3 }
 0x16d   :  { %3797 = vmatmul.bf16.vlgmr.msrb.gmra.mxu3 %v8317_v57  ;;  %v7412_v51 = vld [vmem:[#allocation9 + $0x4c] sm:$0xf]  ;;  %v5962_v55 = vor.u32 %v7620_v46, %v5959_v47  ;;  %v3539_v1 = vadd.f32 %v3538_v54, %v3526_v61 }
 0x16e   :  { %3841 = vmatpush.bf16.msra.mxu3 %v6090_v23  ;;  %3817 = vmatpush.bf16.msra.mxu1 %v5514_v0  ;;  %v5127_v52 = vld [vmem:[#allocation9 + $0x68] sm:$0xf0]  ;;  %v5706_v23 = vor.u32 %v7556_v41, %v5703_v42  ;;  %v3564_v8 = vpop.f32.mrf.mxu1 }
 0x16f   :  { %v7476_v58 = vld [vmem:[#allocation9 + $0x24c] sm:$0xf]  ;;  %v5130_v2 = vor.u32 %v7412_v51, %v5127_v52 }
 0x170   :  { %3829 = vmatpush.bf16.msra.mxu2 %v5802_v6  ;;  %3805 = vmatpush.bf16.msra.mxu0 %v5226_v17  ;;  %v5383_v59 = vld [vmem:[#allocation9 + $0x268] sm:$0xf0] }
 0x171   :  { %v7548_v60 = vld [vmem:[#allocation9 + $0x48c] sm:$0xf]  ;;  %v5386_v3 = vor.u32 %v7476_v58, %v5383_v59 }
 0x172   :  { %3842 = vmatpush.bf16.msra.mxu3 %v6058_v7  ;;  %3818 = vmatpush.bf16.msra.mxu1 %v5482_v50  ;;  %v5671_v62 = vld [vmem:[#allocation9 + $0x4a8] sm:$0xf0]  ;;  %v3551_v7 = vpop.f32.mrf.mxu0 }
 0x173   :  { %v7612_v63 = vld [vmem:[#allocation9 + $0x68c] sm:$0xf]  ;;  %v5674_v9 = vor.u32 %v7548_v60, %v5671_v62  ;;  %v3552_v16 = vadd.f32 %v3551_v7, %v3539_v1 }
 0x174   :  { %3830 = vmatpush.bf16.msra.mxu2 %v5770_v20  ;;  %3806 = vmatpush.bf16.msra.mxu0 %v5194_v31  ;;  %v5927_v0 = vld [vmem:[#allocation9 + $0x6a8] sm:$0xf0]  ;;  %v3540_v29 = vpop.f32.mrf.mxu3 }
 0x175   :  { %v7404_v4 = vld [vmem:[#allocation9 + $0xc] sm:$0xf]  ;;  %v5930_v10 = vor.u32 %v7612_v63, %v5927_v0  ;;  %v3565_v22 = vadd.f32 %v3564_v8, %v3552_v16  ;;  %v887_v8 = vperm.slane %v8333_v43, 1 }
 0x176   :  { %3843 = vmatpush.bf16.msra.mxu3 %v6026_v21  ;;  %3819 = vmatpush.bf16.msra.mxu1 %v5450_v32  ;;  %v5095_v5 = vld [vmem:[#allocation9 + $0x28] sm:$0xf0]  ;;  %v3566_v51 = vpop.f32.mrf.mxu1 }
 0x177   :  { %v7468_v6 = vld [vmem:[#allocation9 + $0x20c] sm:$0xf]  ;;  %v5098_v24 = vor.u32 %v7404_v4, %v5095_v5 }
 0x178   :  { %3831 = vmatpush.bf16.msra.mxu2 %v5738_v37  ;;  %3807 = vmatpush.bf16.msra.mxu0 %v5162_v48  ;;  %v5351_v11 = vld [vmem:[#allocation9 + $0x228] sm:$0xf0] }
 0x179   :  { %v7716_v12 = vld [vmem:[#allocation9 + $0x9cc] sm:$0xf]  ;;  %v5354_v27 = vor.u32 %v7468_v6, %v5351_v11 }
 0x17a   :  { %3844 = vmatpush.bf16.msra.mxu3 %v5994_v38  ;;  %3820 = vmatpush.bf16.msra.mxu1 %v5418_v49  ;;  %v6343_v15 = vld [vmem:[#allocation9 + $0x9e8] sm:$0xf0]  ;;  %v3553_v49 = vpop.f32.mrf.mxu0 }
 0x17b   :  { %v7780_v17 = vld [vmem:[#allocation9 + $0xbcc] sm:$0xf]  ;;  %v6346_v30 = vor.u32 %v7716_v12, %v6343_v15 }
 0x17c   :  { %3832 = vmatpush.bf16.msra.mxu2 %v5706_v23  ;;  %v6599_v50 = vld [vmem:[#allocation9 + $0xbe8] sm:$0xf0]  ;;  %3808 = vmatpush.bf16.msra.mxu0 %v5130_v2  ;;  %v3590_v4 = vpop.f32.mrf.mxu3 }
 0x17d   :  { %v7540_v18 = vld [vmem:[#allocation9 + $0x44c] sm:$0xf]  ;;  %v6602_v31 = vor.u32 %v7780_v17, %v6599_v50 }
 0x17e   :  { %3845 = vmatpush.bf16.msra.mxu3 %v5962_v55  ;;  %v5639_v19 = vld [vmem:[#allocation9 + $0x468] sm:$0xf0]  ;;  %3821 = vmatpush.bf16.msra.mxu1 %v5386_v3  ;;  %v3577_v3 = vpop.f32.mrf.mxu2 }
 0x17f   :  { %v7604_v20 = vld [vmem:[#allocation9 + $0x64c] sm:$0xf]  ;;  %v5642_v35 = vor.u32 %v7540_v18, %v5639_v19  ;;  %v3578_v5 = vadd.f32 %v3577_v3, %v3565_v22  ;;  %v3616_v22 = vpop.f32.mrf.mxu1 }
 0x180   :  { %v5895_v21 = vld [vmem:[#allocation9 + $0x668] sm:$0xf0]  ;;  %3833 = vmatpush.bf16.msra.mxu2 %v5674_v9  ;;  %3809 = vmatpush.bf16.msra.mxu0 %v5098_v24 }
 0x181   :  { %v7708_v32 = vld [vmem:[#allocation9 + $0x98c] sm:$0xf]  ;;  %v5898_v36 = vor.u32 %v7604_v20, %v5895_v21  ;;  %v8343_v50 = vadd.f32 %v3590_v4, %v3578_v5 }
 0x182   :  { %3846 = vmatpush.bf16.msra.mxu3 %v5930_v10  ;;  %v6311_v33 = vld [vmem:[#allocation9 + $0x9a8] sm:$0xf0]  ;;  %3822 = vmatpush.bf16.msra.mxu1 %v5354_v27  ;;  %v3603_v21 = vpop.f32.mrf.mxu0 }
 0x183   :  { %v7772_v34 = vld [vmem:[#allocation9 + $0xb8c] sm:$0xf]  ;;  %v6314_v52 = vor.u32 %v7708_v32, %v6311_v33  ;;  %3810 = vmatmul.bf16.vlgmr.msra.gmra.mxu0 %v8293_v13  ;;  %v3604_v24 = vadd.f32 %v3603_v21, %v887_v8 }
 0x184   :  { %v6567_v37 = vld [vmem:[#allocation9 + $0xba8] sm:$0xf0]  ;;  %3854 = vmatpush.bf16.msrb.mxu0 %v6346_v30  ;;  %3834 = vmatpush.bf16.msra.mxu2 %v5642_v35 }
 0x185   :  { %v7532_v38 = vld [vmem:[#allocation9 + $0x40c] sm:$0xf]  ;;  %v6570_v53 = vor.u32 %v7772_v34, %v6567_v37  ;;  %3823 = vmatmul.bf16.vlgmr.msra.gmra.mxu1 %v8295_v14 }
 0x186   :  { %v5607_v39 = vld [vmem:[#allocation9 + $0x428] sm:$0xf0]  ;;  %3867 = vmatpush.bf16.msrb.mxu1 %v6602_v31  ;;  %3847 = vmatpush.bf16.msra.mxu3 %v5898_v36  ;;  %v3617_v36 = vadd.f32 %v3616_v22, %v3604_v24  ;;  %v5325_v22 = vld [vmem:[#allocation9 + $0x1d0] sm:$0xf] }
 0x187   :  { %v7596_v40 = vld [vmem:[#allocation9 + $0x60c] sm:$0xf]  ;;  %v5610_v54 = vor.u32 %v7532_v38, %v5607_v39  ;;  %v7465_v24 = vld [vmem:[#allocation9 + $0x1ec] sm:$0xf0] }
 0x188   :  { %v5863_v41 = vld [vmem:[#allocation9 + $0x628] sm:$0xf0]  ;;  %3855 = vmatpush.bf16.msrb.mxu0 %v6314_v52 }
 0x189   :  { %v7844_v42 = vld [vmem:[#allocation9 + $0xdcc] sm:$0xf]  ;;  %v5866_v23 = vor.u32 %v7596_v40, %v5863_v41  ;;  %3835 = vmatpush.bf16.msra.mxu2 %v5610_v54  ;;  %v3579_v40 = vpop.f32.mrf.mxu2  ;;  %v3592_v41 = vpop.f32.mrf.mxu3 }
 0x18a   :  { %v6855_v46 = vld [vmem:[#allocation9 + $0xde8] sm:$0xf0]  ;;  %3868 = vmatpush.bf16.msrb.mxu1 %v6570_v53  ;;  %v5549_v40 = vld [vmem:[#allocation9 + $0x390] sm:$0xf] }
 0x18b   :  { %v7908_v47 = vld [vmem:[#allocation9 + $0xfcc] sm:$0xf]  ;;  %v6858_v59 = vor.u32 %v7844_v42, %v6855_v46  ;;  %3848 = vmatpush.bf16.msra.mxu3 %v5866_v23 }
 0x18c   :  { %v7111_v48 = vld [vmem:[#allocation9 + $0xfe8] sm:$0xf0]  ;;  %3836 = vmatmul.bf16.vlgmr.msra.gmra.mxu2 %v8301_v44 }
 0x18d   :  { %v7700_v55 = vld [vmem:[#allocation9 + $0x94c] sm:$0xf]  ;;  %v7114_v60 = vor.u32 %v7908_v47, %v7111_v48  ;;  %3880 = vmatpush.bf16.msrb.mxu2 %v6858_v59  ;;  %v3605_v59 = vpop.f32.mrf.mxu0 }
 0x18e   :  { %v6279_v58 = vld [vmem:[#allocation9 + $0x968] sm:$0xf0]  ;;  %3849 = vmatmul.bf16.vlgmr.msra.gmra.mxu3 %v8303_v45 }
 0x18f   :  { %v7764_v61 = vld [vmem:[#allocation9 + $0xb4c] sm:$0xf]  ;;  %v6282_v6 = vor.u32 %v7700_v55, %v6279_v58  ;;  %3893 = vmatpush.bf16.msrb.mxu3 %v7114_v60  ;;  %v3618_v60 = vpop.f32.mrf.mxu1 }
 0x190   :  { %v6535_v62 = vld [vmem:[#allocation9 + $0xb68] sm:$0xf0] }
 0x191   :  { %v7836_v63 = vld [vmem:[#allocation9 + $0xd8c] sm:$0xf]  ;;  %v6538_v7 = vor.u32 %v7764_v61, %v6535_v62  ;;  %3856 = vmatpush.bf16.msrb.mxu0 %v6282_v6 }
 0x192   :  { %v6823_v0 = vld [vmem:[#allocation9 + $0xda8] sm:$0xf0] }
 0x193   :  { %v7900_v1 = vld [vmem:[#allocation9 + $0xf8c] sm:$0xf]  ;;  %v6826_v11 = vor.u32 %v7836_v63, %v6823_v0  ;;  %3869 = vmatpush.bf16.msrb.mxu1 %v6538_v7 }
 0x194   :  { %v7079_v2 = vld [vmem:[#allocation9 + $0xfa8] sm:$0xf0] }
 0x195   :  { %v7692_v9 = vld [vmem:[#allocation9 + $0x90c] sm:$0xf]  ;;  %v7082_v12 = vor.u32 %v7900_v1, %v7079_v2  ;;  %3881 = vmatpush.bf16.msrb.mxu2 %v6826_v11 }
 0x196   :  { %v6247_v10 = vld [vmem:[#allocation9 + $0x928] sm:$0xf0] }
 0x197   :  { %v7756_v15 = vld [vmem:[#allocation9 + $0xb0c] sm:$0xf]  ;;  %v6250_v27 = vor.u32 %v7692_v9, %v6247_v10  ;;  %3894 = vmatpush.bf16.msrb.mxu3 %v7082_v12  ;;  %v3629_v9 = vpop.f32.mrf.mxu2  ;;  %v3642_v10 = vpop.f32.mrf.mxu3 }
 0x198   :  { %v6503_v16 = vld [vmem:[#allocation9 + $0xb28] sm:$0xf0] }
 0x199   :  { %v7828_v17 = vld [vmem:[#allocation9 + $0xd4c] sm:$0xf]  ;;  %v6506_v28 = vor.u32 %v7756_v15, %v6503_v16  ;;  %3857 = vmatpush.bf16.msrb.mxu0 %v6250_v27  ;;  %v5581_v27 = vld [vmem:[#allocation9 + $0x3d0] sm:$0xf] }
 0x19a   :  { %v6791_v18 = vld [vmem:[#allocation9 + $0xd68] sm:$0xf0] }
 0x19b   :  { %v7892_v19 = vld [vmem:[#allocation9 + $0xf4c] sm:$0xf]  ;;  %v6794_v31 = vor.u32 %v7828_v17, %v6791_v18  ;;  %3870 = vmatpush.bf16.msrb.mxu1 %v6506_v28  ;;  %v3630_v18 = vadd.f32 %v3629_v9, %v3617_v36  ;;  %v7529_v28 = vld [vmem:[#allocation9 + $0x3ec] sm:$0xf0]  ;;  %v5326_v36 = vor.u32 %v7465_v24, %v5325_v22 }
 0x19c   :  { %v7047_v20 = vld [vmem:[#allocation9 + $0xf68] sm:$0xf0]  ;;  %v7577_v22 = vld [vmem:[#allocation9 + $0x56c] sm:$0xf0] }
 0x19d   :  { %v7684_v29 = vld [vmem:[#allocation9 + $0x8cc] sm:$0xf]  ;;  %v7050_v32 = vor.u32 %v7892_v19, %v7047_v20  ;;  %3882 = vmatpush.bf16.msrb.mxu2 %v6794_v31  ;;  %v6029_v24 = vld [vmem:[#allocation9 + $0x750] sm:$0xf] }
 0x19e   :  { %v6215_v30 = vld [vmem:[#allocation9 + $0x8e8] sm:$0xf0] }
 0x19f   :  { %v7748_v33 = vld [vmem:[#allocation9 + $0xacc] sm:$0xf]  ;;  %v6218_v42 = vor.u32 %v7684_v29, %v6215_v30  ;;  %3895 = vmatpush.bf16.msrb.mxu3 %v7050_v32  ;;  %v8347_v30 = vadd.f32 %v3642_v10, %v3630_v18  ;;  %v7505_v18 = vld [vmem:[#allocation9 + $0x32c] sm:$0xf0] }
 0x1a0   :  { %v6471_v34 = vld [vmem:[#allocation9 + $0xae8] sm:$0xf0] }
 0x1a1   :  { %v7820_v35 = vld [vmem:[#allocation9 + $0xd0c] sm:$0xf]  ;;  %v6474_v46 = vor.u32 %v7748_v33, %v6471_v34  ;;  %3858 = vmatpush.bf16.msrb.mxu0 %v6218_v42 }
 0x1a2   :  { %v6759_v37 = vld [vmem:[#allocation9 + $0xd28] sm:$0xf0] }
 0x1a3   :  { %v7884_v38 = vld [vmem:[#allocation9 + $0xf0c] sm:$0xf]  ;;  %v6762_v49 = vor.u32 %v7820_v35, %v6759_v37  ;;  %3871 = vmatpush.bf16.msrb.mxu1 %v6474_v46  ;;  %v5582_v37 = vor.u32 %v7529_v28, %v5581_v27  ;;  %v7521_v46 = vld [vmem:[#allocation9 + $0x3ac] sm:$0xf0] }
 0x1a4   :  { %v7015_v39 = vld [vmem:[#allocation9 + $0xf28] sm:$0xf0]  ;;  %v5550_v60 = vor.u32 %v7521_v46, %v5549_v40  ;;  %v7641_v27 = vld [vmem:[#allocation9 + $0x76c] sm:$0xf0] }
 0x1a5   :  { %v7676_v47 = vld [vmem:[#allocation9 + $0x88c] sm:$0xf]  ;;  %v7018_v51 = vor.u32 %v7884_v38, %v7015_v39  ;;  %3883 = vmatpush.bf16.msrb.mxu2 %v6762_v49  ;;  %v5293_v38 = vld [vmem:[#allocation9 + $0x190] sm:$0xf] }
 0x1a6   :  { %v6183_v48 = vld [vmem:[#allocation9 + $0x8a8] sm:$0xf0]  ;;  %v7457_v39 = vld [vmem:[#allocation9 + $0x1ac] sm:$0xf0] }
 0x1a7   :  { %v7740_v52 = vld [vmem:[#allocation9 + $0xa8c] sm:$0xf]  ;;  %v6186_v61 = vor.u32 %v7676_v47, %v6183_v48  ;;  %3896 = vmatpush.bf16.msrb.mxu3 %v7018_v51  ;;  %v5294_v59 = vor.u32 %v7457_v39, %v5293_v38  ;;  %v7497_v38 = vld [vmem:[#allocation9 + $0x2ec] sm:$0xf0] }
 0x1a8   :  { %v6439_v53 = vld [vmem:[#allocation9 + $0xaa8] sm:$0xf0]  ;;  %v5741_v39 = vld [vmem:[#allocation9 + $0x510] sm:$0xf] }
 0x1a9   :  { %v7812_v54 = vld [vmem:[#allocation9 + $0xccc] sm:$0xf]  ;;  %v6442_v62 = vor.u32 %v7740_v52, %v6439_v53  ;;  %3859 = vmatpush.bf16.msrb.mxu0 %v6186_v61  ;;  %v5837_v52 = vld [vmem:[#allocation9 + $0x5d0] sm:$0xf]  ;;  %v3631_v53 = vpop.f32.mrf.mxu2 }
 0x1aa   :  { %v6727_v23 = vld [vmem:[#allocation9 + $0xce8] sm:$0xf0]  ;;  %v7569_v40 = vld [vmem:[#allocation9 + $0x52c] sm:$0xf0] }
 0x1ab   :  { %v7876_v55 = vld [vmem:[#allocation9 + $0xecc] sm:$0xf]  ;;  %v6730_v1 = vor.u32 %v7812_v54, %v6727_v23  ;;  %3872 = vmatpush.bf16.msrb.mxu1 %v6442_v62  ;;  %v3644_v54 = vpop.f32.mrf.mxu3  ;;  %v7593_v23 = vld [vmem:[#allocation9 + $0x5ec] sm:$0xf0] }
 0x1ac   :  { %v6983_v58 = vld [vmem:[#allocation9 + $0xee8] sm:$0xf0]  ;;  %v7489_v53 = vld [vmem:[#allocation9 + $0x2ac] sm:$0xf0] }
 0x1ad   :  { %v7668_v63 = vld [vmem:[#allocation9 + $0x84c] sm:$0xf]  ;;  %v6986_v2 = vor.u32 %v7876_v55, %v6983_v58  ;;  %3884 = vmatpush.bf16.msrb.mxu2 %v6730_v1  ;;  %v6093_v55 = vld [vmem:[#allocation9 + $0x7d0] sm:$0xf]  ;;  %v5838_v1 = vor.u32 %v7593_v23, %v5837_v52 }
 0x1ae   :  { %v6151_v0 = vld [vmem:[#allocation9 + $0x868] sm:$0xf0]  ;;  %v7657_v58 = vld [vmem:[#allocation9 + $0x7ec] sm:$0xf0] }
 0x1af   :  { %v7732_v3 = vld [vmem:[#allocation9 + $0xa4c] sm:$0xf]  ;;  %v6154_v11 = vor.u32 %v7668_v63, %v6151_v0  ;;  %3897 = vmatpush.bf16.msrb.mxu3 %v6986_v2  ;;  %v5261_v63 = vld [vmem:[#allocation9 + $0x150] sm:$0xf]  ;;  %v6094_v2 = vor.u32 %v7657_v58, %v6093_v55 }
 0x1b0   :  { %v6407_v4 = vld [vmem:[#allocation9 + $0xa68] sm:$0xf0]  ;;  %v7449_v0 = vld [vmem:[#allocation9 + $0x16c] sm:$0xf0] }
 0x1b1   :  { %v7804_v5 = vld [vmem:[#allocation9 + $0xc8c] sm:$0xf]  ;;  %v6410_v12 = vor.u32 %v7732_v3, %v6407_v4  ;;  %3860 = vmatpush.bf16.msrb.mxu0 %v6154_v11  ;;  %v5517_v3 = vld [vmem:[#allocation9 + $0x350] sm:$0xf]  ;;  %v5262_v9 = vor.u32 %v7449_v0, %v5261_v63 }
 0x1b2   :  { %v6695_v6 = vld [vmem:[#allocation9 + $0xca8] sm:$0xf0]  ;;  %v7513_v4 = vld [vmem:[#allocation9 + $0x36c] sm:$0xf0] }
 0x1b3   :  { %v7868_v7 = vld [vmem:[#allocation9 + $0xe8c] sm:$0xf]  ;;  %v6698_v19 = vor.u32 %v7804_v5, %v6695_v6  ;;  %3873 = vmatpush.bf16.msrb.mxu1 %v6410_v12  ;;  %v5805_v5 = vld [vmem:[#allocation9 + $0x590] sm:$0xf]  ;;  %v5518_v10 = vor.u32 %v7513_v4, %v5517_v3 }
 0x1b4   :  { %v6951_v8 = vld [vmem:[#allocation9 + $0xea8] sm:$0xf0]  ;;  %v7585_v6 = vld [vmem:[#allocation9 + $0x5ac] sm:$0xf0] }
 0x1b5   :  { %v7660_v15 = vld [vmem:[#allocation9 + $0x80c] sm:$0xf]  ;;  %v6954_v20 = vor.u32 %v7868_v7, %v6951_v8  ;;  %3885 = vmatpush.bf16.msrb.mxu2 %v6698_v19  ;;  %v6061_v7 = vld [vmem:[#allocation9 + $0x790] sm:$0xf] }
 0x1b6   :  { %v6119_v16 = vld [vmem:[#allocation9 + $0x828] sm:$0xf0]  ;;  %v7649_v8 = vld [vmem:[#allocation9 + $0x7ac] sm:$0xf0] }
 0x1b7   :  { %v7724_v17 = vld [vmem:[#allocation9 + $0xa0c] sm:$0xf]  ;;  %v6122_v34 = vor.u32 %v7660_v15, %v6119_v16  ;;  %3898 = vmatpush.bf16.msrb.mxu3 %v6954_v20  ;;  %v5229_v11 = vld [vmem:[#allocation9 + $0x110] sm:$0xf]  ;;  %v5806_v15 = vor.u32 %v7585_v6, %v5805_v5  ;;  %v6062_v16 = vor.u32 %v7649_v8, %v6061_v7  ;;  %v3655_v20 = vpop.f32.mrf.mxu0  ;;  %v3681_v6 = vpop.f32.mrf.mxu2 }
 0x1b8   :  { %v6375_v21 = vld [vmem:[#allocation9 + $0xa28] sm:$0xf0]  ;;  %v7441_v12 = vld [vmem:[#allocation9 + $0x12c] sm:$0xf0]  ;;  %v3656_v28 = vadd.f32 %v3655_v20, %v8347_v30  ;;  %v3694_v7 = vpop.f32.mrf.mxu3 }
 0x1b9   :  { %v7796_v29 = vld [vmem:[#allocation9 + $0xc4c] sm:$0xf]  ;;  %v6378_v35 = vor.u32 %v7724_v17, %v6375_v21  ;;  %3861 = vmatpush.bf16.msrb.mxu0 %v6122_v34  ;;  %v5485_v17 = vld [vmem:[#allocation9 + $0x310] sm:$0xf]  ;;  %v3668_v21 = vpop.f32.mrf.mxu1 }
 0x1ba   :  { %v6663_v31 = vld [vmem:[#allocation9 + $0xc68] sm:$0xf0]  ;;  %v5773_v19 = vld [vmem:[#allocation9 + $0x550] sm:$0xf]  ;;  %v3669_v34 = vadd.f32 %v3668_v21, %v3656_v28 }
 0x1bb   :  { %v7860_v32 = vld [vmem:[#allocation9 + $0xe4c] sm:$0xf]  ;;  %v6666_v41 = vor.u32 %v7796_v29, %v6663_v31  ;;  %3874 = vmatpush.bf16.msrb.mxu1 %v6378_v35  ;;  %v5230_v29 = vor.u32 %v7441_v12, %v5229_v11  ;;  %v5486_v31 = vor.u32 %v7505_v18, %v5485_v17  ;;  %v5774_v35 = vor.u32 %v7577_v22, %v5773_v19  ;;  %v5421_v52 = vld [vmem:[#allocation9 + $0x290] sm:$0xf] }
 0x1bc   :  { %v6919_v33 = vld [vmem:[#allocation9 + $0xe68] sm:$0xf0]  ;;  %3862 = vmatmul.bf16.vlgmr.msrb.gmra.mxu0 %v8309_v25  ;;  %v5709_v54 = vld [vmem:[#allocation9 + $0x4d0] sm:$0xf]  ;;  %v3682_v11 = vadd.f32 %v3681_v6, %v3669_v34 }
 0x1bd   :  { %v6922_v42 = vor.u32 %v7860_v32, %v6919_v33  ;;  %v7788_v47 = vld [vmem:[#allocation9 + $0xc0c] sm:$0xf]  ;;  %3906 = vmatpush.bf16.msra.mxu0 %v5326_v36  ;;  %3886 = vmatpush.bf16.msrb.mxu2 %v6666_v41  ;;  %v5197_v32 = vld [vmem:[#allocation9 + $0xd0] sm:$0xf]  ;;  %v6030_v36 = vor.u32 %v7641_v27, %v6029_v24 }
 0x1be   :  { %v6631_v48 = vld [vmem:[#allocation9 + $0xc28] sm:$0xf0]  ;;  %3875 = vmatmul.bf16.vlgmr.msrb.gmra.mxu1 %v8311_v26  ;;  %v7433_v33 = vld [vmem:[#allocation9 + $0xec] sm:$0xf0]  ;;  %v3695_v20 = vadd.f32 %v3694_v7, %v3682_v11  ;;  %v888_v11 = vperm.slane %v8333_v43, 2 }
 0x1bf   :  { %v7852_v49 = vld [vmem:[#allocation9 + $0xe0c] sm:$0xf]  ;;  %3919 = vmatpush.bf16.msra.mxu1 %v5582_v37  ;;  %3899 = vmatpush.bf16.msrb.mxu3 %v6922_v42  ;;  %v6634_v61 = vor.u32 %v7788_v47, %v6631_v48  ;;  %v5453_v37 = vld [vmem:[#allocation9 + $0x2d0] sm:$0xf]  ;;  %v5198_v30 = vor.u32 %v7433_v33, %v5197_v32  ;;  %v3657_v23 = vpop.f32.mrf.mxu0  ;;  %v4322_v33 = vmax.f32 %v8343_v50, 0.0 }
 0x1c0   :  { %v6887_v51 = vld [vmem:[#allocation9 + $0xe28] sm:$0xf0]  ;;  %v5997_v41 = vld [vmem:[#allocation9 + $0x710] sm:$0xf]  ;;  %v5454_v46 = vor.u32 %v7497_v38, %v5453_v37  ;;  %v4323_v34 = vmax.f32 %v3695_v20, 0.0  ;;  %v3696_v50 = vpop.f32.mrf.mxu3 }
 0x1c1   :  { %v6890_v62 = vor.u32 %v7852_v49, %v6887_v51  ;;  %3907 = vmatpush.bf16.msra.mxu0 %v5294_v59  ;;  %3887 = vmatpush.bf16.msrb.mxu2 %v6634_v61  ;;  %v7633_v42 = vld [vmem:[#allocation9 + $0x72c] sm:$0xf0]  ;;  %v5742_v49 = vor.u32 %v7569_v40, %v5741_v39  ;;  %v3670_v55 = vpop.f32.mrf.mxu1 }
 0x1c2   :  { %v5165_v47 = vld [vmem:[#allocation9 + $0x90] sm:$0xf]  ;;  %v5998_v51 = vor.u32 %v7633_v42, %v5997_v41  ;;  %v8355_v39 = vpack.c.bf16 %v4323_v34, %v4322_v33 }
 0x1c3   :  { %3920 = vmatpush.bf16.msra.mxu1 %v5550_v60  ;;  %3900 = vmatpush.bf16.msrb.mxu3 %v6890_v62  ;;  %v7425_v48 = vld [vmem:[#allocation9 + $0xac] sm:$0xf0]  ;;  %v5422_v62 = vor.u32 %v7489_v53, %v5421_v52 }
 0x1c4   :  { %3888 = vmatmul.bf16.vlgmr.msrb.gmra.mxu2 %v8315_v56  ;;  %v7561_v58 = vld [vmem:[#allocation9 + $0x4ec] sm:$0xf0]  ;;  %v5166_v61 = vor.u32 %v7425_v48, %v5165_v47 }
 0x1c5   :  { %3932 = vmatpush.bf16.msra.mxu2 %v5838_v1  ;;  %3908 = vmatpush.bf16.msra.mxu0 %v5262_v9  ;;  %v5965_v59 = vld [vmem:[#allocation9 + $0x6d0] sm:$0xf]  ;;  %v5710_v1 = vor.u32 %v7561_v58, %v5709_v54 }
 0x1c6   :  { %3901 = vmatmul.bf16.vlgmr.msrb.gmra.mxu3 %v8317_v57  ;;  %v7625_v60 = vld [vmem:[#allocation9 + $0x6ec] sm:$0xf0] }
 0x1c7   :  { %3945 = vmatpush.bf16.msra.mxu3 %v6094_v2  ;;  %3921 = vmatpush.bf16.msra.mxu1 %v5518_v10  ;;  %v5133_v63 = vld [vmem:[#allocation9 + $0x50] sm:$0xf]  ;;  %v5966_v2 = vor.u32 %v7625_v60, %v5965_v59 }
 0x1c8   :  { %v7417_v0 = vld [vmem:[#allocation9 + $0x6c] sm:$0xf0] }
 0x1c9   :  { %3933 = vmatpush.bf16.msra.mxu2 %v5806_v15  ;;  %3909 = vmatpush.bf16.msra.mxu0 %v5230_v29  ;;  %v5389_v3 = vld [vmem:[#allocation9 + $0x250] sm:$0xf]  ;;  %v5134_v15 = vor.u32 %v7417_v0, %v5133_v63 }
 0x1ca   :  { %v7481_v4 = vld [vmem:[#allocation9 + $0x26c] sm:$0xf0] }
 0x1cb   :  { %3946 = vmatpush.bf16.msra.mxu3 %v6062_v16  ;;  %3922 = vmatpush.bf16.msra.mxu1 %v5486_v31  ;;  %v5677_v5 = vld [vmem:[#allocation9 + $0x490] sm:$0xf]  ;;  %v5390_v16 = vor.u32 %v7481_v4, %v5389_v3 }
 0x1cc   :  { %v7553_v8 = vld [vmem:[#allocation9 + $0x4ac] sm:$0xf0] }
 0x1cd   :  { %3934 = vmatpush.bf16.msra.mxu2 %v5774_v35  ;;  %3910 = vmatpush.bf16.msra.mxu0 %v5198_v30  ;;  %v5933_v9 = vld [vmem:[#allocation9 + $0x690] sm:$0xf]  ;;  %v5678_v21 = vor.u32 %v7553_v8, %v5677_v5 }
 0x1ce   :  { %v7617_v10 = vld [vmem:[#allocation9 + $0x6ac] sm:$0xf0] }
 0x1cf   :  { %3947 = vmatpush.bf16.msra.mxu3 %v6030_v36  ;;  %3923 = vmatpush.bf16.msra.mxu1 %v5454_v46  ;;  %v5101_v12 = vld [vmem:[#allocation9 + $0x10] sm:$0xf]  ;;  %v5934_v22 = vor.u32 %v7617_v10, %v5933_v9 }
 0x1d0   :  { %v7409_v17 = vld [vmem:[#allocation9 + $0x2c] sm:$0xf0] }
 0x1d1   :  { %3935 = vmatpush.bf16.msra.mxu2 %v5742_v49  ;;  %3911 = vmatpush.bf16.msra.mxu0 %v5166_v61  ;;  %v5357_v18 = vld [vmem:[#allocation9 + $0x210] sm:$0xf]  ;;  %v5102_v37 = vor.u32 %v7409_v17, %v5101_v12  ;;  %v3683_v49 = vpop.f32.mrf.mxu2 }
 0x1d2   :  { %v7473_v19 = vld [vmem:[#allocation9 + $0x22c] sm:$0xf0] }
 0x1d3   :  { %3948 = vmatpush.bf16.msra.mxu3 %v5998_v51  ;;  %3924 = vmatpush.bf16.msra.mxu1 %v5422_v62  ;;  %v6349_v24 = vld [vmem:[#allocation9 + $0x9d0] sm:$0xf]  ;;  %v5358_v38 = vor.u32 %v7473_v19, %v5357_v18 }
 0x1d4   :  { %v7721_v27 = vld [vmem:[#allocation9 + $0x9ec] sm:$0xf0] }
 0x1d5   :  { %3936 = vmatpush.bf16.msra.mxu2 %v5710_v1  ;;  %v6605_v28 = vld [vmem:[#allocation9 + $0xbd0] sm:$0xf]  ;;  %3912 = vmatpush.bf16.msra.mxu0 %v5134_v15  ;;  %v6350_v40 = vor.u32 %v7721_v27, %v6349_v24  ;;  %v3707_v24 = vpop.f32.mrf.mxu0  ;;  %v3720_v27 = vpop.f32.mrf.mxu1 }
 0x1d6   :  { %v7785_v29 = vld [vmem:[#allocation9 + $0xbec] sm:$0xf0]  ;;  %v3708_v43 = vadd.f32 %v3707_v24, %v888_v11 }
 0x1d7   :  { %3949 = vmatpush.bf16.msra.mxu3 %v5966_v2  ;;  %v5645_v31 = vld [vmem:[#allocation9 + $0x450] sm:$0xf]  ;;  %3925 = vmatpush.bf16.msra.mxu1 %v5390_v16  ;;  %v6606_v41 = vor.u32 %v7785_v29, %v6605_v28 }
 0x1d8   :  { %v7545_v32 = vld [vmem:[#allocation9 + $0x46c] sm:$0xf0] }
 0x1d9   :  { %v5901_v35 = vld [vmem:[#allocation9 + $0x650] sm:$0xf]  ;;  %3937 = vmatpush.bf16.msra.mxu2 %v5678_v21  ;;  %v5646_v47 = vor.u32 %v7545_v32, %v5645_v31  ;;  %3913 = vmatpush.bf16.msra.mxu0 %v5102_v37 }
 0x1da   :  { %v7609_v36 = vld [vmem:[#allocation9 + $0x66c] sm:$0xf0] }
 0x1db   :  { %3950 = vmatpush.bf16.msra.mxu3 %v5934_v22  ;;  %v6317_v42 = vld [vmem:[#allocation9 + $0x990] sm:$0xf]  ;;  %v5902_v48 = vor.u32 %v7609_v36, %v5901_v35  ;;  %3926 = vmatpush.bf16.msra.mxu1 %v5358_v38  ;;  %v3721_v36 = vadd.f32 %v3720_v27, %v3708_v43  ;;  %v5583_v43 = vld [vmem:[#allocation9 + $0x3f0] sm:$0xf0] }
 0x1dc   :  { %v7713_v30 = vld [vmem:[#allocation9 + $0x9ac] sm:$0xf0]  ;;  %3914 = vmatmul.bf16.vlgmr.msra.gmra.mxu0 %v8293_v13 }
 0x1dd   :  { %v6573_v46 = vld [vmem:[#allocation9 + $0xb90] sm:$0xf]  ;;  %3958 = vmatpush.bf16.msrb.mxu0 %v6350_v40  ;;  %v6318_v61 = vor.u32 %v7713_v30, %v6317_v42  ;;  %3938 = vmatpush.bf16.msra.mxu2 %v5646_v47 }
 0x1de   :  { %v7777_v51 = vld [vmem:[#allocation9 + $0xbac] sm:$0xf0]  ;;  %3927 = vmatmul.bf16.vlgmr.msra.gmra.mxu1 %v8295_v14 }
 0x1df   :  { %v5613_v52 = vld [vmem:[#allocation9 + $0x410] sm:$0xf]  ;;  %3971 = vmatpush.bf16.msrb.mxu1 %v6606_v41  ;;  %v6574_v62 = vor.u32 %v7777_v51, %v6573_v46  ;;  %3951 = vmatpush.bf16.msra.mxu3 %v5902_v48 }
 0x1e0   :  { %v7537_v53 = vld [vmem:[#allocation9 + $0x42c] sm:$0xf0] }
 0x1e1   :  { %v5869_v54 = vld [vmem:[#allocation9 + $0x610] sm:$0xf]  ;;  %v5614_v63 = vor.u32 %v7537_v53, %v5613_v52  ;;  %3959 = vmatpush.bf16.msrb.mxu0 %v6318_v61 }
 0x1e2   :  { %v7601_v23 = vld [vmem:[#allocation9 + $0x62c] sm:$0xf0] }
 0x1e3   :  { %v6861_v55 = vld [vmem:[#allocation9 + $0xdd0] sm:$0xf]  ;;  %v5870_v0 = vor.u32 %v7601_v23, %v5869_v54  ;;  %3972 = vmatpush.bf16.msrb.mxu1 %v6574_v62  ;;  %3939 = vmatpush.bf16.msra.mxu2 %v5614_v63 }
 0x1e4   :  { %v7849_v58 = vld [vmem:[#allocation9 + $0xdec] sm:$0xf0] }
 0x1e5   :  { %v7117_v59 = vld [vmem:[#allocation9 + $0xfd0] sm:$0xf]  ;;  %v6862_v3 = vor.u32 %v7849_v58, %v6861_v55  ;;  %3952 = vmatpush.bf16.msra.mxu3 %v5870_v0  ;;  %v3709_v58 = vpop.f32.mrf.mxu0 }
 0x1e6   :  { %v7913_v60 = vld [vmem:[#allocation9 + $0xfec] sm:$0xf0]  ;;  %3940 = vmatmul.bf16.vlgmr.msra.gmra.mxu2 %v8301_v44  ;;  %v7653_v58 = vld [vmem:[#allocation9 + $0x7d4] sm:$0xf] }
 0x1e7   :  { %v6285_v1 = vld [vmem:[#allocation9 + $0x950] sm:$0xf]  ;;  %v7118_v4 = vor.u32 %v7913_v60, %v7117_v59  ;;  %3984 = vmatpush.bf16.msrb.mxu2 %v6862_v3  ;;  %v3722_v59 = vpop.f32.mrf.mxu1 }
 0x1e8   :  { %v7705_v2 = vld [vmem:[#allocation9 + $0x96c] sm:$0xf0]  ;;  %3953 = vmatmul.bf16.vlgmr.msra.gmra.mxu3 %v8303_v45  ;;  %v6095_v59 = vld [vmem:[#allocation9 + $0x7f0] sm:$0xf0] }
 0x1e9   :  { %v6541_v5 = vld [vmem:[#allocation9 + $0xb50] sm:$0xf]  ;;  %v6286_v12 = vor.u32 %v7705_v2, %v6285_v1  ;;  %3997 = vmatpush.bf16.msrb.mxu3 %v7118_v4 }
 0x1ea   :  { %v7769_v6 = vld [vmem:[#allocation9 + $0xb6c] sm:$0xf0] }
 0x1eb   :  { %v6829_v7 = vld [vmem:[#allocation9 + $0xd90] sm:$0xf]  ;;  %v6542_v15 = vor.u32 %v7769_v6, %v6541_v5  ;;  %3960 = vmatpush.bf16.msrb.mxu0 %v6286_v12 }
 0x1ec   :  { %v7841_v8 = vld [vmem:[#allocation9 + $0xdac] sm:$0xf0] }
 0x1ed   :  { %v7085_v9 = vld [vmem:[#allocation9 + $0xf90] sm:$0xf]  ;;  %v6830_v18 = vor.u32 %v7841_v8, %v6829_v7  ;;  %3973 = vmatpush.bf16.msrb.mxu1 %v6542_v15  ;;  %v3733_v8 = vpop.f32.mrf.mxu2 }
 0x1ee   :  { %v7905_v10 = vld [vmem:[#allocation9 + $0xfac] sm:$0xf0]  ;;  %v3734_v15 = vadd.f32 %v3733_v8, %v3721_v36  ;;  %v7645_v8 = vld [vmem:[#allocation9 + $0x794] sm:$0xf] }
 0x1ef   :  { %v6253_v16 = vld [vmem:[#allocation9 + $0x910] sm:$0xf]  ;;  %v7086_v19 = vor.u32 %v7905_v10, %v7085_v9  ;;  %3985 = vmatpush.bf16.msrb.mxu2 %v6830_v18  ;;  %v3746_v9 = vpop.f32.mrf.mxu3 }
 0x1f0   :  { %v7697_v17 = vld [vmem:[#allocation9 + $0x92c] sm:$0xf0] }
 0x1f1   :  { %v6509_v20 = vld [vmem:[#allocation9 + $0xb10] sm:$0xf]  ;;  %v6254_v32 = vor.u32 %v7697_v17, %v6253_v16  ;;  %3998 = vmatpush.bf16.msrb.mxu3 %v7086_v19 }
 0x1f2   :  { %v7761_v21 = vld [vmem:[#allocation9 + $0xb2c] sm:$0xf0] }
 0x1f3   :  { %v6797_v22 = vld [vmem:[#allocation9 + $0xd50] sm:$0xf]  ;;  %v6510_v33 = vor.u32 %v7761_v21, %v6509_v20  ;;  %3961 = vmatpush.bf16.msrb.mxu0 %v6254_v32  ;;  %v8362_v21 = vadd.f32 %v3746_v9, %v3734_v15  ;;  %v6063_v9 = vld [vmem:[#allocation9 + $0x7b0] sm:$0xf0] }
 0x1f4   :  { %v7833_v28 = vld [vmem:[#allocation9 + $0xd6c] sm:$0xf0]  ;;  %v5231_v15 = vld [vmem:[#allocation9 + $0x130] sm:$0xf0] }
 0x1f5   :  { %v7053_v29 = vld [vmem:[#allocation9 + $0xf50] sm:$0xf]  ;;  %v6798_v37 = vor.u32 %v7833_v28, %v6797_v22  ;;  %3974 = vmatpush.bf16.msrb.mxu1 %v6510_v33  ;;  %v7461_v28 = vld [vmem:[#allocation9 + $0x1d4] sm:$0xf] }
 0x1f6   :  { %v7897_v31 = vld [vmem:[#allocation9 + $0xf6c] sm:$0xf0] }
 0x1f7   :  { %v6221_v34 = vld [vmem:[#allocation9 + $0x8d0] sm:$0xf]  ;;  %v7054_v38 = vor.u32 %v7897_v31, %v7053_v29  ;;  %3986 = vmatpush.bf16.msrb.mxu2 %v6798_v37  ;;  %v5327_v29 = vld [vmem:[#allocation9 + $0x1f0] sm:$0xf0] }
 0x1f8   :  { %v7689_v35 = vld [vmem:[#allocation9 + $0x8ec] sm:$0xf0]  ;;  %v7525_v31 = vld [vmem:[#allocation9 + $0x3d4] sm:$0xf] }
 0x1f9   :  { %v6477_v40 = vld [vmem:[#allocation9 + $0xad0] sm:$0xf]  ;;  %v6222_v48 = vor.u32 %v7689_v35, %v6221_v34  ;;  %3999 = vmatpush.bf16.msrb.mxu3 %v7054_v38  ;;  %v5330_v38 = vor.u32 %v7461_v28, %v5327_v29  ;;  %v7637_v28 = vld [vmem:[#allocation9 + $0x754] sm:$0xf] }
 0x1fa   :  { %v7753_v41 = vld [vmem:[#allocation9 + $0xaec] sm:$0xf0]  ;;  %v6031_v29 = vld [vmem:[#allocation9 + $0x770] sm:$0xf0] }
 0x1fb   :  { %v6765_v42 = vld [vmem:[#allocation9 + $0xd10] sm:$0xf]  ;;  %v6478_v49 = vor.u32 %v7753_v41, %v6477_v40  ;;  %3962 = vmatpush.bf16.msrb.mxu0 %v6222_v48  ;;  %v5586_v40 = vor.u32 %v7525_v31, %v5583_v43  ;;  %v7453_v41 = vld [vmem:[#allocation9 + $0x194] sm:$0xf]  ;;  %v3735_v48 = vpop.f32.mrf.mxu2 }
 0x1fc   :  { %v7825_v30 = vld [vmem:[#allocation9 + $0xd2c] sm:$0xf0]  ;;  %v7421_v48 = vld [vmem:[#allocation9 + $0x94] sm:$0xf] }
 0x1fd   :  { %v7021_v46 = vld [vmem:[#allocation9 + $0xf10] sm:$0xf]  ;;  %v6766_v52 = vor.u32 %v7825_v30, %v6765_v42  ;;  %3975 = vmatpush.bf16.msrb.mxu1 %v6478_v49  ;;  %v5295_v42 = vld [vmem:[#allocation9 + $0x1b0] sm:$0xf0]  ;;  %v3748_v49 = vpop.f32.mrf.mxu3 }
 0x1fe   :  { %v7889_v47 = vld [vmem:[#allocation9 + $0xf2c] sm:$0xf0]  ;;  %v7517_v30 = vld [vmem:[#allocation9 + $0x394] sm:$0xf] }
 0x1ff   :  { %v6189_v50 = vld [vmem:[#allocation9 + $0x890] sm:$0xf]  ;;  %v7022_v53 = vor.u32 %v7889_v47, %v7021_v46  ;;  %3987 = vmatpush.bf16.msrb.mxu2 %v6766_v52  ;;  %v5167_v49 = vld [vmem:[#allocation9 + $0xb0] sm:$0xf0] }
 0x200   :  { %v7681_v51 = vld [vmem:[#allocation9 + $0x8ac] sm:$0xf0] }
 0x201   :  { %v6445_v54 = vld [vmem:[#allocation9 + $0xa90] sm:$0xf]  ;;  %v6190_v63 = vor.u32 %v7681_v51, %v6189_v50  ;;  %4000 = vmatpush.bf16.msrb.mxu3 %v7022_v53  ;;  %v5551_v50 = vld [vmem:[#allocation9 + $0x3b0] sm:$0xf0] }
 0x202   :  { %v7745_v23 = vld [vmem:[#allocation9 + $0xaac] sm:$0xf0] }
 0x203   :  { %v6733_v55 = vld [vmem:[#allocation9 + $0xcd0] sm:$0xf]  ;;  %v6446_v0 = vor.u32 %v7745_v23, %v6445_v54  ;;  %3963 = vmatpush.bf16.msrb.mxu0 %v6190_v63  ;;  %v7589_v23 = vld [vmem:[#allocation9 + $0x5d4] sm:$0xf] }
 0x204   :  { %v7817_v60 = vld [vmem:[#allocation9 + $0xcec] sm:$0xf0] }
 0x205   :  { %v6989_v61 = vld [vmem:[#allocation9 + $0xed0] sm:$0xf]  ;;  %v6734_v3 = vor.u32 %v7817_v60, %v6733_v55  ;;  %3976 = vmatpush.bf16.msrb.mxu1 %v6446_v0  ;;  %v5839_v55 = vld [vmem:[#allocation9 + $0x5f0] sm:$0xf0]  ;;  %v5298_v60 = vor.u32 %v7453_v41, %v5295_v42 }
 0x206   :  { %v7881_v62 = vld [vmem:[#allocation9 + $0xeec] sm:$0xf0]  ;;  %v7445_v0 = vld [vmem:[#allocation9 + $0x154] sm:$0xf] }
 0x207   :  { %v6157_v1 = vld [vmem:[#allocation9 + $0x850] sm:$0xf]  ;;  %v6990_v4 = vor.u32 %v7881_v62, %v6989_v61  ;;  %3988 = vmatpush.bf16.msrb.mxu2 %v6734_v3  ;;  %v5554_v61 = vor.u32 %v7517_v30, %v5551_v50  ;;  %v6098_v3 = vor.u32 %v7653_v58, %v6095_v59  ;;  %v7565_v41 = vld [vmem:[#allocation9 + $0x514] sm:$0xf] }
 0x208   :  { %v7673_v2 = vld [vmem:[#allocation9 + $0x86c] sm:$0xf0]  ;;  %v5743_v42 = vld [vmem:[#allocation9 + $0x530] sm:$0xf0] }
 0x209   :  { %v6413_v5 = vld [vmem:[#allocation9 + $0xa50] sm:$0xf]  ;;  %v6158_v16 = vor.u32 %v7673_v2, %v6157_v1  ;;  %4001 = vmatpush.bf16.msrb.mxu3 %v6990_v4  ;;  %v5263_v1 = vld [vmem:[#allocation9 + $0x170] sm:$0xf0]  ;;  %v5842_v2 = vor.u32 %v7589_v23, %v5839_v55  ;;  %v5746_v50 = vor.u32 %v7565_v41, %v5743_v42 }
 0x20a   :  { %v7737_v6 = vld [vmem:[#allocation9 + $0xa6c] sm:$0xf0]  ;;  %v7509_v4 = vld [vmem:[#allocation9 + $0x354] sm:$0xf] }
 0x20b   :  { %v6701_v7 = vld [vmem:[#allocation9 + $0xc90] sm:$0xf]  ;;  %v6414_v17 = vor.u32 %v7737_v6, %v6413_v5  ;;  %3964 = vmatpush.bf16.msrb.mxu0 %v6158_v16  ;;  %v5519_v5 = vld [vmem:[#allocation9 + $0x370] sm:$0xf0] }
 0x20c   :  { %v7809_v10 = vld [vmem:[#allocation9 + $0xcac] sm:$0xf0]  ;;  %v7581_v6 = vld [vmem:[#allocation9 + $0x594] sm:$0xf] }
 0x20d   :  { %v6957_v11 = vld [vmem:[#allocation9 + $0xe90] sm:$0xf]  ;;  %v6702_v22 = vor.u32 %v7809_v10, %v6701_v7  ;;  %3977 = vmatpush.bf16.msrb.mxu1 %v6414_v17  ;;  %v5807_v7 = vld [vmem:[#allocation9 + $0x5b0] sm:$0xf0]  ;;  %v5266_v10 = vor.u32 %v7445_v0, %v5263_v1  ;;  %v6066_v17 = vor.u32 %v7645_v8, %v6063_v9 }
 0x20e   :  { %v7873_v12 = vld [vmem:[#allocation9 + $0xeac] sm:$0xf0]  ;;  %v5810_v16 = vor.u32 %v7581_v6, %v5807_v7  ;;  %v7629_v30 = vld [vmem:[#allocation9 + $0x714] sm:$0xf]  ;;  %v3785_v6 = vpop.f32.mrf.mxu2  ;;  %v3798_v7 = vpop.f32.mrf.mxu3 }
 0x20f   :  { %v6125_v18 = vld [vmem:[#allocation9 + $0x810] sm:$0xf]  ;;  %v6958_v24 = vor.u32 %v7873_v12, %v6957_v11  ;;  %3989 = vmatpush.bf16.msrb.mxu2 %v6702_v22  ;;  %v5522_v11 = vor.u32 %v7509_v4, %v5519_v5  ;;  %v7437_v12 = vld [vmem:[#allocation9 + $0x114] sm:$0xf]  ;;  %v3759_v22 = vpop.f32.mrf.mxu0 }
 0x210   :  { %v7665_v19 = vld [vmem:[#allocation9 + $0x82c] sm:$0xf0]  ;;  %v3760_v31 = vadd.f32 %v3759_v22, %v8362_v21  ;;  %v5234_v43 = vor.u32 %v7437_v12, %v5231_v15  ;;  %v5711_v58 = vld [vmem:[#allocation9 + $0x4f0] sm:$0xf0] }
 0x211   :  { %v6381_v20 = vld [vmem:[#allocation9 + $0xa10] sm:$0xf]  ;;  %v6126_v36 = vor.u32 %v7665_v19, %v6125_v18  ;;  %4002 = vmatpush.bf16.msrb.mxu3 %v6958_v24  ;;  %v7501_v18 = vld [vmem:[#allocation9 + $0x314] sm:$0xf]  ;;  %v3772_v24 = vpop.f32.mrf.mxu1 }
 0x212   :  { %v7729_v27 = vld [vmem:[#allocation9 + $0xa2c] sm:$0xf0]  ;;  %v5487_v19 = vld [vmem:[#allocation9 + $0x330] sm:$0xf0] }
 0x213   :  { %v6669_v32 = vld [vmem:[#allocation9 + $0xc50] sm:$0xf]  ;;  %v6382_v37 = vor.u32 %v7729_v27, %v6381_v20  ;;  %3965 = vmatpush.bf16.msrb.mxu0 %v6126_v36  ;;  %v7573_v20 = vld [vmem:[#allocation9 + $0x554] sm:$0xf] }
 0x214   :  { %v7801_v33 = vld [vmem:[#allocation9 + $0xc6c] sm:$0xf0]  ;;  %v5775_v27 = vld [vmem:[#allocation9 + $0x570] sm:$0xf0] }
 0x215   :  { %v6925_v34 = vld [vmem:[#allocation9 + $0xe50] sm:$0xf]  ;;  %v6670_v46 = vor.u32 %v7801_v33, %v6669_v32  ;;  %3978 = vmatpush.bf16.msrb.mxu1 %v6382_v37  ;;  %v5490_v32 = vor.u32 %v7501_v18, %v5487_v19  ;;  %v7429_v33 = vld [vmem:[#allocation9 + $0xd4] sm:$0xf]  ;;  %v5778_v36 = vor.u32 %v7573_v20, %v5775_v27  ;;  %v6034_v37 = vor.u32 %v7637_v28, %v6031_v29 }
 0x216   :  { %v7865_v35 = vld [vmem:[#allocation9 + $0xe6c] sm:$0xf0]  ;;  %3966 = vmatmul.bf16.vlgmr.msrb.gmra.mxu0 %v8309_v25  ;;  %v7621_v59 = vld [vmem:[#allocation9 + $0x6d4] sm:$0xf] }
 0x217   :  { %v6926_v47 = vor.u32 %v7865_v35, %v6925_v34  ;;  %v6637_v51 = vld [vmem:[#allocation9 + $0xc10] sm:$0xf]  ;;  %4010 = vmatpush.bf16.msra.mxu0 %v5330_v38  ;;  %3990 = vmatpush.bf16.msrb.mxu2 %v6670_v46  ;;  %v5199_v34 = vld [vmem:[#allocation9 + $0xf0] sm:$0xf0]  ;;  %v3773_v35 = vadd.f32 %v3772_v24, %v3760_v31  ;;  %v3761_v23 = vpop.f32.mrf.mxu0 }
 0x218   :  { %v7793_v52 = vld [vmem:[#allocation9 + $0xc2c] sm:$0xf0]  ;;  %3979 = vmatmul.bf16.vlgmr.msrb.gmra.mxu1 %v8311_v26  ;;  %v7493_v38 = vld [vmem:[#allocation9 + $0x2d4] sm:$0xf]  ;;  %v5202_v21 = vor.u32 %v7429_v33, %v5199_v34 }
 0x219   :  { %v6893_v53 = vld [vmem:[#allocation9 + $0xe10] sm:$0xf]  ;;  %4023 = vmatpush.bf16.msra.mxu1 %v5586_v40  ;;  %4003 = vmatpush.bf16.msrb.mxu3 %v6926_v47  ;;  %v6638_v62 = vor.u32 %v7793_v52, %v6637_v51  ;;  %v5455_v40 = vld [vmem:[#allocation9 + $0x2f0] sm:$0xf0]  ;;  %v3774_v55 = vpop.f32.mrf.mxu1 }
 0x21a   :  { %v7857_v54 = vld [vmem:[#allocation9 + $0xe2c] sm:$0xf0]  ;;  %v5999_v46 = vld [vmem:[#allocation9 + $0x730] sm:$0xf0]  ;;  %v5458_v47 = vor.u32 %v7493_v38, %v5455_v40 }
 0x21b   :  { %v6894_v63 = vor.u32 %v7857_v54, %v6893_v53  ;;  %4011 = vmatpush.bf16.msra.mxu0 %v5298_v60  ;;  %3991 = vmatpush.bf16.msrb.mxu2 %v6638_v62  ;;  %v6002_v51 = vor.u32 %v7629_v30, %v5999_v46  ;;  %v7485_v52 = vld [vmem:[#allocation9 + $0x294] sm:$0xf] }
 0x21c   :  { %v5423_v53 = vld [vmem:[#allocation9 + $0x2b0] sm:$0xf0] }
 0x21d   :  { %4024 = vmatpush.bf16.msra.mxu1 %v5554_v61  ;;  %4004 = vmatpush.bf16.msrb.mxu3 %v6894_v63  ;;  %v7557_v54 = vld [vmem:[#allocation9 + $0x4d4] sm:$0xf]  ;;  %v5170_v61 = vor.u32 %v7421_v48, %v5167_v49  ;;  %v5426_v62 = vor.u32 %v7485_v52, %v5423_v53 }
 0x21e   :  { %3992 = vmatmul.bf16.vlgmr.msrb.gmra.mxu2 %v8315_v56  ;;  %v5967_v60 = vld [vmem:[#allocation9 + $0x6f0] sm:$0xf0]  ;;  %v5714_v1 = vor.u32 %v7557_v54, %v5711_v58 }
 0x21f   :  { %4036 = vmatpush.bf16.msra.mxu2 %v5842_v2  ;;  %4012 = vmatpush.bf16.msra.mxu0 %v5266_v10  ;;  %v7413_v63 = vld [vmem:[#allocation9 + $0x54] sm:$0xf]  ;;  %v5970_v2 = vor.u32 %v7621_v59, %v5967_v60 }
 0x220   :  { %4005 = vmatmul.bf16.vlgmr.msrb.gmra.mxu3 %v8317_v57  ;;  %v5135_v0 = vld [vmem:[#allocation9 + $0x70] sm:$0xf0] }
 0x221   :  { %4049 = vmatpush.bf16.msra.mxu3 %v6098_v3  ;;  %4025 = vmatpush.bf16.msra.mxu1 %v5522_v11  ;;  %v7477_v3 = vld [vmem:[#allocation9 + $0x254] sm:$0xf]  ;;  %v3786_v11 = vadd.f32 %v3785_v6, %v3773_v35  ;;  %v5138_v12 = vor.u32 %v7413_v63, %v5135_v0 }
 0x222   :  { %v5391_v4 = vld [vmem:[#allocation9 + $0x270] sm:$0xf0] }
 0x223   :  { %4037 = vmatpush.bf16.msra.mxu2 %v5810_v16  ;;  %4013 = vmatpush.bf16.msra.mxu0 %v5234_v43  ;;  %v7549_v5 = vld [vmem:[#allocation9 + $0x494] sm:$0xf]  ;;  %v5394_v15 = vor.u32 %v7477_v3, %v5391_v4  ;;  %v8369_v19 = vadd.f32 %v3798_v7, %v3786_v11 }
 0x224   :  { %v5679_v8 = vld [vmem:[#allocation9 + $0x4b0] sm:$0xf0] }
 0x225   :  { %4050 = vmatpush.bf16.msra.mxu3 %v6066_v17  ;;  %4026 = vmatpush.bf16.msra.mxu1 %v5490_v32  ;;  %v7613_v9 = vld [vmem:[#allocation9 + $0x694] sm:$0xf]  ;;  %v5682_v20 = vor.u32 %v7549_v5, %v5679_v8  ;;  %v8373_v8 = vld [vmem:[#allocation11] sm:$0xff] }
 0x226   :  { %v5935_v10 = vld [vmem:[#allocation9 + $0x6b0] sm:$0xf0] }
 0x227   :  { %4038 = vmatpush.bf16.msra.mxu2 %v5778_v36  ;;  %4014 = vmatpush.bf16.msra.mxu0 %v5202_v21  ;;  %v7405_v16 = vld [vmem:[#allocation9 + $0x14] sm:$0xf]  ;;  %v5938_v22 = vor.u32 %v7613_v9, %v5935_v10  ;;  %v3787_v21 = vpop.f32.mrf.mxu2  ;;  %v889_v9 = vperm.slane %v8373_v8, 3 }
 0x228   :  { %v5103_v17 = vld [vmem:[#allocation9 + $0x30] sm:$0xf0] }
 0x229   :  { %4051 = vmatpush.bf16.msra.mxu3 %v6034_v37  ;;  %4027 = vmatpush.bf16.msra.mxu1 %v5458_v47  ;;  %v7469_v18 = vld [vmem:[#allocation9 + $0x214] sm:$0xf]  ;;  %v5106_v35 = vor.u32 %v7405_v16, %v5103_v17  ;;  %v3800_v47 = vpop.f32.mrf.mxu3 }
 0x22a   :  { %v5359_v24 = vld [vmem:[#allocation9 + $0x230] sm:$0xf0] }
 0x22b   :  { %4039 = vmatpush.bf16.msra.mxu2 %v5746_v50  ;;  %4015 = vmatpush.bf16.msra.mxu0 %v5170_v61  ;;  %v7717_v27 = vld [vmem:[#allocation9 + $0x9d4] sm:$0xf]  ;;  %v5362_v36 = vor.u32 %v7469_v18, %v5359_v24  ;;  %v3811_v24 = vpop.f32.mrf.mxu0 }
 0x22c   :  { %v6351_v28 = vld [vmem:[#allocation9 + $0x9f0] sm:$0xf0] }
 0x22d   :  { %4052 = vmatpush.bf16.msra.mxu3 %v6002_v51  ;;  %4028 = vmatpush.bf16.msra.mxu1 %v5426_v62  ;;  %v7781_v29 = vld [vmem:[#allocation9 + $0xbd4] sm:$0xf]  ;;  %v6354_v37 = vor.u32 %v7717_v27, %v6351_v28  ;;  %v3824_v27 = vpop.f32.mrf.mxu1 }
 0x22e   :  { %v6607_v31 = vld [vmem:[#allocation9 + $0xbf0] sm:$0xf0] }
 0x22f   :  { %4040 = vmatpush.bf16.msra.mxu2 %v5714_v1  ;;  %v7541_v43 = vld [vmem:[#allocation9 + $0x454] sm:$0xf]  ;;  %4016 = vmatpush.bf16.msra.mxu0 %v5138_v12  ;;  %v6610_v38 = vor.u32 %v7781_v29, %v6607_v31 }
 0x230   :  { %v5647_v32 = vld [vmem:[#allocation9 + $0x470] sm:$0xf0] }
 0x231   :  { %4053 = vmatpush.bf16.msra.mxu3 %v5970_v2  ;;  %v7605_v33 = vld [vmem:[#allocation9 + $0x654] sm:$0xf]  ;;  %4029 = vmatpush.bf16.msra.mxu1 %v5394_v15  ;;  %v5650_v30 = vor.u32 %v7541_v43, %v5647_v32  ;;  %v3812_v43 = vadd.f32 %v3811_v24, %v889_v9  ;;  %v3850_v9 = vpop.f32.mrf.mxu3 }
 0x232   :  { %v5903_v34 = vld [vmem:[#allocation9 + $0x670] sm:$0xf0] }
 0x233   :  { %4041 = vmatpush.bf16.msra.mxu2 %v5682_v20  ;;  %v7709_v40 = vld [vmem:[#allocation9 + $0x994] sm:$0xf]  ;;  %v5906_v46 = vor.u32 %v7605_v33, %v5903_v34  ;;  %4017 = vmatpush.bf16.msra.mxu0 %v5106_v35 }
 0x234   :  { %v6319_v41 = vld [vmem:[#allocation9 + $0x9b0] sm:$0xf0] }
 0x235   :  { %4054 = vmatpush.bf16.msra.mxu3 %v5938_v22  ;;  %v7773_v42 = vld [vmem:[#allocation9 + $0xb94] sm:$0xf]  ;;  %4030 = vmatpush.bf16.msra.mxu1 %v5362_v36  ;;  %v6322_v58 = vor.u32 %v7709_v40, %v6319_v41  ;;  %v3825_v36 = vadd.f32 %v3824_v27, %v3812_v43  ;;  %v7466_v43 = vld [vmem:[#allocation9 + $0x1f4] sm:$0xf0] }
 0x236   :  { %v6575_v48 = vld [vmem:[#allocation9 + $0xbb0] sm:$0xf0]  ;;  %4018 = vmatmul.bf16.vlgmr.msra.gmra.mxu0 %v8293_v13 }
 0x237   :  { %v7533_v49 = vld [vmem:[#allocation9 + $0x414] sm:$0xf]  ;;  %4062 = vmatpush.bf16.msrb.mxu0 %v6354_v37  ;;  %v6578_v59 = vor.u32 %v7773_v42, %v6575_v48  ;;  %4042 = vmatpush.bf16.msra.mxu2 %v5650_v30 }
 0x238   :  { %v5615_v50 = vld [vmem:[#allocation9 + $0x430] sm:$0xf0]  ;;  %4031 = vmatmul.bf16.vlgmr.msra.gmra.mxu1 %v8295_v14 }
 0x239   :  { %v7597_v51 = vld [vmem:[#allocation9 + $0x614] sm:$0xf]  ;;  %4075 = vmatpush.bf16.msrb.mxu1 %v6610_v38  ;;  %4055 = vmatpush.bf16.msra.mxu3 %v5906_v46  ;;  %v5618_v60 = vor.u32 %v7533_v49, %v5615_v50 }
 0x23a   :  { %v5871_v52 = vld [vmem:[#allocation9 + $0x630] sm:$0xf0] }
 0x23b   :  { %v7845_v53 = vld [vmem:[#allocation9 + $0xdd4] sm:$0xf]  ;;  %v5874_v61 = vor.u32 %v7597_v51, %v5871_v52  ;;  %4063 = vmatpush.bf16.msrb.mxu0 %v6322_v58  ;;  %4043 = vmatpush.bf16.msra.mxu2 %v5618_v60  ;;  %v3826_v58 = vpop.f32.mrf.mxu1 }
 0x23c   :  { %v6863_v54 = vld [vmem:[#allocation9 + $0xdf0] sm:$0xf0]  ;;  %v7594_v58 = vld [vmem:[#allocation9 + $0x5f4] sm:$0xf0] }
 0x23d   :  { %v7909_v23 = vld [vmem:[#allocation9 + $0xfd4] sm:$0xf]  ;;  %v6866_v0 = vor.u32 %v7845_v53, %v6863_v54  ;;  %4076 = vmatpush.bf16.msrb.mxu1 %v6578_v59  ;;  %4056 = vmatpush.bf16.msra.mxu3 %v5874_v61 }
 0x23e   :  { %v7119_v55 = vld [vmem:[#allocation9 + $0xff0] sm:$0xf0]  ;;  %4044 = vmatmul.bf16.vlgmr.msra.gmra.mxu2 %v8301_v44 }
 0x23f   :  { %v7701_v62 = vld [vmem:[#allocation9 + $0x954] sm:$0xf]  ;;  %v7122_v1 = vor.u32 %v7909_v23, %v7119_v55  ;;  %4088 = vmatpush.bf16.msrb.mxu2 %v6866_v0  ;;  %v3813_v55 = vpop.f32.mrf.mxu0 }
 0x240   :  { %v6287_v63 = vld [vmem:[#allocation9 + $0x970] sm:$0xf0]  ;;  %4057 = vmatmul.bf16.vlgmr.msra.gmra.mxu3 %v8303_v45  ;;  %v5845_v55 = vld [vmem:[#allocation9 + $0x5d8] sm:$0xf] }
 0x241   :  { %v7765_v2 = vld [vmem:[#allocation9 + $0xb54] sm:$0xf]  ;;  %v6290_v10 = vor.u32 %v7701_v62, %v6287_v63  ;;  %4101 = vmatpush.bf16.msrb.mxu3 %v7122_v1 }
 0x242   :  { %v6543_v3 = vld [vmem:[#allocation9 + $0xb70] sm:$0xf0] }
 0x243   :  { %v7837_v4 = vld [vmem:[#allocation9 + $0xd94] sm:$0xf]  ;;  %v6546_v11 = vor.u32 %v7765_v2, %v6543_v3  ;;  %4064 = vmatpush.bf16.msrb.mxu0 %v6290_v10 }
 0x244   :  { %v6831_v5 = vld [vmem:[#allocation9 + $0xdb0] sm:$0xf0] }
 0x245   :  { %v7901_v6 = vld [vmem:[#allocation9 + $0xf94] sm:$0xf]  ;;  %v6834_v16 = vor.u32 %v7837_v4, %v6831_v5  ;;  %4077 = vmatpush.bf16.msrb.mxu1 %v6546_v11 }
 0x246   :  { %v7087_v7 = vld [vmem:[#allocation9 + $0xfb0] sm:$0xf0] }
 0x247   :  { %v7693_v12 = vld [vmem:[#allocation9 + $0x914] sm:$0xf]  ;;  %v7090_v17 = vor.u32 %v7901_v6, %v7087_v7  ;;  %4089 = vmatpush.bf16.msrb.mxu2 %v6834_v16  ;;  %v3837_v7 = vpop.f32.mrf.mxu2 }
 0x248   :  { %v6255_v15 = vld [vmem:[#allocation9 + $0x930] sm:$0xf0] }
 0x249   :  { %v7757_v18 = vld [vmem:[#allocation9 + $0xb14] sm:$0xf]  ;;  %v6258_v32 = vor.u32 %v7693_v12, %v6255_v15  ;;  %4102 = vmatpush.bf16.msrb.mxu3 %v7090_v17  ;;  %v3838_v15 = vadd.f32 %v3837_v7, %v3825_v36  ;;  %v5813_v7 = vld [vmem:[#allocation9 + $0x598] sm:$0xf] }
 0x24a   :  { %v6511_v20 = vld [vmem:[#allocation9 + $0xb30] sm:$0xf0] }
 0x24b   :  { %v7829_v22 = vld [vmem:[#allocation9 + $0xd54] sm:$0xf]  ;;  %v6514_v33 = vor.u32 %v7757_v18, %v6511_v20  ;;  %4065 = vmatpush.bf16.msrb.mxu0 %v6258_v32  ;;  %v8378_v24 = vadd.f32 %v3850_v9, %v3838_v15  ;;  %v5589_v32 = vld [vmem:[#allocation9 + $0x3d8] sm:$0xf] }
 0x24c   :  { %v6799_v28 = vld [vmem:[#allocation9 + $0xd70] sm:$0xf0]  ;;  %v7586_v9 = vld [vmem:[#allocation9 + $0x5b4] sm:$0xf0] }
 0x24d   :  { %v7893_v29 = vld [vmem:[#allocation9 + $0xf54] sm:$0xf]  ;;  %v6802_v37 = vor.u32 %v7829_v22, %v6799_v28  ;;  %4078 = vmatpush.bf16.msrb.mxu1 %v6514_v33  ;;  %v7530_v33 = vld [vmem:[#allocation9 + $0x3f4] sm:$0xf0] }
 0x24e   :  { %v7055_v31 = vld [vmem:[#allocation9 + $0xf70] sm:$0xf0] }
 0x24f   :  { %v7685_v34 = vld [vmem:[#allocation9 + $0x8d4] sm:$0xf]  ;;  %v7058_v38 = vor.u32 %v7893_v29, %v7055_v31  ;;  %4090 = vmatpush.bf16.msrb.mxu2 %v6802_v37  ;;  %v5333_v31 = vld [vmem:[#allocation9 + $0x1d8] sm:$0xf] }
 0x250   :  { %v6223_v35 = vld [vmem:[#allocation9 + $0x8f0] sm:$0xf0] }
 0x251   :  { %v7749_v40 = vld [vmem:[#allocation9 + $0xad4] sm:$0xf]  ;;  %v6226_v47 = vor.u32 %v7685_v34, %v6223_v35  ;;  %4103 = vmatpush.bf16.msrb.mxu3 %v7058_v38 }
 0x252   :  { %v6479_v41 = vld [vmem:[#allocation9 + $0xaf0] sm:$0xf0] }
 0x253   :  { %v7821_v42 = vld [vmem:[#allocation9 + $0xd14] sm:$0xf]  ;;  %v6482_v48 = vor.u32 %v7749_v40, %v6479_v41  ;;  %4066 = vmatpush.bf16.msrb.mxu0 %v6226_v47  ;;  %v5334_v41 = vor.u32 %v7466_v43, %v5333_v31  ;;  %v3876_v31 = vpop.f32.mrf.mxu1  ;;  %v7578_v43 = vld [vmem:[#allocation9 + $0x574] sm:$0xf0] }
 0x254   :  { %v6767_v30 = vld [vmem:[#allocation9 + $0xd30] sm:$0xf0] }
 0x255   :  { %v7885_v46 = vld [vmem:[#allocation9 + $0xf14] sm:$0xf]  ;;  %v6770_v51 = vor.u32 %v7821_v42, %v6767_v30  ;;  %4079 = vmatpush.bf16.msrb.mxu1 %v6482_v48  ;;  %v5590_v42 = vor.u32 %v7530_v33, %v5589_v32  ;;  %v5301_v30 = vld [vmem:[#allocation9 + $0x198] sm:$0xf] }
 0x256   :  { %v7023_v21 = vld [vmem:[#allocation9 + $0xf30] sm:$0xf0]  ;;  %v6037_v32 = vld [vmem:[#allocation9 + $0x758] sm:$0xf] }
 0x257   :  { %v7677_v49 = vld [vmem:[#allocation9 + $0x894] sm:$0xf]  ;;  %v7026_v52 = vor.u32 %v7885_v46, %v7023_v21  ;;  %4091 = vmatpush.bf16.msrb.mxu2 %v6770_v51  ;;  %v7458_v46 = vld [vmem:[#allocation9 + $0x1b4] sm:$0xf0] }
 0x258   :  { %v6191_v50 = vld [vmem:[#allocation9 + $0x8b0] sm:$0xf0]  ;;  %v5557_v21 = vld [vmem:[#allocation9 + $0x398] sm:$0xf] }
 0x259   :  { %v7741_v53 = vld [vmem:[#allocation9 + $0xa94] sm:$0xf]  ;;  %v6194_v62 = vor.u32 %v7677_v49, %v6191_v50  ;;  %4104 = vmatpush.bf16.msrb.mxu3 %v7026_v52  ;;  %v3839_v49 = vpop.f32.mrf.mxu2  ;;  %v3852_v50 = vpop.f32.mrf.mxu3  ;;  %v7522_v51 = vld [vmem:[#allocation9 + $0x3b4] sm:$0xf0] }
 0x25a   :  { %v6447_v54 = vld [vmem:[#allocation9 + $0xab0] sm:$0xf0]  ;;  %v7642_v33 = vld [vmem:[#allocation9 + $0x774] sm:$0xf0] }
 0x25b   :  { %v7813_v23 = vld [vmem:[#allocation9 + $0xcd4] sm:$0xf]  ;;  %v6450_v63 = vor.u32 %v7741_v53, %v6447_v54  ;;  %4067 = vmatpush.bf16.msrb.mxu0 %v6194_v62  ;;  %v5558_v62 = vor.u32 %v7522_v51, %v5557_v21  ;;  %v5749_v21 = vld [vmem:[#allocation9 + $0x518] sm:$0xf] }
 0x25c   :  { %v6735_v59 = vld [vmem:[#allocation9 + $0xcf0] sm:$0xf0]  ;;  %v7634_v49 = vld [vmem:[#allocation9 + $0x734] sm:$0xf0] }
 0x25d   :  { %v7877_v60 = vld [vmem:[#allocation9 + $0xed4] sm:$0xf]  ;;  %v6738_v2 = vor.u32 %v7813_v23, %v6735_v59  ;;  %4080 = vmatpush.bf16.msrb.mxu1 %v6450_v63  ;;  %v6101_v59 = vld [vmem:[#allocation9 + $0x7d8] sm:$0xf] }
 0x25e   :  { %v6991_v61 = vld [vmem:[#allocation9 + $0xef0] sm:$0xf0]  ;;  %v5173_v51 = vld [vmem:[#allocation9 + $0x98] sm:$0xf] }
 0x25f   :  { %v7669_v0 = vld [vmem:[#allocation9 + $0x854] sm:$0xf]  ;;  %v6994_v3 = vor.u32 %v7877_v60, %v6991_v61  ;;  %4092 = vmatpush.bf16.msrb.mxu2 %v6738_v2  ;;  %v7658_v60 = vld [vmem:[#allocation9 + $0x7f4] sm:$0xf0]  ;;  %v5302_v61 = vor.u32 %v7458_v46, %v5301_v30 }
 0x260   :  { %v6159_v1 = vld [vmem:[#allocation9 + $0x870] sm:$0xf0]  ;;  %v7450_v2 = vld [vmem:[#allocation9 + $0x174] sm:$0xf0] }
 0x261   :  { %v7733_v4 = vld [vmem:[#allocation9 + $0xa54] sm:$0xf]  ;;  %v6162_v16 = vor.u32 %v7669_v0, %v6159_v1  ;;  %4105 = vmatpush.bf16.msrb.mxu3 %v6994_v3  ;;  %v5269_v1 = vld [vmem:[#allocation9 + $0x158] sm:$0xf]  ;;  %v5846_v3 = vor.u32 %v7594_v58, %v5845_v55 }
 0x262   :  { %v6415_v5 = vld [vmem:[#allocation9 + $0xa70] sm:$0xf0]  ;;  %v5461_v30 = vld [vmem:[#allocation9 + $0x2d8] sm:$0xf] }
 0x263   :  { %v7805_v6 = vld [vmem:[#allocation9 + $0xc94] sm:$0xf]  ;;  %v6418_v17 = vor.u32 %v7733_v4, %v6415_v5  ;;  %4068 = vmatpush.bf16.msrb.mxu0 %v6162_v16  ;;  %v6102_v4 = vor.u32 %v7658_v60, %v6101_v59  ;;  %v5525_v5 = vld [vmem:[#allocation9 + $0x358] sm:$0xf]  ;;  %v3878_v60 = vpop.f32.mrf.mxu1 }
 0x264   :  { %v6703_v10 = vld [vmem:[#allocation9 + $0xcb0] sm:$0xf0]  ;;  %v5237_v16 = vld [vmem:[#allocation9 + $0x118] sm:$0xf] }
 0x265   :  { %v7869_v11 = vld [vmem:[#allocation9 + $0xe94] sm:$0xf]  ;;  %v6706_v27 = vor.u32 %v7805_v6, %v6703_v10  ;;  %4081 = vmatpush.bf16.msrb.mxu1 %v6418_v17  ;;  %v7514_v6 = vld [vmem:[#allocation9 + $0x374] sm:$0xf0] }
 0x266   :  { %v6959_v12 = vld [vmem:[#allocation9 + $0xeb0] sm:$0xf0]  ;;  %v6069_v10 = vld [vmem:[#allocation9 + $0x798] sm:$0xf]  ;;  %v5526_v15 = vor.u32 %v7514_v6, %v5525_v5 }
 0x267   :  { %v7661_v18 = vld [vmem:[#allocation9 + $0x814] sm:$0xf]  ;;  %v6962_v28 = vor.u32 %v7869_v11, %v6959_v12  ;;  %4093 = vmatpush.bf16.msrb.mxu2 %v6706_v27  ;;  %v7650_v11 = vld [vmem:[#allocation9 + $0x7b4] sm:$0xf0]  ;;  %v5270_v12 = vor.u32 %v7450_v2, %v5269_v1 }
 0x268   :  { %v6127_v20 = vld [vmem:[#allocation9 + $0x830] sm:$0xf0]  ;;  %v7442_v17 = vld [vmem:[#allocation9 + $0x134] sm:$0xf0] }
 0x269   :  { %v7725_v22 = vld [vmem:[#allocation9 + $0xa14] sm:$0xf]  ;;  %v6130_v38 = vor.u32 %v7661_v18, %v6127_v20  ;;  %4106 = vmatpush.bf16.msrb.mxu3 %v6962_v28  ;;  %v5814_v18 = vor.u32 %v7586_v9, %v5813_v7  ;;  %v6070_v20 = vor.u32 %v7650_v11, %v6069_v10  ;;  %v7506_v27 = vld [vmem:[#allocation9 + $0x334] sm:$0xf0]  ;;  %v3889_v10 = vpop.f32.mrf.mxu2  ;;  %v3902_v11 = vpop.f32.mrf.mxu3 }
 0x26a   :  { %v6383_v29 = vld [vmem:[#allocation9 + $0xa30] sm:$0xf0]  ;;  %v5781_v28 = vld [vmem:[#allocation9 + $0x558] sm:$0xf] }
 0x26b   :  { %v7797_v34 = vld [vmem:[#allocation9 + $0xc54] sm:$0xf]  ;;  %v6386_v40 = vor.u32 %v7725_v22, %v6383_v29  ;;  %4069 = vmatpush.bf16.msrb.mxu0 %v6130_v38  ;;  %v5493_v22 = vld [vmem:[#allocation9 + $0x318] sm:$0xf]  ;;  %v3863_v29 = vpop.f32.mrf.mxu0 }
 0x26c   :  { %v6671_v35 = vld [vmem:[#allocation9 + $0xc70] sm:$0xf0]  ;;  %v7434_v38 = vld [vmem:[#allocation9 + $0xf4] sm:$0xf0] }
 0x26d   :  { %v7861_v36 = vld [vmem:[#allocation9 + $0xe54] sm:$0xf]  ;;  %v6674_v47 = vor.u32 %v7797_v34, %v6671_v35  ;;  %4082 = vmatpush.bf16.msrb.mxu1 %v6386_v40  ;;  %v3864_v34 = vadd.f32 %v3863_v29, %v8378_v24  ;;  %v5238_v35 = vor.u32 %v7442_v17, %v5237_v16  ;;  %v7498_v46 = vld [vmem:[#allocation9 + $0x2f4] sm:$0xf0] }
 0x26e   :  { %v6927_v37 = vld [vmem:[#allocation9 + $0xe70] sm:$0xf0]  ;;  %4070 = vmatmul.bf16.vlgmr.msrb.gmra.mxu0 %v8309_v25  ;;  %v5462_v50 = vor.u32 %v7498_v46, %v5461_v30  ;;  %v7490_v55 = vld [vmem:[#allocation9 + $0x2b4] sm:$0xf0] }
 0x26f   :  { %v6930_v48 = vor.u32 %v7861_v36, %v6927_v37  ;;  %v7789_v52 = vld [vmem:[#allocation9 + $0xc14] sm:$0xf]  ;;  %4114 = vmatpush.bf16.msra.mxu0 %v5334_v41  ;;  %4094 = vmatpush.bf16.msrb.mxu2 %v6674_v47  ;;  %v5494_v36 = vor.u32 %v7506_v27, %v5493_v22  ;;  %v5205_v37 = vld [vmem:[#allocation9 + $0xd8] sm:$0xf]  ;;  %v3877_v40 = vadd.f32 %v3876_v31, %v3864_v34 }
 0x270   :  { %v6639_v53 = vld [vmem:[#allocation9 + $0xc30] sm:$0xf0]  ;;  %4083 = vmatmul.bf16.vlgmr.msrb.gmra.mxu1 %v8311_v26  ;;  %v5782_v41 = vor.u32 %v7578_v43, %v5781_v28  ;;  %v7570_v47 = vld [vmem:[#allocation9 + $0x534] sm:$0xf0]  ;;  %v5206_v24 = vor.u32 %v7434_v38, %v5205_v37 }
 0x271   :  { %v7853_v54 = vld [vmem:[#allocation9 + $0xe14] sm:$0xf]  ;;  %4127 = vmatpush.bf16.msra.mxu1 %v5590_v42  ;;  %4107 = vmatpush.bf16.msrb.mxu3 %v6930_v48  ;;  %v6642_v63 = vor.u32 %v7789_v52, %v6639_v53  ;;  %v6038_v42 = vor.u32 %v7642_v33, %v6037_v32  ;;  %v6005_v48 = vld [vmem:[#allocation9 + $0x718] sm:$0xf]  ;;  %v5750_v53 = vor.u32 %v7570_v47, %v5749_v21 }
 0x272   :  { %v6895_v23 = vld [vmem:[#allocation9 + $0xe30] sm:$0xf0]  ;;  %v7426_v52 = vld [vmem:[#allocation9 + $0xb4] sm:$0xf0]  ;;  %v3890_v17 = vadd.f32 %v3889_v10, %v3877_v40  ;;  %v4324_v40 = vmax.f32 %v8369_v19, 0.0  ;;  %v3904_v19 = vpop.f32.mrf.mxu3 }
 0x273   :  { %v6898_v0 = vor.u32 %v7853_v54, %v6895_v23  ;;  %4115 = vmatpush.bf16.msra.mxu0 %v5302_v61  ;;  %4095 = vmatpush.bf16.msrb.mxu2 %v6642_v63  ;;  %v6006_v54 = vor.u32 %v7634_v49, %v6005_v48  ;;  %v5429_v23 = vld [vmem:[#allocation9 + $0x298] sm:$0xf]  ;;  %v3865_v59 = vpop.f32.mrf.mxu0 }
 0x274   :  { %v5717_v58 = vld [vmem:[#allocation9 + $0x4d8] sm:$0xf]  ;;  %v5430_v1 = vor.u32 %v7490_v55, %v5429_v23  ;;  %v3903_v31 = vadd.f32 %v3902_v11, %v3890_v17 }
 0x275   :  { %4128 = vmatpush.bf16.msra.mxu1 %v5558_v62  ;;  %4108 = vmatpush.bf16.msrb.mxu3 %v6898_v0  ;;  %v7562_v61 = vld [vmem:[#allocation9 + $0x4f4] sm:$0xf0]  ;;  %v5174_v0 = vor.u32 %v7426_v52, %v5173_v51 }
 0x276   :  { %4096 = vmatmul.bf16.vlgmr.msrb.gmra.mxu2 %v8315_v56  ;;  %v5973_v62 = vld [vmem:[#allocation9 + $0x6d8] sm:$0xf] }
 0x277   :  { %4140 = vmatpush.bf16.msra.mxu2 %v5846_v3  ;;  %4116 = vmatpush.bf16.msra.mxu0 %v5270_v12  ;;  %v7626_v63 = vld [vmem:[#allocation9 + $0x6f4] sm:$0xf0] }
 0x278   :  { %4109 = vmatmul.bf16.vlgmr.msrb.gmra.mxu3 %v8317_v57  ;;  %v5141_v2 = vld [vmem:[#allocation9 + $0x58] sm:$0xf]  ;;  %v5974_v5 = vor.u32 %v7626_v63, %v5973_v62 }
 0x279   :  { %4153 = vmatpush.bf16.msra.mxu3 %v6102_v4  ;;  %4129 = vmatpush.bf16.msra.mxu1 %v5526_v15  ;;  %v7418_v3 = vld [vmem:[#allocation9 + $0x74] sm:$0xf0]  ;;  %v5718_v4 = vor.u32 %v7562_v61, %v5717_v58 }
 0x27a   :  { %v5397_v6 = vld [vmem:[#allocation9 + $0x258] sm:$0xf] }
 0x27b   :  { %4141 = vmatpush.bf16.msra.mxu2 %v5814_v18  ;;  %4117 = vmatpush.bf16.msra.mxu0 %v5238_v35  ;;  %v7482_v7 = vld [vmem:[#allocation9 + $0x274] sm:$0xf0] }
 0x27c   :  { %v5685_v9 = vld [vmem:[#allocation9 + $0x498] sm:$0xf]  ;;  %v5398_v22 = vor.u32 %v7482_v7, %v5397_v6 }
 0x27d   :  { %4154 = vmatpush.bf16.msra.mxu3 %v6070_v20  ;;  %4130 = vmatpush.bf16.msra.mxu1 %v5494_v36  ;;  %v7554_v12 = vld [vmem:[#allocation9 + $0x4b4] sm:$0xf0]  ;;  %v5142_v20 = vor.u32 %v7418_v3, %v5141_v2 }
 0x27e   :  { %v5941_v15 = vld [vmem:[#allocation9 + $0x698] sm:$0xf]  ;;  %v5686_v43 = vor.u32 %v7554_v12, %v5685_v9 }
 0x27f   :  { %4142 = vmatpush.bf16.msra.mxu2 %v5782_v41  ;;  %4118 = vmatpush.bf16.msra.mxu0 %v5206_v24  ;;  %v7618_v16 = vld [vmem:[#allocation9 + $0x6b4] sm:$0xf0]  ;;  %v4325_v41 = vmax.f32 %v3903_v31, 0.0 }
 0x280   :  { %v5109_v18 = vld [vmem:[#allocation9 + $0x18] sm:$0xf]  ;;  %v5942_v32 = vor.u32 %v7618_v16, %v5941_v15 }
 0x281   :  { %4155 = vmatpush.bf16.msra.mxu3 %v6038_v42  ;;  %4131 = vmatpush.bf16.msra.mxu1 %v5462_v50  ;;  %v7410_v27 = vld [vmem:[#allocation9 + $0x34] sm:$0xf0]  ;;  %v8386_v47 = vpack.c.bf16 %v4325_v41, %v4324_v40 }
 0x282   :  { %v5365_v28 = vld [vmem:[#allocation9 + $0x218] sm:$0xf]  ;;  %v5110_v46 = vor.u32 %v7410_v27, %v5109_v18  ;;  %v890_v18 = vperm.slane %v8373_v8, 4 }
 0x283   :  { %4143 = vmatpush.bf16.msra.mxu2 %v5750_v53  ;;  %4119 = vmatpush.bf16.msra.mxu0 %v5174_v0  ;;  %v7474_v29 = vld [vmem:[#allocation9 + $0x234] sm:$0xf0] }
 0x284   :  { %v6357_v33 = vld [vmem:[#allocation9 + $0x9d8] sm:$0xf]  ;;  %v5366_v21 = vor.u32 %v7474_v29, %v5365_v28 }
 0x285   :  { %4156 = vmatpush.bf16.msra.mxu3 %v6006_v54  ;;  %4132 = vmatpush.bf16.msra.mxu1 %v5430_v1  ;;  %v7722_v34 = vld [vmem:[#allocation9 + $0x9f4] sm:$0xf0]  ;;  %v3891_v54 = vpop.f32.mrf.mxu2 }
 0x286   :  { %v6613_v35 = vld [vmem:[#allocation9 + $0xbd8] sm:$0xf]  ;;  %v6358_v48 = vor.u32 %v7722_v34, %v6357_v33  ;;  %v3915_v34 = vpop.f32.mrf.mxu0 }
 0x287   :  { %4144 = vmatpush.bf16.msra.mxu2 %v5718_v4  ;;  %v7786_v36 = vld [vmem:[#allocation9 + $0xbf4] sm:$0xf0]  ;;  %4120 = vmatpush.bf16.msra.mxu0 %v5142_v20  ;;  %v3916_v8 = vadd.f32 %v3915_v34, %v890_v18 }
 0x288   :  { %v5653_v37 = vld [vmem:[#allocation9 + $0x458] sm:$0xf]  ;;  %v6614_v49 = vor.u32 %v7786_v36, %v6613_v35  ;;  %v3928_v35 = vpop.f32.mrf.mxu1 }
 0x289   :  { %4157 = vmatpush.bf16.msra.mxu3 %v5974_v5  ;;  %v7546_v38 = vld [vmem:[#allocation9 + $0x474] sm:$0xf0]  ;;  %4133 = vmatpush.bf16.msra.mxu1 %v5398_v22 }
 0x28a   :  { %v5909_v42 = vld [vmem:[#allocation9 + $0x658] sm:$0xf]  ;;  %v5654_v52 = vor.u32 %v7546_v38, %v5653_v37 }
 0x28b   :  { %v7610_v30 = vld [vmem:[#allocation9 + $0x674] sm:$0xf0]  ;;  %4145 = vmatpush.bf16.msra.mxu2 %v5686_v43  ;;  %4121 = vmatpush.bf16.msra.mxu0 %v5110_v46  ;;  %v3929_v46 = vadd.f32 %v3928_v35, %v3916_v8  ;;  %v7526_v8 = vld [vmem:[#allocation9 + $0x3dc] sm:$0xf] }
 0x28c   :  { %v6325_v24 = vld [vmem:[#allocation9 + $0x998] sm:$0xf]  ;;  %v5910_v53 = vor.u32 %v7610_v30, %v5909_v42 }
 0x28d   :  { %4158 = vmatpush.bf16.msra.mxu3 %v5942_v32  ;;  %v7714_v50 = vld [vmem:[#allocation9 + $0x9b4] sm:$0xf0]  ;;  %4134 = vmatpush.bf16.msra.mxu1 %v5366_v21 }
 0x28e   :  { %v6581_v51 = vld [vmem:[#allocation9 + $0xb98] sm:$0xf]  ;;  %v6326_v1 = vor.u32 %v7714_v50, %v6325_v24  ;;  %4122 = vmatmul.bf16.vlgmr.msra.gmra.mxu0 %v8293_v13 }
 0x28f   :  { %v7778_v23 = vld [vmem:[#allocation9 + $0xbb4] sm:$0xf0]  ;;  %4166 = vmatpush.bf16.msrb.mxu0 %v6358_v48  ;;  %4146 = vmatpush.bf16.msra.mxu2 %v5654_v52 }
 0x290   :  { %v5621_v55 = vld [vmem:[#allocation9 + $0x418] sm:$0xf]  ;;  %v6582_v2 = vor.u32 %v7778_v23, %v6581_v51  ;;  %4135 = vmatmul.bf16.vlgmr.msra.gmra.mxu1 %v8295_v14 }
 0x291   :  { %v7538_v58 = vld [vmem:[#allocation9 + $0x434] sm:$0xf0]  ;;  %4179 = vmatpush.bf16.msrb.mxu1 %v6614_v49  ;;  %4159 = vmatpush.bf16.msra.mxu3 %v5910_v53 }
 0x292   :  { %v5877_v59 = vld [vmem:[#allocation9 + $0x618] sm:$0xf]  ;;  %v5622_v3 = vor.u32 %v7538_v58, %v5621_v55 }
 0x293   :  { %v7602_v60 = vld [vmem:[#allocation9 + $0x634] sm:$0xf0]  ;;  %4167 = vmatpush.bf16.msrb.mxu0 %v6326_v1 }
 0x294   :  { %v6869_v61 = vld [vmem:[#allocation9 + $0xdd8] sm:$0xf]  ;;  %v5878_v4 = vor.u32 %v7602_v60, %v5877_v59  ;;  %4147 = vmatpush.bf16.msra.mxu2 %v5622_v3 }
 0x295   :  { %v7850_v62 = vld [vmem:[#allocation9 + $0xdf4] sm:$0xf0]  ;;  %4180 = vmatpush.bf16.msrb.mxu1 %v6582_v2 }
 0x296   :  { %v7125_v63 = vld [vmem:[#allocation9 + $0xfd8] sm:$0xf]  ;;  %v6870_v7 = vor.u32 %v7850_v62, %v6869_v61  ;;  %4160 = vmatpush.bf16.msra.mxu3 %v5878_v4 }
 0x297   :  { %v7914_v0 = vld [vmem:[#allocation9 + $0xff4] sm:$0xf0]  ;;  %4148 = vmatmul.bf16.vlgmr.msra.gmra.mxu2 %v8301_v44 }
 0x298   :  { %v6293_v5 = vld [vmem:[#allocation9 + $0x958] sm:$0xf]  ;;  %v7126_v9 = vor.u32 %v7914_v0, %v7125_v63  ;;  %4192 = vmatpush.bf16.msrb.mxu2 %v6870_v7  ;;  %v3917_v63 = vpop.f32.mrf.mxu0  ;;  %v3930_v0 = vpop.f32.mrf.mxu1 }
 0x299   :  { %v7706_v6 = vld [vmem:[#allocation9 + $0x974] sm:$0xf0]  ;;  %4161 = vmatmul.bf16.vlgmr.msra.gmra.mxu3 %v8303_v45  ;;  %v5847_v63 = vld [vmem:[#allocation9 + $0x5f8] sm:$0xf0] }
 0x29a   :  { %v6549_v10 = vld [vmem:[#allocation9 + $0xb58] sm:$0xf]  ;;  %v6294_v20 = vor.u32 %v7706_v6, %v6293_v5  ;;  %4205 = vmatpush.bf16.msrb.mxu3 %v7126_v9  ;;  %v7654_v0 = vld [vmem:[#allocation9 + $0x7dc] sm:$0xf] }
 0x29b   :  { %v7770_v11 = vld [vmem:[#allocation9 + $0xb74] sm:$0xf0] }
 0x29c   :  { %v6837_v12 = vld [vmem:[#allocation9 + $0xd98] sm:$0xf]  ;;  %v6550_v22 = vor.u32 %v7770_v11, %v6549_v10  ;;  %4168 = vmatpush.bf16.msrb.mxu0 %v6294_v20 }
 0x29d   :  { %v7842_v15 = vld [vmem:[#allocation9 + $0xdb4] sm:$0xf0] }
 0x29e   :  { %v7093_v16 = vld [vmem:[#allocation9 + $0xf98] sm:$0xf]  ;;  %v6838_v29 = vor.u32 %v7842_v15, %v6837_v12  ;;  %4181 = vmatpush.bf16.msrb.mxu1 %v6550_v22 }
 0x29f   :  { %v7906_v17 = vld [vmem:[#allocation9 + $0xfb4] sm:$0xf0] }
 0x2a0   :  { %v6261_v27 = vld [vmem:[#allocation9 + $0x918] sm:$0xf]  ;;  %v7094_v31 = vor.u32 %v7906_v17, %v7093_v16  ;;  %4193 = vmatpush.bf16.msrb.mxu2 %v6838_v29  ;;  %v3941_v16 = vpop.f32.mrf.mxu2  ;;  %v3954_v17 = vpop.f32.mrf.mxu3 }
 0x2a1   :  { %v7698_v28 = vld [vmem:[#allocation9 + $0x934] sm:$0xf0] }
 0x2a2   :  { %v6517_v43 = vld [vmem:[#allocation9 + $0xb18] sm:$0xf]  ;;  %v6262_v40 = vor.u32 %v7698_v28, %v6261_v27  ;;  %4206 = vmatpush.bf16.msrb.mxu3 %v7094_v31  ;;  %v3942_v27 = vadd.f32 %v3941_v16, %v3929_v46  ;;  %v5815_v16 = vld [vmem:[#allocation9 + $0x5b8] sm:$0xf0] }
 0x2a3   :  { %v7762_v32 = vld [vmem:[#allocation9 + $0xb34] sm:$0xf0] }
 0x2a4   :  { %v6805_v33 = vld [vmem:[#allocation9 + $0xd58] sm:$0xf]  ;;  %v6518_v41 = vor.u32 %v7762_v32, %v6517_v43  ;;  %4169 = vmatpush.bf16.msrb.mxu0 %v6262_v40  ;;  %v5591_v40 = vld [vmem:[#allocation9 + $0x3f8] sm:$0xf0] }
 0x2a5   :  { %v7834_v36 = vld [vmem:[#allocation9 + $0xd74] sm:$0xf0] }
 0x2a6   :  { %v7061_v37 = vld [vmem:[#allocation9 + $0xf58] sm:$0xf]  ;;  %v6806_v21 = vor.u32 %v7834_v36, %v6805_v33  ;;  %4182 = vmatpush.bf16.msrb.mxu1 %v6518_v41  ;;  %v8393_v33 = vadd.f32 %v3954_v17, %v3942_v27  ;;  %v7646_v17 = vld [vmem:[#allocation9 + $0x79c] sm:$0xf] }
 0x2a7   :  { %v7898_v38 = vld [vmem:[#allocation9 + $0xf74] sm:$0xf0]  ;;  %v7438_v27 = vld [vmem:[#allocation9 + $0x11c] sm:$0xf] }
 0x2a8   :  { %v6229_v42 = vld [vmem:[#allocation9 + $0x8d8] sm:$0xf]  ;;  %v7062_v48 = vor.u32 %v7898_v38, %v7061_v37  ;;  %4194 = vmatpush.bf16.msrb.mxu2 %v6806_v21  ;;  %v7462_v37 = vld [vmem:[#allocation9 + $0x1dc] sm:$0xf] }
 0x2a9   :  { %v7690_v30 = vld [vmem:[#allocation9 + $0x8f4] sm:$0xf0]  ;;  %v5335_v38 = vld [vmem:[#allocation9 + $0x1f8] sm:$0xf0] }
 0x2aa   :  { %v6485_v49 = vld [vmem:[#allocation9 + $0xad8] sm:$0xf]  ;;  %v6230_v54 = vor.u32 %v7690_v30, %v6229_v42  ;;  %4207 = vmatpush.bf16.msrb.mxu3 %v7062_v48 }
 0x2ab   :  { %v7754_v24 = vld [vmem:[#allocation9 + $0xaf4] sm:$0xf0] }
 0x2ac   :  { %v6773_v50 = vld [vmem:[#allocation9 + $0xd18] sm:$0xf]  ;;  %v6486_v19 = vor.u32 %v7754_v24, %v6485_v49  ;;  %4170 = vmatpush.bf16.msrb.mxu0 %v6230_v54  ;;  %v5338_v49 = vor.u32 %v7462_v37, %v5335_v38  ;;  %v5594_v24 = vor.u32 %v7526_v8, %v5591_v40  ;;  %v5783_v37 = vld [vmem:[#allocation9 + $0x578] sm:$0xf0] }
 0x2ad   :  { %v7826_v51 = vld [vmem:[#allocation9 + $0xd34] sm:$0xf0]  ;;  %v7638_v38 = vld [vmem:[#allocation9 + $0x75c] sm:$0xf] }
 0x2ae   :  { %v7029_v52 = vld [vmem:[#allocation9 + $0xf18] sm:$0xf]  ;;  %v6774_v58 = vor.u32 %v7826_v51, %v6773_v50  ;;  %4183 = vmatpush.bf16.msrb.mxu1 %v6486_v19  ;;  %v7454_v50 = vld [vmem:[#allocation9 + $0x19c] sm:$0xf]  ;;  %v3943_v19 = vpop.f32.mrf.mxu2 }
 0x2af   :  { %v7890_v53 = vld [vmem:[#allocation9 + $0xf34] sm:$0xf0]  ;;  %v5303_v51 = vld [vmem:[#allocation9 + $0x1b8] sm:$0xf0] }
 0x2b0   :  { %v6197_v23 = vld [vmem:[#allocation9 + $0x898] sm:$0xf]  ;;  %v7030_v59 = vor.u32 %v7890_v53, %v7029_v52  ;;  %4195 = vmatpush.bf16.msrb.mxu2 %v6774_v58  ;;  %v7518_v52 = vld [vmem:[#allocation9 + $0x39c] sm:$0xf] }
 0x2b1   :  { %v7682_v55 = vld [vmem:[#allocation9 + $0x8b4] sm:$0xf0]  ;;  %v6039_v8 = vld [vmem:[#allocation9 + $0x778] sm:$0xf0] }
 0x2b2   :  { %v6453_v60 = vld [vmem:[#allocation9 + $0xa98] sm:$0xf]  ;;  %v6198_v4 = vor.u32 %v7682_v55, %v6197_v23  ;;  %4208 = vmatpush.bf16.msrb.mxu3 %v7030_v59  ;;  %v3956_v23 = vpop.f32.mrf.mxu3  ;;  %v5559_v55 = vld [vmem:[#allocation9 + $0x3b8] sm:$0xf0] }
 0x2b3   :  { %v7746_v61 = vld [vmem:[#allocation9 + $0xab4] sm:$0xf0]  ;;  %v7422_v23 = vld [vmem:[#allocation9 + $0x9c] sm:$0xf] }
 0x2b4   :  { %v6741_v62 = vld [vmem:[#allocation9 + $0xcd8] sm:$0xf]  ;;  %v6454_v5 = vor.u32 %v7746_v61, %v6453_v60  ;;  %4171 = vmatpush.bf16.msrb.mxu0 %v6198_v4 }
 0x2b5   :  { %v7818_v1 = vld [vmem:[#allocation9 + $0xcf4] sm:$0xf0] }
 0x2b6   :  { %v6997_v2 = vld [vmem:[#allocation9 + $0xed8] sm:$0xf]  ;;  %v6742_v9 = vor.u32 %v7818_v1, %v6741_v62  ;;  %4184 = vmatpush.bf16.msrb.mxu1 %v6454_v5  ;;  %v7590_v62 = vld [vmem:[#allocation9 + $0x5dc] sm:$0xf] }
 0x2b7   :  { %v7882_v3 = vld [vmem:[#allocation9 + $0xef4] sm:$0xf0]  ;;  %v6103_v1 = vld [vmem:[#allocation9 + $0x7f8] sm:$0xf0] }
 0x2b8   :  { %v6165_v6 = vld [vmem:[#allocation9 + $0x858] sm:$0xf]  ;;  %v6998_v10 = vor.u32 %v7882_v3, %v6997_v2  ;;  %4196 = vmatpush.bf16.msrb.mxu2 %v6742_v9  ;;  %v5306_v2 = vor.u32 %v7454_v50, %v5303_v51  ;;  %v5562_v3 = vor.u32 %v7518_v52, %v5559_v55  ;;  %v5850_v9 = vor.u32 %v7590_v62, %v5847_v63  ;;  %v5463_v50 = vld [vmem:[#allocation9 + $0x2f8] sm:$0xf0] }
 0x2b9   :  { %v7674_v7 = vld [vmem:[#allocation9 + $0x874] sm:$0xf0]  ;;  %v7566_v51 = vld [vmem:[#allocation9 + $0x51c] sm:$0xf] }
 0x2ba   :  { %v6421_v11 = vld [vmem:[#allocation9 + $0xa58] sm:$0xf]  ;;  %v6166_v28 = vor.u32 %v7674_v7, %v6165_v6  ;;  %4209 = vmatpush.bf16.msrb.mxu3 %v6998_v10  ;;  %v7446_v6 = vld [vmem:[#allocation9 + $0x15c] sm:$0xf]  ;;  %v6106_v10 = vor.u32 %v7654_v0, %v6103_v1 }
 0x2bb   :  { %v7738_v12 = vld [vmem:[#allocation9 + $0xa74] sm:$0xf0]  ;;  %v5271_v7 = vld [vmem:[#allocation9 + $0x178] sm:$0xf0] }
 0x2bc   :  { %v6709_v15 = vld [vmem:[#allocation9 + $0xc98] sm:$0xf]  ;;  %v6422_v29 = vor.u32 %v7738_v12, %v6421_v11  ;;  %4172 = vmatpush.bf16.msrb.mxu0 %v6166_v28  ;;  %v7510_v11 = vld [vmem:[#allocation9 + $0x35c] sm:$0xf] }
 0x2bd   :  { %v7810_v18 = vld [vmem:[#allocation9 + $0xcb4] sm:$0xf0]  ;;  %v5527_v12 = vld [vmem:[#allocation9 + $0x378] sm:$0xf0] }
 0x2be   :  { %v6965_v20 = vld [vmem:[#allocation9 + $0xe98] sm:$0xf]  ;;  %v6710_v34 = vor.u32 %v7810_v18, %v6709_v15  ;;  %4185 = vmatpush.bf16.msrb.mxu1 %v6422_v29  ;;  %v7582_v15 = vld [vmem:[#allocation9 + $0x59c] sm:$0xf] }
 0x2bf   :  { %v7874_v22 = vld [vmem:[#allocation9 + $0xeb4] sm:$0xf0]  ;;  %v6071_v18 = vld [vmem:[#allocation9 + $0x7b8] sm:$0xf0]  ;;  %v5818_v29 = vor.u32 %v7582_v15, %v5815_v16  ;;  %v3993_v16 = vpop.f32.mrf.mxu2 }
 0x2c0   :  { %v6133_v31 = vld [vmem:[#allocation9 + $0x818] sm:$0xf]  ;;  %v6966_v35 = vor.u32 %v7874_v22, %v6965_v20  ;;  %4197 = vmatpush.bf16.msrb.mxu2 %v6710_v34  ;;  %v5274_v20 = vor.u32 %v7446_v6, %v5271_v7  ;;  %v5530_v22 = vor.u32 %v7510_v11, %v5527_v12  ;;  %v5239_v28 = vld [vmem:[#allocation9 + $0x138] sm:$0xf0] }
 0x2c1   :  { %v7666_v43 = vld [vmem:[#allocation9 + $0x834] sm:$0xf0]  ;;  %v7574_v34 = vld [vmem:[#allocation9 + $0x55c] sm:$0xf] }
 0x2c2   :  { %v6389_v32 = vld [vmem:[#allocation9 + $0xa18] sm:$0xf]  ;;  %v6134_v21 = vor.u32 %v7666_v43, %v6133_v31  ;;  %4210 = vmatpush.bf16.msrb.mxu3 %v6966_v35  ;;  %v6074_v31 = vor.u32 %v7646_v17, %v6071_v18  ;;  %v7502_v43 = vld [vmem:[#allocation9 + $0x31c] sm:$0xf]  ;;  %v3967_v35 = vpop.f32.mrf.mxu0  ;;  %v4006_v17 = vpop.f32.mrf.mxu3 }
 0x2c3   :  { %v7730_v36 = vld [vmem:[#allocation9 + $0xa34] sm:$0xf0]  ;;  %v3968_v40 = vadd.f32 %v3967_v35, %v8393_v33  ;;  %v5751_v52 = vld [vmem:[#allocation9 + $0x538] sm:$0xf0] }
 0x2c4   :  { %v6677_v41 = vld [vmem:[#allocation9 + $0xc58] sm:$0xf]  ;;  %v6390_v48 = vor.u32 %v7730_v36, %v6389_v32  ;;  %4173 = vmatpush.bf16.msrb.mxu0 %v6134_v21  ;;  %v5495_v32 = vld [vmem:[#allocation9 + $0x338] sm:$0xf0]  ;;  %v3980_v36 = vpop.f32.mrf.mxu1 }
 0x2c5   :  { %v7802_v42 = vld [vmem:[#allocation9 + $0xc74] sm:$0xf0]  ;;  %v3981_v21 = vadd.f32 %v3980_v36, %v3968_v40  ;;  %v5175_v55 = vld [vmem:[#allocation9 + $0xb8] sm:$0xf0] }
 0x2c6   :  { %v6933_v30 = vld [vmem:[#allocation9 + $0xe58] sm:$0xf]  ;;  %v6678_v53 = vor.u32 %v7802_v42, %v6677_v41  ;;  %4186 = vmatpush.bf16.msrb.mxu1 %v6390_v48  ;;  %v5242_v41 = vor.u32 %v7438_v27, %v5239_v28  ;;  %v5498_v42 = vor.u32 %v7502_v43, %v5495_v32  ;;  %v5786_v48 = vor.u32 %v7574_v34, %v5783_v37  ;;  %v7558_v62 = vld [vmem:[#allocation9 + $0x4dc] sm:$0xf] }
 0x2c7   :  { %v7866_v46 = vld [vmem:[#allocation9 + $0xe74] sm:$0xf0]  ;;  %4174 = vmatmul.bf16.vlgmr.msrb.gmra.mxu0 %v8309_v25  ;;  %v5719_v1 = vld [vmem:[#allocation9 + $0x4f8] sm:$0xf0]  ;;  %v3994_v27 = vadd.f32 %v3993_v16, %v3981_v21 }
 0x2c8   :  { %v6934_v54 = vor.u32 %v7866_v46, %v6933_v30  ;;  %v6645_v58 = vld [vmem:[#allocation9 + $0xc18] sm:$0xf]  ;;  %4218 = vmatpush.bf16.msra.mxu0 %v5338_v49  ;;  %4198 = vmatpush.bf16.msrb.mxu2 %v6678_v53  ;;  %v7430_v30 = vld [vmem:[#allocation9 + $0xdc] sm:$0xf]  ;;  %v6042_v49 = vor.u32 %v7638_v38, %v6039_v8 }
 0x2c9   :  { %v7794_v59 = vld [vmem:[#allocation9 + $0xc34] sm:$0xf0]  ;;  %4187 = vmatmul.bf16.vlgmr.msrb.gmra.mxu1 %v8311_v26  ;;  %v5207_v46 = vld [vmem:[#allocation9 + $0xf8] sm:$0xf0]  ;;  %v8400_v34 = vadd.f32 %v4006_v17, %v3994_v27 }
 0x2ca   :  { %v6901_v60 = vld [vmem:[#allocation9 + $0xe18] sm:$0xf]  ;;  %4231 = vmatpush.bf16.msra.mxu1 %v5594_v24  ;;  %4211 = vmatpush.bf16.msrb.mxu3 %v6934_v54  ;;  %v6646_v4 = vor.u32 %v7794_v59, %v6645_v58  ;;  %v7494_v24 = vld [vmem:[#allocation9 + $0x2dc] sm:$0xf]  ;;  %v5210_v33 = vor.u32 %v7430_v30, %v5207_v46  ;;  %v5754_v58 = vor.u32 %v7566_v51, %v5751_v52  ;;  %v3969_v63 = vpop.f32.mrf.mxu0 }
 0x2cb   :  { %v7858_v61 = vld [vmem:[#allocation9 + $0xe34] sm:$0xf0]  ;;  %v7630_v53 = vld [vmem:[#allocation9 + $0x71c] sm:$0xf]  ;;  %v5466_v19 = vor.u32 %v7494_v24, %v5463_v50 }
 0x2cc   :  { %v6902_v5 = vor.u32 %v7858_v61, %v6901_v60  ;;  %4219 = vmatpush.bf16.msra.mxu0 %v5306_v2  ;;  %4199 = vmatpush.bf16.msrb.mxu2 %v6646_v4  ;;  %v6007_v54 = vld [vmem:[#allocation9 + $0x738] sm:$0xf0]  ;;  %v3982_v0 = vpop.f32.mrf.mxu1  ;;  %v5178_v4 = vor.u32 %v7422_v23, %v5175_v55  ;;  %v4008_v23 = vpop.f32.mrf.mxu3 }
 0x2cd   :  { %v6010_v59 = vor.u32 %v7630_v53, %v6007_v54  ;;  %v7486_v60 = vld [vmem:[#allocation9 + $0x29c] sm:$0xf] }
 0x2ce   :  { %4232 = vmatpush.bf16.msra.mxu1 %v5562_v3  ;;  %4212 = vmatpush.bf16.msrb.mxu3 %v6902_v5  ;;  %v5431_v61 = vld [vmem:[#allocation9 + $0x2b8] sm:$0xf0] }
 0x2cf   :  { %4200 = vmatmul.bf16.vlgmr.msrb.gmra.mxu2 %v8315_v56  ;;  %v7622_v2 = vld [vmem:[#allocation9 + $0x6dc] sm:$0xf]  ;;  %v5434_v5 = vor.u32 %v7486_v60, %v5431_v61 }
 0x2d0   :  { %4244 = vmatpush.bf16.msra.mxu2 %v5850_v9  ;;  %4220 = vmatpush.bf16.msra.mxu0 %v5274_v20  ;;  %v5975_v3 = vld [vmem:[#allocation9 + $0x6f8] sm:$0xf0]  ;;  %v5722_v9 = vor.u32 %v7558_v62, %v5719_v1 }
 0x2d1   :  { %4213 = vmatmul.bf16.vlgmr.msrb.gmra.mxu3 %v8317_v57  ;;  %v7414_v6 = vld [vmem:[#allocation9 + $0x5c] sm:$0xf] }
 0x2d2   :  { %4257 = vmatpush.bf16.msra.mxu3 %v6106_v10  ;;  %4233 = vmatpush.bf16.msra.mxu1 %v5530_v22  ;;  %v5143_v7 = vld [vmem:[#allocation9 + $0x78] sm:$0xf0]  ;;  %v5978_v10 = vor.u32 %v7622_v2, %v5975_v3 }
 0x2d3   :  { %v7478_v11 = vld [vmem:[#allocation9 + $0x25c] sm:$0xf]  ;;  %v5146_v28 = vor.u32 %v7414_v6, %v5143_v7 }
 0x2d4   :  { %4245 = vmatpush.bf16.msra.mxu2 %v5818_v29  ;;  %4221 = vmatpush.bf16.msra.mxu0 %v5242_v41  ;;  %v5399_v12 = vld [vmem:[#allocation9 + $0x278] sm:$0xf0] }
 0x2d5   :  { %v7550_v15 = vld [vmem:[#allocation9 + $0x49c] sm:$0xf]  ;;  %v5402_v29 = vor.u32 %v7478_v11, %v5399_v12 }
 0x2d6   :  { %4258 = vmatpush.bf16.msra.mxu3 %v6074_v31  ;;  %4234 = vmatpush.bf16.msra.mxu1 %v5498_v42  ;;  %v5687_v18 = vld [vmem:[#allocation9 + $0x4b8] sm:$0xf0] }
 0x2d7   :  { %v7614_v20 = vld [vmem:[#allocation9 + $0x69c] sm:$0xf]  ;;  %v5690_v35 = vor.u32 %v7550_v15, %v5687_v18 }
 0x2d8   :  { %4246 = vmatpush.bf16.msra.mxu2 %v5786_v48  ;;  %4222 = vmatpush.bf16.msra.mxu0 %v5210_v33  ;;  %v5943_v22 = vld [vmem:[#allocation9 + $0x6b8] sm:$0xf0] }
 0x2d9   :  { %v7406_v31 = vld [vmem:[#allocation9 + $0x1c] sm:$0xf]  ;;  %v5946_v36 = vor.u32 %v7614_v20, %v5943_v22 }
 0x2da   :  { %4259 = vmatpush.bf16.msra.mxu3 %v6042_v49  ;;  %4235 = vmatpush.bf16.msra.mxu1 %v5466_v19  ;;  %v5111_v43 = vld [vmem:[#allocation9 + $0x38] sm:$0xf0]  ;;  %v3995_v19 = vpop.f32.mrf.mxu2 }
 0x2db   :  { %v7470_v32 = vld [vmem:[#allocation9 + $0x21c] sm:$0xf]  ;;  %v5114_v48 = vor.u32 %v7406_v31, %v5111_v43 }
 0x2dc   :  { %4247 = vmatpush.bf16.msra.mxu2 %v5754_v58  ;;  %4223 = vmatpush.bf16.msra.mxu0 %v5178_v4  ;;  %v5367_v37 = vld [vmem:[#allocation9 + $0x238] sm:$0xf0] }
 0x2dd   :  { %v7718_v38 = vld [vmem:[#allocation9 + $0x9dc] sm:$0xf]  ;;  %v5370_v49 = vor.u32 %v7470_v32, %v5367_v37  ;;  %v8404_v32 = vpop.f32.mrf.mxu0 }
 0x2de   :  { %4260 = vmatpush.bf16.msra.mxu3 %v6010_v59  ;;  %4236 = vmatpush.bf16.msra.mxu1 %v5434_v5  ;;  %v6359_v8 = vld [vmem:[#allocation9 + $0x9f8] sm:$0xf0] }
 0x2df   :  { %v7782_v40 = vld [vmem:[#allocation9 + $0xbdc] sm:$0xf]  ;;  %v6362_v24 = vor.u32 %v7718_v38, %v6359_v8 }
 0x2e0   :  { %4248 = vmatpush.bf16.msra.mxu2 %v5722_v9  ;;  %v6615_v41 = vld [vmem:[#allocation9 + $0xbf8] sm:$0xf0]  ;;  %4224 = vmatpush.bf16.msra.mxu0 %v5146_v28 }
 0x2e1   :  { %v7542_v42 = vld [vmem:[#allocation9 + $0x45c] sm:$0xf]  ;;  %v6618_v50 = vor.u32 %v7782_v40, %v6615_v41 }
 0x2e2   :  { %4261 = vmatpush.bf16.msra.mxu3 %v5978_v10  ;;  %v5655_v30 = vld [vmem:[#allocation9 + $0x478] sm:$0xf0]  ;;  %4237 = vmatpush.bf16.msra.mxu1 %v5402_v29 }
 0x2e3   :  { %v7606_v46 = vld [vmem:[#allocation9 + $0x65c] sm:$0xf]  ;;  %v5658_v54 = vor.u32 %v7542_v42, %v5655_v30 }
 0x2e4   :  { %v5911_v21 = vld [vmem:[#allocation9 + $0x678] sm:$0xf0]  ;;  %4249 = vmatpush.bf16.msra.mxu2 %v5690_v35  ;;  %4225 = vmatpush.bf16.msra.mxu0 %v5114_v48  ;;  %v8406_v35 = vpop.f32.mrf.mxu1 }
 0x2e5   :  { %v7710_v51 = vld [vmem:[#allocation9 + $0x99c] sm:$0xf]  ;;  %v5914_v33 = vor.u32 %v7606_v46, %v5911_v21 }
 0x2e6   :  { %4262 = vmatpush.bf16.msra.mxu3 %v5946_v36  ;;  %v6327_v52 = vld [vmem:[#allocation9 + $0x9b8] sm:$0xf0]  ;;  %4238 = vmatpush.bf16.msra.mxu1 %v5370_v49 }
 0x2e7   :  { %v7774_v53 = vld [vmem:[#allocation9 + $0xb9c] sm:$0xf]  ;;  %v6330_v2 = vor.u32 %v7710_v51, %v6327_v52  ;;  %4226 = vmatmul.bf16.vlgmr.msra.gmra.mxu0 %v8293_v13 }
 0x2e8   :  { %v6583_v55 = vld [vmem:[#allocation9 + $0xbb8] sm:$0xf0]  ;;  %4270 = vmatpush.bf16.msrb.mxu0 %v6362_v24  ;;  %4250 = vmatpush.bf16.msra.mxu2 %v5658_v54 }
 0x2e9   :  { %v7534_v58 = vld [vmem:[#allocation9 + $0x41c] sm:$0xf]  ;;  %v6586_v3 = vor.u32 %v7774_v53, %v6583_v55  ;;  %4239 = vmatmul.bf16.vlgmr.msra.gmra.mxu1 %v8295_v14 }
 0x2ea   :  { %v5623_v59 = vld [vmem:[#allocation9 + $0x438] sm:$0xf0]  ;;  %4283 = vmatpush.bf16.msrb.mxu1 %v6618_v50  ;;  %4263 = vmatpush.bf16.msra.mxu3 %v5914_v33 }
 0x2eb   :  { %v7598_v60 = vld [vmem:[#allocation9 + $0x61c] sm:$0xf]  ;;  %v5626_v4 = vor.u32 %v7534_v58, %v5623_v59  ;;  %v4021_v58 = vpop.f32.mrf.mxu0 }
 0x2ec   :  { %v5879_v61 = vld [vmem:[#allocation9 + $0x638] sm:$0xf0]  ;;  %4271 = vmatpush.bf16.msrb.mxu0 %v6330_v2  ;;  %v4034_v59 = vpop.f32.mrf.mxu1  ;;  %v7936_v58 = vld [vmem:[#allocation12 + $0xa8] sm:$0xff] }
 0x2ed   :  { %v7846_v62 = vld [vmem:[#allocation9 + $0xddc] sm:$0xf]  ;;  %v5882_v5 = vor.u32 %v7598_v60, %v5879_v61  ;;  %4251 = vmatpush.bf16.msra.mxu2 %v5626_v4  ;;  %v7944_v59 = vld [vmem:[#allocation12 + $0xe8] sm:$0xff] }
 0x2ee   :  { %v6871_v63 = vld [vmem:[#allocation9 + $0xdf8] sm:$0xf0]  ;;  %4284 = vmatpush.bf16.msrb.mxu1 %v6586_v3 }
 0x2ef   :  { %v7910_v0 = vld [vmem:[#allocation9 + $0xfdc] sm:$0xf]  ;;  %v6874_v9 = vor.u32 %v7846_v62, %v6871_v63  ;;  %4264 = vmatpush.bf16.msra.mxu3 %v5882_v5 }
 0x2f0   :  { %v7127_v1 = vld [vmem:[#allocation9 + $0xff8] sm:$0xf0]  ;;  %4252 = vmatmul.bf16.vlgmr.msra.gmra.mxu2 %v8301_v44 }
 0x2f1   :  { %v7702_v6 = vld [vmem:[#allocation9 + $0x95c] sm:$0xf]  ;;  %v7130_v10 = vor.u32 %v7910_v0, %v7127_v1  ;;  %4296 = vmatpush.bf16.msrb.mxu2 %v6874_v9  ;;  %v8410_v9 = vpop.f32.mrf.mxu2 }
 0x2f2   :  { %v6295_v7 = vld [vmem:[#allocation9 + $0x978] sm:$0xf0]  ;;  %4265 = vmatmul.bf16.vlgmr.msra.gmra.mxu3 %v8303_v45 }
 0x2f3   :  { %v7766_v11 = vld [vmem:[#allocation9 + $0xb5c] sm:$0xf]  ;;  %v6298_v20 = vor.u32 %v7702_v6, %v6295_v7  ;;  %4309 = vmatpush.bf16.msrb.mxu3 %v7130_v10  ;;  %v8412_v10 = vpop.f32.mrf.mxu3 }
 0x2f4   :  { %v6551_v12 = vld [vmem:[#allocation9 + $0xb78] sm:$0xf0] }
 0x2f5   :  { %v7838_v15 = vld [vmem:[#allocation9 + $0xd9c] sm:$0xf]  ;;  %v6554_v22 = vor.u32 %v7766_v11, %v6551_v12  ;;  %4272 = vmatpush.bf16.msrb.mxu0 %v6298_v20 }
 0x2f6   :  { %v6839_v16 = vld [vmem:[#allocation9 + $0xdb8] sm:$0xf0] }
 0x2f7   :  { %v7902_v17 = vld [vmem:[#allocation9 + $0xf9c] sm:$0xf]  ;;  %v6842_v13 = vor.u32 %v7838_v15, %v6839_v16  ;;  %4285 = vmatpush.bf16.msrb.mxu1 %v6554_v22 }
 0x2f8   :  { %v7095_v18 = vld [vmem:[#allocation9 + $0xfb8] sm:$0xf0] }
 0x2f9   :  { %v7694_v27 = vld [vmem:[#allocation9 + $0x91c] sm:$0xf]  ;;  %v7098_v14 = vor.u32 %v7902_v17, %v7095_v18  ;;  %4297 = vmatpush.bf16.msrb.mxu2 %v6842_v13 }
 0x2fa   :  { %v6263_v28 = vld [vmem:[#allocation9 + $0x938] sm:$0xf0] }
 0x2fb   :  { %v7758_v29 = vld [vmem:[#allocation9 + $0xb1c] sm:$0xf]  ;;  %v6266_v8 = vor.u32 %v7694_v27, %v6263_v28  ;;  %4310 = vmatpush.bf16.msrb.mxu3 %v7098_v14 }
 0x2fc   :  { %v6519_v31 = vld [vmem:[#allocation9 + $0xb38] sm:$0xf0] }
 0x2fd   :  { %v7830_v43 = vld [vmem:[#allocation9 + $0xd5c] sm:$0xf]  ;;  %v6522_v40 = vor.u32 %v7758_v29, %v6519_v31  ;;  %4273 = vmatpush.bf16.msrb.mxu0 %v6266_v8  ;;  %v7930_v8 = vld [vmem:[#allocation12 + $0x78] sm:$0xff] }
 0x2fe   :  { %v6807_v36 = vld [vmem:[#allocation9 + $0xd78] sm:$0xf0] }
 0x2ff   :  { %v7894_v37 = vld [vmem:[#allocation9 + $0xf5c] sm:$0xf]  ;;  %v6810_v30 = vor.u32 %v7830_v43, %v6807_v36  ;;  %4286 = vmatpush.bf16.msrb.mxu1 %v6522_v40 }
 0x300   :  { %v7063_v38 = vld [vmem:[#allocation9 + $0xf78] sm:$0xf0] }
 0x301   :  { %v7686_v41 = vld [vmem:[#allocation9 + $0x8dc] sm:$0xf]  ;;  %v7066_v46 = vor.u32 %v7894_v37, %v7063_v38  ;;  %4298 = vmatpush.bf16.msrb.mxu2 %v6810_v30  ;;  %v7922_v38 = vld [vmem:[#allocation12 + $0x38] sm:$0xff]  ;;  %v4060_v30 = vpop.f32.mrf.mxu3 }
 0x302   :  { %v6231_v42 = vld [vmem:[#allocation9 + $0x8f8] sm:$0xf0] }
 0x303   :  { %v7750_v21 = vld [vmem:[#allocation9 + $0xadc] sm:$0xf]  ;;  %v6234_v44 = vor.u32 %v7686_v41, %v6231_v42  ;;  %4311 = vmatpush.bf16.msrb.mxu3 %v7066_v46  ;;  %v4047_v42 = vpop.f32.mrf.mxu2 }
 0x304   :  { %v6487_v48 = vld [vmem:[#allocation9 + $0xaf8] sm:$0xf0]  ;;  %v4481_v42 = vunpack.c.h.b16 %v8386_v47 }
 0x305   :  { %v7822_v49 = vld [vmem:[#allocation9 + $0xd1c] sm:$0xf]  ;;  %v6490_v45 = vor.u32 %v7750_v21, %v6487_v48  ;;  %4274 = vmatpush.bf16.msrb.mxu0 %v6234_v44 }
 0x306   :  { %v6775_v24 = vld [vmem:[#allocation9 + $0xd38] sm:$0xf0] }
 0x307   :  { %v7886_v50 = vld [vmem:[#allocation9 + $0xf1c] sm:$0xf]  ;;  %v6778_v54 = vor.u32 %v7822_v49, %v6775_v24  ;;  %4287 = vmatpush.bf16.msrb.mxu1 %v6490_v45  ;;  %v7938_v45 = vld [vmem:[#allocation12 + $0xb8] sm:$0xff] }
 0x308   :  { %v7031_v51 = vld [vmem:[#allocation9 + $0xf38] sm:$0xf0] }
 0x309   :  { %v7678_v52 = vld [vmem:[#allocation9 + $0x89c] sm:$0xf]  ;;  %v7034_v33 = vor.u32 %v7886_v50, %v7031_v51  ;;  %4299 = vmatpush.bf16.msrb.mxu2 %v6778_v54  ;;  %v7928_v54 = vld [vmem:[#allocation12 + $0x68] sm:$0xff] }
 0x30a   :  { %v6199_v53 = vld [vmem:[#allocation9 + $0x8b8] sm:$0xf0] }
 0x30b   :  { %v7742_v19 = vld [vmem:[#allocation9 + $0xa9c] sm:$0xf]  ;;  %v6202_v63 = vor.u32 %v7678_v52, %v6199_v53  ;;  %4312 = vmatpush.bf16.msrb.mxu3 %v7034_v33  ;;  %v7946_v52 = vld [vmem:[#allocation12 + $0xf8] sm:$0xff]  ;;  %v7920_v53 = vld [vmem:[#allocation12 + $0x28] sm:$0xff] }
 0x30c   :  { %v6455_v23 = vld [vmem:[#allocation9 + $0xab8] sm:$0xf0] }
 0x30d   :  { %v7814_v55 = vld [vmem:[#allocation9 + $0xcdc] sm:$0xf]  ;;  %v6458_v0 = vor.u32 %v7742_v19, %v6455_v23  ;;  %4275 = vmatpush.bf16.msrb.mxu0 %v6202_v63  ;;  %v8416_v23 = vpop.f32.mrf.mxu0  ;;  %v7943_v63 = vld [vmem:[#allocation12 + $0xe0] sm:$0xff] }
 0x30e   :  { %v6743_v60 = vld [vmem:[#allocation9 + $0xcf8] sm:$0xf0] }
 0x30f   :  { %v7878_v61 = vld [vmem:[#allocation9 + $0xedc] sm:$0xf]  ;;  %v6746_v3 = vor.u32 %v7814_v55, %v6743_v60  ;;  %4288 = vmatpush.bf16.msrb.mxu1 %v6458_v0  ;;  %v8418_v55 = vpop.f32.mrf.mxu1  ;;  %v7918_v60 = vld [vmem:[#allocation12 + $0x18] sm:$0xff] }
 0x310   :  { %v6999_v62 = vld [vmem:[#allocation9 + $0xef8] sm:$0xf0] }
 0x311   :  { %v7670_v1 = vld [vmem:[#allocation9 + $0x85c] sm:$0xf]  ;;  %v7002_v4 = vor.u32 %v7878_v61, %v6999_v62  ;;  %4300 = vmatpush.bf16.msrb.mxu2 %v6746_v3  ;;  %v7926_v61 = vld [vmem:[#allocation12 + $0x58] sm:$0xff]  ;;  %v7935_v62 = vld [vmem:[#allocation12 + $0xa0] sm:$0xff] }
 0x312   :  { %v6167_v2 = vld [vmem:[#allocation9 + $0x878] sm:$0xf0] }
 0x313   :  { %v7734_v5 = vld [vmem:[#allocation9 + $0xa5c] sm:$0xf]  ;;  %v6170_v16 = vor.u32 %v7670_v1, %v6167_v2  ;;  %4313 = vmatpush.bf16.msrb.mxu3 %v7002_v4  ;;  %v8422_v2 = vld [vmem:[#allocation11] sm:$0xff] }
 0x314   :  { %v6423_v6 = vld [vmem:[#allocation9 + $0xa78] sm:$0xf0]  ;;  %v891_v3 = vperm.slane %v8422_v2, 5  ;;  %v7934_v4 = vld [vmem:[#allocation12 + $0x98] sm:$0xff] }
 0x315   :  { %v7806_v7 = vld [vmem:[#allocation9 + $0xc9c] sm:$0xf]  ;;  %v6426_v17 = vor.u32 %v7734_v5, %v6423_v6  ;;  %4276 = vmatpush.bf16.msrb.mxu0 %v6170_v16  ;;  %v4073_v0 = vpop.f32.mrf.mxu0  ;;  %v7942_v5 = vld [vmem:[#allocation12 + $0xd8] sm:$0xff]  ;;  %v8425_v6 = vpop.f32.mrf.mxu2 }
 0x316   :  { %v6711_v11 = vld [vmem:[#allocation9 + $0xcb8] sm:$0xf0]  ;;  %v7956_v0 = vld [vmem:[#allocation12 + $0x148] sm:$0xff] }
 0x317   :  { %v7870_v12 = vld [vmem:[#allocation9 + $0xe9c] sm:$0xf]  ;;  %v6714_v20 = vor.u32 %v7806_v7, %v6711_v11  ;;  %4289 = vmatpush.bf16.msrb.mxu1 %v6426_v17  ;;  %v8427_v7 = vpop.f32.mrf.mxu3  ;;  %v7916_v11 = vld [vmem:[#allocation12 + $0x8] sm:$0xff] }
 0x318   :  { %v6967_v15 = vld [vmem:[#allocation9 + $0xeb8] sm:$0xf0] }
 0x319   :  { %v7662_v18 = vld [vmem:[#allocation9 + $0x81c] sm:$0xf]  ;;  %v6970_v22 = vor.u32 %v7870_v12, %v6967_v15  ;;  %4301 = vmatpush.bf16.msrb.mxu2 %v6714_v20  ;;  %v7924_v12 = vld [vmem:[#allocation12 + $0x48] sm:$0xff]  ;;  %v4020_v15 = vadd.f32 %v8404_v32, %v891_v3  ;;  %v7923_v20 = vld [vmem:[#allocation12 + $0x40] sm:$0xff] }
 0x31a   :  { %v6135_v27 = vld [vmem:[#allocation9 + $0x838] sm:$0xf0]  ;;  %v7940_v32 = vld [vmem:[#allocation12 + $0xc8] sm:$0xff]  ;;  %v7955_v3 = vld [vmem:[#allocation12 + $0x140] sm:$0xff] }
 0x31b   :  { %v7726_v28 = vld [vmem:[#allocation9 + $0xa1c] sm:$0xf]  ;;  %v6138_v36 = vor.u32 %v7662_v18, %v6135_v27  ;;  %4314 = vmatpush.bf16.msrb.mxu3 %v6970_v22  ;;  %v7915_v18 = vld [vmem:[#allocation12] sm:$0xff]  ;;  %v4478_v22 = vunpack.c.l.b16 %v8355_v39  ;;  %v4479_v27 = vunpack.c.h.b16 %v8355_v39 }
 0x31c   :  { %v6391_v13 = vld [vmem:[#allocation9 + $0xa38] sm:$0xf0] }
 0x31d   :  { %v7798_v14 = vld [vmem:[#allocation9 + $0xc5c] sm:$0xf]  ;;  %v6394_v37 = vor.u32 %v7726_v28, %v6391_v13  ;;  %4277 = vmatpush.bf16.msrb.mxu0 %v6138_v36  ;;  %v4033_v28 = vadd.f32 %v8406_v35, %v4020_v15  ;;  %v7954_v13 = vld [vmem:[#allocation12 + $0x138] sm:$0xff]  ;;  %v7931_v35 = vld [vmem:[#allocation12 + $0x80] sm:$0xff] }
 0x31e   :  { %v6679_v29 = vld [vmem:[#allocation9 + $0xc78] sm:$0xf0] }
 0x31f   :  { %v7862_v31 = vld [vmem:[#allocation9 + $0xe5c] sm:$0xf]  ;;  %v6682_v40 = vor.u32 %v7798_v14, %v6679_v29  ;;  %4290 = vmatpush.bf16.msrb.mxu1 %v6394_v37  ;;  %v7962_v14 = vld [vmem:[#allocation12 + $0x178] sm:$0xff]  ;;  %v7932_v29 = vld [vmem:[#allocation12 + $0x88] sm:$0xff]  ;;  %v4046_v36 = vadd.f32 %v8410_v9, %v4033_v28  ;;  %v4486_v37 = vpack.c.b16 %v4478_v22, %v4478_v22 }
 0x320   :  { %v6935_v43 = vld [vmem:[#allocation9 + $0xe78] sm:$0xf0]  ;;  %4278 = vmatmul.bf16.vlgmr.msrb.gmra.mxu0 %v8309_v25  ;;  %v7919_v25 = vld [vmem:[#allocation12 + $0x20] sm:$0xff]  ;;  %v7970_v28 = vld [vmem:[#allocation12 + $0x1b8] sm:$0xff] }
 0x321   :  { %v6938_v41 = vor.u32 %v7862_v31, %v6935_v43  ;;  %v7790_v46 = vld [vmem:[#allocation9 + $0xc1c] sm:$0xf]  ;;  %4886 = vmatpush.bf16.msra.mxu0 %v7922_v38  ;;  %4302 = vmatpush.bf16.msrb.mxu2 %v6682_v40  ;;  %v4099_v31 = vpop.f32.mrf.mxu2  ;;  %v4112_v43 = vpop.f32.mrf.mxu3  ;;  %v4487_v38 = vpack.c.b16 %v4479_v27, %v4479_v27  ;;  %v7939_v40 = vld [vmem:[#allocation12 + $0xc0] sm:$0xff]  ;;  %v4059_v30 = vadd.f32 %v8412_v10, %v4046_v36 }
 0x322   :  { %v6647_v21 = vld [vmem:[#allocation9 + $0xc38] sm:$0xf0]  ;;  %4291 = vmatmul.bf16.vlgmr.msrb.gmra.mxu1 %v8311_v26  ;;  %v7927_v26 = vld [vmem:[#allocation12 + $0x60] sm:$0xff] }
 0x323   :  { %v7854_v48 = vld [vmem:[#allocation9 + $0xe1c] sm:$0xf]  ;;  %4899 = vmatpush.bf16.msra.mxu1 %v7930_v8  ;;  %4315 = vmatpush.bf16.msrb.mxu3 %v6938_v41  ;;  %v6650_v51 = vor.u32 %v7790_v46, %v6647_v21  ;;  %v4480_v41 = vunpack.c.l.b16 %v8386_v47  ;;  %v4072_v9 = vadd.f32 %v8416_v23, %v4059_v30  ;;  %v892_v46 = vperm.slane %v8422_v2, 6  ;;  %v7952_v21 = vld [vmem:[#allocation12 + $0x128] sm:$0xff] }
 0x324   :  { %v6903_v49 = vld [vmem:[#allocation9 + $0xe38] sm:$0xf0] }
 0x325   :  { %v7921_v24 = vld [vmem:[#allocation12 + $0x30] sm:$0xff]  ;;  %v6906_v44 = vor.u32 %v7854_v48, %v6903_v49  ;;  %4303 = vmatpush.bf16.msrb.mxu2 %v6650_v51  ;;  %v7960_v48 = vld [vmem:[#allocation12 + $0x168] sm:$0xff]  ;;  %v4488_v49 = vpack.c.b16 %v4480_v41, %v4480_v41  ;;  %v4085_v47 = vadd.f32 %v8418_v55, %v4072_v9 }
 0x326   :  { %v7929_v50 = vld [vmem:[#allocation12 + $0x70] sm:$0xff]  ;;  %4887 = vmatpush.bf16.msra.mxu0 %v7921_v24  ;;  %v4489_v24 = vpack.c.b16 %v4481_v42, %v4481_v42 }
 0x327   :  { %4900 = vmatpush.bf16.msra.mxu1 %v7929_v50  ;;  %4316 = vmatpush.bf16.msrb.mxu3 %v6906_v44  ;;  %v7937_v33 = vld [vmem:[#allocation12 + $0xb0] sm:$0xff]  ;;  %v4123_v50 = vpop.f32.mrf.mxu0  ;;  %v7951_v44 = vld [vmem:[#allocation12 + $0x120] sm:$0xff] }
 0x328   :  { %v7945_v19 = vld [vmem:[#allocation12 + $0xf0] sm:$0xff]  ;;  %4304 = vmatmul.bf16.vlgmr.msrb.gmra.mxu2 %v8315_v56  ;;  %v4086_v56 = vpop.f32.mrf.mxu1  ;;  %v4124_v10 = vadd.f32 %v4123_v50, %v892_v46 }
 0x329   :  { %4912 = vmatpush.bf16.msra.mxu2 %v7938_v45  ;;  %v7925_v1 = vld [vmem:[#allocation12 + $0x50] sm:$0xff]  ;;  %v7959_v45 = vld [vmem:[#allocation12 + $0x160] sm:$0xff] }
 0x32a   :  { %4317 = vmatmul.bf16.vlgmr.msrb.gmra.mxu3 %v8317_v57  ;;  %4888 = vmatpush.bf16.msra.mxu0 %v7920_v53  ;;  %v7917_v57 = vld [vmem:[#allocation12 + $0x10] sm:$0xff] }
 0x32b   :  { %4925 = vmatpush.bf16.msra.mxu3 %v7946_v52  ;;  %4901 = vmatpush.bf16.msra.mxu1 %v7928_v54  ;;  %v7933_v16 = vld [vmem:[#allocation12 + $0x90] sm:$0xff]  ;;  %v4098_v52 = vadd.f32 %v8425_v6, %v4085_v47  ;;  %v7950_v54 = vld [vmem:[#allocation12 + $0x118] sm:$0xff]  ;;  %v7971_v47 = vld [vmem:[#allocation12 + $0x1c0] sm:$0xff] }
 0x32c   :  { %v7941_v17 = vld [vmem:[#allocation12 + $0xd0] sm:$0xff] }
 0x32d   :  { %4913 = vmatpush.bf16.msra.mxu2 %v7937_v33  ;;  %v7953_v8 = vld [vmem:[#allocation12 + $0x130] sm:$0xff]  ;;  %v7958_v33 = vld [vmem:[#allocation12 + $0x158] sm:$0xff] }
 0x32e   :  { %4889 = vmatpush.bf16.msra.mxu0 %v7919_v25  ;;  %v7961_v39 = vld [vmem:[#allocation12 + $0x170] sm:$0xff] }
 0x32f   :  { %4926 = vmatpush.bf16.msra.mxu3 %v7945_v19  ;;  %4902 = vmatpush.bf16.msra.mxu1 %v7927_v26  ;;  %v4111_v19 = vadd.f32 %v8427_v7, %v4098_v52  ;;  %v4125_v23 = vpop.f32.mrf.mxu0  ;;  %v7949_v55 = vld [vmem:[#allocation12 + $0x110] sm:$0xff] }
 0x330   :  { %v4136_v51 = vpop.f32.mrf.mxu1  ;;  %v7957_v26 = vld [vmem:[#allocation12 + $0x150] sm:$0xff] }
 0x331   :  { %4914 = vmatpush.bf16.msra.mxu2 %v7936_v58  ;;  %v4137_v53 = vadd.f32 %v4136_v51, %v4124_v10  ;;  %v4327_v58 = vmax.f32 %v4111_v19, 0.0  ;;  %v7977_v31 = vld [vmem:[#allocation12 + $0x1f0] sm:$0xff]  ;;  %v7963_v51 = vld [vmem:[#allocation12 + $0x180] sm:$0xff]  ;;  %v893_v10 = vperm.slane %v8422_v2, 7 }
 0x332   :  { %4890 = vmatpush.bf16.msra.mxu0 %v7918_v60  ;;  %v4162_v60 = vpop.f32.mrf.mxu3  ;;  %v7965_v46 = vld [vmem:[#allocation12 + $0x190] sm:$0xff] }
 0x333   :  { %4927 = vmatpush.bf16.msra.mxu3 %v7944_v59  ;;  %4903 = vmatpush.bf16.msra.mxu1 %v7926_v61  ;;  %v4149_v59 = vpop.f32.mrf.mxu2  ;;  %v4326_v61 = vmax.f32 %v8400_v34, 0.0 }
 0x335   :  { %4915 = vmatpush.bf16.msra.mxu2 %v7935_v62  ;;  %v4150_v62 = vadd.f32 %v4149_v59, %v4137_v53  ;;  %v4332_v56 = vpack.c.bf16 %v4327_v58, %v4326_v61 }
 0x336   :  { %4891 = vmatpush.bf16.msra.mxu0 %v7917_v57 }
 0x337   :  { %4928 = vmatpush.bf16.msra.mxu3 %v7943_v63  ;;  %4904 = vmatpush.bf16.msra.mxu1 %v7925_v1  ;;  %v7948_v63 = vld [vmem:[#allocation12 + $0x108] sm:$0xff]  ;;  %v4163_v57 = vadd.f32 %v4162_v60, %v4150_v62  ;;  %v7947_v1 = vld [vmem:[#allocation12 + $0x100] sm:$0xff] }
 0x338   :  { %v4138_v25 = vpop.f32.mrf.mxu1 }
 0x339   :  { %4916 = vmatpush.bf16.msra.mxu2 %v7934_v4  ;;  %v4482_v4 = vunpack.c.l.b16 %v4332_v56 }
 0x33a   :  { %4892 = vmatpush.bf16.msra.mxu0 %v7916_v11  ;;  %v4164_v7 = vpop.f32.mrf.mxu3 }
 0x33b   :  { %4929 = vmatpush.bf16.msra.mxu3 %v7942_v5  ;;  %4905 = vmatpush.bf16.msra.mxu1 %v7924_v12  ;;  %v4483_v5 = vunpack.c.h.b16 %v4332_v56  ;;  %v4151_v6 = vpop.f32.mrf.mxu2  ;;  %v4490_v11 = vpack.c.b16 %v4482_v4, %v4482_v4 }
 0x33c   :  { %v7991_v6 = vld [vmem:[#allocation14] ss:$0 sm:$0xff] }
 0x33d   :  { %4917 = vmatpush.bf16.msra.mxu2 %v7933_v16  ;;  %v4491_v12 = vpack.c.b16 %v4483_v5, %v4483_v5 }
 0x33e   :  { %4893 = vmatpush.bf16.msra.mxu0 %v7915_v18 }
 0x33f   :  { %4930 = vmatpush.bf16.msra.mxu3 %v7941_v17  ;;  %4906 = vmatpush.bf16.msra.mxu1 %v7923_v20 }
 0x341   :  { %4918 = vmatpush.bf16.msra.mxu2 %v7932_v29  ;;  %4894 = vmatmul.bf16.vlgmr.msra.gmra.mxu0 %v4486_v37  ;;  %v7968_v37 = vld [vmem:[#allocation12 + $0x1a8] sm:$0xff] }
 0x342   :  { %4938 = vmatpush.bf16.msrb.mxu0 %v7954_v13  ;;  %4907 = vmatmul.bf16.vlgmr.msra.gmra.mxu1 %v4487_v38  ;;  %v7978_v13 = vld [vmem:[#allocation12 + $0x1f8] sm:$0xff]  ;;  %v7976_v38 = vld [vmem:[#allocation12 + $0x1e8] sm:$0xff] }
 0x343   :  { %4951 = vmatpush.bf16.msrb.mxu1 %v7962_v14  ;;  %4931 = vmatpush.bf16.msra.mxu3 %v7940_v32  ;;  %v7969_v32 = vld [vmem:[#allocation12 + $0x1b0] sm:$0xff] }
 0x344   :  { %v4175_v34 = vpop.f32.mrf.mxu0 }
 0x345   :  { %4919 = vmatpush.bf16.msra.mxu2 %v7931_v35  ;;  %v4176_v16 = vadd.f32 %v4175_v34, %v4163_v57  ;;  %v7966_v35 = vld [vmem:[#allocation12 + $0x198] sm:$0xff] }
 0x346   :  { %4939 = vmatpush.bf16.msrb.mxu0 %v7953_v8  ;;  %v4188_v15 = vpop.f32.mrf.mxu1  ;;  %v7967_v8 = vld [vmem:[#allocation12 + $0x1a0] sm:$0xff] }
 0x347   :  { %4952 = vmatpush.bf16.msrb.mxu1 %v7961_v39  ;;  %4932 = vmatpush.bf16.msra.mxu3 %v7939_v40  ;;  %v4189_v17 = vadd.f32 %v4188_v15, %v4176_v16  ;;  %v7975_v39 = vld [vmem:[#allocation12 + $0x1e0] sm:$0xff]  ;;  %v7974_v40 = vld [vmem:[#allocation12 + $0x1d8] sm:$0xff] }
 0x348   :  { %4920 = vmatmul.bf16.vlgmr.msra.gmra.mxu2 %v4488_v49  ;;  %v7972_v49 = vld [vmem:[#allocation12 + $0x1c8] sm:$0xff] }
 0x349   :  { %4964 = vmatpush.bf16.msrb.mxu2 %v7970_v28 }
 0x34a   :  { %4933 = vmatmul.bf16.vlgmr.msra.gmra.mxu3 %v4489_v24  ;;  %4940 = vmatpush.bf16.msrb.mxu0 %v7952_v21  ;;  %v7973_v21 = vld [vmem:[#allocation12 + $0x1d0] sm:$0xff] }
 0x34b   :  { %4953 = vmatpush.bf16.msrb.mxu1 %v7960_v48  ;;  %4977 = vmatpush.bf16.msrb.mxu3 %v7978_v13  ;;  %v7964_v48 = vld [vmem:[#allocation12 + $0x188] sm:$0xff] }
 0x34c   :  { %v4177_v18 = vpop.f32.mrf.mxu0 }
 0x34d   :  { %4965 = vmatpush.bf16.msrb.mxu2 %v7969_v32 }
 0x34e   :  { %4941 = vmatpush.bf16.msrb.mxu0 %v7951_v44  ;;  %v4190_v20 = vpop.f32.mrf.mxu1 }
 0x34f   :  { %4954 = vmatpush.bf16.msrb.mxu1 %v7959_v45  ;;  %4978 = vmatpush.bf16.msrb.mxu3 %v7977_v31 }
 0x351   :  { %4966 = vmatpush.bf16.msrb.mxu2 %v7968_v37 }
 0x352   :  { %4942 = vmatpush.bf16.msrb.mxu0 %v7950_v54  ;;  %v4201_v22 = vpop.f32.mrf.mxu2 }
 0x353   :  { %4955 = vmatpush.bf16.msrb.mxu1 %v7958_v33  ;;  %4979 = vmatpush.bf16.msrb.mxu3 %v7976_v38 }
 0x354   :  { %v4214_v27 = vpop.f32.mrf.mxu3 }
 0x355   :  { %4967 = vmatpush.bf16.msrb.mxu2 %v7967_v8 }
 0x356   :  { %4943 = vmatpush.bf16.msrb.mxu0 %v7949_v55  ;;  %v4202_v55 = vadd.f32 %v4201_v22, %v4189_v17 }
 0x357   :  { %4956 = vmatpush.bf16.msrb.mxu1 %v7957_v26  ;;  %4980 = vmatpush.bf16.msrb.mxu3 %v7975_v39 }
 0x358   :  { %v4215_v60 = vadd.f32 %v4214_v27, %v4202_v55 }
 0x359   :  { %4968 = vmatpush.bf16.msrb.mxu2 %v7966_v35 }
 0x35a   :  { %4944 = vmatpush.bf16.msrb.mxu0 %v7948_v63  ;;  %v4203_v14 = vpop.f32.mrf.mxu2  ;;  %v4328_v63 = vmax.f32 %v4215_v60, 0.0 }
 0x35b   :  { %4957 = vmatpush.bf16.msrb.mxu1 %v7956_v0  ;;  %4981 = vmatpush.bf16.msrb.mxu3 %v7974_v40 }
 0x35c   :  { %v4216_v29 = vpop.f32.mrf.mxu3 }
 0x35d   :  { %4969 = vmatpush.bf16.msrb.mxu2 %v7965_v46 }
 0x35e   :  { %4945 = vmatpush.bf16.msrb.mxu0 %v7947_v1 }
 0x35f   :  { %4958 = vmatpush.bf16.msrb.mxu1 %v7955_v3  ;;  %4982 = vmatpush.bf16.msrb.mxu3 %v7973_v21 }
 0x361   :  { %4946 = vmatmul.bf16.vlgmr.msrb.gmra.mxu0 %v4490_v11  ;;  %4970 = vmatpush.bf16.msrb.mxu2 %v7964_v48 }
 0x362   :  { %4959 = vmatmul.bf16.vlgmr.msrb.gmra.mxu1 %v4491_v12 }
 0x363   :  { %4983 = vmatpush.bf16.msrb.mxu3 %v7972_v49 }
 0x364   :  { %v4227_v43 = vpop.f32.mrf.mxu0 }
 0x365   :  { %4971 = vmatpush.bf16.msrb.mxu2 %v7963_v51  ;;  %v4228_v44 = vadd.f32 %v4227_v43, %v893_v10 }
 0x366   :  { %v4240_v36 = vpop.f32.mrf.mxu1 }
 0x367   :  { %4984 = vmatpush.bf16.msrb.mxu3 %v7971_v47  ;;  %v4241_v45 = vadd.f32 %v4240_v36, %v4228_v44 }
 0x36c   :  { %v4229_v41 = vpop.f32.mrf.mxu0 }
 0x36e   :  { %v4242_v42 = vpop.f32.mrf.mxu1 }
 0x373   :  { %v4253_v30 = vpop.f32.mrf.mxu2 }
 0x374   :  { %v4254_v54 = vadd.f32 %v4253_v30, %v4241_v45 }
 0x375   :  { %v4266_v9 = vpop.f32.mrf.mxu3 }
 0x376   :  { %v4267_v33 = vadd.f32 %v4266_v9, %v4254_v54 }
 0x37b   :  { %v4255_v24 = vpop.f32.mrf.mxu2 }
 0x37d   :  { %v4268_v50 = vpop.f32.mrf.mxu3 }
 0x39d   :  { %v4279_v52 = vpop.f32.mrf.mxu0 }
 0x39e   :  { %v4280_v19 = vadd.f32 %v4279_v52, %v4267_v33 }
 0x39f   :  { %v4292_v53 = vpop.f32.mrf.mxu1 }
 0x3a0   :  { %v4293_v26 = vadd.f32 %v4292_v53, %v4280_v19 }
 0x3a5   :  { %v4281_v23 = vpop.f32.mrf.mxu0 }
 0x3a7   :  { %v4294_v25 = vpop.f32.mrf.mxu1 }
 0x3ab   :  { %v4305_v58 = vpop.f32.mrf.mxu2 }
 0x3ac   :  { %v4306_v61 = vadd.f32 %v4305_v58, %v4293_v26 }
 0x3ad   :  { %v4318_v59 = vpop.f32.mrf.mxu3 }
 0x3ae   :  { %v4319_v62 = vadd.f32 %v4318_v59, %v4306_v61 }
 0x3b0   :  { %v4329_v2 = vmax.f32 %v4319_v62, 0.0 }
 0x3b2   :  { %v4333_v0 = vpack.c.bf16 %v4329_v2, %v4328_v63 }
 0x3b3   :  { %v4307_v56 = vpop.f32.mrf.mxu2 }
 0x3b4   :  { %v4484_v1 = vunpack.c.l.b16 %v4333_v0  ;;  %v4485_v3 = vunpack.c.h.b16 %v4333_v0 }
 0x3b5   :  { %v4320_v57 = vpop.f32.mrf.mxu3 }
 0x3b6   :  { %v4492_v4 = vpack.c.b16 %v4484_v1, %v4484_v1  ;;  %v4493_v5 = vpack.c.b16 %v4485_v3, %v4485_v3 }
 0x3b8   :  { %4972 = vmatmul.bf16.vlgmr.msrb.gmra.mxu2 %v4492_v4  ;;  %4985 = vmatmul.bf16.vlgmr.msrb.gmra.mxu3 %v4493_v5 }
 0x3be   :  { %v4895_v7 = vpop.f32.mrf.mxu0 }
 0x3bf   :  { %v4908_v11 = vpop.f32.mrf.mxu1  ;;  %v4896_v12 = vadd.f32 %v7991_v6, %v4895_v7 }
 0x3c1   :  { %v4909_v34 = vadd.f32 %v4908_v11, %v4896_v12 }
 0x3c6   :  { %v4897_v15 = vpop.f32.mrf.mxu0 }
 0x3c7   :  { %v4910_v16 = vpop.f32.mrf.mxu1 }
 0x3cb   :  { %v4921_v17 = vpop.f32.mrf.mxu2 }
 0x3cc   :  { %v4922_v20 = vadd.f32 %v4921_v17, %v4909_v34 }
 0x3cd   :  { %v4934_v18 = vpop.f32.mrf.mxu3 }
 0x3ce   :  { %v4935_v22 = vadd.f32 %v4934_v18, %v4922_v20 }
 0x3d3   :  { %v4923_v27 = vpop.f32.mrf.mxu2 }
 0x3d5   :  { %v4936_v28 = vpop.f32.mrf.mxu3 }
 0x3de   :  { %v4947_v13 = vpop.f32.mrf.mxu0 }
 0x3df   :  { %v4960_v14 = vpop.f32.mrf.mxu1  ;;  %v4948_v29 = vadd.f32 %v4947_v13, %v4935_v22 }
 0x3e1   :  { %v4961_v32 = vadd.f32 %v4960_v14, %v4948_v29 }
 0x3e6   :  { %v4949_v31 = vpop.f32.mrf.mxu0 }
 0x3e7   :  { %v4962_v43 = vpop.f32.mrf.mxu1 }
 0x43b   :  { %v4973_v36 = vpop.f32.mrf.mxu2  ;;  %v4986_v37 = vpop.f32.mrf.mxu3 }
 0x43c   :  { %v4974_v38 = vadd.f32 %v4973_v36, %v4961_v32 }
 0x43e   :  { %v4987_v8 = vadd.f32 %v4986_v37, %v4974_v38 }
 0x440   :  { %4990 = vst [vmem:[#allocation15] sm:$0xff] %v4987_v8 }
 0x441   :  { %5001 = dma.vmem_to_hbm [thread:$0]  %s4997_s6, 128, %s4999_s14, [#allocation5]  }
 0x443   :  { %v4975_v39 = vpop.f32.mrf.mxu2  ;;  %v4988_v35 = vpop.f32.mrf.mxu3 }
 0x444   :  { %8194 = dma.done.wait [#allocation5], 128  }
 0x445   :  { %8195 = vsyncadd [#allocation5], 4294967168 }
 0x446   :  { %5006 = vsyncpa [#allocation4], 1 }
 0x447   :  { %5007 = vsyncpa [#allocation7], 1 }
 0x448   :  { %5008 = vsyncpa [#allocation10], 1 }
 0x449   :  { %5009 = vsyncpa [#allocation13], 1 }
 0x44a   :  { %5010 = vsyncpa [#allocation5], 1 }

</bundles_post_ra>
